<compile_context>
chip_gen: v7x
topology: tpu7x:2x2x1
jax: 0.10.0
libtpu: 0.0.40
codegen_flags: <defaults>
</compile_context>

<pallas_src>
import functools

import numpy as np

import jax
import jax.numpy as jnp
from jax.experimental import pallas as pl
from jax.experimental.pallas import tpu as pltpu


# ----------------------------------------------------------------------------
# Fused encoder kernel.
#   xe_ref : (tb, 17, 204)  parity-folded input, lane = j*12 + pa*6 + pb*3 + c
#   zp_ref : (tb, 17, 512)  line buffer, lane = w*32 + c, row 16 is the zero pad
# ----------------------------------------------------------------------------
def _encoder_kernel(xe_ref, m1_ref, b1_ref, m2_ref, b2_ref,
                    m3_ref, b3_ref, m4_ref, b4_ref,
                    w1_ref, bl1_ref, w2_ref, bl2_ref,
                    out_ref, zp_ref):
    tb = xe_ref.shape[0]
    rows = tb * 16

    # Zero ONLY the pad row of the line buffer.  Unconditional (megacore-safe,
    # never gated on program_id); the 16-row interior is fully rewritten
    # before every use, so no full-scratch clears are needed.
    zp_ref[:, 16:17, :] = jnp.zeros((tb, 1, 512), jnp.float32)

    # --- conv1 (3->3, 2x2) + ReLU + conv2 (3->32, 2x2, stride 2) + ReLU ------
    # Stride-2 grid, conv1 taps and the right/bottom zero padding are folded
    # into pack-time block matrices: two K=204 dots (row offsets 0/1) and one
    # K=192 dot.  No per-tap mini-matmuls, no strided gathers.
    x0 = xe_ref[:, 0:16, :].reshape(rows, 204)
    x1 = xe_ref[:, 1:17, :].reshape(rows, 204)
    t = (jnp.dot(x0, m1_ref[0], preferred_element_type=jnp.float32)
         + jnp.dot(x1, m1_ref[1], preferred_element_type=jnp.float32))
    t = jnp.maximum(t + b1_ref[...], 0.0)                       # (rows, 192)
    z = jnp.dot(t, m2_ref[...], preferred_element_type=jnp.float32)
    z = jnp.maximum(z + b2_ref[...], 0.0)                       # (rows, 512)

    # --- conv3 / conv4 (32->32, 2x2, pad right/bottom) + ReLU ----------------
    # Lane-dense layout (lane = w*32 + c).  The kw taps and the zero column
    # live inside the (512,512) band matrices; the kh=1 tap is a one-row
    # shifted read from the zero-bottom-padded line buffer.
    def conv_2x2(zin, m_ref, b_ref):
        zp_ref[:, 0:16, :] = zin.reshape(tb, 16, 512)
        z_dn = zp_ref[:, 1:17, :].reshape(rows, 512)
        acc = (jnp.dot(zin, m_ref[0], preferred_element_type=jnp.float32)
               + jnp.dot(z_dn, m_ref[1], preferred_element_type=jnp.float32))
        return jnp.maximum(acc + b_ref[...], 0.0)

    z = conv_2x2(z, m3_ref, b3_ref)
    z = conv_2x2(z, m4_ref, b4_ref)

    # --- Flatten + Linear(8192->128) + ReLU + Linear(128->latent) ------------
    # The NCHW flatten permutation is folded into w1's rows at pack time; the
    # 8192-wide contraction runs as 16 per-row dots against the resident
    # (16, 512, 128) weight, so no big activation relayout is needed.
    zp_ref[:, 0:16, :] = z.reshape(tb, 16, 512)
    h = jnp.zeros((tb, 128), jnp.float32)
    for hh in range(16):
        h = h + jnp.dot(zp_ref[:, hh, :], w1_ref[hh],
                        preferred_element_type=jnp.float32)
    h = jnp.maximum(h + bl1_ref[...], 0.0)
    y = jnp.dot(h, w2_ref[...], preferred_element_type=jnp.float32)
    y = y + bl2_ref[...]
    out_ref[...] = y.reshape(tb, 1, y.shape[-1])


# ----------------------------------------------------------------------------
# VMEM budgeting (per TPU generation) and batch tiling.
# ----------------------------------------------------------------------------
_FIXED_WEIGHT_VMEM = 20 << 20      # double-buffered resident weights (~18 MiB)
_PER_IMAGE_VMEM = 512 << 10        # in/out blocks + line buffer + live values
_MAX_BATCH_TILE = 32


def _vmem_budget():
    try:
        physical = int(pltpu.get_tpu_info().vmem_capacity_bytes)
    except Exception:
        physical = 64 << 20        # v7x (smallest current generation) fallback
    limit = max(40 << 20, min(int(physical * 0.70), 96 << 20))
    cap = (limit - _FIXED_WEIGHT_VMEM) // _PER_IMAGE_VMEM
    cap = int(max(1, min(_MAX_BATCH_TILE, cap)))
    return limit, cap


def _batch_tiling(n, cap):
    # Full-size tiles for any n (batch is zero-padded), >= 2 grid steps when
    # n >= 2 so both v7x TensorCores get work and the DMA pipeline overlaps.
    if n <= 1:
        return 1, max(n, 1)
    steps = max(2, -(-n // cap))
    tb = -(-n // steps)
    return tb, steps * tb


def _encoder_pallas(xe, p, *, batch_tile, latent, vmem_limit):
    n_pad = xe.shape[0]
    c3 = lambda i: (0, 0, 0)
    c2 = lambda i: (0, 0)
    out = pl.pallas_call(
        _encoder_kernel,
        out_shape=jax.ShapeDtypeStruct((n_pad, 1, latent), jnp.float32),
        grid=(n_pad // batch_tile,),
        in_specs=[
            pl.BlockSpec((batch_tile, 17, 204), lambda i: (i, 0, 0)),
            pl.BlockSpec((2, 204, 192), c3),
            pl.BlockSpec((1, 192), c2),
            pl.BlockSpec((192, 512), c2),
            pl.BlockSpec((1, 512), c2),
            pl.BlockSpec((2, 512, 512), c3),
            pl.BlockSpec((1, 512), c2),
            pl.BlockSpec((2, 512, 512), c3),
            pl.BlockSpec((1, 512), c2),
            pl.BlockSpec((16, 512, 128), c3),
            pl.BlockSpec((1, 128), c2),
            pl.BlockSpec((128, latent), c2),
            pl.BlockSpec((1, latent), c2),
        ],
        out_specs=pl.BlockSpec((batch_tile, 1, latent), lambda i: (i, 0, 0)),
        scratch_shapes=[pltpu.VMEM((batch_tile, 17, 512), jnp.float32)],
        compiler_params=pltpu.CompilerParams(
            dimension_semantics=("parallel",),
            vmem_limit_bytes=int(vmem_limit)),
    )(xe, p["m1"], p["b1"], p["m2"], p["b2"],
      p["m3"], p["b3"], p["m4"], p["b4"],
      p["l1_w"], p["l1_b"], p["l2_w"], p["l2_b"])
    return out.reshape(n_pad, latent)


# ----------------------------------------------------------------------------
# Parameters: PyTorch-style init, then a ONE-TIME re-layout to kernel form.
# ----------------------------------------------------------------------------
def _uniform(key, shape, fan_in):
    bound = 1.0 / jnp.sqrt(jnp.float32(fan_in))
    return jax.random.uniform(key, shape, jnp.float32, -bound, bound)


def init_torch_params(key, latent_size):
    ks = jax.random.split(key, 12)
    return {
        "c1_w": _uniform(ks[0], (3, 3, 2, 2), 3 * 4),
        "c1_b": _uniform(ks[1], (3,), 3 * 4),
        "c2_w": _uniform(ks[2], (32, 3, 2, 2), 3 * 4),
        "c2_b": _uniform(ks[3], (32,), 3 * 4),
        "c3_w": _uniform(ks[4], (32, 32, 2, 2), 32 * 4),
        "c3_b": _uniform(ks[5], (32,), 32 * 4),
        "c4_w": _uniform(ks[6], (32, 32, 2, 2), 32 * 4),
        "c4_b": _uniform(ks[7], (32,), 32 * 4),
        "l1_w": _uniform(ks[8], (128, 16 * 16 * 32), 16 * 16 * 32),
        "l1_b": _uniform(ks[9], (128,), 16 * 16 * 32),
        "l2_w": _uniform(ks[10], (latent_size, 128), 128),
        "l2_b": _uniform(ks[11], (latent_size,), 128),
    }


def pack_params(tp):
    latent = int(tp["l2_w"].shape[0])
    c1 = np.asarray(tp["c1_w"], np.float32)
    c2 = np.asarray(tp["c2_w"], np.float32)
    c3w = np.asarray(tp["c3_w"], np.float32)
    c4w = np.asarray(tp["c4_w"], np.float32)

    # conv1 + stride-2 fold:
    #   m1[da][(j+db)*12 + pa*6 + pb*3 + ci, j*12 + (a*2+b)*3 + co]
    #       = c1[co, ci, kh, kw],  da=(a+kh)//2, pa=(a+kh)%2 (likewise b/kw).
    m1 = np.zeros((2, 204, 192), np.float32)
    for a in range(2):
        for b in range(2):
            for kh in range(2):
                for kw in range(2):
                    da, pa = divmod(a + kh, 2)
                    db, pb = divmod(b + kw, 2)
                    blk = c1[:, :, kh, kw].T            # (ci, co)
                    for j in range(16):
                        r = (j + db) * 12 + pa * 6 + pb * 3
                        c = j * 12 + (a * 2 + b) * 3
                        m1[da, r:r + 3, c:c + 3] += blk

    # conv2 (stride-2 taps -> sub-pixel groups of the conv1 output):
    #   m2[j*12 + (a*2+b)*3 + ci, j*32 + co] = c2[co, ci, a, b].
    m2 = np.zeros((192, 512), np.float32)
    for a in range(2):
        for b in range(2):
            blk = c2[:, :, a, b].T                      # (ci=3, co=32)
            for j in range(16):
                r = j * 12 + (a * 2 + b) * 3
                m2[r:r + 3, j * 32:j * 32 + 32] = blk

    # conv3/conv4 band matrices: m[kh][(w+kw)*32 + ci, w*32 + co] = w[co,ci,kh,kw]
    # (the w+kw==16 / zero-pad-column entries are simply absent).
    def band(w):
        m = np.zeros((2, 512, 512), np.float32)
        for kh in range(2):
            for kw in range(2):
                blk = w[:, :, kh, kw].T                 # (ci, co) = (32, 32)
                for x in range(16):
                    if x + kw > 15:
                        continue
                    m[kh, (x + kw) * 32:(x + kw + 1) * 32,
                      x * 32:(x + 1) * 32] = blk
        return m

    # Fold the NCHW flatten (c*256 + h*16 + w) into l1's rows; store as
    # (h, w*32+c, out) so the kernel contracts per-h slabs of the line buffer.
    l1 = np.asarray(tp["l1_w"], np.float32)             # (128, 8192)
    w1p = l1.reshape(128, 32, 16, 16).transpose(2, 3, 1, 0)   # (h, w, c, out)
    w1p = np.ascontiguousarray(w1p.reshape(16, 512, 128))

    def tile_bias(bias, rep):
        return np.tile(np.asarray(bias, np.float32), rep).reshape(1, -1)

    return {
        "m1": jnp.asarray(m1),
        "b1": jnp.asarray(tile_bias(tp["c1_b"], 64)),          # (1, 192)
        "m2": jnp.asarray(m2),
        "b2": jnp.asarray(tile_bias(tp["c2_b"], 16)),          # (1, 512)
        "m3": jnp.asarray(band(c3w)),
        "b3": jnp.asarray(tile_bias(tp["c3_b"], 16)),
        "m4": jnp.asarray(band(c4w)),
        "b4": jnp.asarray(tile_bias(tp["c4_b"], 16)),
        "l1_w": jnp.asarray(w1p),                              # (16, 512, 128)
        "l1_b": jnp.asarray(tp["l1_b"], jnp.float32).reshape(1, 128),
        "l2_w": jnp.asarray(tp["l2_w"], jnp.float32).T,        # (128, latent)
        "l2_b": jnp.asarray(tp["l2_b"], jnp.float32).reshape(1, latent),
    }


# ----------------------------------------------------------------------------
# Forward pass.
# ----------------------------------------------------------------------------
def encoder_forward(packed, images_nchw):
    n, c, h, w = images_nchw.shape
    assert c == 3 and h == 32 and w == 32
    latent = packed["l2_w"].shape[1]

    # Tiny XLA prolog: NCHW -> NHWC, zero-pad right/bottom to 34 (even parity
    # split), fold the stride-2 parity onto the channel axis and fuse
    # (column, parity*channel) into one lane-dense 204-wide axis:
    #   xe[n, i, j*12 + pa*6 + pb*3 + c] = x_pad[n, 2i+pa, 2j+pb, c]
    x = jnp.transpose(images_nchw, (0, 2, 3, 1))            # (n, 32, 32, 3)
    xp = jnp.pad(x, ((0, 0), (0, 2), (0, 2), (0, 0)))       # (n, 34, 34, 3)
    xe = xp.reshape(n, 17, 2, 17, 2, 3).transpose(0, 1, 3, 2, 4, 5)
    xe = xe.reshape(n, 17, 17 * 12)                         # (n, 17, 204)

    vmem_limit, cap = _vmem_budget()
    tb, n_pad = _batch_tiling(n, cap)
    if n_pad != n:
        xe = jnp.pad(xe, ((0, n_pad - n), (0, 0), (0, 0)))

    out = _encoder_pallas(xe, packed, batch_tile=tb, latent=latent,
                          vmem_limit=vmem_limit)
    return out[:n]


# ----------------------------------------------------------------------------
# Pure-JAX reference (mirrors the PyTorch nn.Sequential) for validation.
# ----------------------------------------------------------------------------
def reference_forward(tp, images_nchw):
    hi = jax.lax.Precision.HIGHEST

    def pad_rb(z):
        return jnp.pad(z, ((0, 0), (0, 0), (0, 1), (0, 1)))

    def conv(z, wgt, bias, stride):
        out = jax.lax.conv_general_dilated(
            z, wgt, window_strides=(stride, stride), padding="VALID",
            dimension_numbers=("NCHW", "OIHW", "NCHW"), precision=hi)
        return out + bias.reshape(1, -1, 1, 1)

    z = jax.nn.relu(conv(pad_rb(images_nchw), tp["c1_w"], tp["c1_b"], 1))
    z = jax.nn.relu(conv(z, tp["c2_w"], tp["c2_b"], 2))
    z = jax.nn.relu(conv(pad_rb(z), tp["c3_w"], tp["c3_b"], 1))
    z = jax.nn.relu(conv(pad_rb(z), tp["c4_w"], tp["c4_b"], 1))
    z = z.reshape(z.shape[0], -1)
    z = jax.nn.relu(jnp.dot(z, tp["l1_w"].T, precision=hi) + tp["l1_b"])
    return jnp.dot(z, tp["l2_w"].T, precision=hi) + tp["l2_b"]


if __name__ == "__main__":
    latent_size = 32
    key = jax.random.PRNGKey(0)
    k_params, k_input = jax.random.split(key)

    torch_params = init_torch_params(k_params, latent_size)
    params = pack_params(torch_params)
    x = jax.random.normal(k_input, (2, 3, 32, 32), jnp.float32)

    fwd = jax.jit(functools.partial(encoder_forward, params))
    latent = fwd(x)
    jax.block_until_ready(latent)

    assert latent.shape == (2, latent_size), latent.shape
    assert latent.ndim == 2

    ref = reference_forward(torch_params, x)
    err = float(jnp.max(jnp.abs(latent - ref)))
    assert err < 5e-3, f"mismatch vs reference: max abs err = {err}"

    print("KERNEL_OK")
</pallas_src>

<mosaic_0001>
module attributes {stable_mosaic.version = 11 : i64} {
  func.func @_encoder_kernel(%arg0: i32, %arg1: memref<1x17x204xf32, #tpu.memory_space<vmem>>, %arg2: memref<2x204x192xf32, #tpu.memory_space<vmem>>, %arg3: memref<1x192xf32, #tpu.memory_space<vmem>>, %arg4: memref<192x512xf32, #tpu.memory_space<vmem>>, %arg5: memref<1x512xf32, #tpu.memory_space<vmem>>, %arg6: memref<2x512x512xf32, #tpu.memory_space<vmem>>, %arg7: memref<1x512xf32, #tpu.memory_space<vmem>>, %arg8: memref<2x512x512xf32, #tpu.memory_space<vmem>>, %arg9: memref<1x512xf32, #tpu.memory_space<vmem>>, %arg10: memref<16x512x128xf32, #tpu.memory_space<vmem>>, %arg11: memref<1x128xf32, #tpu.memory_space<vmem>>, %arg12: memref<128x32xf32, #tpu.memory_space<vmem>>, %arg13: memref<1x32xf32, #tpu.memory_space<vmem>>, %arg14: memref<1x1x32xf32, #tpu.memory_space<vmem>>, %arg15: memref<1x17x512xf32, #tpu.memory_space<vmem>>) attributes {dimension_semantics = [#tpu.dimension_semantics<parallel>], iteration_bounds = array<i64: 2>, scalar_prefetch = 0 : i64, scratch_operands = 1 : i64, tpu.core_type = #tpu.core_type<tc>, window_params = [{transform_indices = @transform_0, window_bounds = array<i64: 1, 17, 204>}, {pipeline_mode = #tpu.pipeline_mode<synchronous>, transform_indices = @transform_1, window_bounds = array<i64: 2, 204, 192>}, {pipeline_mode = #tpu.pipeline_mode<synchronous>, transform_indices = @transform_2, window_bounds = array<i64: 1, 192>}, {pipeline_mode = #tpu.pipeline_mode<synchronous>, transform_indices = @transform_3, window_bounds = array<i64: 192, 512>}, {pipeline_mode = #tpu.pipeline_mode<synchronous>, transform_indices = @transform_4, window_bounds = array<i64: 1, 512>}, {pipeline_mode = #tpu.pipeline_mode<synchronous>, transform_indices = @transform_5, window_bounds = array<i64: 2, 512, 512>}, {pipeline_mode = #tpu.pipeline_mode<synchronous>, transform_indices = @transform_6, window_bounds = array<i64: 1, 512>}, {pipeline_mode = #tpu.pipeline_mode<synchronous>, transform_indices = @transform_7, window_bounds = array<i64: 2, 512, 512>}, {pipeline_mode = #tpu.pipeline_mode<synchronous>, transform_indices = @transform_8, window_bounds = array<i64: 1, 512>}, {pipeline_mode = #tpu.pipeline_mode<synchronous>, transform_indices = @transform_9, window_bounds = array<i64: 16, 512, 128>}, {pipeline_mode = #tpu.pipeline_mode<synchronous>, transform_indices = @transform_10, window_bounds = array<i64: 1, 128>}, {pipeline_mode = #tpu.pipeline_mode<synchronous>, transform_indices = @transform_11, window_bounds = array<i64: 128, 32>}, {pipeline_mode = #tpu.pipeline_mode<synchronous>, transform_indices = @transform_12, window_bounds = array<i64: 1, 32>}, {transform_indices = @transform_13, window_bounds = array<i64: 1, 1, 32>}]} {
    %cst = arith.constant 0.000000e+00 : f32
    %0 = vector.broadcast %cst : f32 to vector<1x1x512xf32>
    %c0 = arith.constant 0 : index
    %c16 = arith.constant 16 : index
    %c0_0 = arith.constant 0 : index
    %1 = vector.load %arg15[%c0, %c16, %c0_0] : memref<1x17x512xf32, #tpu.memory_space<vmem>>, vector<1x1x512xf32>
    tpu.vector_store %arg15[%c0, %c16, %c0_0], %0 {strides = array<i32>} : memref<1x17x512xf32, #tpu.memory_space<vmem>>, vector<1x1x512xf32>,
    %c0_1 = arith.constant 0 : index
    %c0_2 = arith.constant 0 : index
    %c0_3 = arith.constant 0 : index
    %2 = vector.load %arg1[%c0_1, %c0_2, %c0_3] : memref<1x17x204xf32, #tpu.memory_space<vmem>>, vector<1x16x204xf32>
    %3 = vector.shape_cast %2 : vector<1x16x204xf32> to vector<16x204xf32>
    %c0_4 = arith.constant 0 : index
    %c1 = arith.constant 1 : index
    %c0_5 = arith.constant 0 : index
    %4 = vector.load %arg1[%c0_4, %c1, %c0_5] : memref<1x17x204xf32, #tpu.memory_space<vmem>>, vector<1x16x204xf32>
    %5 = vector.shape_cast %4 : vector<1x16x204xf32> to vector<16x204xf32>
    %c0_6 = arith.constant 0 : index
    %c0_7 = arith.constant 0 : index
    %c0_8 = arith.constant 0 : index
    %6 = vector.load %arg2[%c0_6, %c0_7, %c0_8] : memref<2x204x192xf32, #tpu.memory_space<vmem>>, vector<1x204x192xf32>
    %7 = vector.shape_cast %6 : vector<1x204x192xf32> to vector<204x192xf32>
    %cst_9 = arith.constant dense<0.000000e+00> : vector<16x192xf32>
    %8 = tpu.matmul %3, %7, %cst_9 {dimension_numbers = #tpu.dot_dimension_numbers<[1], [0], [0], [1], [0, 0, 1, 1], [], []>} : vector<16x204xf32>, vector<204x192xf32>, vector<16x192xf32> -> vector<16x192xf32>
    %c1_10 = arith.constant 1 : index
    %c0_11 = arith.constant 0 : index
    %c0_12 = arith.constant 0 : index
    %9 = vector.load %arg2[%c1_10, %c0_11, %c0_12] : memref<2x204x192xf32, #tpu.memory_space<vmem>>, vector<1x204x192xf32>
    %10 = vector.shape_cast %9 : vector<1x204x192xf32> to vector<204x192xf32>
    %cst_13 = arith.constant dense<0.000000e+00> : vector<16x192xf32>
    %11 = tpu.matmul %5, %10, %cst_13 {dimension_numbers = #tpu.dot_dimension_numbers<[1], [0], [0], [1], [0, 0, 1, 1], [], []>} : vector<16x204xf32>, vector<204x192xf32>, vector<16x192xf32> -> vector<16x192xf32>
    %12 = arith.addf %8, %11 : vector<16x192xf32>
    %c0_14 = arith.constant 0 : index
    %c0_15 = arith.constant 0 : index
    %13 = vector.load %arg3[%c0_14, %c0_15] : memref<1x192xf32, #tpu.memory_space<vmem>>, vector<1x192xf32>
    %14 = vector.broadcast %13 : vector<1x192xf32> to vector<16x192xf32>
    %15 = arith.addf %12, %14 : vector<16x192xf32>
    %cst_16 = arith.constant 0.000000e+00 : f32
    %16 = vector.broadcast %cst_16 : f32 to vector<16x192xf32>
    %17 = arith.maximumf %15, %16 : vector<16x192xf32>
    %c0_17 = arith.constant 0 : index
    %c0_18 = arith.constant 0 : index
    %18 = vector.load %arg4[%c0_17, %c0_18] : memref<192x512xf32, #tpu.memory_space<vmem>>, vector<192x512xf32>
    %cst_19 = arith.constant dense<0.000000e+00> : vector<16x512xf32>
    %19 = tpu.matmul %17, %18, %cst_19 {dimension_numbers = #tpu.dot_dimension_numbers<[1], [0], [0], [1], [0, 0, 1, 1], [], []>} : vector<16x192xf32>, vector<192x512xf32>, vector<16x512xf32> -> vector<16x512xf32>
    %c0_20 = arith.constant 0 : index
    %c0_21 = arith.constant 0 : index
    %20 = vector.load %arg5[%c0_20, %c0_21] : memref<1x512xf32, #tpu.memory_space<vmem>>, vector<1x512xf32>
    %21 = vector.broadcast %20 : vector<1x512xf32> to vector<16x512xf32>
    %22 = arith.addf %19, %21 : vector<16x512xf32>
    %cst_22 = arith.constant 0.000000e+00 : f32
    %23 = vector.broadcast %cst_22 : f32 to vector<16x512xf32>
    %24 = arith.maximumf %22, %23 : vector<16x512xf32>
    %25 = vector.shape_cast %24 : vector<16x512xf32> to vector<1x16x512xf32>
    %c0_23 = arith.constant 0 : index
    %c0_24 = arith.constant 0 : index
    %c0_25 = arith.constant 0 : index
    %26 = vector.load %arg15[%c0_23, %c0_24, %c0_25] : memref<1x17x512xf32, #tpu.memory_space<vmem>>, vector<1x16x512xf32>
    tpu.vector_store %arg15[%c0_23, %c0_24, %c0_25], %25 {strides = array<i32>} : memref<1x17x512xf32, #tpu.memory_space<vmem>>, vector<1x16x512xf32>,
    %c0_26 = arith.constant 0 : index
    %c1_27 = arith.constant 1 : index
    %c0_28 = arith.constant 0 : index
    %27 = vector.load %arg15[%c0_26, %c1_27, %c0_28] : memref<1x17x512xf32, #tpu.memory_space<vmem>>, vector<1x16x512xf32>
    %28 = vector.shape_cast %27 : vector<1x16x512xf32> to vector<16x512xf32>
    %c0_29 = arith.constant 0 : index
    %c0_30 = arith.constant 0 : index
    %c0_31 = arith.constant 0 : index
    %29 = vector.load %arg6[%c0_29, %c0_30, %c0_31] : memref<2x512x512xf32, #tpu.memory_space<vmem>>, vector<1x512x512xf32>
    %30 = vector.shape_cast %29 : vector<1x512x512xf32> to vector<512x512xf32>
    %cst_32 = arith.constant dense<0.000000e+00> : vector<16x512xf32>
    %31 = tpu.matmul %24, %30, %cst_32 {dimension_numbers = #tpu.dot_dimension_numbers<[1], [0], [0], [1], [0, 0, 1, 1], [], []>} : vector<16x512xf32>, vector<512x512xf32>, vector<16x512xf32> -> vector<16x512xf32>
    %c1_33 = arith.constant 1 : index
    %c0_34 = arith.constant 0 : index
    %c0_35 = arith.constant 0 : index
    %32 = vector.load %arg6[%c1_33, %c0_34, %c0_35] : memref<2x512x512xf32, #tpu.memory_space<vmem>>, vector<1x512x512xf32>
    %33 = vector.shape_cast %32 : vector<1x512x512xf32> to vector<512x512xf32>
    %cst_36 = arith.constant dense<0.000000e+00> : vector<16x512xf32>
    %34 = tpu.matmul %28, %33, %cst_36 {dimension_numbers = #tpu.dot_dimension_numbers<[1], [0], [0], [1], [0, 0, 1, 1], [], []>} : vector<16x512xf32>, vector<512x512xf32>, vector<16x512xf32> -> vector<16x512xf32>
    %35 = arith.addf %31, %34 : vector<16x512xf32>
    %c0_37 = arith.constant 0 : index
    %c0_38 = arith.constant 0 : index
    %36 = vector.load %arg7[%c0_37, %c0_38] : memref<1x512xf32, #tpu.memory_space<vmem>>, vector<1x512xf32>
    %37 = vector.broadcast %36 : vector<1x512xf32> to vector<16x512xf32>
    %38 = arith.addf %35, %37 : vector<16x512xf32>
    %cst_39 = arith.constant 0.000000e+00 : f32
    %39 = vector.broadcast %cst_39 : f32 to vector<16x512xf32>
    %40 = arith.maximumf %38, %39 : vector<16x512xf32>
    %41 = vector.shape_cast %40 : vector<16x512xf32> to vector<1x16x512xf32>
    %c0_40 = arith.constant 0 : index
    %c0_41 = arith.constant 0 : index
    %c0_42 = arith.constant 0 : index
    %42 = vector.load %arg15[%c0_40, %c0_41, %c0_42] : memref<1x17x512xf32, #tpu.memory_space<vmem>>, vector<1x16x512xf32>
    tpu.vector_store %arg15[%c0_40, %c0_41, %c0_42], %41 {strides = array<i32>} : memref<1x17x512xf32, #tpu.memory_space<vmem>>, vector<1x16x512xf32>,
    %c0_43 = arith.constant 0 : index
    %c1_44 = arith.constant 1 : index
    %c0_45 = arith.constant 0 : index
    %43 = vector.load %arg15[%c0_43, %c1_44, %c0_45] : memref<1x17x512xf32, #tpu.memory_space<vmem>>, vector<1x16x512xf32>
    %44 = vector.shape_cast %43 : vector<1x16x512xf32> to vector<16x512xf32>
    %c0_46 = arith.constant 0 : index
    %c0_47 = arith.constant 0 : index
    %c0_48 = arith.constant 0 : index
    %45 = vector.load %arg8[%c0_46, %c0_47, %c0_48] : memref<2x512x512xf32, #tpu.memory_space<vmem>>, vector<1x512x512xf32>
    %46 = vector.shape_cast %45 : vector<1x512x512xf32> to vector<512x512xf32>
    %cst_49 = arith.constant dense<0.000000e+00> : vector<16x512xf32>
    %47 = tpu.matmul %40, %46, %cst_49 {dimension_numbers = #tpu.dot_dimension_numbers<[1], [0], [0], [1], [0, 0, 1, 1], [], []>} : vector<16x512xf32>, vector<512x512xf32>, vector<16x512xf32> -> vector<16x512xf32>
    %c1_50 = arith.constant 1 : index
    %c0_51 = arith.constant 0 : index
    %c0_52 = arith.constant 0 : index
    %48 = vector.load %arg8[%c1_50, %c0_51, %c0_52] : memref<2x512x512xf32, #tpu.memory_space<vmem>>, vector<1x512x512xf32>
    %49 = vector.shape_cast %48 : vector<1x512x512xf32> to vector<512x512xf32>
    %cst_53 = arith.constant dense<0.000000e+00> : vector<16x512xf32>
    %50 = tpu.matmul %44, %49, %cst_53 {dimension_numbers = #tpu.dot_dimension_numbers<[1], [0], [0], [1], [0, 0, 1, 1], [], []>} : vector<16x512xf32>, vector<512x512xf32>, vector<16x512xf32> -> vector<16x512xf32>
    %51 = arith.addf %47, %50 : vector<16x512xf32>
    %c0_54 = arith.constant 0 : index
    %c0_55 = arith.constant 0 : index
    %52 = vector.load %arg9[%c0_54, %c0_55] : memref<1x512xf32, #tpu.memory_space<vmem>>, vector<1x512xf32>
    %53 = vector.broadcast %52 : vector<1x512xf32> to vector<16x512xf32>
    %54 = arith.addf %51, %53 : vector<16x512xf32>
    %cst_56 = arith.constant 0.000000e+00 : f32
    %55 = vector.broadcast %cst_56 : f32 to vector<16x512xf32>
    %56 = arith.maximumf %54, %55 : vector<16x512xf32>
    %57 = vector.shape_cast %56 : vector<16x512xf32> to vector<1x16x512xf32>
    %c0_57 = arith.constant 0 : index
    %c0_58 = arith.constant 0 : index
    %c0_59 = arith.constant 0 : index
    %58 = vector.load %arg15[%c0_57, %c0_58, %c0_59] : memref<1x17x512xf32, #tpu.memory_space<vmem>>, vector<1x16x512xf32>
    tpu.vector_store %arg15[%c0_57, %c0_58, %c0_59], %57 {strides = array<i32>} : memref<1x17x512xf32, #tpu.memory_space<vmem>>, vector<1x16x512xf32>,
    %cst_60 = arith.constant 0.000000e+00 : f32
    %59 = vector.broadcast %cst_60 : f32 to vector<1x128xf32>
    %c0_61 = arith.constant 0 : index
    %c0_62 = arith.constant 0 : index
    %c0_63 = arith.constant 0 : index
    %60 = vector.load %arg15[%c0_61, %c0_62, %c0_63] : memref<1x17x512xf32, #tpu.memory_space<vmem>>, vector<1x1x512xf32>
    %61 = vector.shape_cast %60 : vector<1x1x512xf32> to vector<1x512xf32>
    %c0_64 = arith.constant 0 : index
    %c0_65 = arith.constant 0 : index
    %c0_66 = arith.constant 0 : index
    %62 = vector.load %arg10[%c0_64, %c0_65, %c0_66] : memref<16x512x128xf32, #tpu.memory_space<vmem>>, vector<1x512x128xf32>
    %63 = vector.shape_cast %62 : vector<1x512x128xf32> to vector<512x128xf32>
    %cst_67 = arith.constant dense<0.000000e+00> : vector<1x128xf32>
    %64 = tpu.matmul %61, %63, %cst_67 {dimension_numbers = #tpu.dot_dimension_numbers<[1], [0], [0], [1], [0, 0, 1, 1], [], []>} : vector<1x512xf32>, vector<512x128xf32>, vector<1x128xf32> -> vector<1x128xf32>
    %65 = arith.addf %59, %64 : vector<1x128xf32>
    %c0_68 = arith.constant 0 : index
    %c1_69 = arith.constant 1 : index
    %c0_70 = arith.constant 0 : index
    %66 = vector.load %arg15[%c0_68, %c1_69, %c0_70] : memref<1x17x512xf32, #tpu.memory_space<vmem>>, vector<1x1x512xf32>
    %67 = vector.shape_cast %66 : vector<1x1x512xf32> to vector<1x512xf32>
    %c1_71 = arith.constant 1 : index
    %c0_72 = arith.constant 0 : index
    %c0_73 = arith.constant 0 : index
    %68 = vector.load %arg10[%c1_71, %c0_72, %c0_73] : memref<16x512x128xf32, #tpu.memory_space<vmem>>, vector<1x512x128xf32>
    %69 = vector.shape_cast %68 : vector<1x512x128xf32> to vector<512x128xf32>
    %cst_74 = arith.constant dense<0.000000e+00> : vector<1x128xf32>
    %70 = tpu.matmul %67, %69, %cst_74 {dimension_numbers = #tpu.dot_dimension_numbers<[1], [0], [0], [1], [0, 0, 1, 1], [], []>} : vector<1x512xf32>, vector<512x128xf32>, vector<1x128xf32> -> vector<1x128xf32>
    %71 = arith.addf %65, %70 : vector<1x128xf32>
    %c0_75 = arith.constant 0 : index
    %c2 = arith.constant 2 : index
    %c0_76 = arith.constant 0 : index
    %72 = vector.load %arg15[%c0_75, %c2, %c0_76] : memref<1x17x512xf32, #tpu.memory_space<vmem>>, vector<1x1x512xf32>
    %73 = vector.shape_cast %72 : vector<1x1x512xf32> to vector<1x512xf32>
    %c2_77 = arith.constant 2 : index
    %c0_78 = arith.constant 0 : index
    %c0_79 = arith.constant 0 : index
    %74 = vector.load %arg10[%c2_77, %c0_78, %c0_79] : memref<16x512x128xf32, #tpu.memory_space<vmem>>, vector<1x512x128xf32>
    %75 = vector.shape_cast %74 : vector<1x512x128xf32> to vector<512x128xf32>
    %cst_80 = arith.constant dense<0.000000e+00> : vector<1x128xf32>
    %76 = tpu.matmul %73, %75, %cst_80 {dimension_numbers = #tpu.dot_dimension_numbers<[1], [0], [0], [1], [0, 0, 1, 1], [], []>} : vector<1x512xf32>, vector<512x128xf32>, vector<1x128xf32> -> vector<1x128xf32>
    %77 = arith.addf %71, %76 : vector<1x128xf32>
    %c0_81 = arith.constant 0 : index
    %c3 = arith.constant 3 : index
    %c0_82 = arith.constant 0 : index
    %78 = vector.load %arg15[%c0_81, %c3, %c0_82] : memref<1x17x512xf32, #tpu.memory_space<vmem>>, vector<1x1x512xf32>
    %79 = vector.shape_cast %78 : vector<1x1x512xf32> to vector<1x512xf32>
    %c3_83 = arith.constant 3 : index
    %c0_84 = arith.constant 0 : index
    %c0_85 = arith.constant 0 : index
    %80 = vector.load %arg10[%c3_83, %c0_84, %c0_85] : memref<16x512x128xf32, #tpu.memory_space<vmem>>, vector<1x512x128xf32>
    %81 = vector.shape_cast %80 : vector<1x512x128xf32> to vector<512x128xf32>
    %cst_86 = arith.constant dense<0.000000e+00> : vector<1x128xf32>
    %82 = tpu.matmul %79, %81, %cst_86 {dimension_numbers = #tpu.dot_dimension_numbers<[1], [0], [0], [1], [0, 0, 1, 1], [], []>} : vector<1x512xf32>, vector<512x128xf32>, vector<1x128xf32> -> vector<1x128xf32>
    %83 = arith.addf %77, %82 : vector<1x128xf32>
    %c0_87 = arith.constant 0 : index
    %c4 = arith.constant 4 : index
    %c0_88 = arith.constant 0 : index
    %84 = vector.load %arg15[%c0_87, %c4, %c0_88] : memref<1x17x512xf32, #tpu.memory_space<vmem>>, vector<1x1x512xf32>
    %85 = vector.shape_cast %84 : vector<1x1x512xf32> to vector<1x512xf32>
    %c4_89 = arith.constant 4 : index
    %c0_90 = arith.constant 0 : index
    %c0_91 = arith.constant 0 : index
    %86 = vector.load %arg10[%c4_89, %c0_90, %c0_91] : memref<16x512x128xf32, #tpu.memory_space<vmem>>, vector<1x512x128xf32>
    %87 = vector.shape_cast %86 : vector<1x512x128xf32> to vector<512x128xf32>
    %cst_92 = arith.constant dense<0.000000e+00> : vector<1x128xf32>
    %88 = tpu.matmul %85, %87, %cst_92 {dimension_numbers = #tpu.dot_dimension_numbers<[1], [0], [0], [1], [0, 0, 1, 1], [], []>} : vector<1x512xf32>, vector<512x128xf32>, vector<1x128xf32> -> vector<1x128xf32>
    %89 = arith.addf %83, %88 : vector<1x128xf32>
    %c0_93 = arith.constant 0 : index
    %c5 = arith.constant 5 : index
    %c0_94 = arith.constant 0 : index
    %90 = vector.load %arg15[%c0_93, %c5, %c0_94] : memref<1x17x512xf32, #tpu.memory_space<vmem>>, vector<1x1x512xf32>
    %91 = vector.shape_cast %90 : vector<1x1x512xf32> to vector<1x512xf32>
    %c5_95 = arith.constant 5 : index
    %c0_96 = arith.constant 0 : index
    %c0_97 = arith.constant 0 : index
    %92 = vector.load %arg10[%c5_95, %c0_96, %c0_97] : memref<16x512x128xf32, #tpu.memory_space<vmem>>, vector<1x512x128xf32>
    %93 = vector.shape_cast %92 : vector<1x512x128xf32> to vector<512x128xf32>
    %cst_98 = arith.constant dense<0.000000e+00> : vector<1x128xf32>
    %94 = tpu.matmul %91, %93, %cst_98 {dimension_numbers = #tpu.dot_dimension_numbers<[1], [0], [0], [1], [0, 0, 1, 1], [], []>} : vector<1x512xf32>, vector<512x128xf32>, vector<1x128xf32> -> vector<1x128xf32>
    %95 = arith.addf %89, %94 : vector<1x128xf32>
    %c0_99 = arith.constant 0 : index
    %c6 = arith.constant 6 : index
    %c0_100 = arith.constant 0 : index
    %96 = vector.load %arg15[%c0_99, %c6, %c0_100] : memref<1x17x512xf32, #tpu.memory_space<vmem>>, vector<1x1x512xf32>
    %97 = vector.shape_cast %96 : vector<1x1x512xf32> to vector<1x512xf32>
    %c6_101 = arith.constant 6 : index
    %c0_102 = arith.constant 0 : index
    %c0_103 = arith.constant 0 : index
    %98 = vector.load %arg10[%c6_101, %c0_102, %c0_103] : memref<16x512x128xf32, #tpu.memory_space<vmem>>, vector<1x512x128xf32>
    %99 = vector.shape_cast %98 : vector<1x512x128xf32> to vector<512x128xf32>
    %cst_104 = arith.constant dense<0.000000e+00> : vector<1x128xf32>
    %100 = tpu.matmul %97, %99, %cst_104 {dimension_numbers = #tpu.dot_dimension_numbers<[1], [0], [0], [1], [0, 0, 1, 1], [], []>} : vector<1x512xf32>, vector<512x128xf32>, vector<1x128xf32> -> vector<1x128xf32>
    %101 = arith.addf %95, %100 : vector<1x128xf32>
    %c0_105 = arith.constant 0 : index
    %c7 = arith.constant 7 : index
    %c0_106 = arith.constant 0 : index
    %102 = vector.load %arg15[%c0_105, %c7, %c0_106] : memref<1x17x512xf32, #tpu.memory_space<vmem>>, vector<1x1x512xf32>
    %103 = vector.shape_cast %102 : vector<1x1x512xf32> to vector<1x512xf32>
    %c7_107 = arith.constant 7 : index
    %c0_108 = arith.constant 0 : index
    %c0_109 = arith.constant 0 : index
    %104 = vector.load %arg10[%c7_107, %c0_108, %c0_109] : memref<16x512x128xf32, #tpu.memory_space<vmem>>, vector<1x512x128xf32>
    %105 = vector.shape_cast %104 : vector<1x512x128xf32> to vector<512x128xf32>
    %cst_110 = arith.constant dense<0.000000e+00> : vector<1x128xf32>
    %106 = tpu.matmul %103, %105, %cst_110 {dimension_numbers = #tpu.dot_dimension_numbers<[1], [0], [0], [1], [0, 0, 1, 1], [], []>} : vector<1x512xf32>, vector<512x128xf32>, vector<1x128xf32> -> vector<1x128xf32>
    %107 = arith.addf %101, %106 : vector<1x128xf32>
    %c0_111 = arith.constant 0 : index
    %c8 = arith.constant 8 : index
    %c0_112 = arith.constant 0 : index
    %108 = vector.load %arg15[%c0_111, %c8, %c0_112] : memref<1x17x512xf32, #tpu.memory_space<vmem>>, vector<1x1x512xf32>
    %109 = vector.shape_cast %108 : vector<1x1x512xf32> to vector<1x512xf32>
    %c8_113 = arith.constant 8 : index
    %c0_114 = arith.constant 0 : index
    %c0_115 = arith.constant 0 : index
    %110 = vector.load %arg10[%c8_113, %c0_114, %c0_115] : memref<16x512x128xf32, #tpu.memory_space<vmem>>, vector<1x512x128xf32>
    %111 = vector.shape_cast %110 : vector<1x512x128xf32> to vector<512x128xf32>
    %cst_116 = arith.constant dense<0.000000e+00> : vector<1x128xf32>
    %112 = tpu.matmul %109, %111, %cst_116 {dimension_numbers = #tpu.dot_dimension_numbers<[1], [0], [0], [1], [0, 0, 1, 1], [], []>} : vector<1x512xf32>, vector<512x128xf32>, vector<1x128xf32> -> vector<1x128xf32>
    %113 = arith.addf %107, %112 : vector<1x128xf32>
    %c0_117 = arith.constant 0 : index
    %c9 = arith.constant 9 : index
    %c0_118 = arith.constant 0 : index
    %114 = vector.load %arg15[%c0_117, %c9, %c0_118] : memref<1x17x512xf32, #tpu.memory_space<vmem>>, vector<1x1x512xf32>
    %115 = vector.shape_cast %114 : vector<1x1x512xf32> to vector<1x512xf32>
    %c9_119 = arith.constant 9 : index
    %c0_120 = arith.constant 0 : index
    %c0_121 = arith.constant 0 : index
    %116 = vector.load %arg10[%c9_119, %c0_120, %c0_121] : memref<16x512x128xf32, #tpu.memory_space<vmem>>, vector<1x512x128xf32>
    %117 = vector.shape_cast %116 : vector<1x512x128xf32> to vector<512x128xf32>
    %cst_122 = arith.constant dense<0.000000e+00> : vector<1x128xf32>
    %118 = tpu.matmul %115, %117, %cst_122 {dimension_numbers = #tpu.dot_dimension_numbers<[1], [0], [0], [1], [0, 0, 1, 1], [], []>} : vector<1x512xf32>, vector<512x128xf32>, vector<1x128xf32> -> vector<1x128xf32>
    %119 = arith.addf %113, %118 : vector<1x128xf32>
    %c0_123 = arith.constant 0 : index
    %c10 = arith.constant 10 : index
    %c0_124 = arith.constant 0 : index
    %120 = vector.load %arg15[%c0_123, %c10, %c0_124] : memref<1x17x512xf32, #tpu.memory_space<vmem>>, vector<1x1x512xf32>
    %121 = vector.shape_cast %120 : vector<1x1x512xf32> to vector<1x512xf32>
    %c10_125 = arith.constant 10 : index
    %c0_126 = arith.constant 0 : index
    %c0_127 = arith.constant 0 : index
    %122 = vector.load %arg10[%c10_125, %c0_126, %c0_127] : memref<16x512x128xf32, #tpu.memory_space<vmem>>, vector<1x512x128xf32>
    %123 = vector.shape_cast %122 : vector<1x512x128xf32> to vector<512x128xf32>
    %cst_128 = arith.constant dense<0.000000e+00> : vector<1x128xf32>
    %124 = tpu.matmul %121, %123, %cst_128 {dimension_numbers = #tpu.dot_dimension_numbers<[1], [0], [0], [1], [0, 0, 1, 1], [], []>} : vector<1x512xf32>, vector<512x128xf32>, vector<1x128xf32> -> vector<1x128xf32>
    %125 = arith.addf %119, %124 : vector<1x128xf32>
    %c0_129 = arith.constant 0 : index
    %c11 = arith.constant 11 : index
    %c0_130 = arith.constant 0 : index
    %126 = vector.load %arg15[%c0_129, %c11, %c0_130] : memref<1x17x512xf32, #tpu.memory_space<vmem>>, vector<1x1x512xf32>
    %127 = vector.shape_cast %126 : vector<1x1x512xf32> to vector<1x512xf32>
    %c11_131 = arith.constant 11 : index
    %c0_132 = arith.constant 0 : index
    %c0_133 = arith.constant 0 : index
    %128 = vector.load %arg10[%c11_131, %c0_132, %c0_133] : memref<16x512x128xf32, #tpu.memory_space<vmem>>, vector<1x512x128xf32>
    %129 = vector.shape_cast %128 : vector<1x512x128xf32> to vector<512x128xf32>
    %cst_134 = arith.constant dense<0.000000e+00> : vector<1x128xf32>
    %130 = tpu.matmul %127, %129, %cst_134 {dimension_numbers = #tpu.dot_dimension_numbers<[1], [0], [0], [1], [0, 0, 1, 1], [], []>} : vector<1x512xf32>, vector<512x128xf32>, vector<1x128xf32> -> vector<1x128xf32>
    %131 = arith.addf %125, %130 : vector<1x128xf32>
    %c0_135 = arith.constant 0 : index
    %c12 = arith.constant 12 : index
    %c0_136 = arith.constant 0 : index
    %132 = vector.load %arg15[%c0_135, %c12, %c0_136] : memref<1x17x512xf32, #tpu.memory_space<vmem>>, vector<1x1x512xf32>
    %133 = vector.shape_cast %132 : vector<1x1x512xf32> to vector<1x512xf32>
    %c12_137 = arith.constant 12 : index
    %c0_138 = arith.constant 0 : index
    %c0_139 = arith.constant 0 : index
    %134 = vector.load %arg10[%c12_137, %c0_138, %c0_139] : memref<16x512x128xf32, #tpu.memory_space<vmem>>, vector<1x512x128xf32>
    %135 = vector.shape_cast %134 : vector<1x512x128xf32> to vector<512x128xf32>
    %cst_140 = arith.constant dense<0.000000e+00> : vector<1x128xf32>
    %136 = tpu.matmul %133, %135, %cst_140 {dimension_numbers = #tpu.dot_dimension_numbers<[1], [0], [0], [1], [0, 0, 1, 1], [], []>} : vector<1x512xf32>, vector<512x128xf32>, vector<1x128xf32> -> vector<1x128xf32>
    %137 = arith.addf %131, %136 : vector<1x128xf32>
    %c0_141 = arith.constant 0 : index
    %c13 = arith.constant 13 : index
    %c0_142 = arith.constant 0 : index
    %138 = vector.load %arg15[%c0_141, %c13, %c0_142] : memref<1x17x512xf32, #tpu.memory_space<vmem>>, vector<1x1x512xf32>
    %139 = vector.shape_cast %138 : vector<1x1x512xf32> to vector<1x512xf32>
    %c13_143 = arith.constant 13 : index
    %c0_144 = arith.constant 0 : index
    %c0_145 = arith.constant 0 : index
    %140 = vector.load %arg10[%c13_143, %c0_144, %c0_145] : memref<16x512x128xf32, #tpu.memory_space<vmem>>, vector<1x512x128xf32>
    %141 = vector.shape_cast %140 : vector<1x512x128xf32> to vector<512x128xf32>
    %cst_146 = arith.constant dense<0.000000e+00> : vector<1x128xf32>
    %142 = tpu.matmul %139, %141, %cst_146 {dimension_numbers = #tpu.dot_dimension_numbers<[1], [0], [0], [1], [0, 0, 1, 1], [], []>} : vector<1x512xf32>, vector<512x128xf32>, vector<1x128xf32> -> vector<1x128xf32>
    %143 = arith.addf %137, %142 : vector<1x128xf32>
    %c0_147 = arith.constant 0 : index
    %c14 = arith.constant 14 : index
    %c0_148 = arith.constant 0 : index
    %144 = vector.load %arg15[%c0_147, %c14, %c0_148] : memref<1x17x512xf32, #tpu.memory_space<vmem>>, vector<1x1x512xf32>
    %145 = vector.shape_cast %144 : vector<1x1x512xf32> to vector<1x512xf32>
    %c14_149 = arith.constant 14 : index
    %c0_150 = arith.constant 0 : index
    %c0_151 = arith.constant 0 : index
    %146 = vector.load %arg10[%c14_149, %c0_150, %c0_151] : memref<16x512x128xf32, #tpu.memory_space<vmem>>, vector<1x512x128xf32>
    %147 = vector.shape_cast %146 : vector<1x512x128xf32> to vector<512x128xf32>
    %cst_152 = arith.constant dense<0.000000e+00> : vector<1x128xf32>
    %148 = tpu.matmul %145, %147, %cst_152 {dimension_numbers = #tpu.dot_dimension_numbers<[1], [0], [0], [1], [0, 0, 1, 1], [], []>} : vector<1x512xf32>, vector<512x128xf32>, vector<1x128xf32> -> vector<1x128xf32>
    %149 = arith.addf %143, %148 : vector<1x128xf32>
    %c0_153 = arith.constant 0 : index
    %c15 = arith.constant 15 : index
    %c0_154 = arith.constant 0 : index
    %150 = vector.load %arg15[%c0_153, %c15, %c0_154] : memref<1x17x512xf32, #tpu.memory_space<vmem>>, vector<1x1x512xf32>
    %151 = vector.shape_cast %150 : vector<1x1x512xf32> to vector<1x512xf32>
    %c15_155 = arith.constant 15 : index
    %c0_156 = arith.constant 0 : index
    %c0_157 = arith.constant 0 : index
    %152 = vector.load %arg10[%c15_155, %c0_156, %c0_157] : memref<16x512x128xf32, #tpu.memory_space<vmem>>, vector<1x512x128xf32>
    %153 = vector.shape_cast %152 : vector<1x512x128xf32> to vector<512x128xf32>
    %cst_158 = arith.constant dense<0.000000e+00> : vector<1x128xf32>
    %154 = tpu.matmul %151, %153, %cst_158 {dimension_numbers = #tpu.dot_dimension_numbers<[1], [0], [0], [1], [0, 0, 1, 1], [], []>} : vector<1x512xf32>, vector<512x128xf32>, vector<1x128xf32> -> vector<1x128xf32>
    %155 = arith.addf %149, %154 : vector<1x128xf32>
    %c0_159 = arith.constant 0 : index
    %c0_160 = arith.constant 0 : index
    %156 = vector.load %arg11[%c0_159, %c0_160] : memref<1x128xf32, #tpu.memory_space<vmem>>, vector<1x128xf32>
    %157 = arith.addf %155, %156 : vector<1x128xf32>
    %cst_161 = arith.constant 0.000000e+00 : f32
    %158 = vector.broadcast %cst_161 : f32 to vector<1x128xf32>
    %159 = arith.maximumf %157, %158 : vector<1x128xf32>
    %c0_162 = arith.constant 0 : index
    %c0_163 = arith.constant 0 : index
    %160 = vector.load %arg12[%c0_162, %c0_163] : memref<128x32xf32, #tpu.memory_space<vmem>>, vector<128x32xf32>
    %cst_164 = arith.constant dense<0.000000e+00> : vector<1x32xf32>
    %161 = tpu.matmul %159, %160, %cst_164 {dimension_numbers = #tpu.dot_dimension_numbers<[1], [0], [0], [1], [0, 0, 1, 1], [], []>} : vector<1x128xf32>, vector<128x32xf32>, vector<1x32xf32> -> vector<1x32xf32>
    %c0_165 = arith.constant 0 : index
    %c0_166 = arith.constant 0 : index
    %162 = vector.load %arg13[%c0_165, %c0_166] : memref<1x32xf32, #tpu.memory_space<vmem>>, vector<1x32xf32>
    %163 = arith.addf %161, %162 : vector<1x32xf32>
    %164 = vector.shape_cast %163 : vector<1x32xf32> to vector<1x1x32xf32>
    %c0_167 = arith.constant 0 : index
    %c0_168 = arith.constant 0 : index
    %c0_169 = arith.constant 0 : index
    %165 = vector.load %arg14[%c0_167, %c0_168, %c0_169] : memref<1x1x32xf32, #tpu.memory_space<vmem>>, vector<1x1x32xf32>
    tpu.vector_store %arg14[%c0_167, %c0_168, %c0_169], %164 {strides = array<i32>} : memref<1x1x32xf32, #tpu.memory_space<vmem>>, vector<1x1x32xf32>,
    return
  }
  func.func @transform_0(%arg0: i32) -> (i32, i32, i32) {
    %c0_i32 = arith.constant 0 : i32
    %c0_i32_0 = arith.constant 0 : i32
    %c0_i32_1 = arith.constant 0 : i32
    return %arg0, %c0_i32, %c0_i32_0 : i32, i32, i32
  }
  func.func @transform_1(%arg0: i32) -> (i32, i32, i32) {
    %c0_i32 = arith.constant 0 : i32
    %c0_i32_0 = arith.constant 0 : i32
    %c0_i32_1 = arith.constant 0 : i32
    %c0_i32_2 = arith.constant 0 : i32
    return %c0_i32, %c0_i32_0, %c0_i32_1 : i32, i32, i32
  }
  func.func @transform_2(%arg0: i32) -> (i32, i32) {
    %c0_i32 = arith.constant 0 : i32
    %c0_i32_0 = arith.constant 0 : i32
    %c0_i32_1 = arith.constant 0 : i32
    return %c0_i32, %c0_i32_0 : i32, i32
  }
  func.func @transform_3(%arg0: i32) -> (i32, i32) {
    %c0_i32 = arith.constant 0 : i32
    %c0_i32_0 = arith.constant 0 : i32
    %c0_i32_1 = arith.constant 0 : i32
    return %c0_i32, %c0_i32_0 : i32, i32
  }
  func.func @transform_4(%arg0: i32) -> (i32, i32) {
    %c0_i32 = arith.constant 0 : i32
    %c0_i32_0 = arith.constant 0 : i32
    %c0_i32_1 = arith.constant 0 : i32
    return %c0_i32, %c0_i32_0 : i32, i32
  }
  func.func @transform_5(%arg0: i32) -> (i32, i32, i32) {
    %c0_i32 = arith.constant 0 : i32
    %c0_i32_0 = arith.constant 0 : i32
    %c0_i32_1 = arith.constant 0 : i32
    %c0_i32_2 = arith.constant 0 : i32
    return %c0_i32, %c0_i32_0, %c0_i32_1 : i32, i32, i32
  }
  func.func @transform_6(%arg0: i32) -> (i32, i32) {
    %c0_i32 = arith.constant 0 : i32
    %c0_i32_0 = arith.constant 0 : i32
    %c0_i32_1 = arith.constant 0 : i32
    return %c0_i32, %c0_i32_0 : i32, i32
  }
  func.func @transform_7(%arg0: i32) -> (i32, i32, i32) {
    %c0_i32 = arith.constant 0 : i32
    %c0_i32_0 = arith.constant 0 : i32
    %c0_i32_1 = arith.constant 0 : i32
    %c0_i32_2 = arith.constant 0 : i32
    return %c0_i32, %c0_i32_0, %c0_i32_1 : i32, i32, i32
  }
  func.func @transform_8(%arg0: i32) -> (i32, i32) {
    %c0_i32 = arith.constant 0 : i32
    %c0_i32_0 = arith.constant 0 : i32
    %c0_i32_1 = arith.constant 0 : i32
    return %c0_i32, %c0_i32_0 : i32, i32
  }
  func.func @transform_9(%arg0: i32) -> (i32, i32, i32) {
    %c0_i32 = arith.constant 0 : i32
    %c0_i32_0 = arith.constant 0 : i32
    %c0_i32_1 = arith.constant 0 : i32
    %c0_i32_2 = arith.constant 0 : i32
    return %c0_i32, %c0_i32_0, %c0_i32_1 : i32, i32, i32
  }
  func.func @transform_10(%arg0: i32) -> (i32, i32) {
    %c0_i32 = arith.constant 0 : i32
    %c0_i32_0 = arith.constant 0 : i32
    %c0_i32_1 = arith.constant 0 : i32
    return %c0_i32, %c0_i32_0 : i32, i32
  }
  func.func @transform_11(%arg0: i32) -> (i32, i32) {
    %c0_i32 = arith.constant 0 : i32
    %c0_i32_0 = arith.constant 0 : i32
    %c0_i32_1 = arith.constant 0 : i32
    return %c0_i32, %c0_i32_0 : i32, i32
  }
  func.func @transform_12(%arg0: i32) -> (i32, i32) {
    %c0_i32 = arith.constant 0 : i32
    %c0_i32_0 = arith.constant 0 : i32
    %c0_i32_1 = arith.constant 0 : i32
    return %c0_i32, %c0_i32_0 : i32, i32
  }
  func.func @transform_13(%arg0: i32) -> (i32, i32, i32) {
    %c0_i32 = arith.constant 0 : i32
    %c0_i32_0 = arith.constant 0 : i32
    %c0_i32_1 = arith.constant 0 : i32
    return %arg0, %c0_i32, %c0_i32_0 : i32, i32, i32
  }
}

</mosaic_0001>

<bundles_post_ra>
// kernel: encoder_forward.1
= control target key start
LH: loop header
LB: loop body
LE: loop exit
PB: predicated region body
PF: predicated region fallthrough
CT: control target
= control target key end

     0   :  { %s16541_s0 = inlined_call_operand.vmem [shape: f32[2,17,204], index: 0, kind: input, shape index: {}]   ;;  %s16542_s1 = inlined_call_operand.vmem [shape: f32[2,204,192], index: 1, kind: input, shape index: {}]   ;;  %s16543_s2 = inlined_call_operand.vmem [shape: f32[1,192], index: 2, kind: input, shape index: {}]   ;;  %s16544_s3 = inlined_call_operand.vmem [shape: f32[192,512], index: 3, kind: input, shape index: {}]   ;;  %s16545_s4 = inlined_call_operand.vmem [shape: f32[1,512], index: 4, kind: input, shape index: {}]   ;;  %s16546_s5 = inlined_call_operand.hbm [shape: f32[2,512,512], index: 5, kind: input, shape index: {}]   ;;  %s16547_s6 = inlined_call_operand.vmem [shape: f32[1,512], index: 6, kind: input, shape index: {}]   ;;  %s16548_s7 = inlined_call_operand.hbm [shape: f32[2,512,512], index: 7, kind: input, shape index: {}]   ;;  %s16549_s8 = inlined_call_operand.vmem [shape: f32[1,512], index: 8, kind: input, shape index: {}]   ;;  %s16550_s9 = inlined_call_operand.vmem [shape: f32[16,512,128], index: 9, kind: input, shape index: {}]   ;;  %s16551_s10 = inlined_call_operand.vmem [shape: f32[1,128], index: 10, kind: input, shape index: {}]   ;;  %s16552_s11 = inlined_call_operand.hbm [shape: f32[128,32], index: 11, kind: input, shape index: {}]   ;;  %s16553_s12 = inlined_call_operand.vmem [shape: f32[1,32], index: 12, kind: input, shape index: {}]   ;;  %s16554_s13 = inlined_call_operand.hbm [shape: f32[2,1,32], index: 13, kind: output, shape index: {}]  }
   0x1   :  { %16567 = sst [smem:[#allocation20_spill]] %s16553_s12 }
   0x2   :  { %16568 = sst [smem:[#allocation21_spill]] %s16554_s13 }
   0x3   :  { %18 = vsyncpa [#allocation4], 0 }
   0x4   :  { %19 = vsyncpa [#allocation7], 0 }
   0x5   :  { %20 = vsyncpa [#allocation5], 0 }
   0x6   :  { %22 = vsyncpa [#allocation5 + $0x1], 0  ;;  %s12278_s25 = smov 0   ;;  %s12280_s26 = smov 0  }
   0x7   :  { %s12282_s27 = smov 0   ;;  %s12284_s28 = smov 0  }
   0x8 LB: > { %16569 = sst [smem:[#allocation13_spill]] %s12182_s25  ;;  %s12299_s29 = sadd.s32 4294967295, %s12194_s28   ;;  %s12194_s28 = sphi %s12284_s28, %s16596_s28   ;;  %s12190_s27 = sphi %s12282_s27, %s16598_s27   ;;  %s12186_s26 = sphi %s12280_s26, %s16600_s26   ;;  %s12182_s25 = sphi %s12278_s25, %s16599_s25  }
   0x9   : > { %16570 = sst [smem:[#allocation14_spill]] %s12190_s27  ;;  %s7418_s30 = sadd.s32 4294967294, %s12194_s28  }
   0xa   : > { %16571 = sst [smem:[#allocation15_spill]] %s12194_s28  ;;  %s12303_s14 = sadd.s32 1, %s12194_s28  }
   0xb   : > { %16572 = sst [smem:[#allocation16_spill]] %s12303_s14  ;;  %s313_s15 = sadd.s32 1, %s12190_s27 }
   0xc   : > { %s310_s16 = ssub.s32 %s12194_s28, %s12303_s14  ;;  %p323_p0 = scmp.ne.s32.totalorder %s12190_s27, %s12186_s26 }
   0xd   : > { %p311_p1 = scmp.eq.s32.totalorder %s310_s16, 0  ;;  %p324_p2 = scmp.eq.s32.totalorder %s12299_s29, 1 }
   0xe   : > { %p329_p3 = scmp.ne.s32.totalorder %s12186_s26, %s12182_s25  ;;  %p330_p4 = scmp.eq.s32.totalorder %s7418_s30, 1 }
   0xf   : > { %s12314_s17 = scalar_select %p311_p1, %s12190_s27, %s313_s15  }
  0x10   : > { %p12316_p5 = por %p324_p2, %p323_p0  ;;  %p12320_p6 = por %p330_p4, %p329_p3 }
  0x11   : > { %16573 = sst [smem:[#allocation17_spill]] %s12314_s17  ;;  %p7419_p7 = scmp.ge.s32.totalorder %s12194_s28, 1 }
  0x12   : > { %s16574_s18 = scalar_select %p12316_p5, 1, 0 }
  0x13   : > { %s16576_s19 = scalar_select %p12320_p6, 1, 0 }
  0x14   : > { %16575 = sst [smem:[#allocation18_spill]] %s16574_s18  ;;  %p337_p8 = scmp.lt.s32.totalorder %s12194_s28, 3 }
  0x15   : > { %16577 = sst [smem:[#allocation19_spill]] %s16576_s19  ;;  %p16560_p9 = scmp.eq.s32.totalorder %s12299_s29, 0 }
  0x16   : > { %p12327_p10 = pnand %p7419_p7, %p337_p8  ;;  %s12196_s21 = smov [#allocation6]  }
  0x17   : > { %s377_s22 = sshll.u32 %s12196_s21, 4  ;;  %s12197_s24 = smov [#allocation3]   ;;  %s12333_s22 = int_to_ptr.vmem [resolvable:$true] %s377_s22 }
  0x18   : > { %s16578_s20 = scalar_select %p12327_p10, 1, 0 }
  0x19   : > { %p11971_p11 = pneg %p12327_p10  ;;  %s361_s30 = sshll.u32 %s12197_s24, 4  ;;  %s12341_s30 = int_to_ptr.vmem [resolvable:$true] %s361_s30 }
  0x1a   : > { %s12198_s15 = smov [#allocation8]   ;;  %s12040_s14 = scalar_lea.hbm %s16548_s7, 65536 }
  0x1b   : > { %p12337_p12 = pnand %p16560_p9, %p11971_p11  ;;  %s12343_s16 = sshll.u32 %s12198_s15, 4  ;;  %s400_s16 = int_to_ptr.vmem [resolvable:$true] %s12343_s16 }
  0x1c   : > { %p12041_p13 = scmp.ne.s32.totalorder %s16548_s7, %s12040_s14  ;;  %p12047_p3 = scmp.lt.u32.totalorder %s12040_s14, %s16548_s7 }
  0x1d   : > { %p12353_p0 = pneg %p12337_p12 }
  0x1f   : > { %p12043_p1 = pnand %p12353_p0, %p12041_p13 }
  0x21   : > { %p12044_p2 = pneg %p12043_p1 }
  0x23   : > { %p12049_p4 = pnand %p12047_p3, %p12044_p2 }
  0x25   : > { %12052 = shalt.err (!%p12049_p4)
}
  0x26   : > { %s12053_s27 = scalar_lea.vmem %s12333_s22, 65536  ;;  %p12061_p9 = scmp.lt.s32.totalorder %s12333_s22, %s12333_s22 }
  0x27   : > { %p12054_p7 = scmp.ne.s32.totalorder %s12333_s22, %s12053_s27  ;;  %p12062_p6 = scmp.lt.s32.totalorder %s12053_s27, %s12053_s27 }
  0x29   : > { %p12056_p8 = pnand %p12054_p7, %p12353_p0  ;;  %p12063_p13 = por %p12062_p6, %p12061_p9 }
  0x2b   : > { %p12057_p11 = pneg %p12056_p8 }
  0x2d   : > { %p12064_p1 = pnand %p12063_p13, %p12057_p11 }
  0x2f   : > { %12067 = shalt.err (!%p12064_p1)
}
  0x30   : > { %s12199_s17 = smov 512   ;;  %s12200_s14 = smov 32  }
  0x31   : > { %11977 = dma.hbm_to_vmem [thread:$0]  (!%p12337_p12), %s16548_s7, 65536, %s12333_s22, [#allocation7], %s12199_s17, %s12199_s17, %s12200_s14  }
  0x32   : > { %s12068_s28 = scalar_lea.hbm %s16546_s5, 65536 }
  0x33   : > { %p12069_p6 = scmp.ne.s32.totalorder %s16546_s5, %s12068_s28  ;;  %p12075_p3 = scmp.lt.u32.totalorder %s12068_s28, %s16546_s5 }
  0x35   : > { %p12071_p9 = pnand %p12069_p6, %p12353_p0 }
  0x37   : > { %p12072_p2 = pneg %p12071_p9 }
  0x39   : > { %p12077_p4 = pnand %p12075_p3, %p12072_p2 }
  0x3b   : > { %12080 = shalt.err (!%p12077_p4)
}
  0x3c   : > { %s12081_s22 = scalar_lea.vmem %s12341_s30, 65536  ;;  %p12089_p13 = scmp.lt.s32.totalorder %s12341_s30, %s12341_s30 }
  0x3d   : > { %p12082_p7 = scmp.ne.s32.totalorder %s12341_s30, %s12081_s22  ;;  %p12090_p1 = scmp.lt.s32.totalorder %s12081_s22, %s12081_s22 }
  0x3f   : > { %p12084_p8 = pnand %p12082_p7, %p12353_p0  ;;  %p12091_p6 = por %p12090_p1, %p12089_p13 }
  0x41   : > { %p12085_p11 = pneg %p12084_p8 }
  0x43   : > { %p12092_p9 = pnand %p12091_p6, %p12085_p11 }
  0x45   : > { %12095 = shalt.err (!%p12092_p9)
}
  0x46   : > { %11974 = dma.hbm_to_vmem [thread:$0]  (!%p12337_p12), %s16546_s5, 65536, %s12341_s30, [#allocation4], %s12199_s17, %s12199_s17, %s12200_s14  }
  0x47   : > { %s12096_s19 = scalar_lea.hbm %s16552_s11, 2048 }
  0x48   : > { %p12097_p2 = scmp.ne.s32.totalorder %s16552_s11, %s12096_s19  ;;  %p12103_p7 = scmp.lt.u32.totalorder %s12096_s19, %s16552_s11 }
  0x4a   : > { %p12099_p3 = pnand %p12097_p2, %p12353_p0 }
  0x4c   : > { %p12100_p4 = pneg %p12099_p3 }
  0x4e   : > { %p12105_p8 = pnand %p12103_p7, %p12100_p4 }
  0x50   : > { %12108 = shalt.err (!%p12105_p8)
}
  0x51   : > { %s12109_s22 = scalar_lea.vmem %s400_s16, 2048  ;;  %p12117_p6 = scmp.lt.s32.totalorder %s400_s16, %s400_s16 }
  0x52   : > { %p12110_p11 = scmp.ne.s32.totalorder %s400_s16, %s12109_s22  ;;  %p12118_p9 = scmp.lt.s32.totalorder %s12109_s22, %s12109_s22 }
  0x54   : > { %p12112_p13 = pnand %p12110_p11, %p12353_p0  ;;  %p12119_p5 = por %p12118_p9, %p12117_p6 }
  0x56   : > { %p12113_p1 = pneg %p12112_p13 }
  0x58   : > { %p12120_p10 = pnand %p12119_p5, %p12113_p1 }
  0x5a   : > { %12123 = shalt.err (!%p12120_p10)
}
  0x5b   : > { %s12201_s30 = smov 128   ;;  %s12202_s17 = smov 8  }
  0x5c   : > { %11980 = dma.hbm_to_vmem [thread:$0]  (!%p12337_p12), %s16552_s11, 2048, %s400_s16, [#allocation7], %s12201_s30, %s12201_s30, %s12202_s17  }
  0x5d   : > { %p16581_p2 = scmp.ne.s32.totalorder %s16578_s20, 0 }
  0x5e   : > { %p16582_p3 = scmp.eq.s32.totalorder (!%p16581_p2), %s12299_s29, 0 }
  0x5f   : > { %426 = sbr.rel (%p16581_p2) target bundleno = 2437 (0x985), region = 72 }
  0x66   : > { %12169 = dma.done.wait (%p16582_p3), [#allocation4], 65536   ;;  %p16583_p0 = pmov %p16582_p3 }
  0x68   : > { %12171 = vsyncadd (%p16583_p0), [#allocation4], 4294901760  ;;  %p16584_p5 = pmov %p16583_p0 }
  0x69   : > { %p16585_p10 = pmov %p16583_p0 }
  0x6a   : > { %12173 = dma.done.wait (%p16584_p5), [#allocation7], 67584  }
  0x6b   : > { %12175 = vsyncadd (%p16585_p10), [#allocation7], 4294899712  ;;  %v7430_v0 = vld [vmem:[%s16542_s1 + $0x1a8] sm:$0xff]  ;;  %v7432_v1 = vld [vmem:[%s16542_s1 + $0x1b8] sm:$0xff]  ;;  %p477_p12 = scmp.lt.s32.totalorder %s12299_s29, 1  ;;  %vm608_vm0 = vcmask 1046528  }
  0x6c   : > { %v7429_v2 = vld [vmem:[%s16542_s1 + $0x1a0] sm:$0xff]  ;;  %v9628_v3 = vpack.c.bf16 %v7432_v1, %v7430_v0  ;;  %v7431_v4 = vld [vmem:[%s16542_s1 + $0x1b0] sm:$0xff]  ;;  %v7434_v5 = vld [vmem:[%s16542_s1 + $0x1c8] sm:$0xff]  ;;  %vm621_vm1 = vcmask 621568   ;;  %vm626_vm2 = vcmask 1043456   ;;  %vm12203_vm3 = vmmov 1  }
  0x6d   : > { %v7436_v6 = vld [vmem:[%s16542_s1 + $0x1d8] sm:$0xff]  ;;  %v9630_v7 = vpack.c.bf16 %v7431_v4, %v7429_v2  ;;  %v7433_v9 = vld [vmem:[%s16542_s1 + $0x1c0] sm:$0xff]  ;;  %v7435_v10 = vld [vmem:[%s16542_s1 + $0x1d0] sm:$0xff]  ;;  %s478_s27 = scalar_select %p477_p12, %s12299_s29, 1  ;;  %vm936_vm5 = vcmask 523264   ;;  %vm12206_vm7 = vmmov 0  }
  0x6e   : > { %v9632_v8 = vpack.c.bf16 %v7436_v6, %v7434_v5  ;;  %v7438_v11 = vld [vmem:[%s16542_s1 + $0x1e8] sm:$0xff]  ;;  %9629 = vmatprep.subr.bf16.mxu0 %v9628_v3  ;;  %v7440_v12 = vld [vmem:[%s16542_s1 + $0x1f8] sm:$0xff]  ;;  %v9634_v13 = vpack.c.bf16 %v7435_v10, %v7433_v9  ;;  %v7437_v15 = vld [vmem:[%s16542_s1 + $0x1e0] sm:$0xff]  ;;  %s16588_s30 = sld [smem:[#allocation18_spill]]  ;;  %s475_s14 = sand.u32 1, %s12186_s26   ;;  %vm7317_vm8 = vcmask 253952  }
  0x6f   : > { %9631 = vmatpush1.bf16.msra.mxu0 %v9630_v7  ;;  %v9636_v14 = vpack.c.bf16 %v7440_v12, %v7438_v11  ;;  %v7439_v16 = vld [vmem:[%s16542_s1 + $0x1f0] sm:$0xff]  ;;  %v7442_v17 = vld [vmem:[%s16542_s1 + $0x208] sm:$0xff]  ;;  %v7444_v18 = vld [vmem:[%s16542_s1 + $0x218] sm:$0xff]  ;;  %s11956_s20 = smul.u32 48, %s478_s27  ;;  %s16589_s25 = sld [smem:[#allocation20_spill]] }
  0x70   : > { %9633 = vmatprep.subr.bf16.mxu0 %v9632_v8  ;;  %v9638_v19 = vpack.c.bf16 %v7439_v16, %v7437_v15  ;;  %v9640_v20 = vpack.c.bf16 %v7444_v18, %v7442_v17  ;;  %v7441_v21 = vld [vmem:[%s16542_s1 + $0x200] sm:$0xff]  ;;  %v7443_v22 = vld [vmem:[%s16542_s1 + $0x210] sm:$0xff]  ;;  %v7446_v23 = vld [vmem:[%s16542_s1 + $0x228] sm:$0xff]  ;;  %s8453_s23 = sshll.u32 %s12299_s29, 4  ;;  %s476_s16 = scalar_lea.vmem [#allocation9], %s475_s14 }
  0x71   : > { %v7448_v24 = vld [vmem:[%s16542_s1 + $0x238] sm:$0xff]  ;;  %v9642_v25 = vpack.c.bf16 %v7443_v22, %v7441_v21  ;;  %v7445_v27 = vld [vmem:[%s16542_s1 + $0x220] sm:$0xff]  ;;  %v7447_v28 = vld [vmem:[%s16542_s1 + $0x230] sm:$0xff]  ;;  %s12497_s17 = scalar_lea.vmem %s16541_s0, %s11956_s20  ;;  %s7332_s20 = sshll.u32 %s476_s16, 4  ;;  %s16501_s20 = int_to_ptr.vmem [resolvable:$true] %s7332_s20 }
  0x72   : > { %v9644_v26 = vpack.c.bf16 %v7448_v24, %v7446_v23  ;;  %v7450_v29 = vld [vmem:[%s16542_s1 + $0x248] sm:$0xff]  ;;  %v7452_v30 = vld [vmem:[%s16542_s1 + $0x258] sm:$0xff]  ;;  %v9646_v31 = vpack.c.bf16 %v7447_v28, %v7445_v27  ;;  %v7449_v32 = vld [vmem:[%s16542_s1 + $0x240] sm:$0xff]  ;;  %s16590_s18 = sld [smem:[#allocation21_spill]]  ;;  %s7320_s21 = scalar_lea.sflag [#allocation5], %s475_s14 }
  0x73   : > { %9635 = vmatpush1.bf16.msra.mxu0 %v9634_v13  ;;  %v9648_v33 = vpack.c.bf16 %v7452_v30, %v7450_v29  ;;  %v7451_v34 = vld [vmem:[%s16542_s1 + $0x250] sm:$0xff]  ;;  %v12506_v35 = vld [vmem:[%s12497_s17 + $0x18] sm:$0xff]  ;;  %v494_v36 = vld [vmem:[%s12497_s17 + $0x8] sm:$0xfe]  ;;  %s12124_s24 = scalar_lea.vmem %s16501_s20, 16  ;;  %s12207_s29 = smov [#allocation9]  }
  0x74   : > { %9637 = vmatprep.subr.bf16.mxu0 %v9636_v14  ;;  %v7454_v37 = vld [vmem:[%s16542_s1 + $0x268] sm:$0xff]  ;;  %v7456_v38 = vld [vmem:[%s16542_s1 + $0x278] sm:$0xff]  ;;  %v612_v39 = vrot.slane %v494_v36, 1  ;;  %v613_v40 = vrot.slane %v12506_v35, 1  ;;  %v9650_v41 = vpack.c.bf16 %v7451_v34, %v7449_v32  ;;  %v7453_v44 = vld [vmem:[%s16542_s1 + $0x260] sm:$0xff]  ;;  %p12125_p4 = scmp.ne.s32.totalorder %s16501_s20, %s12124_s24  ;;  %p16591_p7 = scmp.ne.s32.totalorder %s16588_s30, 0 }
  0x75   : > { %v9652_v43 = vpack.c.bf16 %v7456_v38, %v7454_v37  ;;  %v7455_v45 = vld [vmem:[%s16542_s1 + $0x270] sm:$0xff]  ;;  %v7458_v46 = vld [vmem:[%s16542_s1 + $0x288] sm:$0xff]  ;;  %v7460_v47 = vld [vmem:[%s16542_s1 + $0x298] sm:$0xff]  ;;  %s12128_s15 = sshll.u32 %s12207_s29, 4  ;;  %s12129_s15 = int_to_ptr.vmem [resolvable:$false] %s12128_s15 }
  0x76   : > { %v614_v42 = vsel %vm608_vm0, %v612_v39, %v613_v40  ;;  %v9654_v48 = vpack.c.bf16 %v7455_v45, %v7453_v44  ;;  %v9656_v49 = vpack.c.bf16 %v7460_v47, %v7458_v46  ;;  %v7457_v50 = vld [vmem:[%s16542_s1 + $0x280] sm:$0xff]  ;;  %v7459_v51 = vld [vmem:[%s16542_s1 + $0x290] sm:$0xff]  ;;  %v7462_v52 = vld [vmem:[%s16542_s1 + $0x2a8] sm:$0xff]  ;;  %p12126_p8 = pnand %p12125_p4, %p16591_p7  ;;  %s12130_s22 = scalar_lea.vmem %s12129_s15, 32 }
  0x77   : > { %9639 = vmatpush1.bf16.msra.mxu0 %v9638_v19  ;;  %7483 = vmatprep.mubr.msk.f32.mxu0 %vm621_vm1, %v614_v42  ;;  %v7464_v53 = vld [vmem:[%s16542_s1 + $0x2b8] sm:$0xff]  ;;  %v9658_v54 = vpack.c.bf16 %v7459_v51, %v7457_v50  ;;  %v7461_v56 = vld [vmem:[%s16542_s1 + $0x2a0] sm:$0xff]  ;;  %v7463_v57 = vld [vmem:[%s16542_s1 + $0x2b0] sm:$0xff]  ;;  %p12131_p13 = scmp.lt.s32.totalorder %s16501_s20, %s12129_s15  ;;  %p12132_p1 = scmp.lt.s32.totalorder %s12130_s22, %s12124_s24 }
  0x78   : > { %9641 = vmatprep.subr.bf16.mxu0 %v9640_v20  ;;  %v9660_v55 = vpack.c.bf16 %v7464_v53, %v7462_v52  ;;  %v7466_v58 = vld [vmem:[%s16542_s1 + $0x2c8] sm:$0xff]  ;;  %v7468_v59 = vld [vmem:[%s16542_s1 + $0x2d8] sm:$0xff]  ;;  %v9662_v60 = vpack.c.bf16 %v7463_v57, %v7461_v56  ;;  %v7465_v62 = vld [vmem:[%s16542_s1 + $0x2c0] sm:$0xff]  ;;  %s16499_s19 = scalar_lea.hbm %s16590_s18, %s8453_s23  ;;  %p12127_p11 = pneg %p12126_p8 }
  0x79   : > { %v9664_v61 = vpack.c.bf16 %v7468_v59, %v7466_v58  ;;  %v7467_v63 = vld [vmem:[%s16542_s1 + $0x2d0] sm:$0xff]  ;;  %v7470_v0 = vld [vmem:[%s16542_s1 + $0x2e8] sm:$0xff]  ;;  %v7472_v1 = vld [vmem:[%s16542_s1 + $0x2f8] sm:$0xff]  ;;  %p12133_p6 = por %p12132_p1, %p12131_p13 }
  0x7a   : > { %v9666_v2 = vpack.c.bf16 %v7467_v63, %v7465_v62  ;;  %v7469_v3 = vld [vmem:[%s16542_s1 + $0x2e0] sm:$0xff]  ;;  %v7471_v4 = vld [vmem:[%s16542_s1 + $0x2f0] sm:$0xff]  ;;  %v7474_v5 = vld [vmem:[%s16542_s1 + $0x308] sm:$0xff]  ;;  %v9668_v6 = vpack.c.bf16 %v7472_v1, %v7470_v0 }
  0x7b   : > { %9643 = vmatpush1.bf16.msra.mxu0 %v9642_v25  ;;  %v7476_v7 = vld [vmem:[%s16542_s1 + $0x318] sm:$0xff]  ;;  %v819_v8 = vld [vmem:[%s16544_s3 + $0x8] sm:$0xff]  ;;  %v818_v11 = vld [vmem:[%s16544_s3] sm:$0xff]  ;;  %v9670_v18 = vpack.c.bf16 %v7471_v4, %v7469_v3  ;;  %p12134_p9 = pnand %p12133_p6, %p12127_p11 }
  0x7c   : > { %9645 = vmatprep.subr.bf16.mxu0 %v9644_v26  ;;  %v823_v9 = vld [vmem:[%s16544_s3 + $0x28] sm:$0xff]  ;;  %v822_v12 = vld [vmem:[%s16544_s3 + $0x20] sm:$0xff]  ;;  %v9672_v22 = vpack.c.bf16 %v7476_v7, %v7474_v5  ;;  %v7475_v24 = vld [vmem:[%s16542_s1 + $0x310] sm:$0xff] }
  0x7d   : > { %v9736_v10 = vpack.c.bf16 %v823_v9, %v819_v8  ;;  %v827_v13 = vld [vmem:[%s16544_s3 + $0x48] sm:$0xff]  ;;  %v9738_v14 = vpack.c.bf16 %v822_v12, %v818_v11  ;;  %v826_v16 = vld [vmem:[%s16544_s3 + $0x40] sm:$0xff]  ;;  %v7480_v27 = vld [vmem:[%s16542_s1 + $0x338] sm:$0xf] }
  0x7e   : > { %v831_v15 = vld [vmem:[%s16544_s3 + $0x68] sm:$0xff]  ;;  %v830_v17 = vld [vmem:[%s16544_s3 + $0x60] sm:$0xff]  ;;  %vm12629_vm4 = vmpackc.low %vm626_vm2, %vm12203_vm3 }
  0x7f   : > { %9647 = vmatpush1.bf16.msra.mxu0 %v9646_v31  ;;  %9737 = vmatprep.subr.bf16.mxu1 %v9736_v10  ;;  %v9740_v19 = vpack.c.bf16 %v831_v15, %v827_v13  ;;  %v835_v20 = vld [vmem:[%s16544_s3 + $0x88] sm:$0xff]  ;;  %v7473_v23 = vld [vmem:[%s16542_s1 + $0x300] sm:$0xff]  ;;  %v9742_v26 = vpack.c.bf16 %v830_v17, %v826_v16  ;;  %v7479_v37 = vld [vmem:[%s16542_s1 + $0x330] sm:$0xf] }
  0x80   : > { %9649 = vmatprep.subr.bf16.mxu0 %v9648_v33  ;;  %v839_v21 = vld [vmem:[%s16544_s3 + $0xa8] sm:$0xff]  ;;  %9739 = vmatpush1.bf16.msra.mxu1 %v9738_v14  ;;  %v834_v29 = vld [vmem:[%s16544_s3 + $0x80] sm:$0xff]  ;;  %v9674_v34 = vpack.c.bf16 %v7475_v24, %v7473_v23  ;;  %v12652_v42 = vld [vmem:[%s12497_s17 + $0x10] sm:$0xff] }
  0x81   : > { %v7478_v25 = vld [vmem:[%s16542_s1 + $0x328] sm:$0xff]  ;;  %9741 = vmatprep.subr.bf16.mxu1 %v9740_v19  ;;  %v9744_v28 = vpack.c.bf16 %v839_v21, %v835_v20  ;;  %v838_v30 = vld [vmem:[%s16544_s3 + $0xa0] sm:$0xff]  ;;  %v610_v53 = vrot.slane %v12652_v42, 1  ;;  %v499_v56 = vld [vmem:[%s16542_s1 + $0x10] sm:$0xff] }
  0x82   : > { %v843_v32 = vld [vmem:[%s16544_s3 + $0xc8] sm:$0xff]  ;;  %v7477_v36 = vld [vmem:[%s16542_s1 + $0x320] sm:$0xff]  ;;  %v9676_v39 = vpack.c.bf16 %v7480_v27, %v7478_v25  ;;  %v9746_v44 = vpack.c.bf16 %v838_v30, %v834_v29  ;;  %v503_v8 = vld [vmem:[%s16542_s1 + $0x30] sm:$0xff] }
  0x83   : > { %9651 = vmatpush1.bf16.msra.mxu0 %v9650_v41  ;;  %v847_v33 = vld [vmem:[%s16544_s3 + $0xe8] sm:$0xff]  ;;  %v500_v41 = vld [vmem:[%s16542_s1 + $0x18] sm:$0xff]  ;;  %v842_v47 = vld [vmem:[%s16544_s3 + $0xc0] sm:$0xff]  ;;  %v9679_v51 = vpack.c.bf16 %v7479_v37, %v7477_v36 }
  0x84   : > { %9653 = vmatprep.subr.bf16.mxu0 %v9652_v43  ;;  %v498_v38 = vld [vmem:[%s16542_s1 + $0x8] sm:$0xff]  ;;  %v493_v43 = vld [vmem:[%s12497_s17] sm:$0xfe]  ;;  %9743 = vmatpush1.bf16.msra.mxu1 %v9742_v26  ;;  %v9748_v46 = vpack.c.bf16 %v847_v33, %v843_v32  ;;  %v495_v59 = vld [vmem:[%s12497_s17 + $0x20] sm:$0x1] }
  0x85   : > { %v496_v45 = vld [vmem:[%s12497_s17 + $0x28] sm:$0x1]  ;;  %9745 = vmatprep.subr.bf16.mxu1 %v9744_v28  ;;  %v609_v52 = vrot.slane %v493_v43, 1  ;;  %v850_v63 = vld [vmem:[%s16544_s3 + $0x100] sm:$0xff]  ;;  %v615_v5 = vrot.slane %v495_v59, 1  ;;  %v508_v12 = vld [vmem:[%s16542_s1 + $0x58] sm:$0xff] }
  0x86   : > { %v855_v50 = vld [vmem:[%s16544_s3 + $0x128] sm:$0xff]  ;;  %v617_v58 = vrot.slane %v496_v45, 1  ;;  %v854_v0 = vld [vmem:[%s16544_s3 + $0x120] sm:$0xff]  ;;  %v507_v21 = vld [vmem:[%s16542_s1 + $0x50] sm:$0xff] }
  0x87   : > { %9655 = vmatpush1.bf16.msra.mxu0 %v9654_v48  ;;  %v846_v48 = vld [vmem:[%s16544_s3 + $0xe0] sm:$0xff]  ;;  %v502_v57 = vld [vmem:[%s16542_s1 + $0x28] sm:$0xff]  ;;  %v611_v3 = vsel %vm608_vm0, %v609_v52, %v610_v53  ;;  %v9754_v11 = vpack.c.bf16 %v854_v0, %v850_v63  ;;  %v616_v19 = vsel %vm608_vm0, %v610_v53, %v615_v5  ;;  %v512_v25 = vld [vmem:[%s16542_s1 + $0x78] sm:$0xff] }
  0x88   : > { %9657 = vmatprep.subr.bf16.mxu0 %v9656_v49  ;;  %v851_v49 = vld [vmem:[%s16544_s3 + $0x108] sm:$0xff]  ;;  %9747 = vmatpush1.bf16.msra.mxu1 %v9746_v44  ;;  %v501_v7 = vld [vmem:[%s16542_s1 + $0x20] sm:$0xff]  ;;  %v618_v10 = vsel %vm608_vm0, %v613_v40, %v617_v58  ;;  %v511_v36 = vld [vmem:[%s16542_s1 + $0x70] sm:$0xff] }
  0x89   : > { %9749 = vmatprep.subr.bf16.mxu1 %v9748_v46  ;;  %v9752_v62 = vpack.c.bf16 %v855_v50, %v851_v49  ;;  %v859_v1 = vld [vmem:[%s16544_s3 + $0x148] sm:$0xff]  ;;  %v858_v14 = vld [vmem:[%s16544_s3 + $0x140] sm:$0xff]  ;;  %v9688_v17 = vpack.c.bf16 %v503_v8, %v501_v7  ;;  %v515_v50 = vld [vmem:[%s16542_s1 + $0x90] sm:$0xff] }
  0x8a   : > { %v506_v9 = vld [vmem:[%s16542_s1 + $0x48] sm:$0xff]  ;;  %v862_v15 = vld [vmem:[%s16544_s3 + $0x160] sm:$0xff]  ;;  %v520_v53 = vld [vmem:[%s16542_s1 + $0xb8] sm:$0xff] }
  0x8b   : > { %9659 = vmatpush1.bf16.msra.mxu0 %v9658_v54  ;;  %v497_v54 = vld [vmem:[%s16542_s1] sm:$0xff]  ;;  %v867_v40 = vld [vmem:[%s16544_s3 + $0x188] sm:$0xff]  ;;  %v9690_v20 = vpack.c.bf16 %v508_v12, %v506_v9  ;;  %v9758_v24 = vpack.c.bf16 %v862_v15, %v858_v14 }
  0x8c   : > { %9661 = vmatprep.subr.bf16.mxu0 %v9660_v55  ;;  %v9682_v55 = vpack.c.bf16 %v500_v41, %v498_v38  ;;  %v9684_v4 = vpack.c.bf16 %v499_v56, %v497_v54  ;;  %v871_v16 = vld [vmem:[%s16544_s3 + $0x1a8] sm:$0xff]  ;;  %v866_v27 = vld [vmem:[%s16544_s3 + $0x180] sm:$0xff] }
  0x8d   : > { %v490_v23 = vld [vmem:[%s12497_s17 + $0x8] sm:$0xff]  ;;  %v9760_v26 = vpack.c.bf16 %v871_v16, %v867_v40  ;;  %v870_v28 = vld [vmem:[%s16544_s3 + $0x1a0] sm:$0xff] }
  0x8e   : > { %v875_v29 = vld [vmem:[%s16544_s3 + $0x1c8] sm:$0xff]  ;;  %v9762_v38 = vpack.c.bf16 %v870_v28, %v866_v27  ;;  %v874_v43 = vld [vmem:[%s16544_s3 + $0x1c0] sm:$0xff]  ;;  %v536_v28 = vld [vmem:[%s16542_s1 + $0x138] sm:$0xff] }
  0x8f   : > { %9663 = vmatpush1.bf16.msra.mxu0 %v9662_v60  ;;  %v9750_v60 = vpack.c.bf16 %v846_v48, %v842_v47  ;;  %v879_v30 = vld [vmem:[%s16544_s3 + $0x1e8] sm:$0xff]  ;;  %v878_v44 = vld [vmem:[%s16544_s3 + $0x1e0] sm:$0xff] }
  0x90   : > { %9665 = vmatprep.subr.bf16.mxu0 %v9664_v61  ;;  %v504_v61 = vld [vmem:[%s16542_s1 + $0x38] sm:$0xff]  ;;  %v514_v37 = vld [vmem:[%s16542_s1 + $0x88] sm:$0xff]  ;;  %v9764_v41 = vpack.c.bf16 %v879_v30, %v875_v29  ;;  %v513_v49 = vld [vmem:[%s16542_s1 + $0x80] sm:$0xff]  ;;  %v9766_v52 = vpack.c.bf16 %v878_v44, %v874_v43 }
  0x91   : > { %9751 = vmatpush1.bf16.msra.mxu1 %v9750_v60  ;;  %v883_v45 = vld [vmem:[%s16544_s3 + $0x208] sm:$0xff]  ;;  %v886_v56 = vld [vmem:[%s16544_s3 + $0x220] sm:$0xff]  ;;  %v9700_v59 = vpack.c.bf16 %v515_v50, %v513_v49  ;;  %v544_v44 = vld [vmem:[%s16542_s1 + $0x178] sm:$0xff] }
  0x92   : > { %9753 = vmatprep.subr.bf16.mxu1 %v9752_v62  ;;  %v887_v46 = vld [vmem:[%s16544_s3 + $0x228] sm:$0xff]  ;;  %v519_v62 = vld [vmem:[%s16542_s1 + $0xb0] sm:$0xff]  ;;  %v521_v9 = vld [vmem:[%s16542_s1 + $0xc0] sm:$0xff] }
  0x93   : > { %9667 = vmatpush1.bf16.msra.mxu0 %v9666_v2  ;;  %v863_v2 = vld [vmem:[%s16544_s3 + $0x168] sm:$0xff]  ;;  %v9768_v54 = vpack.c.bf16 %v887_v46, %v883_v45  ;;  %v898_v15 = vld [vmem:[%s16544_s3 + $0x280] sm:$0xff]  ;;  %v548_v50 = vld [vmem:[%s16542_s1 + $0x198] sm:$0xf] }
  0x94   : > { %9669 = vmatprep.subr.bf16.mxu0 %v9668_v6  ;;  %v9686_v6 = vpack.c.bf16 %v504_v61, %v502_v57  ;;  %v9756_v13 = vpack.c.bf16 %v863_v2, %v859_v1  ;;  %v891_v57 = vld [vmem:[%s16544_s3 + $0x248] sm:$0xff]  ;;  %v517_v61 = vld [vmem:[%s16542_s1 + $0xa0] sm:$0xff]  ;;  %v524_v1 = vld [vmem:[%s16542_s1 + $0xd8] sm:$0xff] }
  0x95   : > { %9755 = vmatpush1.bf16.msra.mxu1 %v9754_v11  ;;  %v895_v58 = vld [vmem:[%s16544_s3 + $0x268] sm:$0xff]  ;;  %v9704_v7 = vpack.c.bf16 %v519_v62, %v517_v61  ;;  %v902_v40 = vld [vmem:[%s16544_s3 + $0x2a0] sm:$0xff]  ;;  %v825_v61 = vld [vmem:[%s16544_s3 + $0x38] sm:$0xff] }
  0x96   : > { %9757 = vmatprep.subr.bf16.mxu1 %v9756_v13  ;;  %v522_v63 = vld [vmem:[%s16542_s1 + $0xc8] sm:$0xff]  ;;  %v9772_v2 = vpack.c.bf16 %v895_v58, %v891_v57  ;;  %v528_v13 = vld [vmem:[%s16542_s1 + $0xf8] sm:$0xff]  ;;  %v906_v31 = vld [vmem:[%s16544_s3 + $0x2c0] sm:$0xff] }
  0x97   : > { %9671 = vmatpush1.bf16.msra.mxu0 %v9670_v18  ;;  %v505_v18 = vld [vmem:[%s16542_s1 + $0x40] sm:$0xff]  ;;  %v899_v5 = vld [vmem:[%s16544_s3 + $0x288] sm:$0xff]  ;;  %v9706_v8 = vpack.c.bf16 %v524_v1, %v522_v63  ;;  %v1385_v63 = vld [vmem:[#allocation3 + $0x818] sm:$0xff] }
  0x98   : > { %9673 = vmatprep.subr.bf16.mxu0 %v9672_v22  ;;  %v510_v22 = vld [vmem:[%s16542_s1 + $0x68] sm:$0xff]  ;;  %v9692_v32 = vpack.c.bf16 %v507_v21, %v505_v18  ;;  %v525_v18 = vld [vmem:[%s16542_s1 + $0xe0] sm:$0xff] }
  0x99   : > { %v9694_v33 = vpack.c.bf16 %v512_v25, %v510_v22  ;;  %9759 = vmatpush1.bf16.msra.mxu1 %v9758_v24  ;;  %v526_v11 = vld [vmem:[%s16542_s1 + $0xe8] sm:$0xff]  ;;  %v532_v22 = vld [vmem:[%s16542_s1 + $0x118] sm:$0xff]  ;;  %v529_v25 = vld [vmem:[%s16542_s1 + $0x100] sm:$0xff] }
  0x9a   : > { %9761 = vmatprep.subr.bf16.mxu1 %v9760_v26  ;;  %v530_v21 = vld [vmem:[%s16542_s1 + $0x108] sm:$0xff]  ;;  %v531_v26 = vld [vmem:[%s16542_s1 + $0x110] sm:$0xff] }
  0x9b   : > { %9675 = vmatpush1.bf16.msra.mxu0 %v9674_v34  ;;  %v509_v34 = vld [vmem:[%s16542_s1 + $0x60] sm:$0xff]  ;;  %v9714_v24 = vpack.c.bf16 %v532_v22, %v530_v21  ;;  %v534_v27 = vld [vmem:[%s16542_s1 + $0x128] sm:$0xff]  ;;  %v9716_v29 = vpack.c.bf16 %v531_v26, %v529_v25  ;;  %v1417_v21 = vld [vmem:[#allocation3 + $0x918] sm:$0xff] }
  0x9c   : > { %9678 = vmatprep.subr.msk.bf16.mxu0 %vm12629_vm4, %v9676_v39  ;;  %v516_v39 = vld [vmem:[%s16542_s1 + $0x98] sm:$0xff]  ;;  %v9696_v47 = vpack.c.bf16 %v511_v36, %v509_v34  ;;  %v9718_v30 = vpack.c.bf16 %v536_v28, %v534_v27  ;;  %v538_v34 = vld [vmem:[%s16542_s1 + $0x148] sm:$0xff]  ;;  %v1416_v25 = vld [vmem:[#allocation3 + $0x910] sm:$0xff] }
  0x9d   : > { %v9698_v48 = vpack.c.bf16 %v516_v39, %v514_v37  ;;  %9763 = vmatpush1.bf16.msra.mxu1 %v9762_v38  ;;  %v540_v36 = vld [vmem:[%s16542_s1 + $0x158] sm:$0xff]  ;;  %v537_v39 = vld [vmem:[%s16542_s1 + $0x140] sm:$0xff]  ;;  %v542_v43 = vld [vmem:[%s16542_s1 + $0x168] sm:$0xff] }
  0x9e   : > { %9765 = vmatprep.subr.bf16.mxu1 %v9764_v41  ;;  %v9722_v38 = vpack.c.bf16 %v540_v36, %v538_v34  ;;  %v539_v41 = vld [vmem:[%s16542_s1 + $0x150] sm:$0xff]  ;;  %v9726_v46 = vpack.c.bf16 %v544_v44, %v542_v43  ;;  %v546_v49 = vld [vmem:[%s16542_s1 + $0x188] sm:$0xff]  ;;  %v1421_v22 = vld [vmem:[#allocation3 + $0x938] sm:$0xff] }
  0x9f   : > { %9681 = vmatpush1.bf16.msk.msra.mxu0 %vm12629_vm4, %v9679_v51  ;;  %v518_v51 = vld [vmem:[%s16542_s1 + $0xa8] sm:$0xff]  ;;  %v9724_v45 = vpack.c.bf16 %v539_v41, %v537_v39  ;;  %v1420_v26 = vld [vmem:[#allocation3 + $0x930] sm:$0xff]  ;;  %v1425_v27 = vld [vmem:[#allocation3 + $0x958] sm:$0xff] }
  0xa0   : > { %9683 = vmatprep.subr.bf16.mxu0 %v9682_v55  ;;  %v882_v55 = vld [vmem:[%s16544_s3 + $0x200] sm:$0xff]  ;;  %v9702_v60 = vpack.c.bf16 %v520_v53, %v518_v51  ;;  %v907_v57 = vld [vmem:[%s16544_s3 + $0x2c8] sm:$0xff]  ;;  %v1429_v28 = vld [vmem:[#allocation3 + $0x978] sm:$0xff] }
  0xa1   : > { %9767 = vmatpush1.bf16.msra.mxu1 %v9766_v52  ;;  %v9770_v0 = vpack.c.bf16 %v886_v56, %v882_v55  ;;  %v9730_v52 = vpack.c.bf16 %v548_v50, %v546_v49  ;;  %v545_v53 = vld [vmem:[%s16542_s1 + $0x180] sm:$0xff]  ;;  %v911_v58 = vld [vmem:[%s16544_s3 + $0x2e8] sm:$0xff]  ;;  %v1433_v34 = vld [vmem:[#allocation3 + $0x998] sm:$0xff] }
  0xa2   : > { %698 = vmatmul.mubr.f32.vlgmr.msra.gmra.mrb[0].mxu0 %v611_v3  ;;  %9769 = vmatprep.subr.bf16.mxu1 %v9768_v54  ;;  %v890_v3 = vld [vmem:[%s16544_s3 + $0x240] sm:$0xff]  ;;  %v547_v54 = vld [vmem:[%s16542_s1 + $0x190] sm:$0xf]  ;;  %v1437_v36 = vld [vmem:[#allocation3 + $0x9b8] sm:$0xff] }
  0xa3   : > { %9685 = vmatpush1.bf16.msra.mxu0 %v9684_v4  ;;  %7484 = vmatprep.mubr.msk.f32.mxu0 %vm621_vm1, %v618_v10  ;;  %v894_v4 = vld [vmem:[%s16544_s3 + $0x260] sm:$0xff]  ;;  %v523_v10 = vld [vmem:[%s16542_s1 + $0xd0] sm:$0xff]  ;;  %v9733_v55 = vpack.c.bf16 %v547_v54, %v545_v53  ;;  %v1441_v43 = vld [vmem:[#allocation3 + $0x9d8] sm:$0xff] }
  0xa4   : > { %9687 = vmatprep.subr.bf16.mxu0 %v9686_v6  ;;  %v903_v6 = vld [vmem:[%s16544_s3 + $0x2a8] sm:$0xff]  ;;  %v9774_v12 = vpack.c.bf16 %v894_v4, %v890_v3  ;;  %v9708_v16 = vpack.c.bf16 %v523_v10, %v521_v9  ;;  %v489_v56 = vld [vmem:[%s12497_s17] sm:$0xff]  ;;  %v1388_v3 = vld [vmem:[#allocation3 + $0x830] sm:$0xff] }
  0xa5   : > { %9771 = vmatpush1.bf16.msra.mxu1 %v9770_v0  ;;  %v9776_v14 = vpack.c.bf16 %v903_v6, %v899_v5  ;;  %v1389_v0 = vld [vmem:[#allocation3 + $0x838] sm:$0xff]  ;;  %v1396_v9 = vld [vmem:[#allocation3 + $0x870] sm:$0xff] }
  0xa6   : > { %704 = vmatmul.mubr.f32.gmra.mrb[2].mxu0 %v616_v19  ;;  %9773 = vmatprep.subr.bf16.mxu1 %v9772_v2  ;;  %v527_v19 = vld [vmem:[%s16542_s1 + $0xf0] sm:$0xff]  ;;  %v9960_v1 = vpack.c.bf16 %v1389_v0, %v1385_v63  ;;  %v1393_v5 = vld [vmem:[#allocation3 + $0x858] sm:$0xff] }
  0xa7   : > { %9689 = vmatpush1.bf16.msra.mxu0 %v9688_v17  ;;  %7487 = vmatprep.mubr.msk.f32.mxu0 %vm621_vm1, %v490_v23  ;;  %v9710_v17 = vpack.c.bf16 %v528_v13, %v526_v11  ;;  %v9712_v23 = vpack.c.bf16 %v527_v19, %v525_v18  ;;  %v1384_v2 = vld [vmem:[#allocation3 + $0x810] sm:$0xff]  ;;  %v1397_v6 = vld [vmem:[#allocation3 + $0x878] sm:$0xff] }
  0xa8   : > { %9691 = vmatprep.subr.bf16.mxu0 %v9690_v20  ;;  %v9778_v20 = vpack.c.bf16 %v902_v40, %v898_v15  ;;  %v9962_v4 = vpack.c.bf16 %v1388_v3, %v1384_v2  ;;  %v1401_v11 = vld [vmem:[#allocation3 + $0x898] sm:$0xff]  ;;  %v1404_v15 = vld [vmem:[#allocation3 + $0x8b0] sm:$0xff] }
  0xa9   : > { %9775 = vmatpush1.bf16.msra.mxu1 %v9774_v12  ;;  %v1405_v12 = vld [vmem:[#allocation3 + $0x8b8] sm:$0xff]  ;;  %v1408_v19 = vld [vmem:[#allocation3 + $0x8d0] sm:$0xff] }
  0xaa   : > { %9777 = vmatprep.subr.bf16.mxu1 %v9776_v14  ;;  %v9968_v13 = vpack.c.bf16 %v1405_v12, %v1401_v11  ;;  %v1400_v14 = vld [vmem:[#allocation3 + $0x890] sm:$0xff]  ;;  %v1409_v40 = vld [vmem:[#allocation3 + $0x8d8] sm:$0xff] }
  0xab   : > { %9693 = vmatpush1.bf16.msra.mxu0 %v9692_v32  ;;  %v533_v32 = vld [vmem:[%s16542_s1 + $0x120] sm:$0xff]  ;;  %v1432_v39 = vld [vmem:[#allocation3 + $0x990] sm:$0xff]  ;;  %v1445_v44 = vld [vmem:[#allocation3 + $0x9f8] sm:$0xff] }
  0xac   : > { %9695 = vmatprep.subr.bf16.mxu0 %v9694_v33  ;;  %v535_v33 = vld [vmem:[%s16542_s1 + $0x130] sm:$0xff]  ;;  %v1449_v49 = vld [vmem:[#allocation3 + $0xa18] sm:$0xff] }
  0xad   : > { %9779 = vmatpush1.bf16.msra.mxu1 %v9778_v20  ;;  %v9720_v37 = vpack.c.bf16 %v535_v33, %v533_v32  ;;  %v1412_v20 = vld [vmem:[#allocation3 + $0x8f0] sm:$0xff]  ;;  %v1453_v50 = vld [vmem:[#allocation3 + $0xa38] sm:$0xff] }
  0xae   : > { %v1424_v32 = vld [vmem:[#allocation3 + $0x950] sm:$0xff] }
  0xaf   : > { %9697 = vmatpush1.bf16.msra.mxu0 %v9696_v47  ;;  %v541_v47 = vld [vmem:[%s16542_s1 + $0x160] sm:$0xff]  ;;  %v1428_v33 = vld [vmem:[#allocation3 + $0x970] sm:$0xff] }
  0xb0   : > { %9699 = vmatprep.subr.bf16.mxu0 %v9698_v48  ;;  %v543_v48 = vld [vmem:[%s16542_s1 + $0x170] sm:$0xff] }
  0xb1   : > { %v9728_v51 = vpack.c.bf16 %v543_v48, %v541_v47  ;;  %v1436_v41 = vld [vmem:[#allocation3 + $0x9b0] sm:$0xff] }
  0xb2   : > { %v1440_v47 = vld [vmem:[#allocation3 + $0x9d0] sm:$0xff] }
  0xb3   : > { %9701 = vmatpush1.bf16.msra.mxu0 %v9700_v59  ;;  %v9780_v59 = vpack.c.bf16 %v911_v58, %v907_v57  ;;  %v1444_v48 = vld [vmem:[#allocation3 + $0x9f0] sm:$0xff] }
  0xb4   : > { %9703 = vmatprep.subr.bf16.mxu0 %v9702_v60  ;;  %v910_v60 = vld [vmem:[%s16544_s3 + $0x2e0] sm:$0xff]  ;;  %v1448_v53 = vld [vmem:[#allocation3 + $0xa10] sm:$0xff] }
  0xb5   : > { %9781 = vmatprep.subr.bf16.mxu1 %v9780_v59  ;;  %v1452_v54 = vld [vmem:[#allocation3 + $0xa30] sm:$0xff] }
  0xb6   : > { %v9994_v57 = vpack.c.bf16 %v1452_v54, %v1448_v53  ;;  %v1456_v59 = vld [vmem:[#allocation3 + $0xa50] sm:$0xff] }
  0xb7   : > { %9705 = vmatpush1.bf16.msra.mxu0 %v9704_v7  ;;  %v9964_v7 = vpack.c.bf16 %v1397_v6, %v1393_v5  ;;  %v1468_v63 = vld [vmem:[#allocation3 + $0xab0] sm:$0xff] }
  0xb8   : > { %9707 = vmatprep.subr.bf16.mxu0 %v9706_v8  ;;  %v1392_v8 = vld [vmem:[#allocation3 + $0x850] sm:$0xff] }
  0xb9   : > { %v9966_v10 = vpack.c.bf16 %v1396_v9, %v1392_v8  ;;  %v820_v11 = vld [vmem:[%s16544_s3 + $0x10] sm:$0xff] }
  0xba   : > { %v824_v12 = vld [vmem:[%s16544_s3 + $0x30] sm:$0xff] }
  0xbb   : > { %9709 = vmatpush1.bf16.msra.mxu0 %v9708_v16  ;;  %v9970_v16 = vpack.c.bf16 %v1404_v15, %v1400_v14  ;;  %v829_v14 = vld [vmem:[%s16544_s3 + $0x58] sm:$0xff]  ;;  %v860_v53 = vld [vmem:[%s16544_s3 + $0x150] sm:$0xff] }
  0xbc   : > { %9711 = vmatprep.subr.bf16.mxu0 %v9710_v17  ;;  %v1413_v17 = vld [vmem:[#allocation3 + $0x8f8] sm:$0xff]  ;;  %v864_v54 = vld [vmem:[%s16544_s3 + $0x170] sm:$0xff] }
  0xbd   : > { %v9972_v18 = vpack.c.bf16 %v1413_v17, %v1409_v40  ;;  %v833_v15 = vld [vmem:[%s16544_s3 + $0x78] sm:$0xff]  ;;  %v9786_v17 = vpack.c.bf16 %v824_v12, %v820_v11 }
  0xbe   : > { %v893_v11 = vld [vmem:[%s16544_s3 + $0x258] sm:$0xff] }
  0xbf   : > { %9713 = vmatpush1.bf16.msra.mxu0 %v9712_v23  ;;  %v9974_v23 = vpack.c.bf16 %v1412_v20, %v1408_v19  ;;  %v897_v12 = vld [vmem:[%s16544_s3 + $0x278] sm:$0xff] }
  0xc0   : > { %9715 = vmatprep.subr.bf16.mxu0 %v9714_v24  ;;  %v9976_v24 = vpack.c.bf16 %v1421_v22, %v1417_v21  ;;  %v9788_v21 = vpack.c.bf16 %v833_v15, %v829_v14  ;;  %v828_v22 = vld [vmem:[%s16544_s3 + $0x50] sm:$0xff]  ;;  %v9820_v14 = vpack.c.bf16 %v897_v12, %v893_v11  ;;  %v1439_v11 = vld [vmem:[#allocation3 + $0x9c8] sm:$0xff] }
  0xc1   : > { %v892_v15 = vld [vmem:[%s16544_s3 + $0x250] sm:$0xff]  ;;  %v1443_v12 = vld [vmem:[#allocation3 + $0x9e8] sm:$0xff] }
  0xc3   : > { %9717 = vmatpush1.bf16.msra.mxu0 %v9716_v29  ;;  %v9978_v29 = vpack.c.bf16 %v1420_v26, %v1416_v25  ;;  %v837_v25 = vld [vmem:[%s16544_s3 + $0x98] sm:$0xff] }
  0xc4   : > { %9719 = vmatprep.subr.bf16.mxu0 %v9718_v30  ;;  %v9980_v30 = vpack.c.bf16 %v1429_v28, %v1425_v27  ;;  %v841_v26 = vld [vmem:[%s16544_s3 + $0xb8] sm:$0xff] }
  0xc7   : > { %9721 = vmatpush1.bf16.msra.mxu0 %v9720_v37  ;;  %v9982_v37 = vpack.c.bf16 %v1428_v33, %v1424_v32  ;;  %v836_v32 = vld [vmem:[%s16544_s3 + $0x90] sm:$0xff] }
  0xc8   : > { %9723 = vmatprep.subr.bf16.mxu0 %v9722_v38  ;;  %v9984_v38 = vpack.c.bf16 %v1437_v36, %v1433_v34  ;;  %v840_v33 = vld [vmem:[%s16544_s3 + $0xb0] sm:$0xff]  ;;  %v845_v34 = vld [vmem:[%s16544_s3 + $0xd8] sm:$0xff] }
  0xc9   : > { %v849_v36 = vld [vmem:[%s16544_s3 + $0xf8] sm:$0xff] }
  0xcb   : > { %9725 = vmatpush1.bf16.msra.mxu0 %v9724_v45  ;;  %v9986_v45 = vpack.c.bf16 %v1436_v41, %v1432_v39  ;;  %v844_v39 = vld [vmem:[%s16544_s3 + $0xd0] sm:$0xff] }
  0xcc   : > { %9727 = vmatprep.subr.bf16.mxu0 %v9726_v46  ;;  %v9988_v46 = vpack.c.bf16 %v1445_v44, %v1441_v43  ;;  %v848_v41 = vld [vmem:[%s16544_s3 + $0xf0] sm:$0xff]  ;;  %v853_v43 = vld [vmem:[%s16544_s3 + $0x118] sm:$0xff] }
  0xcd   : > { %v857_v44 = vld [vmem:[%s16544_s3 + $0x138] sm:$0xff] }
  0xcf   : > { %9729 = vmatpush1.bf16.msra.mxu0 %v9728_v51  ;;  %v9990_v51 = vpack.c.bf16 %v1444_v48, %v1440_v47  ;;  %v852_v47 = vld [vmem:[%s16544_s3 + $0x110] sm:$0xff] }
  0xd0   : > { %9732 = vmatprep.subr.msk.bf16.mxu0 %vm12629_vm4, %v9730_v52  ;;  %v9992_v52 = vpack.c.bf16 %v1453_v50, %v1449_v49  ;;  %v856_v48 = vld [vmem:[%s16544_s3 + $0x130] sm:$0xff]  ;;  %v861_v49 = vld [vmem:[%s16544_s3 + $0x158] sm:$0xff] }
  0xd1   : > { %v865_v50 = vld [vmem:[%s16544_s3 + $0x178] sm:$0xff] }
  0xd3   : > { %9735 = vmatpush1.bf16.msk.msra.mxu0 %vm12629_vm4, %v9733_v55  ;;  %v1457_v55 = vld [vmem:[#allocation3 + $0xa58] sm:$0xff] }
  0xd4   : > { %9961 = vmatprep.subr.bf16.mxu0 %v9960_v1  ;;  %v482_v1 = vlaneseq }
  0xd6   : > { %786 = vmatmul.mubr.f32.vlgmr.msra.gmra.mrb[0].mxu0 %v489_v56  ;;  %v1461_v56 = vld [vmem:[#allocation3 + $0xa78] sm:$0xff]  ;;  %v12937_v2 = vshrl.u32 %v482_v1, 7  ;;  %vm484_vm6 = vcmp.lt.s32.totalorder %v482_v1, 512 }
  0xd7   : > { %7488 = vmatprep.mubr.msk.f32.mxu0 %vm621_vm1, %v12506_v35  ;;  %v9782_v35 = vpack.c.bf16 %v910_v60, %v906_v31  ;;  %9963 = vmatpush1.bf16.msra.mxu0 %v9962_v4  ;;  %v9996_v58 = vpack.c.bf16 %v1461_v56, %v1457_v55  ;;  %v1460_v31 = vld [vmem:[#allocation3 + $0xa70] sm:$0xff]  ;;  %v1465_v60 = vld [vmem:[#allocation3 + $0xa98] sm:$0xff]  ;;  %v798_v4 = vld [vmem:[%s16543_s2] sm:$0x3] }
  0xd8   : > { %9965 = vmatprep.subr.bf16.mxu0 %v9964_v7  ;;  %v12940_v3 = vsub.s32 0, %v12937_v2  ;;  %v12946_v5 = vsub.s32 1, %v12937_v2  ;;  %v869_v55 = vld [vmem:[%s16544_s3 + $0x198] sm:$0xff] }
  0xd9   : > { %9783 = vmatpush1.bf16.msra.mxu1 %v9782_v35  ;;  %v1469_v35 = vld [vmem:[#allocation3 + $0xab8] sm:$0xff] }
  0xda   : > { %792 = vmatmul.mubr.f32.gmra.mrb[2].mxu0 %v12652_v42  ;;  %v821_v42 = vld [vmem:[%s16544_s3 + $0x18] sm:$0xff]  ;;  %v803_v6 = vrot.slane %v798_v4, %v12940_v3  ;;  %v807_v7 = vrot.slane %v798_v4, %v12946_v5 }
  0xdb   : > { %v9784_v62 = vpack.c.bf16 %v825_v61, %v821_v42  ;;  %9967 = vmatpush1.bf16.msra.mxu0 %v9966_v10  ;;  %v9998_v42 = vpack.c.bf16 %v1460_v31, %v1456_v59  ;;  %v10000_v61 = vpack.c.bf16 %v1469_v35, %v1465_v60  ;;  %v873_v56 = vld [vmem:[%s16544_s3 + $0x1b8] sm:$0xff]  ;;  %v868_v59 = vld [vmem:[%s16544_s3 + $0x190] sm:$0xff] }
  0xdc   : > { %9969 = vmatprep.subr.bf16.mxu0 %v9968_v13  ;;  %v872_v31 = vld [vmem:[%s16544_s3 + $0x1b0] sm:$0xff]  ;;  %v877_v60 = vld [vmem:[%s16544_s3 + $0x1d8] sm:$0xff] }
  0xdd   : > { %9785 = vmatprep.subr.bf16.mxu1 %v9784_v62  ;;  %v1464_v62 = vld [vmem:[#allocation3 + $0xa90] sm:$0xff]  ;;  %v881_v35 = vld [vmem:[%s16544_s3 + $0x1f8] sm:$0xff] }
  0xde   : > { %v10002_v0 = vpack.c.bf16 %v1468_v63, %v1464_v62  ;;  %v876_v62 = vld [vmem:[%s16544_s3 + $0x1d0] sm:$0xff]  ;;  %v889_v4 = vld [vmem:[%s16544_s3 + $0x238] sm:$0xff] }
  0xdf   : > { %9971 = vmatpush1.bf16.msra.mxu0 %v9970_v16  ;;  %v880_v63 = vld [vmem:[%s16544_s3 + $0x1f0] sm:$0xff] }
  0xe0   : > { %9973 = vmatprep.subr.bf16.mxu0 %v9972_v18 }
  0xe3   : > { %9975 = vmatpush1.bf16.msra.mxu0 %v9974_v23  ;;  %v832_v23 = vld [vmem:[%s16544_s3 + $0x70] sm:$0xff] }
  0xe4   : > { %9977 = vmatprep.subr.bf16.mxu0 %v9976_v24  ;;  %v9790_v28 = vpack.c.bf16 %v832_v23, %v828_v22  ;;  %v900_v22 = vld [vmem:[%s16544_s3 + $0x290] sm:$0xff] }
  0xe5   : > { %v904_v23 = vld [vmem:[%s16544_s3 + $0x2b0] sm:$0xff] }
  0xe7   : > { %9979 = vmatpush1.bf16.msra.mxu0 %v9978_v29 }
  0xe8   : > { %9981 = vmatprep.subr.bf16.mxu0 %v9980_v30  ;;  %v9792_v30 = vpack.c.bf16 %v841_v26, %v837_v25  ;;  %v909_v25 = vld [vmem:[%s16544_s3 + $0x2d8] sm:$0xff] }
  0xe9   : > { %v913_v26 = vld [vmem:[%s16544_s3 + $0x2f8] sm:$0xff] }
  0xeb   : > { %9983 = vmatpush1.bf16.msra.mxu0 %v9982_v37  ;;  %v9794_v37 = vpack.c.bf16 %v840_v33, %v836_v32  ;;  %v908_v32 = vld [vmem:[%s16544_s3 + $0x2d0] sm:$0xff] }
  0xec   : > { %9985 = vmatprep.subr.bf16.mxu0 %v9984_v38  ;;  %v9796_v38 = vpack.c.bf16 %v849_v36, %v845_v34  ;;  %v912_v33 = vld [vmem:[%s16544_s3 + $0x2f0] sm:$0xff]  ;;  %v1383_v34 = vld [vmem:[#allocation3 + $0x808] sm:$0xff] }
  0xed   : > { %v1387_v36 = vld [vmem:[#allocation3 + $0x828] sm:$0xff] }
  0xef   : > { %9987 = vmatpush1.bf16.msra.mxu0 %v9986_v45  ;;  %v9798_v45 = vpack.c.bf16 %v848_v41, %v844_v39  ;;  %v1382_v39 = vld [vmem:[#allocation3 + $0x800] sm:$0xff] }
  0xf0   : > { %9989 = vmatprep.subr.bf16.mxu0 %v9988_v46  ;;  %v9800_v46 = vpack.c.bf16 %v857_v44, %v853_v43  ;;  %v1386_v41 = vld [vmem:[#allocation3 + $0x820] sm:$0xff]  ;;  %v1391_v43 = vld [vmem:[#allocation3 + $0x848] sm:$0xff] }
  0xf1   : > { %v1395_v44 = vld [vmem:[#allocation3 + $0x868] sm:$0xff] }
  0xf3   : > { %9991 = vmatpush1.bf16.msra.mxu0 %v9990_v51  ;;  %v9802_v51 = vpack.c.bf16 %v856_v48, %v852_v47  ;;  %v1390_v47 = vld [vmem:[#allocation3 + $0x840] sm:$0xff] }
  0xf4   : > { %9993 = vmatprep.subr.bf16.mxu0 %v9992_v52  ;;  %v9804_v52 = vpack.c.bf16 %v865_v50, %v861_v49  ;;  %v1394_v48 = vld [vmem:[#allocation3 + $0x860] sm:$0xff]  ;;  %v1399_v49 = vld [vmem:[#allocation3 + $0x888] sm:$0xff] }
  0xf5   : > { %v1403_v50 = vld [vmem:[#allocation3 + $0x8a8] sm:$0xff] }
  0xf7   : > { %9995 = vmatpush1.bf16.msra.mxu0 %v9994_v57  ;;  %v9806_v57 = vpack.c.bf16 %v864_v54, %v860_v53  ;;  %v1398_v53 = vld [vmem:[#allocation3 + $0x880] sm:$0xff] }
  0xf8   : > { %9997 = vmatprep.subr.bf16.mxu0 %v9996_v58  ;;  %v9808_v58 = vpack.c.bf16 %v873_v56, %v869_v55  ;;  %v1402_v54 = vld [vmem:[#allocation3 + $0x8a0] sm:$0xff]  ;;  %v1407_v55 = vld [vmem:[#allocation3 + $0x8c8] sm:$0xff] }
  0xf9   : > { %v1411_v56 = vld [vmem:[#allocation3 + $0x8e8] sm:$0xff] }
  0xfb   : > { %9999 = vmatpush1.bf16.msra.mxu0 %v9998_v42  ;;  %v9810_v42 = vpack.c.bf16 %v872_v31, %v868_v59  ;;  %v1419_v59 = vld [vmem:[#allocation3 + $0x928] sm:$0xff] }
  0xfc   : > { %10001 = vmatprep.subr.bf16.mxu0 %v10000_v61  ;;  %v9812_v61 = vpack.c.bf16 %v881_v35, %v877_v60  ;;  %v1414_v60 = vld [vmem:[#allocation3 + $0x900] sm:$0xff] }
  0xfd   : > { %v1418_v35 = vld [vmem:[#allocation3 + $0x920] sm:$0xff] }
  0xff   : > { %10003 = vmatpush1.bf16.msra.mxu0 %v10002_v0  ;;  %v885_v0 = vld [vmem:[%s16544_s3 + $0x218] sm:$0xff] }
 0x1a9   : > { %v787_v8 = vpop.f32.mrb[0].mxu0 }
 0x1aa   : > { %v12950_v9 = vadd.f32 %v803_v6, %v787_v8  ;;  %v789_v10 = vpop.f32.mrb[1].mxu0  ;;  %v884_v8 = vld [vmem:[%s16544_s3 + $0x210] sm:$0xff] }
 0x1ab   : > { %v811_v13 = vadd.f32 %v807_v7, %v789_v10  ;;  %v888_v10 = vld [vmem:[%s16544_s3 + $0x230] sm:$0xff] }
 0x1ac   : > { %v814_v18 = vmax.f32 %v12950_v9, 0.0  ;;  %v9844_v9 = vpack.c.bf16 %v1411_v56, %v1407_v55  ;;  %v1484_v55 = vld [vmem:[#allocation3 + $0xb30] sm:$0xff] }
 0x1ad   : > { %v815_v40 = vmax.f32 %v811_v13, 0.0  ;;  %v793_v16 = vpop.f32.mrb[2].mxu0  ;;  %v9818_v13 = vpack.c.bf16 %v888_v10, %v884_v8  ;;  %v1430_v8 = vld [vmem:[#allocation3 + $0x980] sm:$0xff] }
 0x1ae   : > { %v12965_v19 = vadd.f32 %v803_v6, %v793_v16  ;;  %v795_v20 = vpop.f32.mrb[3].mxu0  ;;  %v9814_v6 = vpack.c.bf16 %v880_v63, %v876_v62  ;;  %v901_v16 = vld [vmem:[%s16544_s3 + $0x298] sm:$0xff]  ;;  %v9850_v62 = vpack.c.bf16 %v1418_v35, %v1414_v60  ;;  %v1426_v63 = vld [vmem:[#allocation3 + $0x960] sm:$0xff] }
 0x1af   : > { %v12973_v24 = vadd.f32 %v807_v7, %v795_v20  ;;  %7489 = vmatprep.mubr.msk.f32.mxu1 %vm936_vm5, %v815_v40  ;;  %v9816_v7 = vpack.c.bf16 %v889_v4, %v885_v0  ;;  %v1431_v0 = vld [vmem:[#allocation3 + $0x988] sm:$0xff]  ;;  %v1434_v10 = vld [vmem:[#allocation3 + $0x9a0] sm:$0xff]  ;;  %v1493_v60 = vld [vmem:[#allocation3 + $0xb78] sm:$0xff] }
 0x1b0   : > { %1008 = vmatmul.mubr.f32.vlgmr.msra.gmra.mrb[0].mxu1 %v814_v18  ;;  %v816_v29 = vmax.f32 %v12965_v19, 0.0  ;;  %v1435_v4 = vld [vmem:[#allocation3 + $0x9a8] sm:$0xff] }
 0x1b1   : > { %v817_v27 = vmax.f32 %v12973_v24, 0.0  ;;  %9787 = vmatpush1.bf16.msra.mxu1 %v9786_v17  ;;  %v905_v17 = vld [vmem:[%s16544_s3 + $0x2b8] sm:$0xff]  ;;  %v1415_v24 = vld [vmem:[#allocation3 + $0x908] sm:$0xff] }
 0x1b2   : > { %9789 = vmatprep.subr.bf16.mxu1 %v9788_v21  ;;  %v9824_v21 = vpack.c.bf16 %v905_v17, %v901_v16  ;;  %v9848_v31 = vpack.c.bf16 %v1419_v59, %v1415_v24  ;;  %v1447_v16 = vld [vmem:[#allocation3 + $0xa08] sm:$0xff]  ;;  %v1489_v24 = vld [vmem:[#allocation3 + $0xb58] sm:$0xff]  ;;  %v12204_v59 = vmov 0.0  }
 0x1b3   : > { %7490 = vmatprep.mubr.msk.f32.mxu1 %vm936_vm5, %v817_v27  ;;  %v1451_v17 = vld [vmem:[#allocation3 + $0xa28] sm:$0xff]  ;;  %487 = vst.msk [vmem:[#allocation2 + $0x40] ss:$8 sm:$0xf] %vm484_vm6, %v12204_v59  ;;  %v10012_v35 = vpack.c.bf16 %v1493_v60, %v1489_v24 }
 0x1b4   : > { %1014 = vmatmul.mubr.f32.gmra.mrb[2].mxu1 %v816_v29 }
 0x1b5   : > { %9791 = vmatpush1.bf16.msra.mxu1 %v9790_v28  ;;  %7491 = vmatprep.mubr.msk.f32.mxu1 %vm936_vm5, %v815_v40  ;;  %v896_v40 = vld [vmem:[%s16544_s3 + $0x270] sm:$0xff]  ;;  %v9826_v28 = vpack.c.bf16 %v904_v23, %v900_v22  ;;  %v1446_v22 = vld [vmem:[#allocation3 + $0xa00] sm:$0xff] }
 0x1b6   : > { %9793 = vmatprep.subr.bf16.mxu1 %v9792_v30  ;;  %v9822_v20 = vpack.c.bf16 %v896_v40, %v892_v15  ;;  %v9828_v30 = vpack.c.bf16 %v913_v26, %v909_v25  ;;  %v1438_v15 = vld [vmem:[#allocation3 + $0x9c0] sm:$0xff]  ;;  %v1455_v25 = vld [vmem:[#allocation3 + $0xa48] sm:$0xff] }
 0x1b7   : > { %v1442_v40 = vld [vmem:[#allocation3 + $0x9e0] sm:$0xff]  ;;  %v1459_v26 = vld [vmem:[#allocation3 + $0xa68] sm:$0xff] }
 0x1b8   : > { %v1450_v23 = vld [vmem:[#allocation3 + $0xa20] sm:$0xff] }
 0x1b9   : > { %9795 = vmatpush1.bf16.msra.mxu1 %v9794_v37  ;;  %v9830_v37 = vpack.c.bf16 %v912_v33, %v908_v32  ;;  %v1454_v32 = vld [vmem:[#allocation3 + $0xa40] sm:$0xff] }
 0x1ba   : > { %9797 = vmatprep.subr.bf16.mxu1 %v9796_v38  ;;  %v9832_v38 = vpack.c.bf16 %v1387_v36, %v1383_v34  ;;  %v1458_v33 = vld [vmem:[#allocation3 + $0xa60] sm:$0xff]  ;;  %v1473_v34 = vld [vmem:[#allocation3 + $0xad8] sm:$0xff]  ;;  %v1463_v36 = vld [vmem:[#allocation3 + $0xa88] sm:$0xff] }
 0x1bd   : > { %9799 = vmatpush1.bf16.msra.mxu1 %v9798_v45  ;;  %v9834_v45 = vpack.c.bf16 %v1386_v41, %v1382_v39  ;;  %v1472_v41 = vld [vmem:[#allocation3 + $0xad0] sm:$0xff] }
 0x1be   : > { %9801 = vmatprep.subr.bf16.mxu1 %v9800_v46  ;;  %v9836_v46 = vpack.c.bf16 %v1395_v44, %v1391_v43  ;;  %v1476_v43 = vld [vmem:[#allocation3 + $0xaf0] sm:$0xff]  ;;  %v9870_v44 = vpack.c.bf16 %v1458_v33, %v1454_v32  ;;  %v1494_v32 = vld [vmem:[#allocation3 + $0xb80] sm:$0xff] }
 0x1bf   : > { %v1498_v33 = vld [vmem:[#allocation3 + $0xba0] sm:$0xff] }
 0x1c1   : > { %9803 = vmatpush1.bf16.msra.mxu1 %v9802_v51  ;;  %v9838_v51 = vpack.c.bf16 %v1394_v48, %v1390_v47  ;;  %v1462_v47 = vld [vmem:[#allocation3 + $0xa80] sm:$0xff] }
 0x1c2   : > { %9805 = vmatprep.subr.bf16.mxu1 %v9804_v52  ;;  %v9840_v52 = vpack.c.bf16 %v1403_v50, %v1399_v49  ;;  %v1466_v48 = vld [vmem:[#allocation3 + $0xaa0] sm:$0xff]  ;;  %v1481_v49 = vld [vmem:[#allocation3 + $0xb18] sm:$0xff]  ;;  %v1471_v50 = vld [vmem:[#allocation3 + $0xac8] sm:$0xff] }
 0x1c3   : > { %v9874_v56 = vpack.c.bf16 %v1466_v48, %v1462_v47  ;;  %v1515_v47 = vld [vmem:[#allocation3 + $0xc28] sm:$0xff] }
 0x1c5   : > { %9807 = vmatpush1.bf16.msra.mxu1 %v9806_v57  ;;  %v9842_v57 = vpack.c.bf16 %v1402_v54, %v1398_v53  ;;  %v1480_v54 = vld [vmem:[#allocation3 + $0xb10] sm:$0xff] }
 0x1c6   : > { %9809 = vmatprep.subr.bf16.mxu1 %v9808_v58  ;;  %v1410_v58 = vld [vmem:[#allocation3 + $0x8e0] sm:$0xff] }
 0x1c9   : > { %9811 = vmatpush1.bf16.msra.mxu1 %v9810_v42  ;;  %v1423_v42 = vld [vmem:[#allocation3 + $0x948] sm:$0xff] }
 0x1ca   : > { %9813 = vmatprep.subr.bf16.mxu1 %v9812_v61  ;;  %v1427_v61 = vld [vmem:[#allocation3 + $0x968] sm:$0xff] }
 0x1cb   : > { %v9852_v19 = vpack.c.bf16 %v1427_v61, %v1423_v42  ;;  %v1488_v42 = vld [vmem:[#allocation3 + $0xb50] sm:$0xff] }
 0x1cc   : > { %v1492_v61 = vld [vmem:[#allocation3 + $0xb70] sm:$0xff] }
 0x1cd   : > { %9815 = vmatpush1.bf16.msra.mxu1 %v9814_v6 }
 0x1ce   : > { %9817 = vmatprep.subr.bf16.mxu1 %v9816_v7  ;;  %v9856_v7 = vpack.c.bf16 %v1435_v4, %v1431_v0  ;;  %v1497_v0 = vld [vmem:[#allocation3 + $0xb98] sm:$0xff]  ;;  %v1487_v4 = vld [vmem:[#allocation3 + $0xb48] sm:$0xff] }
 0x1d1   : > { %9819 = vmatpush1.bf16.msra.mxu1 %v9818_v13  ;;  %v9858_v13 = vpack.c.bf16 %v1434_v10, %v1430_v8  ;;  %v1496_v10 = vld [vmem:[#allocation3 + $0xb90] sm:$0xff] }
 0x1d2   : > { %9821 = vmatprep.subr.bf16.mxu1 %v9820_v14  ;;  %v9860_v14 = vpack.c.bf16 %v1443_v12, %v1439_v11  ;;  %v1500_v11 = vld [vmem:[#allocation3 + $0xbb0] sm:$0xff] }
 0x1d5   : > { %9823 = vmatpush1.bf16.msra.mxu1 %v9822_v20  ;;  %v9862_v20 = vpack.c.bf16 %v1442_v40, %v1438_v15  ;;  %v1509_v15 = vld [vmem:[#allocation3 + $0xbf8] sm:$0xff] }
 0x1d6   : > { %9825 = vmatprep.subr.bf16.mxu1 %v9824_v21  ;;  %v9864_v21 = vpack.c.bf16 %v1451_v17, %v1447_v16  ;;  %v1486_v16 = vld [vmem:[#allocation3 + $0xb40] sm:$0xff] }
 0x1d7   : > { %v1490_v17 = vld [vmem:[#allocation3 + $0xb60] sm:$0xff] }
 0x1d9   : > { %9827 = vmatpush1.bf16.msra.mxu1 %v9826_v28  ;;  %v9866_v28 = vpack.c.bf16 %v1450_v23, %v1446_v22  ;;  %v1495_v22 = vld [vmem:[#allocation3 + $0xb88] sm:$0xff] }
 0x1da   : > { %9829 = vmatprep.subr.bf16.mxu1 %v9828_v30  ;;  %v9868_v30 = vpack.c.bf16 %v1459_v26, %v1455_v25  ;;  %v1499_v23 = vld [vmem:[#allocation3 + $0xba8] sm:$0xff]  ;;  %v1508_v25 = vld [vmem:[#allocation3 + $0xbf0] sm:$0xff] }
 0x1dd   : > { %9831 = vmatpush1.bf16.msra.mxu1 %v9830_v37  ;;  %v1467_v37 = vld [vmem:[#allocation3 + $0xaa8] sm:$0xff] }
 0x1de   : > { %9833 = vmatprep.subr.bf16.mxu1 %v9832_v38  ;;  %v1477_v38 = vld [vmem:[#allocation3 + $0xaf8] sm:$0xff] }
 0x1df   : > { %v10004_v39 = vpack.c.bf16 %v1477_v38, %v1473_v34  ;;  %v1513_v34 = vld [vmem:[#allocation3 + $0xc18] sm:$0xff] }
 0x1e0   : > { %1085 = vmatmul.mubr.f32.vlgmr.msra.gmra.mrb[4].mxu1 %v814_v18  ;;  %v1406_v18 = vld [vmem:[#allocation3 + $0x8c0] sm:$0xff]  ;;  %v1517_v38 = vld [vmem:[#allocation3 + $0xc38] sm:$0xff] }
 0x1e1   : > { %7492 = vmatprep.mubr.msk.f32.mxu1 %vm936_vm5, %v817_v27  ;;  %9835 = vmatpush1.bf16.msra.mxu1 %v9834_v45  ;;  %v9846_v27 = vpack.c.bf16 %v1410_v58, %v1406_v18  ;;  %v10006_v45 = vpack.c.bf16 %v1476_v43, %v1472_v41  ;;  %v1470_v18 = vld [vmem:[#allocation3 + $0xac0] sm:$0xff]  ;;  %v9890_v41 = vpack.c.bf16 %v1498_v33, %v1494_v32  ;;  %v1529_v32 = vld [vmem:[#allocation3 + $0xc98] sm:$0xff] }
 0x1e2   : > { %9837 = vmatprep.subr.bf16.mxu1 %v9836_v46  ;;  %v9872_v46 = vpack.c.bf16 %v1467_v37, %v1463_v36  ;;  %10005 = vmatprep.subr.bf16.mxu0 %v10004_v39  ;;  %v1474_v58 = vld [vmem:[#allocation3 + $0xae0] sm:$0xff]  ;;  %v1503_v36 = vld [vmem:[#allocation3 + $0xbc8] sm:$0xff]  ;;  %v10024_v39 = vpack.c.bf16 %v1517_v38, %v1513_v34  ;;  %v1533_v33 = vld [vmem:[#allocation3 + $0xcb8] sm:$0xff] }
 0x1e3   : > { %10007 = vmatpush1.bf16.msra.mxu0 %v10006_v45  ;;  %v9878_v1 = vpack.c.bf16 %v1474_v58, %v1470_v18  ;;  %v1507_v37 = vld [vmem:[#allocation3 + $0xbe8] sm:$0xff]  ;;  %v1506_v45 = vld [vmem:[#allocation3 + $0xbe0] sm:$0xff] }
 0x1e4   : > { %1091 = vmatmul.mubr.f32.gmra.mrb[6].mxu1 %v816_v29  ;;  %v1422_v29 = vld [vmem:[#allocation3 + $0x940] sm:$0xff]  ;;  %v9892_v43 = vpack.c.bf16 %v1507_v37, %v1503_v36 }
 0x1e5   : > { %9839 = vmatpush1.bf16.msra.mxu1 %v9838_v51  ;;  %v9854_v6 = vpack.c.bf16 %v1426_v63, %v1422_v29  ;;  %v1475_v51 = vld [vmem:[#allocation3 + $0xae8] sm:$0xff]  ;;  %v1478_v29 = vld [vmem:[#allocation3 + $0xb00] sm:$0xff] }
 0x1e6   : > { %9841 = vmatprep.subr.bf16.mxu1 %v9840_v52  ;;  %v1485_v52 = vld [vmem:[#allocation3 + $0xb38] sm:$0xff]  ;;  %v1482_v63 = vld [vmem:[#allocation3 + $0xb20] sm:$0xff] }
 0x1e7   : > { %v10008_v53 = vpack.c.bf16 %v1485_v52, %v1481_v49  ;;  %v9882_v12 = vpack.c.bf16 %v1482_v63, %v1478_v29  ;;  %v1526_v38 = vld [vmem:[#allocation3 + $0xc80] sm:$0xff] }
 0x1e9   : > { %9843 = vmatpush1.bf16.msra.mxu1 %v9842_v57  ;;  %v10010_v57 = vpack.c.bf16 %v1484_v55, %v1480_v54  ;;  %10009 = vmatprep.subr.bf16.mxu0 %v10008_v53 }
 0x1ea   : > { %9845 = vmatprep.subr.bf16.mxu1 %v9844_v9  ;;  %v9876_v9 = vpack.c.bf16 %v1475_v51, %v1471_v50  ;;  %v13118_v50 = vld [vmem:[%s16545_s4] sm:$0xf] }
 0x1eb   : > { %10011 = vmatpush1.bf16.msra.mxu0 %v10010_v57  ;;  %v919_v51 = vrot.slane %v13118_v50, %v12940_v3  ;;  %v923_v52 = vrot.slane %v13118_v50, %v12946_v5 }
 0x1ec   : > { %10013 = vmatprep.subr.bf16.mxu0 %v10012_v35  ;;  %v1510_v35 = vld [vmem:[#allocation3 + $0xc00] sm:$0xff] }
 0x1ed   : > { %9847 = vmatpush1.bf16.msra.mxu1 %v9846_v27  ;;  %v1479_v27 = vld [vmem:[#allocation3 + $0xb08] sm:$0xff] }
 0x1ee   : > { %9849 = vmatprep.subr.bf16.mxu1 %v9848_v31  ;;  %v1483_v31 = vld [vmem:[#allocation3 + $0xb28] sm:$0xff] }
 0x1f1   : > { %9851 = vmatpush1.bf16.msra.mxu1 %v9850_v62  ;;  %v10014_v62 = vpack.c.bf16 %v1492_v61, %v1488_v42  ;;  %v1514_v42 = vld [vmem:[#allocation3 + $0xc20] sm:$0xff]  ;;  %v1122_v61 = vld [vmem:[#allocation2 + $0x48] sm:$0x1] }
 0x1f2   : > { %9853 = vmatprep.subr.bf16.mxu1 %v9852_v19  ;;  %v9880_v19 = vpack.c.bf16 %v1483_v31, %v1479_v27 }
 0x1f3   : > { %10015 = vmatpush1.bf16.msra.mxu0 %v10014_v62  ;;  %v1512_v62 = vld [vmem:[#allocation3 + $0xc10] sm:$0xff] }
 0x1f5   : > { %9855 = vmatpush1.bf16.msra.mxu1 %v9854_v6  ;;  %v1491_v6 = vld [vmem:[#allocation3 + $0xb68] sm:$0xff] }
 0x1f6   : > { %9857 = vmatprep.subr.bf16.mxu1 %v9856_v7  ;;  %v1501_v7 = vld [vmem:[#allocation3 + $0xbb8] sm:$0xff]  ;;  %v9884_v40 = vpack.c.bf16 %v1491_v6, %v1487_v4  ;;  %v1121_v4 = vld [vmem:[#allocation2 + $0x40] sm:$0x1] }
 0x1f7   : > { %v10016_v8 = vpack.c.bf16 %v1501_v7, %v1497_v0  ;;  %v1519_v0 = vld [vmem:[#allocation3 + $0xc48] sm:$0xff] }
 0x1f9   : > { %9859 = vmatpush1.bf16.msra.mxu1 %v9858_v13  ;;  %v10018_v13 = vpack.c.bf16 %v1500_v11, %v1496_v10  ;;  %10017 = vmatprep.subr.bf16.mxu0 %v10016_v8  ;;  %v1523_v8 = vld [vmem:[#allocation3 + $0xc68] sm:$0xff]  ;;  %v1521_v10 = vld [vmem:[#allocation3 + $0xc58] sm:$0xff] }
 0x1fa   : > { %9861 = vmatprep.subr.bf16.mxu1 %v9860_v14  ;;  %v1505_v14 = vld [vmem:[#allocation3 + $0xbd8] sm:$0xff] }
 0x1fb   : > { %10019 = vmatpush1.bf16.msra.mxu0 %v10018_v13  ;;  %v1525_v11 = vld [vmem:[#allocation3 + $0xc78] sm:$0xff]  ;;  %v9898_v13 = vpack.c.bf16 %v1514_v42, %v1510_v35 }
 0x1fc   : > { %v1545_v35 = vld [vmem:[#allocation3 + $0xd18] sm:$0xff] }
 0x1fd   : > { %9863 = vmatpush1.bf16.msra.mxu1 %v9862_v20  ;;  %v10020_v20 = vpack.c.bf16 %v1509_v15, %v1505_v14  ;;  %v1664_v15 = vrot.slane %v1122_v61, 1  ;;  %v1549_v42 = vld [vmem:[#allocation3 + $0xd38] sm:$0xff] }
 0x1fe   : > { %9865 = vmatprep.subr.bf16.mxu1 %v9864_v21  ;;  %v1504_v21 = vld [vmem:[#allocation3 + $0xbd0] sm:$0xff] }
 0x1ff   : > { %10021 = vmatprep.subr.bf16.mxu0 %v10020_v20  ;;  %v10022_v26 = vpack.c.bf16 %v1508_v25, %v1504_v21  ;;  %v1520_v20 = vld [vmem:[#allocation3 + $0xc50] sm:$0xff]  ;;  %v9900_v25 = vpack.c.bf16 %v1523_v8, %v1519_v0  ;;  %v1553_v8 = vld [vmem:[#allocation3 + $0xd58] sm:$0xff] }
 0x200   : > { %v1524_v21 = vld [vmem:[#allocation3 + $0xc70] sm:$0xff] }
 0x201   : > { %9867 = vmatpush1.bf16.msra.mxu1 %v9866_v28  ;;  %v9886_v28 = vpack.c.bf16 %v1490_v17, %v1486_v16  ;;  %10023 = vmatpush1.bf16.msra.mxu0 %v10022_v26  ;;  %v1522_v16 = vld [vmem:[#allocation3 + $0xc60] sm:$0xff]  ;;  %v10028_v26 = vpack.c.bf16 %v1525_v11, %v1521_v10  ;;  %v10030_v37 = vpack.c.bf16 %v1524_v21, %v1520_v20  ;;  %v1544_v0 = vld [vmem:[#allocation3 + $0xd10] sm:$0xff]  ;;  %v1557_v10 = vld [vmem:[#allocation3 + $0xd78] sm:$0xff] }
 0x202   : > { %9869 = vmatprep.subr.bf16.mxu1 %v9868_v30  ;;  %v9888_v30 = vpack.c.bf16 %v1499_v23, %v1495_v22  ;;  %10025 = vmatprep.subr.bf16.mxu0 %v10024_v39  ;;  %v1527_v22 = vld [vmem:[#allocation3 + $0xc88] sm:$0xff]  ;;  %v1530_v39 = vld [vmem:[#allocation3 + $0xca0] sm:$0xff] }
 0x203   : > { %v1559_v20 = vld [vmem:[#allocation3 + $0xd88] sm:$0xff] }
 0x204   : > { %v1563_v21 = vld [vmem:[#allocation3 + $0xda8] sm:$0xff] }
 0x205   : > { %9871 = vmatpush1.bf16.msra.mxu1 %v9870_v44  ;;  %v1502_v44 = vld [vmem:[#allocation3 + $0xbc0] sm:$0xff] }
 0x206   : > { %9873 = vmatprep.subr.bf16.mxu1 %v9872_v46  ;;  %v1511_v46 = vld [vmem:[#allocation3 + $0xc08] sm:$0xff]  ;;  %v9894_v48 = vpack.c.bf16 %v1506_v45, %v1502_v44  ;;  %v1528_v44 = vld [vmem:[#allocation3 + $0xc90] sm:$0xff] }
 0x207   : > { %v9896_v49 = vpack.c.bf16 %v1515_v47, %v1511_v46  ;;  %v1532_v45 = vld [vmem:[#allocation3 + $0xcb0] sm:$0xff]  ;;  %v1535_v46 = vld [vmem:[#allocation3 + $0xcc8] sm:$0xff] }
 0x209   : > { %9875 = vmatpush1.bf16.msra.mxu1 %v9874_v56 }
 0x20a   : > { %9877 = vmatprep.subr.bf16.mxu1 %v9876_v9 }
 0x20d   : > { %9879 = vmatpush1.bf16.msra.mxu1 %v9878_v1 }
 0x20e   : > { %9881 = vmatprep.subr.bf16.mxu1 %v9880_v19  ;;  %v1516_v19 = vld [vmem:[#allocation3 + $0xc30] sm:$0xff] }
 0x20f   : > { %v10026_v14 = vpack.c.bf16 %v1516_v19, %v1512_v62  ;;  %v1542_v62 = vld [vmem:[#allocation3 + $0xd00] sm:$0xff] }
 0x210   : > { %v1546_v19 = vld [vmem:[#allocation3 + $0xd20] sm:$0xff] }
 0x211   : > { %9883 = vmatpush1.bf16.msra.mxu1 %v9882_v12  ;;  %v9914_v11 = vpack.c.bf16 %v1546_v19, %v1542_v62  ;;  %v1583_v62 = vld [vmem:[#allocation3 + $0xe48] sm:$0xff] }
 0x212   : > { %9885 = vmatprep.subr.bf16.mxu1 %v9884_v40  ;;  %v1518_v40 = vld [vmem:[#allocation3 + $0xc40] sm:$0xff] }
 0x213   : > { %v9902_v36 = vpack.c.bf16 %v1522_v16, %v1518_v40  ;;  %v10044_v40 = vpack.c.bf16 %v1557_v10, %v1553_v8  ;;  %v1552_v16 = vld [vmem:[#allocation3 + $0xd50] sm:$0xff]  ;;  %v1586_v8 = vld [vmem:[#allocation3 + $0xe60] sm:$0xff] }
 0x215   : > { %9887 = vmatpush1.bf16.msra.mxu1 %v9886_v28  ;;  %v1662_v28 = vrot.slane %v1121_v4, 1  ;;  %v1548_v4 = vld [vmem:[#allocation3 + $0xd30] sm:$0xff] }
 0x216   : > { %9889 = vmatprep.subr.bf16.mxu1 %v9888_v30  ;;  %v1531_v30 = vld [vmem:[#allocation3 + $0xca8] sm:$0xff] }
 0x219   : > { %9891 = vmatpush1.bf16.msra.mxu1 %v9890_v41  ;;  %v9904_v41 = vpack.c.bf16 %v1531_v30, %v1527_v22  ;;  %v1561_v22 = vld [vmem:[#allocation3 + $0xd98] sm:$0xff]  ;;  %v1562_v30 = vld [vmem:[#allocation3 + $0xda0] sm:$0xff] }
 0x21a   : > { %9893 = vmatprep.subr.bf16.mxu1 %v9892_v43  ;;  %v10032_v43 = vpack.c.bf16 %v1533_v33, %v1529_v32  ;;  %v9920_v32 = vpack.c.bf16 %v1563_v21, %v1559_v20  ;;  %v1593_v20 = vld [vmem:[#allocation3 + $0xe98] sm:$0xff] }
 0x21d   : > { %9895 = vmatpush1.bf16.msra.mxu1 %v9894_v48  ;;  %v1539_v48 = vld [vmem:[#allocation3 + $0xce8] sm:$0xff] }
 0x21e   : > { %9897 = vmatprep.subr.bf16.mxu1 %v9896_v49  ;;  %v1537_v49 = vld [vmem:[#allocation3 + $0xcd8] sm:$0xff] }
 0x283   : > { %v1009_v53 = vpop.f32.mrb[0].mxu1 }
 0x284   : > { %v1010_v54 = vadd.f32 %v1009_v53, %v919_v51  ;;  %v1011_v55 = vpop.f32.mrb[1].mxu1  ;;  %v10034_v53 = vpack.c.bf16 %v1532_v45, %v1528_v44  ;;  %v1566_v45 = vld [vmem:[#allocation3 + $0xdc0] sm:$0xff] }
 0x285   : > { %v1012_v56 = vadd.f32 %v1011_v55, %v923_v52  ;;  %v1538_v55 = vld [vmem:[#allocation3 + $0xce0] sm:$0xff] }
 0x286   : > { %v1097_v57 = vmax.f32 %v1010_v54, 0.0  ;;  %v1534_v54 = vld [vmem:[#allocation3 + $0xcc0] sm:$0xff] }
 0x287   : > { %v13124_v9 = vmax.f32 %v1012_v56, 0.0  ;;  %v1015_v18 = vpop.f32.mrb[2].mxu1  ;;  %v9908_v56 = vpack.c.bf16 %v1539_v48, %v1535_v46  ;;  %v9910_v61 = vpack.c.bf16 %v1538_v55, %v1534_v54  ;;  %v1570_v46 = vld [vmem:[#allocation3 + $0xde0] sm:$0xff]  ;;  %v1579_v54 = vld [vmem:[#allocation3 + $0xe28] sm:$0xff]  ;;  %v1577_v55 = vld [vmem:[#allocation3 + $0xe18] sm:$0xff] }
 0x288   : > { %1105 = vst [vmem:[#allocation2] sm:$0xff] %v1097_v57  ;;  %v1017_v58 = vpop.f32.mrb[3].mxu1  ;;  %v1016_v27 = vadd.f32 %v1015_v18, %v919_v51  ;;  %v1541_v51 = vld [vmem:[#allocation3 + $0xcf8] sm:$0xff]  ;;  %v1536_v18 = vld [vmem:[#allocation3 + $0xcd0] sm:$0xff] }
 0x289   : > { %1106 = vst [vmem:[#allocation2 + $0x8] sm:$0xff] %v13124_v9  ;;  %v1018_v24 = vadd.f32 %v1017_v58, %v923_v52  ;;  %v9906_v52 = vpack.c.bf16 %v1530_v39, %v1526_v38  ;;  %v10036_v57 = vpack.c.bf16 %v1541_v51, %v1537_v49  ;;  %v1540_v58 = vld [vmem:[#allocation3 + $0xcf0] sm:$0xff]  ;;  %v1571_v38 = vld [vmem:[#allocation3 + $0xde8] sm:$0xff]  ;;  %v1569_v39 = vld [vmem:[#allocation3 + $0xdd8] sm:$0xff] }
 0x28a   : > { %v13129_v60 = vmax.f32 %v1016_v27, 0.0  ;;  %v1547_v27 = vld [vmem:[#allocation3 + $0xd28] sm:$0xff]  ;;  %v1568_v49 = vld [vmem:[#allocation3 + $0xdd0] sm:$0xff] }
 0x28b   : > { %v13127_v31 = vmax.f32 %v1018_v24, 0.0  ;;  %v1543_v24 = vld [vmem:[#allocation3 + $0xd08] sm:$0xff]  ;;  %v1572_v51 = vld [vmem:[#allocation3 + $0xdf0] sm:$0xff] }
 0x28c   : > { %v1651_v12 = vrot.slane %v13129_v60, 1 }
 0x28d   : > { %v1654_v7 = vrot.slane %v13127_v31, 1 }
 0x28e   : > { %v1663_v47 = vsel %vm608_vm0, %v1651_v12, %v1662_v28  ;;  %v1558_v28 = vld [vmem:[#allocation3 + $0xd80] sm:$0xff] }
 0x28f   : > { %v1113_v1 = vld [vmem:[#allocation2] sm:$0xfe]  ;;  %v1665_v34 = vsel %vm608_vm0, %v1654_v7, %v1664_v15 }
 0x290   : > { %v1114_v29 = vld [vmem:[#allocation2 + $0x8] sm:$0xfe]  ;;  %v1650_v63 = vrot.slane %v1113_v1, 1  ;;  %v10038_v1 = vpack.c.bf16 %v1540_v58, %v1536_v18  ;;  %v9926_v18 = vpack.c.bf16 %v1570_v46, %v1566_v45  ;;  %v10054_v58 = vpack.c.bf16 %v1572_v51, %v1568_v49  ;;  %v1602_v49 = vld [vmem:[#allocation3 + $0xee0] sm:$0xff] }
 0x291   : > { %v1653_v6 = vrot.slane %v1114_v29, 1  ;;  %v9912_v29 = vpack.c.bf16 %v1547_v27, %v1543_v24  ;;  %v1574_v24 = vld [vmem:[#allocation3 + $0xe00] sm:$0xff] }
 0x292   : > { %v1652_v23 = vsel %vm608_vm0, %v1650_v63, %v1651_v12  ;;  %v10040_v63 = vpack.c.bf16 %v1549_v42, %v1545_v35  ;;  %v10042_v12 = vpack.c.bf16 %v1548_v4, %v1544_v0  ;;  %v1578_v27 = vld [vmem:[#allocation3 + $0xe20] sm:$0xff] }
 0x293   : > { %v1655_v17 = vsel %vm608_vm0, %v1653_v6, %v1654_v7  ;;  %v1551_v6 = vld [vmem:[#allocation3 + $0xd48] sm:$0xff]  ;;  %v9930_v4 = vpack.c.bf16 %v1578_v27, %v1574_v24  ;;  %v1613_v24 = vld [vmem:[#allocation3 + $0xf38] sm:$0xff] }
 0x294   : > { %1742 = vmatprep.mubr.f32.mxu1 %v1655_v17  ;;  %1896 = vmatprep.mubr.f32.mxu0 %v1655_v17  ;;  %v1555_v7 = vld [vmem:[#allocation3 + $0xd68] sm:$0xff]  ;;  %v1556_v17 = vld [vmem:[#allocation3 + $0xd70] sm:$0xff] }
 0x295   : > { %1743 = vmatmul.mubr.f32.vlgmr.msra.gmra.mrb[8].mxu1 %v1652_v23  ;;  %1897 = vmatmul.mubr.f32.vlgmr.msra.gmra.mrb[4].mxu0 %v1652_v23  ;;  %v9916_v15 = vpack.c.bf16 %v1555_v7, %v1551_v6  ;;  %v1565_v23 = vld [vmem:[#allocation3 + $0xdb8] sm:$0xff]  ;;  %v1582_v7 = vld [vmem:[#allocation3 + $0xe40] sm:$0xff] }
 0x296   : > { %9899 = vmatpush1.bf16.msra.mxu1 %v9898_v13  ;;  %10027 = vmatpush1.bf16.msra.mxu0 %v10026_v14  ;;  %v1550_v13 = vld [vmem:[#allocation3 + $0xd40] sm:$0xff]  ;;  %v10048_v33 = vpack.c.bf16 %v1565_v23, %v1561_v22  ;;  %v9934_v23 = vpack.c.bf16 %v1586_v8, %v1582_v7  ;;  %v1617_v7 = vld [vmem:[#allocation3 + $0xf58] sm:$0xff] }
 0x297   : > { %1748 = vmatprep.mubr.f32.mxu1 %v1665_v34  ;;  %1902 = vmatprep.mubr.f32.mxu0 %v1665_v34  ;;  %v1554_v14 = vld [vmem:[#allocation3 + $0xd60] sm:$0xff]  ;;  %v1560_v34 = vld [vmem:[#allocation3 + $0xd90] sm:$0xff]  ;;  %v1621_v8 = vld [vmem:[#allocation3 + $0xf78] sm:$0xff] }
 0x298   : > { %9901 = vmatprep.subr.bf16.mxu1 %v9900_v25  ;;  %10029 = vmatprep.subr.bf16.mxu0 %v10028_v26  ;;  %v9918_v25 = vpack.c.bf16 %v1554_v14, %v1550_v13  ;;  %v10046_v26 = vpack.c.bf16 %v1556_v17, %v1552_v16  ;;  %v1584_v13 = vld [vmem:[#allocation3 + $0xe50] sm:$0xff]  ;;  %v1595_v17 = vld [vmem:[#allocation3 + $0xea8] sm:$0xff] }
 0x299   : > { %1749 = vmatmul.mubr.f32.gmra.mrb[10].mxu1 %v1663_v47  ;;  %1903 = vmatmul.mubr.f32.gmra.mrb[6].mxu0 %v1663_v47  ;;  %v1588_v14 = vld [vmem:[#allocation3 + $0xe70] sm:$0xff] }
 0x29a   : > { %9903 = vmatpush1.bf16.msra.mxu1 %v9902_v36  ;;  %10031 = vmatpush1.bf16.msra.mxu0 %v10030_v37  ;;  %v1564_v36 = vld [vmem:[#allocation3 + $0xdb0] sm:$0xff]  ;;  %v1567_v37 = vld [vmem:[#allocation3 + $0xdc8] sm:$0xff] }
 0x29b   : > { %9905 = vmatprep.subr.bf16.mxu1 %v9904_v41  ;;  %10033 = vmatprep.subr.bf16.mxu0 %v10032_v43  ;;  %v1573_v41 = vld [vmem:[#allocation3 + $0xdf8] sm:$0xff]  ;;  %v9922_v43 = vpack.c.bf16 %v1562_v30, %v1558_v28  ;;  %v10050_v44 = vpack.c.bf16 %v1564_v36, %v1560_v34  ;;  %v9924_v47 = vpack.c.bf16 %v1571_v38, %v1567_v37  ;;  %v1594_v28 = vld [vmem:[#allocation3 + $0xea0] sm:$0xff]  ;;  %v1592_v36 = vld [vmem:[#allocation3 + $0xe90] sm:$0xff] }
 0x29c   : > { %v10052_v48 = vpack.c.bf16 %v1573_v41, %v1569_v39  ;;  %v1596_v37 = vld [vmem:[#allocation3 + $0xeb0] sm:$0xff]  ;;  %v1599_v38 = vld [vmem:[#allocation3 + $0xec8] sm:$0xff] }
 0x29d   : > { %v1603_v41 = vld [vmem:[#allocation3 + $0xee8] sm:$0xff] }
 0x29e   : > { %9907 = vmatpush1.bf16.msra.mxu1 %v9906_v52  ;;  %10035 = vmatpush1.bf16.msra.mxu0 %v10034_v53  ;;  %v1575_v52 = vld [vmem:[#allocation3 + $0xe08] sm:$0xff]  ;;  %v13138_v53 = vsub.s32 2, %v12937_v2  ;;  %v9940_v51 = vpack.c.bf16 %v1603_v41, %v1599_v38  ;;  %v1624_v38 = vld [vmem:[#allocation3 + $0xf90] sm:$0xff] }
 0x29f   : > { %9909 = vmatprep.subr.bf16.mxu1 %v9908_v56  ;;  %10037 = vmatprep.subr.bf16.mxu0 %v10036_v57  ;;  %v1581_v56 = vld [vmem:[#allocation3 + $0xe38] sm:$0xff]  ;;  %v13141_v57 = vsub.s32 3, %v12937_v2  ;;  %v9928_v35 = vpack.c.bf16 %v1579_v54, %v1575_v52  ;;  %v1600_v54 = vld [vmem:[#allocation3 + $0xed0] sm:$0xff]  ;;  %v1631_v41 = vld [vmem:[#allocation3 + $0xfc8] sm:$0xff] }
 0x2a0   : > { %v10056_v42 = vpack.c.bf16 %v1581_v56, %v1577_v55  ;;  %v13145_v19 = vrot.slane %v13118_v50, %v13138_v53  ;;  %v1585_v2 = vld [vmem:[#allocation3 + $0xe58] sm:$0xff]  ;;  %v1604_v55 = vld [vmem:[#allocation3 + $0xef0] sm:$0xff]  ;;  %v1607_v56 = vld [vmem:[#allocation3 + $0xf08] sm:$0xff] }
 0x2a1   : > { %v931_v0 = vrot.slane %v13118_v50, %v13141_v57  ;;  %v1597_v50 = vld [vmem:[#allocation3 + $0xeb8] sm:$0xff] }
 0x2a2   : > { %9911 = vmatpush1.bf16.msra.mxu1 %v9910_v61  ;;  %10039 = vmatpush1.bf16.msra.mxu0 %v10038_v1  ;;  %v1576_v61 = vld [vmem:[#allocation3 + $0xe10] sm:$0xff]  ;;  %v10064_v34 = vpack.c.bf16 %v1597_v50, %v1593_v20 }
 0x2a3   : > { %9913 = vmatprep.subr.bf16.mxu1 %v9912_v29  ;;  %10041 = vmatprep.subr.bf16.mxu0 %v10040_v63  ;;  %v1580_v1 = vld [vmem:[#allocation3 + $0xe30] sm:$0xff]  ;;  %v1587_v29 = vld [vmem:[#allocation3 + $0xe68] sm:$0xff]  ;;  %v1589_v63 = vld [vmem:[#allocation3 + $0xe78] sm:$0xff] }
 0x2a4   : > { %v10058_v6 = vpack.c.bf16 %v1580_v1, %v1576_v61  ;;  %v1606_v61 = vld [vmem:[#allocation3 + $0xf00] sm:$0xff]  ;;  %v1616_v20 = vld [vmem:[#allocation3 + $0xf50] sm:$0xff] }
 0x2a5   : > { %v1610_v1 = vld [vmem:[#allocation3 + $0xf20] sm:$0xff]  ;;  %v1620_v50 = vld [vmem:[#allocation3 + $0xf70] sm:$0xff] }
 0x2a6   : > { %9915 = vmatpush1.bf16.msra.mxu1 %v9914_v11  ;;  %10043 = vmatpush1.bf16.msra.mxu0 %v10042_v12  ;;  %v9932_v11 = vpack.c.bf16 %v1587_v29, %v1583_v62  ;;  %v10060_v12 = vpack.c.bf16 %v1589_v63, %v1585_v2  ;;  %v1608_v62 = vld [vmem:[#allocation3 + $0xf10] sm:$0xff] }
 0x2a7   : > { %9917 = vmatprep.subr.bf16.mxu1 %v9916_v15  ;;  %10045 = vmatprep.subr.bf16.mxu0 %v10044_v40  ;;  %v1591_v15 = vld [vmem:[#allocation3 + $0xe88] sm:$0xff]  ;;  %v1612_v63 = vld [vmem:[#allocation3 + $0xf30] sm:$0xff] }
 0x2aa   : > { %9919 = vmatpush1.bf16.msra.mxu1 %v9918_v25  ;;  %10047 = vmatpush1.bf16.msra.mxu0 %v10046_v26  ;;  %v10062_v25 = vpack.c.bf16 %v1588_v14, %v1584_v13  ;;  %v1590_v26 = vld [vmem:[#allocation3 + $0xe80] sm:$0xff]  ;;  %v10074_v13 = vpack.c.bf16 %v1612_v63, %v1608_v62 }
 0x2ab   : > { %9921 = vmatprep.subr.bf16.mxu1 %v9920_v32  ;;  %10049 = vmatprep.subr.bf16.mxu0 %v10048_v33  ;;  %v9936_v33 = vpack.c.bf16 %v1595_v17, %v1591_v15  ;;  %v9938_v46 = vpack.c.bf16 %v1594_v28, %v1590_v26  ;;  %v1614_v14 = vld [vmem:[#allocation3 + $0xf40] sm:$0xff]  ;;  %v10076_v17 = vpack.c.bf16 %v1621_v8, %v1617_v7  ;;  %v1131_v7 = vld [vmem:[#allocation3 + $0x30] sm:$0xff]  ;;  %v1134_v8 = vld [vmem:[#allocation3 + $0x48] sm:$0xff] }
 0x2ac   : > { %v1618_v15 = vld [vmem:[#allocation3 + $0xf60] sm:$0xff]  ;;  %v10078_v28 = vpack.c.bf16 %v1620_v50, %v1616_v20 }
 0x2ad   : > { %v9950_v26 = vpack.c.bf16 %v1618_v15, %v1614_v14  ;;  %v1129_v63 = vld [vmem:[#allocation3 + $0x20] sm:$0xff]  ;;  %v1140_v14 = vld [vmem:[#allocation3 + $0x78] sm:$0xff] }
 0x2ae   : > { %9923 = vmatpush1.bf16.msra.mxu1 %v9922_v43  ;;  %10051 = vmatpush1.bf16.msra.mxu0 %v10050_v44  ;;  %v1601_v43 = vld [vmem:[#allocation3 + $0xed8] sm:$0xff]  ;;  %v1137_v20 = vld [vmem:[#allocation3 + $0x60] sm:$0xff] }
 0x2af   : > { %9925 = vmatprep.subr.bf16.mxu1 %v9924_v47  ;;  %10053 = vmatprep.subr.bf16.mxu0 %v10052_v48  ;;  %v1605_v44 = vld [vmem:[#allocation3 + $0xef8] sm:$0xff]  ;;  %v10066_v47 = vpack.c.bf16 %v1596_v37, %v1592_v36  ;;  %v1598_v48 = vld [vmem:[#allocation3 + $0xec0] sm:$0xff] }
 0x2b0   : > { %v10068_v52 = vpack.c.bf16 %v1605_v44, %v1601_v43  ;;  %v1635_v43 = vld [vmem:[#allocation3 + $0xfe8] sm:$0xff]  ;;  %v1633_v44 = vld [vmem:[#allocation3 + $0xfd8] sm:$0xff] }
 0x2b2   : > { %9927 = vmatpush1.bf16.msra.mxu1 %v9926_v18  ;;  %10055 = vmatpush1.bf16.msra.mxu0 %v10054_v58  ;;  %v1611_v18 = vld [vmem:[#allocation3 + $0xf28] sm:$0xff]  ;;  %v1609_v58 = vld [vmem:[#allocation3 + $0xf18] sm:$0xff] }
 0x2b3   : > { %v1086_v10 = vpop.f32.mrb[4].mxu1  ;;  %9929 = vmatprep.subr.bf16.mxu1 %v9928_v35  ;;  %10057 = vmatprep.subr.bf16.mxu0 %v10056_v42  ;;  %v9942_v35 = vpack.c.bf16 %v1602_v49, %v1598_v48  ;;  %v10070_v42 = vpack.c.bf16 %v1604_v55, %v1600_v54  ;;  %v9944_v29 = vpack.c.bf16 %v1611_v18, %v1607_v56  ;;  %v1630_v49 = vld [vmem:[#allocation3 + $0xfc0] sm:$0xff]  ;;  %v1632_v55 = vld [vmem:[#allocation3 + $0xfd0] sm:$0xff]  ;;  %v1126_v18 = vld [vmem:[#allocation3 + $0x8] sm:$0xff] }
 0x2b4   : > { %v1087_v40 = vadd.f32 %v1086_v10, %v13145_v19  ;;  %v1088_v16 = vpop.f32.mrb[5].mxu1  ;;  %v10072_v2 = vpack.c.bf16 %v1613_v24, %v1609_v58  ;;  %v1636_v56 = vld [vmem:[#allocation3 + $0xff0] sm:$0xff]  ;;  %v1130_v58 = vld [vmem:[#allocation3 + $0x28] sm:$0xff]  ;;  %v1128_v24 = vld [vmem:[#allocation3 + $0x18] sm:$0xff] }
 0x2b5   : > { %v1089_v21 = vadd.f32 %v1088_v16, %v931_v0  ;;  %v10088_v62 = vpack.c.bf16 %v1130_v58, %v1126_v18  ;;  %v1153_v18 = vld [vmem:[#allocation3 + $0xe0] sm:$0xff] }
 0x2b6   : > { %v1099_v22 = vmax.f32 %v1087_v40, 0.0  ;;  %9931 = vmatpush1.bf16.msra.mxu1 %v9930_v4  ;;  %10059 = vmatpush1.bf16.msra.mxu0 %v10058_v6  ;;  %v1619_v4 = vld [vmem:[#allocation3 + $0xf68] sm:$0xff] }
 0x2b7   : > { %v13150_v30 = vmax.f32 %v1089_v21, 0.0  ;;  %v13152_v32 = vpop.f32.mrb[6].mxu1  ;;  %9933 = vmatprep.subr.bf16.mxu1 %v9932_v11  ;;  %10061 = vmatprep.subr.bf16.mxu0 %v10060_v12  ;;  %v9946_v12 = vpack.c.bf16 %v1610_v1, %v1606_v61  ;;  %v1623_v21 = vld [vmem:[#allocation3 + $0xf88] sm:$0xff]  ;;  %v1124_v1 = vld [vmem:[#allocation2 + $0x58] sm:$0x1] }
 0x2b8   : > { %1107 = vst [vmem:[#allocation2 + $0x10] sm:$0xff] %v1099_v22  ;;  %v1094_v39 = vpop.f32.mrb[7].mxu1  ;;  %v1627_v22 = vld [vmem:[#allocation3 + $0xfa8] sm:$0xff] }
 0x2b9   : > { %1108 = vst [vmem:[#allocation2 + $0x18] sm:$0xff] %v13150_v30  ;;  %v1095_v45 = vadd.f32 %v1094_v39, %v931_v0  ;;  %v1615_v0 = vld [vmem:[#allocation3 + $0xf48] sm:$0xff]  ;;  %v9952_v36 = vpack.c.bf16 %v1627_v22, %v1623_v21  ;;  %v1628_v39 = vld [vmem:[#allocation3 + $0xfb0] sm:$0xff] }
 0x2ba   : > { %9935 = vmatpush1.bf16.msra.mxu1 %v9934_v23  ;;  %10063 = vmatpush1.bf16.msra.mxu0 %v10062_v25  ;;  %v9948_v16 = vpack.c.bf16 %v1619_v4, %v1615_v0  ;;  %v1625_v23 = vld [vmem:[#allocation3 + $0xf98] sm:$0xff]  ;;  %v10082_v48 = vpack.c.bf16 %v1628_v39, %v1624_v38  ;;  %v1123_v0 = vld [vmem:[#allocation2 + $0x50] sm:$0x1] }
 0x2bb   : > { %9937 = vmatprep.subr.bf16.mxu1 %v9936_v33  ;;  %10065 = vmatprep.subr.bf16.mxu0 %v10064_v34  ;;  %v13155_v27 = vmax.f32 %v1095_v45, 0.0  ;;  %v1629_v25 = vld [vmem:[#allocation3 + $0xfb8] sm:$0xff]  ;;  %v1622_v33 = vld [vmem:[#allocation3 + $0xf80] sm:$0xff]  ;;  %v1666_v21 = vrot.slane %v1123_v0, 1 }
 0x2bc   : > { %v1626_v34 = vld [vmem:[#allocation3 + $0xfa0] sm:$0xff]  ;;  %v10080_v37 = vpack.c.bf16 %v1629_v25, %v1625_v23  ;;  %v1637_v45 = vld [vmem:[#allocation3 + $0xff8] sm:$0xff]  ;;  %v1135_v25 = vld [vmem:[#allocation3 + $0x50] sm:$0xff] }
 0x2bd   : > { %v1660_v11 = vrot.slane %v13155_v27, 1  ;;  %v10084_v54 = vpack.c.bf16 %v1637_v45, %v1633_v44 }
 0x2be   : > { %9939 = vmatpush1.bf16.msra.mxu1 %v9938_v46  ;;  %10067 = vmatpush1.bf16.msra.mxu0 %v10066_v47  ;;  %v1093_v46 = vadd.f32 %v13152_v32, %v13145_v19  ;;  %v9954_v47 = vpack.c.bf16 %v1626_v34, %v1622_v33  ;;  %v10086_v32 = vpack.c.bf16 %v1636_v56, %v1632_v55  ;;  %v1146_v34 = vld [vmem:[#allocation3 + $0xa8] sm:$0xff]  ;;  %v1149_v56 = vld [vmem:[#allocation3 + $0xc0] sm:$0xff] }
 0x2bf   : > { %9941 = vmatprep.subr.bf16.mxu1 %v9940_v51  ;;  %10069 = vmatprep.subr.bf16.mxu0 %v10068_v52  ;;  %v1634_v51 = vld [vmem:[#allocation3 + $0xfe0] sm:$0xff]  ;;  %v9956_v52 = vpack.c.bf16 %v1635_v43, %v1631_v41 }
 0x2c0   : > { %v1116_v6 = vld [vmem:[#allocation2 + $0x18] sm:$0xfe]  ;;  %v13163_v61 = vmax.f32 %v1093_v46, 0.0  ;;  %v9958_v19 = vpack.c.bf16 %v1634_v51, %v1630_v49  ;;  %v1141_v41 = vld [vmem:[#allocation3 + $0x80] sm:$0xff]  ;;  %v1154_v49 = vld [vmem:[#allocation3 + $0xe8] sm:$0xff] }
 0x2c1   : > { %v1659_v10 = vrot.slane %v1116_v6, 1  ;;  %v1127_v6 = vld [vmem:[#allocation3 + $0x10] sm:$0xff]  ;;  %v1145_v43 = vld [vmem:[#allocation3 + $0xa0] sm:$0xff]  ;;  %v1152_v51 = vld [vmem:[#allocation3 + $0xd8] sm:$0xff] }
 0x2c2   : > { %9943 = vmatpush1.bf16.msra.mxu1 %v9942_v35  ;;  %10071 = vmatpush1.bf16.msra.mxu0 %v10070_v42  ;;  %v1132_v35 = vld [vmem:[#allocation3 + $0x38] sm:$0xff]  ;;  %v1115_v42 = vld [vmem:[#allocation2 + $0x10] sm:$0xfe]  ;;  %v1657_v15 = vrot.slane %v13163_v61, 1 }
 0x2c3   : > { %v1661_v40 = vsel %vm608_vm0, %v1659_v10, %v1660_v11  ;;  %9945 = vmatprep.subr.bf16.mxu1 %v9944_v29  ;;  %10073 = vmatprep.subr.bf16.mxu0 %v10072_v2  ;;  %v10216_v29 = vpack.c.bf16 %v1132_v35, %v1128_v24  ;;  %v1125_v2 = vld [vmem:[#allocation3] sm:$0xff]  ;;  %v1656_v4 = vrot.slane %v1115_v42, 1  ;;  %v1668_v10 = vrot.slane %v1124_v1, 1  ;;  %v1151_v35 = vld [vmem:[#allocation3 + $0xd0] sm:$0xff]  ;;  %v1160_v1 = vld [vmem:[#allocation3 + $0x118] sm:$0xff] }
 0x2c4   : > { %1819 = vmatprep.mubr.f32.mxu1 %v1661_v40  ;;  %1973 = vmatprep.mubr.f32.mxu0 %v1661_v40  ;;  %v10090_v40 = vpack.c.bf16 %v1129_v63, %v1125_v2  ;;  %v1667_v44 = vsel %vm608_vm0, %v1657_v15, %v1666_v21  ;;  %v1155_v42 = vld [vmem:[#allocation3 + $0xf0] sm:$0xff]  ;;  %v1157_v2 = vld [vmem:[#allocation3 + $0x100] sm:$0xff] }
 0x2c5   : > { %v1658_v50 = vsel %vm608_vm0, %v1656_v4, %v1657_v15  ;;  %v1669_v33 = vsel %vm608_vm0, %v1660_v11, %v1668_v10  ;;  %v1150_v11 = vld [vmem:[#allocation3 + $0xc8] sm:$0xff]  ;;  %v1161_v63 = vld [vmem:[#allocation3 + $0x120] sm:$0xff]  ;;  %v1171_v21 = vld [vmem:[#allocation3 + $0x170] sm:$0xff] }
 0x2c6   : > { %9947 = vmatpush1.bf16.msra.mxu1 %v9946_v12  ;;  %10075 = vmatpush1.bf16.msra.mxu0 %v10074_v13  ;;  %v1138_v12 = vld [vmem:[#allocation3 + $0x68] sm:$0xff]  ;;  %v1136_v13 = vld [vmem:[#allocation3 + $0x58] sm:$0xff]  ;;  %v10100_v58 = vpack.c.bf16 %v1154_v49, %v1150_v11  ;;  %v1181_v11 = vld [vmem:[#allocation3 + $0x1c0] sm:$0xff] }
 0x2c7   : > { %9949 = vmatprep.subr.bf16.mxu1 %v9948_v16  ;;  %10077 = vmatprep.subr.bf16.mxu0 %v10076_v17  ;;  %v10218_v16 = vpack.c.bf16 %v1131_v7, %v1127_v6  ;;  %v1133_v17 = vld [vmem:[#allocation3 + $0x40] sm:$0xff]  ;;  %v10092_v22 = vpack.c.bf16 %v1138_v12, %v1134_v8  ;;  %v10220_v23 = vpack.c.bf16 %v1140_v14, %v1136_v13  ;;  %v1159_v6 = vld [vmem:[#allocation3 + $0x110] sm:$0xff]  ;;  %v1166_v8 = vld [vmem:[#allocation3 + $0x148] sm:$0xff] }
 0x2c8   : > { %v10094_v38 = vpack.c.bf16 %v1137_v20, %v1133_v17  ;;  %v1163_v7 = vld [vmem:[#allocation3 + $0x130] sm:$0xff]  ;;  %v1170_v10 = vld [vmem:[#allocation3 + $0x168] sm:$0xff]  ;;  %v1168_v12 = vld [vmem:[#allocation3 + $0x158] sm:$0xff]  ;;  %v10106_v14 = vpack.c.bf16 %v1161_v63, %v1157_v2 }
 0x2c9   : > { %v1172_v13 = vld [vmem:[#allocation3 + $0x178] sm:$0xff]  ;;  %v10234_v15 = vpack.c.bf16 %v1163_v7, %v1159_v6  ;;  %v10108_v17 = vpack.c.bf16 %v1170_v10, %v1166_v8  ;;  %v1185_v49 = vld [vmem:[#allocation3 + $0x1e0] sm:$0xff]  ;;  %v1198_v2 = vld [vmem:[#allocation3 + $0x248] sm:$0xff] }
 0x2ca   : > { %9951 = vmatpush1.bf16.msra.mxu1 %v9950_v26  ;;  %10079 = vmatpush1.bf16.msra.mxu0 %v10078_v28  ;;  %v1139_v26 = vld [vmem:[#allocation3 + $0x70] sm:$0xff]  ;;  %v1142_v28 = vld [vmem:[#allocation3 + $0x88] sm:$0xff]  ;;  %v10236_v20 = vpack.c.bf16 %v1172_v13, %v1168_v12  ;;  %v1197_v8 = vld [vmem:[#allocation3 + $0x240] sm:$0xff] }
 0x2cb   : > { %9953 = vmatprep.subr.bf16.mxu1 %v9952_v36  ;;  %10081 = vmatprep.subr.bf16.mxu0 %v10080_v37  ;;  %v1144_v36 = vld [vmem:[#allocation3 + $0x98] sm:$0xff]  ;;  %v10222_v39 = vpack.c.bf16 %v1139_v26, %v1135_v25  ;;  %v10096_v45 = vpack.c.bf16 %v1146_v34, %v1142_v28  ;;  %v1173_v34 = vld [vmem:[#allocation3 + $0x180] sm:$0xff]  ;;  %v1202_v63 = vld [vmem:[#allocation3 + $0x268] sm:$0xff] }
 0x2cc   : > { %v1148_v37 = vld [vmem:[#allocation3 + $0xb8] sm:$0xff]  ;;  %v1201_v10 = vld [vmem:[#allocation3 + $0x260] sm:$0xff]  ;;  %v10124_v12 = vpack.c.bf16 %v1202_v63, %v1198_v2 }
 0x2cd   : > { %v10224_v46 = vpack.c.bf16 %v1148_v37, %v1144_v36  ;;  %v1176_v25 = vld [vmem:[#allocation3 + $0x198] sm:$0xff]  ;;  %v1177_v36 = vld [vmem:[#allocation3 + $0x1a0] sm:$0xff] }
 0x2ce   : > { %9955 = vmatpush1.bf16.msra.mxu1 %v9954_v47  ;;  %10083 = vmatpush1.bf16.msra.mxu0 %v10082_v48  ;;  %v1143_v47 = vld [vmem:[#allocation3 + $0x90] sm:$0xff]  ;;  %v1180_v26 = vld [vmem:[#allocation3 + $0x1b8] sm:$0xff]  ;;  %v1229_v2 = vld [vmem:[#allocation3 + $0x340] sm:$0xff] }
 0x2cf   : > { %9957 = vmatprep.subr.bf16.mxu1 %v9956_v52  ;;  %10085 = vmatprep.subr.bf16.mxu0 %v10084_v54  ;;  %v1147_v48 = vld [vmem:[#allocation3 + $0xb0] sm:$0xff]  ;;  %v1156_v52 = vld [vmem:[#allocation3 + $0xf8] sm:$0xff]  ;;  %v10098_v54 = vpack.c.bf16 %v1145_v43, %v1141_v41  ;;  %v1182_v43 = vld [vmem:[#allocation3 + $0x1c8] sm:$0xff] }
 0x2d0   : > { %v10226_v55 = vpack.c.bf16 %v1147_v48, %v1143_v47  ;;  %v10228_v24 = vpack.c.bf16 %v1156_v52, %v1152_v51  ;;  %v1179_v41 = vld [vmem:[#allocation3 + $0x1b0] sm:$0xff]  ;;  %v10114_v47 = vpack.c.bf16 %v1177_v36, %v1173_v34  ;;  %v1214_v34 = vld [vmem:[#allocation3 + $0x2c8] sm:$0xff]  ;;  %v1233_v63 = vld [vmem:[#allocation3 + $0x360] sm:$0xff] }
 0x2d1   : > { %v1218_v36 = vld [vmem:[#allocation3 + $0x2e8] sm:$0xff] }
 0x2d2   : > { %9959 = vmatpush1.bf16.msra.mxu1 %v9958_v19  ;;  %10087 = vmatpush1.bf16.msra.mxu0 %v10086_v32  ;;  %v1158_v19 = vld [vmem:[#allocation3 + $0x108] sm:$0xff] }
 0x2d3   : > { %10089 = vmatprep.subr.bf16.mxu1 %v10088_v62  ;;  %10217 = vmatprep.subr.bf16.mxu0 %v10216_v29  ;;  %v1162_v32 = vld [vmem:[#allocation3 + $0x128] sm:$0xff]  ;;  %v1164_v62 = vld [vmem:[#allocation3 + $0x138] sm:$0xff]  ;;  %v10102_v29 = vpack.c.bf16 %v1153_v18, %v1149_v56 }
 0x2d4   : > { %v10104_v0 = vpack.c.bf16 %v1162_v32, %v1158_v19  ;;  %v10232_v4 = vpack.c.bf16 %v1164_v62, %v1160_v1  ;;  %v1190_v56 = vld [vmem:[#allocation3 + $0x208] sm:$0xff]  ;;  %v1189_v19 = vld [vmem:[#allocation3 + $0x200] sm:$0xff] }
 0x2d5   : > { %1820 = vmatmul.mubr.f32.vlgmr.msra.gmra.mrb[8].mxu1 %v1658_v50  ;;  %1974 = vmatmul.mubr.f32.vlgmr.msra.gmra.mrb[4].mxu0 %v1658_v50  ;;  %v1167_v50 = vld [vmem:[#allocation3 + $0x150] sm:$0xff]  ;;  %v1194_v18 = vld [vmem:[#allocation3 + $0x228] sm:$0xff]  ;;  %v1193_v32 = vld [vmem:[#allocation3 + $0x220] sm:$0xff] }
 0x2d6   : > { %1825 = vmatprep.mubr.f32.mxu1 %v1669_v33  ;;  %1979 = vmatprep.mubr.f32.mxu0 %v1669_v33  ;;  %v10238_v33 = vpack.c.bf16 %v1171_v21, %v1167_v50  ;;  %v10120_v1 = vpack.c.bf16 %v1194_v18, %v1190_v56  ;;  %v10122_v6 = vpack.c.bf16 %v1193_v32, %v1189_v19  ;;  %v1221_v56 = vld [vmem:[#allocation3 + $0x300] sm:$0xff]  ;;  %v1230_v19 = vld [vmem:[#allocation3 + $0x348] sm:$0xff] }
 0x2d7   : > { %10091 = vmatpush1.bf16.msra.mxu1 %v10090_v40  ;;  %10219 = vmatpush1.bf16.msra.mxu0 %v10218_v16  ;;  %v1165_v40 = vld [vmem:[#allocation3 + $0x140] sm:$0xff]  ;;  %v10126_v50 = vpack.c.bf16 %v1201_v10, %v1197_v8  ;;  %v1234_v32 = vld [vmem:[#allocation3 + $0x368] sm:$0xff] }
 0x2d8   : > { %10093 = vmatprep.subr.bf16.mxu1 %v10092_v22  ;;  %10221 = vmatprep.subr.bf16.mxu0 %v10220_v23  ;;  %v1169_v16 = vld [vmem:[#allocation3 + $0x160] sm:$0xff]  ;;  %v1174_v22 = vld [vmem:[#allocation3 + $0x188] sm:$0xff] }
 0x2d9   : > { %1826 = vmatmul.mubr.f32.gmra.mrb[10].mxu1 %v1667_v44  ;;  %1980 = vmatmul.mubr.f32.gmra.mrb[6].mxu0 %v1667_v44  ;;  %v1178_v23 = vld [vmem:[#allocation3 + $0x1a8] sm:$0xff]  ;;  %v10110_v28 = vpack.c.bf16 %v1169_v16, %v1165_v40  ;;  %v1225_v18 = vld [vmem:[#allocation3 + $0x320] sm:$0xff] }
 0x2da   : > { %2050 = vmatprep.mubr.f32.mxu1 %v13124_v9  ;;  %2204 = vmatprep.mubr.f32.mxu0 %v13124_v9  ;;  %v10230_v9 = vpack.c.bf16 %v1155_v42, %v1151_v35  ;;  %v10112_v37 = vpack.c.bf16 %v1178_v23, %v1174_v22  ;;  %v1186_v44 = vld [vmem:[#allocation3 + $0x1e8] sm:$0xff]  ;;  %v10118_v35 = vpack.c.bf16 %v1185_v49, %v1181_v11  ;;  %v1205_v22 = vld [vmem:[#allocation3 + $0x280] sm:$0xff] }
 0x2db   : > { %10095 = vmatpush1.bf16.msra.mxu1 %v10094_v38  ;;  %10223 = vmatpush1.bf16.msra.mxu0 %v10222_v39  ;;  %v10240_v38 = vpack.c.bf16 %v1180_v26, %v1176_v25  ;;  %v1175_v39 = vld [vmem:[#allocation3 + $0x190] sm:$0xff]  ;;  %v10116_v51 = vpack.c.bf16 %v1186_v44, %v1182_v43  ;;  %v1206_v40 = vld [vmem:[#allocation3 + $0x288] sm:$0xff]  ;;  %v1209_v23 = vld [vmem:[#allocation3 + $0x2a0] sm:$0xff] }
 0x2dc   : > { %10097 = vmatprep.subr.bf16.mxu1 %v10096_v45  ;;  %10225 = vmatprep.subr.bf16.mxu0 %v10224_v46  ;;  %v1184_v45 = vld [vmem:[#allocation3 + $0x1d8] sm:$0xff]  ;;  %v10242_v48 = vpack.c.bf16 %v1179_v41, %v1175_v39  ;;  %v1210_v16 = vld [vmem:[#allocation3 + $0x2a8] sm:$0xff]  ;;  %v10130_v39 = vpack.c.bf16 %v1209_v23, %v1205_v22  ;;  %v1213_v43 = vld [vmem:[#allocation3 + $0x2c0] sm:$0xff] }
 0x2dd   : > { %v1188_v46 = vld [vmem:[#allocation3 + $0x1f8] sm:$0xff]  ;;  %v10128_v25 = vpack.c.bf16 %v1210_v16, %v1206_v40  ;;  %v1217_v44 = vld [vmem:[#allocation3 + $0x2e0] sm:$0xff]  ;;  %v1222_v11 = vld [vmem:[#allocation3 + $0x308] sm:$0xff] }
 0x2de   : > { %v10244_v52 = vpack.c.bf16 %v1188_v46, %v1184_v45  ;;  %v10132_v45 = vpack.c.bf16 %v1218_v36, %v1214_v34  ;;  %v1226_v49 = vld [vmem:[#allocation3 + $0x328] sm:$0xff]  ;;  %v1237_v40 = vld [vmem:[#allocation3 + $0x380] sm:$0xff] }
 0x2df   : > { %10099 = vmatpush1.bf16.msra.mxu1 %v10098_v54  ;;  %10227 = vmatpush1.bf16.msra.mxu0 %v10226_v55  ;;  %v1183_v54 = vld [vmem:[#allocation3 + $0x1d0] sm:$0xff]  ;;  %v1238_v8 = vld [vmem:[#allocation3 + $0x388] sm:$0xff]  ;;  %v1241_v16 = vld [vmem:[#allocation3 + $0x3a0] sm:$0xff] }
 0x2e0   : > { %10101 = vmatprep.subr.bf16.mxu1 %v10100_v58  ;;  %10229 = vmatprep.subr.bf16.mxu0 %v10228_v24  ;;  %v1187_v55 = vld [vmem:[#allocation3 + $0x1f0] sm:$0xff]  ;;  %v1192_v58 = vld [vmem:[#allocation3 + $0x218] sm:$0xff]  ;;  %v1242_v10 = vld [vmem:[#allocation3 + $0x3a8] sm:$0xff] }
 0x2e1   : > { %v1196_v24 = vld [vmem:[#allocation3 + $0x238] sm:$0xff]  ;;  %v10246_v42 = vpack.c.bf16 %v1187_v55, %v1183_v54  ;;  %v10134_v54 = vpack.c.bf16 %v1217_v44, %v1213_v43  ;;  %v1246_v22 = vld [vmem:[#allocation3 + $0x3c8] sm:$0xff]  ;;  %v1245_v34 = vld [vmem:[#allocation3 + $0x3c0] sm:$0xff] }
 0x2e2   : > { %v10248_v62 = vpack.c.bf16 %v1196_v24, %v1192_v58  ;;  %v10136_v58 = vpack.c.bf16 %v1226_v49, %v1222_v11  ;;  %v1250_v23 = vld [vmem:[#allocation3 + $0x3e8] sm:$0xff]  ;;  %v1249_v36 = vld [vmem:[#allocation3 + $0x3e0] sm:$0xff] }
 0x2e3   : > { %10103 = vmatpush1.bf16.msra.mxu1 %v10102_v29  ;;  %10231 = vmatpush1.bf16.msra.mxu0 %v10230_v9  ;;  %v1191_v29 = vld [vmem:[#allocation3 + $0x210] sm:$0xff]  ;;  %v1254_v43 = vld [vmem:[#allocation3 + $0x408] sm:$0xff] }
 0x2e4   : > { %10105 = vmatprep.subr.bf16.mxu1 %v10104_v0  ;;  %10233 = vmatprep.subr.bf16.mxu0 %v10232_v4  ;;  %v1195_v9 = vld [vmem:[#allocation3 + $0x230] sm:$0xff]  ;;  %v1200_v0 = vld [vmem:[#allocation3 + $0x258] sm:$0xff]  ;;  %v1258_v44 = vld [vmem:[#allocation3 + $0x428] sm:$0xff] }
 0x2e5   : > { %v1204_v4 = vld [vmem:[#allocation3 + $0x278] sm:$0xff]  ;;  %v10250_v7 = vpack.c.bf16 %v1195_v9, %v1191_v29  ;;  %v10138_v29 = vpack.c.bf16 %v1225_v18, %v1221_v56  ;;  %v10152_v11 = vpack.c.bf16 %v1258_v44, %v1254_v43  ;;  %v1262_v56 = vld [vmem:[#allocation3 + $0x448] sm:$0xff]  ;;  %v1289_v43 = vld [vmem:[#allocation3 + $0x520] sm:$0xff] }
 0x2e6   : > { %v10252_v13 = vpack.c.bf16 %v1204_v4, %v1200_v0  ;;  %v10140_v0 = vpack.c.bf16 %v1234_v32, %v1230_v19  ;;  %v1266_v18 = vld [vmem:[#allocation3 + $0x468] sm:$0xff]  ;;  %v1261_v19 = vld [vmem:[#allocation3 + $0x440] sm:$0xff]  ;;  %v1287_v44 = vld [vmem:[#allocation3 + $0x510] sm:$0xff] }
 0x2e7   : > { %10107 = vmatpush1.bf16.msra.mxu1 %v10106_v14  ;;  %10235 = vmatpush1.bf16.msra.mxu0 %v10234_v15  ;;  %v1199_v14 = vld [vmem:[#allocation3 + $0x250] sm:$0xff]  ;;  %v1265_v32 = vld [vmem:[#allocation3 + $0x460] sm:$0xff] }
 0x2e8   : > { %10109 = vmatprep.subr.bf16.mxu1 %v10108_v17  ;;  %10237 = vmatprep.subr.bf16.mxu0 %v10236_v20  ;;  %v1203_v15 = vld [vmem:[#allocation3 + $0x270] sm:$0xff]  ;;  %v1208_v17 = vld [vmem:[#allocation3 + $0x298] sm:$0xff] }
 0x2e9   : > { %v1212_v20 = vld [vmem:[#allocation3 + $0x2b8] sm:$0xff]  ;;  %v10254_v21 = vpack.c.bf16 %v1203_v15, %v1199_v14  ;;  %v10142_v14 = vpack.c.bf16 %v1233_v63, %v1229_v2  ;;  %v1270_v2 = vld [vmem:[#allocation3 + $0x488] sm:$0xff]  ;;  %v12035_v63 = vld [vmem:[#allocation2] sm:$0xff] }
 0x2ea   : > { %v10256_v26 = vpack.c.bf16 %v1212_v20, %v1208_v17  ;;  %v10144_v17 = vpack.c.bf16 %v1242_v10, %v1238_v8  ;;  %v1269_v10 = vld [vmem:[#allocation3 + $0x480] sm:$0xff] }
 0x2eb   : > { %10111 = vmatpush1.bf16.msra.mxu1 %v10110_v28  ;;  %10239 = vmatpush1.bf16.msra.mxu0 %v10238_v33  ;;  %v1207_v28 = vld [vmem:[#allocation3 + $0x290] sm:$0xff] }
 0x2ec   : > { %10113 = vmatprep.subr.bf16.mxu1 %v10112_v37  ;;  %10241 = vmatprep.subr.bf16.mxu0 %v10240_v38  ;;  %v1211_v33 = vld [vmem:[#allocation3 + $0x2b0] sm:$0xff]  ;;  %v1216_v37 = vld [vmem:[#allocation3 + $0x2d8] sm:$0xff] }
 0x2ed   : > { %v1220_v38 = vld [vmem:[#allocation3 + $0x2f8] sm:$0xff]  ;;  %v10258_v41 = vpack.c.bf16 %v1211_v33, %v1207_v28  ;;  %v10146_v28 = vpack.c.bf16 %v1241_v16, %v1237_v40  ;;  %v1275_v40 = vld [vmem:[#allocation3 + $0x4b0] sm:$0xff]  ;;  %v1278_v16 = vld [vmem:[#allocation3 + $0x4c8] sm:$0xff] }
 0x2ee   : > { %v10260_v46 = vpack.c.bf16 %v1220_v38, %v1216_v37  ;;  %v10148_v37 = vpack.c.bf16 %v1250_v23, %v1246_v22  ;;  %v1277_v23 = vld [vmem:[#allocation3 + $0x4c0] sm:$0xff] }
 0x2ef   : > { %10115 = vmatpush1.bf16.msra.mxu1 %v10114_v47  ;;  %10243 = vmatpush1.bf16.msra.mxu0 %v10242_v48  ;;  %v1215_v47 = vld [vmem:[#allocation3 + $0x2d0] sm:$0xff] }
 0x2f0   : > { %10117 = vmatprep.subr.bf16.mxu1 %v10116_v51  ;;  %10245 = vmatprep.subr.bf16.mxu0 %v10244_v52  ;;  %v1219_v48 = vld [vmem:[#allocation3 + $0x2f0] sm:$0xff]  ;;  %v1224_v51 = vld [vmem:[#allocation3 + $0x318] sm:$0xff] }
 0x2f1   : > { %v1228_v52 = vld [vmem:[#allocation3 + $0x338] sm:$0xff]  ;;  %v10262_v55 = vpack.c.bf16 %v1219_v48, %v1215_v47  ;;  %v10150_v47 = vpack.c.bf16 %v1249_v36, %v1245_v34  ;;  %v1286_v34 = vld [vmem:[#allocation3 + $0x508] sm:$0xff] }
 0x2f2   : > { %v10264_v24 = vpack.c.bf16 %v1228_v52, %v1224_v51  ;;  %v1253_v51 = vld [vmem:[#allocation3 + $0x400] sm:$0xff]  ;;  %v1288_v36 = vld [vmem:[#allocation3 + $0x518] sm:$0xff] }
 0x2f3   : > { %10119 = vmatpush1.bf16.msra.mxu1 %v10118_v35  ;;  %10247 = vmatpush1.bf16.msra.mxu0 %v10246_v42  ;;  %v1223_v35 = vld [vmem:[#allocation3 + $0x310] sm:$0xff]  ;;  %v1257_v52 = vld [vmem:[#allocation3 + $0x420] sm:$0xff] }
 0x2f4   : > { %10121 = vmatprep.subr.bf16.mxu1 %v10120_v1  ;;  %10249 = vmatprep.subr.bf16.mxu0 %v10248_v62  ;;  %v1227_v42 = vld [vmem:[#allocation3 + $0x330] sm:$0xff]  ;;  %v1232_v1 = vld [vmem:[#allocation3 + $0x358] sm:$0xff] }
 0x2f5   : > { %v1236_v62 = vld [vmem:[#allocation3 + $0x378] sm:$0xff]  ;;  %v10266_v9 = vpack.c.bf16 %v1227_v42, %v1223_v35  ;;  %v10154_v35 = vpack.c.bf16 %v1257_v52, %v1253_v51 }
 0x2f6   : > { %v10268_v4 = vpack.c.bf16 %v1236_v62, %v1232_v1  ;;  %v10156_v1 = vpack.c.bf16 %v1266_v18, %v1262_v56  ;;  %v1297_v56 = vld [vmem:[#allocation3 + $0x560] sm:$0xff]  ;;  %v1295_v18 = vld [vmem:[#allocation3 + $0x550] sm:$0xff] }
 0x2f7   : > { %10123 = vmatpush1.bf16.msra.mxu1 %v10122_v6  ;;  %10251 = vmatpush1.bf16.msra.mxu0 %v10250_v7  ;;  %v1231_v6 = vld [vmem:[#allocation3 + $0x350] sm:$0xff] }
 0x2f8   : > { %10125 = vmatprep.subr.bf16.mxu1 %v10124_v12  ;;  %10253 = vmatprep.subr.bf16.mxu0 %v10252_v13  ;;  %v1235_v7 = vld [vmem:[#allocation3 + $0x370] sm:$0xff]  ;;  %v1240_v12 = vld [vmem:[#allocation3 + $0x398] sm:$0xff] }
 0x2f9   : > { %v1244_v13 = vld [vmem:[#allocation3 + $0x3b8] sm:$0xff]  ;;  %v10270_v15 = vpack.c.bf16 %v1235_v7, %v1231_v6  ;;  %v10158_v7 = vpack.c.bf16 %v1265_v32, %v1261_v19 }
 0x2fa   : > { %v10272_v20 = vpack.c.bf16 %v1244_v13, %v1240_v12  ;;  %v1276_v6 = vld [vmem:[#allocation3 + $0x4b8] sm:$0xff]  ;;  %v1273_v12 = vld [vmem:[#allocation3 + $0x4a0] sm:$0xff]  ;;  %v1271_v13 = vld [vmem:[#allocation3 + $0x490] sm:$0xff] }
 0x2fb   : > { %10127 = vmatpush1.bf16.msra.mxu1 %v10126_v50  ;;  %10255 = vmatpush1.bf16.msra.mxu0 %v10254_v21  ;;  %v1239_v50 = vld [vmem:[#allocation3 + $0x390] sm:$0xff]  ;;  %v1304_v19 = vld [vmem:[#allocation3 + $0x598] sm:$0xff] }
 0x2fc   : > { %10129 = vmatprep.subr.bf16.mxu1 %v10128_v25  ;;  %10257 = vmatprep.subr.bf16.mxu0 %v10256_v26  ;;  %v1243_v21 = vld [vmem:[#allocation3 + $0x3b0] sm:$0xff]  ;;  %v1248_v25 = vld [vmem:[#allocation3 + $0x3d8] sm:$0xff] }
 0x2fd   : > { %v1252_v26 = vld [vmem:[#allocation3 + $0x3f8] sm:$0xff]  ;;  %v10274_v33 = vpack.c.bf16 %v1243_v21, %v1239_v50  ;;  %v10290_v21 = vpack.c.bf16 %v1275_v40, %v1271_v13  ;;  %v1313_v40 = vld [vmem:[#allocation3 + $0x5e0] sm:$0xff] }
 0x2fe   : > { %v10276_v38 = vpack.c.bf16 %v1252_v26, %v1248_v25  ;;  %v1284_v50 = vld [vmem:[#allocation3 + $0x4f8] sm:$0xff]  ;;  %v1281_v25 = vld [vmem:[#allocation3 + $0x4e0] sm:$0xff]  ;;  %v1279_v26 = vld [vmem:[#allocation3 + $0x4d0] sm:$0xff] }
 0x2ff   : > { %10131 = vmatpush1.bf16.msra.mxu1 %v10130_v39  ;;  %10259 = vmatpush1.bf16.msra.mxu0 %v10258_v41  ;;  %v1247_v39 = vld [vmem:[#allocation3 + $0x3d0] sm:$0xff]  ;;  %v1308_v32 = vld [vmem:[#allocation3 + $0x5b8] sm:$0xff] }
 0x300   : > { %10133 = vmatprep.subr.bf16.mxu1 %v10132_v45  ;;  %10261 = vmatprep.subr.bf16.mxu0 %v10260_v46  ;;  %v1251_v41 = vld [vmem:[#allocation3 + $0x3f0] sm:$0xff]  ;;  %v1256_v45 = vld [vmem:[#allocation3 + $0x418] sm:$0xff] }
 0x301   : > { %v1260_v46 = vld [vmem:[#allocation3 + $0x438] sm:$0xff]  ;;  %v10278_v48 = vpack.c.bf16 %v1251_v41, %v1247_v39 }
 0x302   : > { %v10280_v49 = vpack.c.bf16 %v1260_v46, %v1256_v45  ;;  %v1291_v46 = vld [vmem:[#allocation3 + $0x530] sm:$0xff] }
 0x303   : > { %10135 = vmatpush1.bf16.msra.mxu1 %v10134_v54  ;;  %10263 = vmatpush1.bf16.msra.mxu0 %v10262_v55  ;;  %v1255_v54 = vld [vmem:[#allocation3 + $0x410] sm:$0xff]  ;;  %v10298_v52 = vpack.c.bf16 %v1291_v46, %v1287_v44  ;;  %v1329_v46 = vld [vmem:[#allocation3 + $0x660] sm:$0xff] }
 0x304   : > { %10137 = vmatprep.subr.bf16.mxu1 %v10136_v58  ;;  %10265 = vmatprep.subr.bf16.mxu0 %v10264_v24  ;;  %v1259_v55 = vld [vmem:[#allocation3 + $0x430] sm:$0xff]  ;;  %v1264_v58 = vld [vmem:[#allocation3 + $0x458] sm:$0xff] }
 0x305   : > { %v1268_v24 = vld [vmem:[#allocation3 + $0x478] sm:$0xff]  ;;  %v10282_v42 = vpack.c.bf16 %v1259_v55, %v1255_v54  ;;  %v1293_v55 = vld [vmem:[#allocation3 + $0x540] sm:$0xff] }
 0x306   : > { %v10284_v62 = vpack.c.bf16 %v1268_v24, %v1264_v58  ;;  %v1299_v24 = vld [vmem:[#allocation3 + $0x570] sm:$0xff] }
 0x307   : > { %10139 = vmatpush1.bf16.msra.mxu1 %v10138_v29  ;;  %10267 = vmatpush1.bf16.msra.mxu0 %v10266_v9  ;;  %v1263_v29 = vld [vmem:[#allocation3 + $0x450] sm:$0xff] }
 0x308   : > { %10141 = vmatprep.subr.bf16.mxu1 %v10140_v0  ;;  %10269 = vmatprep.subr.bf16.mxu0 %v10268_v4  ;;  %v1267_v9 = vld [vmem:[#allocation3 + $0x470] sm:$0xff]  ;;  %v1274_v0 = vld [vmem:[#allocation3 + $0x4a8] sm:$0xff]  ;;  %v1272_v4 = vld [vmem:[#allocation3 + $0x498] sm:$0xff] }
 0x309   : > { %v10286_v8 = vpack.c.bf16 %v1267_v9, %v1263_v29  ;;  %v1301_v9 = vld [vmem:[#allocation3 + $0x580] sm:$0xff] }
 0x30b   : > { %10143 = vmatpush1.bf16.msra.mxu1 %v10142_v14  ;;  %10271 = vmatpush1.bf16.msra.mxu0 %v10270_v15  ;;  %v10160_v14 = vpack.c.bf16 %v1274_v0, %v1270_v2  ;;  %v10288_v15 = vpack.c.bf16 %v1276_v6, %v1272_v4  ;;  %v1305_v2 = vld [vmem:[#allocation3 + $0x5a0] sm:$0xff]  ;;  %v10304_v0 = vpack.c.bf16 %v1308_v32, %v1304_v19  ;;  %v1307_v4 = vld [vmem:[#allocation3 + $0x5b0] sm:$0xff]  ;;  %v1310_v6 = vld [vmem:[#allocation3 + $0x5c8] sm:$0xff] }
 0x30c   : > { %10145 = vmatprep.subr.bf16.mxu1 %v10144_v17  ;;  %10273 = vmatprep.subr.bf16.mxu0 %v10272_v20  ;;  %v1282_v17 = vld [vmem:[#allocation3 + $0x4e8] sm:$0xff]  ;;  %v1280_v20 = vld [vmem:[#allocation3 + $0x4d8] sm:$0xff]  ;;  %v1339_v19 = vld [vmem:[#allocation3 + $0x6b0] sm:$0xff] }
 0x30d   : > { %v10164_v22 = vpack.c.bf16 %v1282_v17, %v1278_v16  ;;  %v1311_v16 = vld [vmem:[#allocation3 + $0x5d0] sm:$0xff]  ;;  %v1342_v32 = vld [vmem:[#allocation3 + $0x6c8] sm:$0xff] }
 0x30f   : > { %10147 = vmatpush1.bf16.msra.mxu1 %v10146_v28  ;;  %10275 = vmatpush1.bf16.msra.mxu0 %v10274_v33  ;;  %v10292_v28 = vpack.c.bf16 %v1284_v50, %v1280_v20  ;;  %v1283_v33 = vld [vmem:[#allocation3 + $0x4f0] sm:$0xff]  ;;  %v1318_v50 = vld [vmem:[#allocation3 + $0x608] sm:$0xff] }
 0x310   : > { %10149 = vmatprep.subr.bf16.mxu1 %v10148_v37  ;;  %10277 = vmatprep.subr.bf16.mxu0 %v10276_v38  ;;  %v1292_v37 = vld [vmem:[#allocation3 + $0x538] sm:$0xff]  ;;  %v10166_v38 = vpack.c.bf16 %v1281_v25, %v1277_v23  ;;  %v10294_v39 = vpack.c.bf16 %v1283_v33, %v1279_v26  ;;  %v1315_v20 = vld [vmem:[#allocation3 + $0x5f0] sm:$0xff]  ;;  %v1321_v33 = vld [vmem:[#allocation3 + $0x620] sm:$0xff] }
 0x311   : > { %v10296_v45 = vpack.c.bf16 %v1292_v37, %v1288_v36  ;;  %v10310_v25 = vpack.c.bf16 %v1315_v20, %v1311_v16  ;;  %v1323_v36 = vld [vmem:[#allocation3 + $0x630] sm:$0xff]  ;;  %v1326_v37 = vld [vmem:[#allocation3 + $0x648] sm:$0xff]  ;;  %v1353_v20 = vld [vmem:[#allocation3 + $0x720] sm:$0xff] }
 0x313   : > { %10151 = vmatpush1.bf16.msra.mxu1 %v10150_v47  ;;  %10279 = vmatpush1.bf16.msra.mxu0 %v10278_v48  ;;  %v1294_v47 = vld [vmem:[#allocation3 + $0x548] sm:$0xff] }
 0x314   : > { %10153 = vmatprep.subr.bf16.mxu1 %v10152_v11  ;;  %10281 = vmatprep.subr.bf16.mxu0 %v10280_v49  ;;  %v1298_v48 = vld [vmem:[#allocation3 + $0x568] sm:$0xff]  ;;  %v1296_v11 = vld [vmem:[#allocation3 + $0x558] sm:$0xff] }
 0x315   : > { %v1300_v49 = vld [vmem:[#allocation3 + $0x578] sm:$0xff]  ;;  %v10172_v54 = vpack.c.bf16 %v1298_v48, %v1294_v47  ;;  %v1327_v47 = vld [vmem:[#allocation3 + $0x650] sm:$0xff] }
 0x316   : > { %2051 = vmatmul.mubr.f32.vlgmr.msra.gmra.mrb[8].mxu1 %v12035_v63  ;;  %2205 = vmatmul.mubr.f32.vlgmr.msra.gmra.mrb[4].mxu0 %v12035_v63  ;;  %v10300_v58 = vpack.c.bf16 %v1300_v49, %v1296_v11  ;;  %v1303_v63 = vld [vmem:[#allocation3 + $0x590] sm:$0xff]  ;;  %v1334_v49 = vld [vmem:[#allocation3 + $0x688] sm:$0xff] }
 0x317   : > { %2056 = vmatprep.mubr.f32.mxu1 %v13127_v31  ;;  %10155 = vmatpush1.bf16.msra.mxu1 %v10154_v35  ;;  %v1302_v35 = vld [vmem:[#allocation3 + $0x588] sm:$0xff]  ;;  %v10306_v13 = vpack.c.bf16 %v1307_v4, %v1303_v63  ;;  %v1331_v11 = vld [vmem:[#allocation3 + $0x670] sm:$0xff]  ;;  %v1345_v4 = vld [vmem:[#allocation3 + $0x6e0] sm:$0xff] }
 0x318   : > { %2210 = vmatprep.mubr.f32.mxu0 %v13127_v31  ;;  %10283 = vmatpush1.bf16.msra.mxu0 %v10282_v42  ;;  %v10162_v31 = vpack.c.bf16 %v1273_v12, %v1269_v10  ;;  %v1306_v42 = vld [vmem:[#allocation3 + $0x5a8] sm:$0xff]  ;;  %v1316_v10 = vld [vmem:[#allocation3 + $0x5f8] sm:$0xff]  ;;  %v10178_v12 = vpack.c.bf16 %v1305_v2, %v1301_v9 }
 0x319   : > { %10157 = vmatprep.subr.bf16.mxu1 %v10156_v1  ;;  %10285 = vmatprep.subr.bf16.mxu0 %v10284_v62  ;;  %v10174_v1 = vpack.c.bf16 %v1297_v56, %v1293_v55  ;;  %v10302_v62 = vpack.c.bf16 %v1299_v24, %v1295_v18  ;;  %v10176_v29 = vpack.c.bf16 %v1306_v42, %v1302_v35  ;;  %v1337_v24 = vld [vmem:[#allocation3 + $0x6a0] sm:$0xff]  ;;  %v1335_v35 = vld [vmem:[#allocation3 + $0x690] sm:$0xff] }
 0x31a   : > { %2057 = vmatmul.mubr.f32.gmra.mrb[10].mxu1 %v13129_v60  ;;  %2211 = vmatmul.mubr.f32.gmra.mrb[6].mxu0 %v13129_v60  ;;  %v1290_v60 = vld [vmem:[#allocation3 + $0x528] sm:$0xff]  ;;  %v10318_v56 = vpack.c.bf16 %v1331_v11, %v1327_v47  ;;  %v10322_v2 = vpack.c.bf16 %v1339_v19, %v1335_v35  ;;  %v1369_v11 = vld [vmem:[#allocation3 + $0x7a0] sm:$0xff] }
 0x31b   : > { %10159 = vmatpush1.bf16.msra.mxu1 %v10158_v7  ;;  %2127 = vmatprep.mubr.f32.mxu1 %v13150_v30  ;;  %v10168_v41 = vpack.c.bf16 %v1290_v60, %v1286_v34  ;;  %v1314_v7 = vld [vmem:[#allocation3 + $0x5e8] sm:$0xff]  ;;  %v1319_v34 = vld [vmem:[#allocation3 + $0x610] sm:$0xff]  ;;  %v1377_v19 = vld [vmem:[#allocation3 + $0x7e0] sm:$0xff] }
 0x31c   : > { %10287 = vmatpush1.bf16.msra.mxu0 %v10286_v8  ;;  %2281 = vmatprep.mubr.f32.mxu0 %v13150_v30  ;;  %v1285_v30 = vld [vmem:[#allocation3 + $0x500] sm:$0xff]  ;;  %v1312_v8 = vld [vmem:[#allocation3 + $0x5d8] sm:$0xff] }
 0x31d   : > { %10161 = vmatprep.subr.bf16.mxu1 %v10160_v14  ;;  %10289 = vmatprep.subr.bf16.mxu0 %v10288_v15  ;;  %v10170_v51 = vpack.c.bf16 %v1289_v43, %v1285_v30  ;;  %v10180_v14 = vpack.c.bf16 %v1314_v7, %v1310_v6  ;;  %v1309_v15 = vld [vmem:[#allocation3 + $0x5c0] sm:$0xff]  ;;  %v10308_v17 = vpack.c.bf16 %v1316_v10, %v1312_v8  ;;  %v1343_v6 = vld [vmem:[#allocation3 + $0x6d0] sm:$0xff]  ;;  %v1350_v10 = vld [vmem:[#allocation3 + $0x708] sm:$0xff] }
 0x31e   : > { %v10182_v23 = vpack.c.bf16 %v1313_v40, %v1309_v15  ;;  %v10314_v43 = vpack.c.bf16 %v1323_v36, %v1319_v34  ;;  %v1347_v8 = vld [vmem:[#allocation3 + $0x6f0] sm:$0xff]  ;;  %v1361_v36 = vld [vmem:[#allocation3 + $0x760] sm:$0xff] }
 0x31f   : > { %10163 = vmatpush1.bf16.msra.mxu1 %v10162_v31  ;;  %v1322_v31 = vld [vmem:[#allocation3 + $0x628] sm:$0xff]  ;;  %v10326_v40 = vpack.c.bf16 %v1347_v8, %v1343_v6  ;;  %v2609_v8 = vld [vmem:[#allocation6 + $0x800] sm:$0xff] }
 0x320   : > { %10291 = vmatpush1.bf16.msra.mxu0 %v10290_v21  ;;  %10165 = vmatprep.subr.bf16.mxu1 %v10164_v22  ;;  %v1320_v21 = vld [vmem:[#allocation3 + $0x618] sm:$0xff]  ;;  %v10184_v26 = vpack.c.bf16 %v1322_v31, %v1318_v50  ;;  %v1351_v50 = vld [vmem:[#allocation3 + $0x710] sm:$0xff] }
 0x321   : > { %10293 = vmatprep.subr.bf16.mxu0 %v10292_v28  ;;  %v1324_v22 = vld [vmem:[#allocation3 + $0x638] sm:$0xff]  ;;  %v1317_v28 = vld [vmem:[#allocation3 + $0x600] sm:$0xff] }
 0x322   : > { %v10312_v60 = vpack.c.bf16 %v1324_v22, %v1320_v21  ;;  %v10186_v30 = vpack.c.bf16 %v1321_v33, %v1317_v28  ;;  %v1355_v21 = vld [vmem:[#allocation3 + $0x730] sm:$0xff]  ;;  %v1358_v22 = vld [vmem:[#allocation3 + $0x748] sm:$0xff] }
 0x323   : > { %10167 = vmatpush1.bf16.msra.mxu1 %v10166_v38  ;;  %v1330_v38 = vld [vmem:[#allocation3 + $0x668] sm:$0xff]  ;;  %v10330_v33 = vpack.c.bf16 %v1355_v21, %v1351_v50  ;;  %v2621_v21 = vld [vmem:[#allocation6 + $0x860] sm:$0xff] }
 0x324   : > { %10295 = vmatpush1.bf16.msra.mxu0 %v10294_v39  ;;  %10169 = vmatprep.subr.bf16.mxu1 %v10168_v41  ;;  %v1328_v39 = vld [vmem:[#allocation3 + $0x658] sm:$0xff]  ;;  %v10188_v44 = vpack.c.bf16 %v1330_v38, %v1326_v37  ;;  %v1359_v37 = vld [vmem:[#allocation3 + $0x750] sm:$0xff] }
 0x325   : > { %10297 = vmatprep.subr.bf16.mxu0 %v10296_v45  ;;  %v1332_v41 = vld [vmem:[#allocation3 + $0x678] sm:$0xff]  ;;  %v1325_v45 = vld [vmem:[#allocation3 + $0x640] sm:$0xff] }
 0x326   : > { %v10316_v48 = vpack.c.bf16 %v1332_v41, %v1328_v39  ;;  %v10190_v55 = vpack.c.bf16 %v1329_v46, %v1325_v45  ;;  %v1363_v39 = vld [vmem:[#allocation3 + $0x770] sm:$0xff]  ;;  %v1366_v41 = vld [vmem:[#allocation3 + $0x788] sm:$0xff] }
 0x327   : > { %10171 = vmatpush1.bf16.msra.mxu1 %v10170_v51  ;;  %v1338_v51 = vld [vmem:[#allocation3 + $0x6a8] sm:$0xff]  ;;  %v10334_v46 = vpack.c.bf16 %v1363_v39, %v1359_v37  ;;  %v2625_v39 = vld [vmem:[#allocation6 + $0x880] sm:$0xff] }
 0x328   : > { %10299 = vmatpush1.bf16.msra.mxu0 %v10298_v52  ;;  %10173 = vmatprep.subr.bf16.mxu1 %v10172_v54  ;;  %v1336_v52 = vld [vmem:[#allocation3 + $0x698] sm:$0xff]  ;;  %v10192_v18 = vpack.c.bf16 %v1338_v51, %v1334_v49  ;;  %v1367_v49 = vld [vmem:[#allocation3 + $0x790] sm:$0xff] }
 0x329   : > { %10301 = vmatprep.subr.bf16.mxu0 %v10300_v58  ;;  %v1340_v54 = vld [vmem:[#allocation3 + $0x6b8] sm:$0xff]  ;;  %v1333_v58 = vld [vmem:[#allocation3 + $0x680] sm:$0xff] }
 0x32a   : > { %v10320_v42 = vpack.c.bf16 %v1340_v54, %v1336_v52  ;;  %v10194_v9 = vpack.c.bf16 %v1337_v24, %v1333_v58  ;;  %v1371_v52 = vld [vmem:[#allocation3 + $0x7b0] sm:$0xff]  ;;  %v1374_v54 = vld [vmem:[#allocation3 + $0x7c8] sm:$0xff] }
 0x32b   : > { %10175 = vmatpush1.bf16.msra.mxu1 %v10174_v1  ;;  %v1346_v1 = vld [vmem:[#allocation3 + $0x6e8] sm:$0xff]  ;;  %v10338_v24 = vpack.c.bf16 %v1371_v52, %v1367_v49  ;;  %v2637_v52 = vld [vmem:[#allocation6 + $0x8e0] sm:$0xff] }
 0x32c   : > { %10303 = vmatpush1.bf16.msra.mxu0 %v10302_v62  ;;  %10177 = vmatprep.subr.bf16.mxu1 %v10176_v29  ;;  %v1344_v62 = vld [vmem:[#allocation3 + $0x6d8] sm:$0xff]  ;;  %v10196_v63 = vpack.c.bf16 %v1346_v1, %v1342_v32  ;;  %v1375_v32 = vld [vmem:[#allocation3 + $0x7d0] sm:$0xff] }
 0x32d   : > { %10305 = vmatprep.subr.bf16.mxu0 %v10304_v0  ;;  %v1348_v29 = vld [vmem:[#allocation3 + $0x6f8] sm:$0xff]  ;;  %v1341_v0 = vld [vmem:[#allocation3 + $0x6c0] sm:$0xff] }
 0x32e   : > { %v10324_v7 = vpack.c.bf16 %v1348_v29, %v1344_v62  ;;  %v10198_v15 = vpack.c.bf16 %v1345_v4, %v1341_v0  ;;  %v1379_v62 = vld [vmem:[#allocation3 + $0x7f0] sm:$0xff]  ;;  %v2610_v29 = vld [vmem:[#allocation6 + $0x808] sm:$0xff] }
 0x32f   : > { %10179 = vmatpush1.bf16.msra.mxu1 %v10178_v12  ;;  %v1354_v12 = vld [vmem:[#allocation3 + $0x728] sm:$0xff]  ;;  %v10342_v4 = vpack.c.bf16 %v1379_v62, %v1375_v32  ;;  %v2641_v32 = vld [vmem:[#allocation6 + $0x900] sm:$0xff]  ;;  %v2643_v62 = vld [vmem:[#allocation6 + $0x910] sm:$0xff] }
 0x330   : > { %10307 = vmatpush1.bf16.msra.mxu0 %v10306_v13  ;;  %10181 = vmatprep.subr.bf16.mxu1 %v10180_v14  ;;  %v1352_v13 = vld [vmem:[#allocation3 + $0x718] sm:$0xff]  ;;  %v10200_v16 = vpack.c.bf16 %v1354_v12, %v1350_v10  ;;  %v2613_v10 = vld [vmem:[#allocation6 + $0x820] sm:$0xff]  ;;  %v2611_v12 = vld [vmem:[#allocation6 + $0x810] sm:$0xff] }
 0x331   : > { %10309 = vmatprep.subr.bf16.mxu0 %v10308_v17  ;;  %v1356_v14 = vld [vmem:[#allocation3 + $0x738] sm:$0xff]  ;;  %v1349_v17 = vld [vmem:[#allocation3 + $0x700] sm:$0xff] }
 0x332   : > { %v10328_v31 = vpack.c.bf16 %v1356_v14, %v1352_v13  ;;  %v10202_v28 = vpack.c.bf16 %v1353_v20, %v1349_v17  ;;  %v2615_v13 = vld [vmem:[#allocation6 + $0x830] sm:$0xff]  ;;  %v2618_v14 = vld [vmem:[#allocation6 + $0x848] sm:$0xff]  ;;  %v10346_v17 = vpack.c.bf16 %v2613_v10, %v2609_v8  ;;  %v2649_v10 = vld [vmem:[#allocation6 + $0x940] sm:$0xff] }
 0x333   : > { %10183 = vmatpush1.bf16.msra.mxu1 %v10182_v23  ;;  %v1362_v23 = vld [vmem:[#allocation3 + $0x768] sm:$0xff]  ;;  %v10474_v20 = vpack.c.bf16 %v2615_v13, %v2611_v12  ;;  %v2653_v12 = vld [vmem:[#allocation6 + $0x960] sm:$0xff]  ;;  %v2651_v13 = vld [vmem:[#allocation6 + $0x950] sm:$0xff] }
 0x334   : > { %10311 = vmatpush1.bf16.msra.mxu0 %v10310_v25  ;;  %10185 = vmatprep.subr.bf16.mxu1 %v10184_v26  ;;  %v1360_v25 = vld [vmem:[#allocation3 + $0x758] sm:$0xff]  ;;  %v10204_v34 = vpack.c.bf16 %v1362_v23, %v1358_v22  ;;  %v2619_v22 = vld [vmem:[#allocation6 + $0x850] sm:$0xff] }
 0x335   : > { %10313 = vmatprep.subr.bf16.mxu0 %v10312_v60  ;;  %v1364_v26 = vld [vmem:[#allocation3 + $0x778] sm:$0xff]  ;;  %v1357_v60 = vld [vmem:[#allocation3 + $0x740] sm:$0xff]  ;;  %v12036_v23 = vld [vmem:[#allocation2 + $0x10] sm:$0xff] }
 0x336   : > { %v10332_v38 = vpack.c.bf16 %v1364_v26, %v1360_v25  ;;  %v10206_v45 = vpack.c.bf16 %v1361_v36, %v1357_v60  ;;  %v2623_v26 = vld [vmem:[#allocation6 + $0x870] sm:$0xff]  ;;  %v2632_v60 = vld [vmem:[#allocation6 + $0x8b8] sm:$0xff] }
 0x337   : > { %10187 = vmatpush1.bf16.msra.mxu1 %v10186_v30  ;;  %v1370_v30 = vld [vmem:[#allocation3 + $0x7a8] sm:$0xff]  ;;  %v10478_v37 = vpack.c.bf16 %v2623_v26, %v2619_v22  ;;  %v2657_v22 = vld [vmem:[#allocation6 + $0x980] sm:$0xff] }
 0x338   : > { %10315 = vmatpush1.bf16.msra.mxu0 %v10314_v43  ;;  %10189 = vmatprep.subr.bf16.mxu1 %v10188_v44  ;;  %v1368_v43 = vld [vmem:[#allocation3 + $0x798] sm:$0xff]  ;;  %v10208_v47 = vpack.c.bf16 %v1370_v30, %v1366_v41  ;;  %v2629_v41 = vld [vmem:[#allocation6 + $0x8a0] sm:$0xff]  ;;  %v2627_v30 = vld [vmem:[#allocation6 + $0x890] sm:$0xff] }
 0x339   : > { %10317 = vmatprep.subr.bf16.mxu0 %v10316_v48  ;;  %v1372_v44 = vld [vmem:[#allocation3 + $0x7b8] sm:$0xff]  ;;  %v1365_v48 = vld [vmem:[#allocation3 + $0x780] sm:$0xff] }
 0x33a   : > { %v10336_v51 = vpack.c.bf16 %v1372_v44, %v1368_v43  ;;  %v10210_v58 = vpack.c.bf16 %v1369_v11, %v1365_v48  ;;  %v2631_v44 = vld [vmem:[#allocation6 + $0x8b0] sm:$0xff]  ;;  %v10354_v48 = vpack.c.bf16 %v2629_v41, %v2625_v39  ;;  %v2665_v41 = vld [vmem:[#allocation6 + $0x9c0] sm:$0xff] }
 0x33b   : > { %10191 = vmatpush1.bf16.msra.mxu1 %v10190_v55  ;;  %v1378_v55 = vld [vmem:[#allocation3 + $0x7e8] sm:$0xff]  ;;  %v10482_v11 = vpack.c.bf16 %v2631_v44, %v2627_v30  ;;  %v2669_v30 = vld [vmem:[#allocation6 + $0x9e0] sm:$0xff] }
 0x33c   : > { %10319 = vmatpush1.bf16.msra.mxu0 %v10318_v56  ;;  %10193 = vmatprep.subr.bf16.mxu1 %v10192_v18  ;;  %v1376_v56 = vld [vmem:[#allocation3 + $0x7d8] sm:$0xff]  ;;  %v10212_v35 = vpack.c.bf16 %v1378_v55, %v1374_v54  ;;  %v2635_v54 = vld [vmem:[#allocation6 + $0x8d0] sm:$0xff] }
 0x33d   : > { %10321 = vmatprep.subr.bf16.mxu0 %v10320_v42  ;;  %v1380_v18 = vld [vmem:[#allocation3 + $0x7f8] sm:$0xff]  ;;  %v1373_v42 = vld [vmem:[#allocation3 + $0x7c0] sm:$0xff] }
 0x33e   : > { %v10340_v1 = vpack.c.bf16 %v1380_v18, %v1376_v56  ;;  %v10214_v0 = vpack.c.bf16 %v1377_v19, %v1373_v42  ;;  %v2639_v56 = vld [vmem:[#allocation6 + $0x8f0] sm:$0xff]  ;;  %v2642_v18 = vld [vmem:[#allocation6 + $0x908] sm:$0xff] }
 0x33f   : > { %10195 = vmatpush1.bf16.msra.mxu1 %v10194_v9  ;;  %v2614_v9 = vld [vmem:[#allocation6 + $0x828] sm:$0xff]  ;;  %v10486_v42 = vpack.c.bf16 %v2639_v56, %v2635_v54  ;;  %v2677_v54 = vld [vmem:[#allocation6 + $0xa20] sm:$0xff] }
 0x340   : > { %10323 = vmatpush1.bf16.msra.mxu0 %v10322_v2  ;;  %10197 = vmatprep.subr.bf16.mxu1 %v10196_v63  ;;  %v2612_v2 = vld [vmem:[#allocation6 + $0x818] sm:$0xff]  ;;  %v10344_v6 = vpack.c.bf16 %v2614_v9, %v2610_v29  ;;  %v2647_v9 = vld [vmem:[#allocation6 + $0x930] sm:$0xff] }
 0x341   : > { %10325 = vmatprep.subr.bf16.mxu0 %v10324_v7  ;;  %v2616_v63 = vld [vmem:[#allocation6 + $0x838] sm:$0xff] }
 0x342   : > { %v10472_v7 = vpack.c.bf16 %v2616_v63, %v2612_v2  ;;  %v2650_v2 = vld [vmem:[#allocation6 + $0x948] sm:$0xff] }
 0x343   : > { %10199 = vmatpush1.bf16.msra.mxu1 %v10198_v15  ;;  %v2622_v15 = vld [vmem:[#allocation6 + $0x868] sm:$0xff] }
 0x344   : > { %10327 = vmatpush1.bf16.msra.mxu0 %v10326_v40  ;;  %10201 = vmatprep.subr.bf16.mxu1 %v10200_v16  ;;  %v2620_v40 = vld [vmem:[#allocation6 + $0x858] sm:$0xff]  ;;  %v10348_v50 = vpack.c.bf16 %v2622_v15, %v2618_v14  ;;  %v2654_v63 = vld [vmem:[#allocation6 + $0x968] sm:$0xff]  ;;  %v2655_v15 = vld [vmem:[#allocation6 + $0x970] sm:$0xff] }
 0x345   : > { %10329 = vmatprep.subr.bf16.mxu0 %v10328_v31  ;;  %v2624_v16 = vld [vmem:[#allocation6 + $0x878] sm:$0xff]  ;;  %v2617_v31 = vld [vmem:[#allocation6 + $0x840] sm:$0xff]  ;;  %v10364_v8 = vpack.c.bf16 %v2654_v63, %v2650_v2  ;;  %v2687_v2 = vld [vmem:[#allocation6 + $0xa70] sm:$0xff] }
 0x346   : > { %v10476_v25 = vpack.c.bf16 %v2624_v16, %v2620_v40  ;;  %v10350_v36 = vpack.c.bf16 %v2621_v21, %v2617_v31  ;;  %v2658_v40 = vld [vmem:[#allocation6 + $0x988] sm:$0xff]  ;;  %v10494_v31 = vpack.c.bf16 %v2655_v15, %v2651_v13  ;;  %v2693_v13 = vld [vmem:[#allocation6 + $0xaa0] sm:$0xff]  ;;  %v2691_v15 = vld [vmem:[#allocation6 + $0xa90] sm:$0xff] }
 0x347   : > { %10203 = vmatpush1.bf16.msra.mxu1 %v10202_v28  ;;  %v2626_v28 = vld [vmem:[#allocation6 + $0x888] sm:$0xff] }
 0x348   : > { %10331 = vmatpush1.bf16.msra.mxu0 %v10330_v33  ;;  %10205 = vmatprep.subr.bf16.mxu1 %v10204_v34  ;;  %v2630_v33 = vld [vmem:[#allocation6 + $0x8a8] sm:$0xff]  ;;  %v2628_v34 = vld [vmem:[#allocation6 + $0x898] sm:$0xff] }
 0x349   : > { %10333 = vmatprep.subr.bf16.mxu0 %v10332_v38  ;;  %v10352_v38 = vpack.c.bf16 %v2630_v33, %v2626_v28  ;;  %v10480_v43 = vpack.c.bf16 %v2632_v60, %v2628_v34  ;;  %v2662_v16 = vld [vmem:[#allocation6 + $0x9a8] sm:$0xff]  ;;  %v2663_v28 = vld [vmem:[#allocation6 + $0x9b0] sm:$0xff]  ;;  %v2668_v60 = vld [vmem:[#allocation6 + $0x9d8] sm:$0xff] }
 0x34a   : > { %v10368_v21 = vpack.c.bf16 %v2662_v16, %v2658_v40  ;;  %v2666_v33 = vld [vmem:[#allocation6 + $0x9c8] sm:$0xff]  ;;  %v2695_v40 = vld [vmem:[#allocation6 + $0xab0] sm:$0xff] }
 0x34b   : > { %10207 = vmatpush1.bf16.msra.mxu1 %v10206_v45  ;;  %v2634_v45 = vld [vmem:[#allocation6 + $0x8c8] sm:$0xff] }
 0x34c   : > { %10335 = vmatpush1.bf16.msra.mxu0 %v10334_v46  ;;  %10209 = vmatprep.subr.bf16.mxu1 %v10208_v47  ;;  %v2638_v46 = vld [vmem:[#allocation6 + $0x8e8] sm:$0xff]  ;;  %v2636_v47 = vld [vmem:[#allocation6 + $0x8d8] sm:$0xff] }
 0x34d   : > { %10337 = vmatprep.subr.bf16.mxu0 %v10336_v51  ;;  %v10356_v49 = vpack.c.bf16 %v2638_v46, %v2634_v45  ;;  %v2633_v51 = vld [vmem:[#allocation6 + $0x8c0] sm:$0xff]  ;;  %v2670_v34 = vld [vmem:[#allocation6 + $0x9e8] sm:$0xff]  ;;  %v2671_v45 = vld [vmem:[#allocation6 + $0x9f0] sm:$0xff] }
 0x34e   : > { %v10372_v39 = vpack.c.bf16 %v2670_v34, %v2666_v33  ;;  %v2674_v46 = vld [vmem:[#allocation6 + $0xa08] sm:$0xff]  ;;  %v2699_v33 = vld [vmem:[#allocation6 + $0xad0] sm:$0xff] }
 0x34f   : > { %10211 = vmatpush1.bf16.msra.mxu1 %v10210_v58  ;;  %v2646_v58 = vld [vmem:[#allocation6 + $0x928] sm:$0xff]  ;;  %v2703_v34 = vld [vmem:[#allocation6 + $0xaf0] sm:$0xff] }
 0x350   : > { %10339 = vmatpush1.bf16.msra.mxu0 %v10338_v24  ;;  %10213 = vmatprep.subr.bf16.mxu1 %v10212_v35  ;;  %v2644_v24 = vld [vmem:[#allocation6 + $0x918] sm:$0xff]  ;;  %v10360_v19 = vpack.c.bf16 %v2646_v58, %v2642_v18  ;;  %v2679_v18 = vld [vmem:[#allocation6 + $0xa30] sm:$0xff]  ;;  %v2682_v58 = vld [vmem:[#allocation6 + $0xa48] sm:$0xff] }
 0x351   : > { %10341 = vmatprep.subr.bf16.mxu0 %v10340_v1  ;;  %v2648_v35 = vld [vmem:[#allocation6 + $0x938] sm:$0xff]  ;;  %v2645_v1 = vld [vmem:[#allocation6 + $0x920] sm:$0xff]  ;;  %v2690_v63 = vld [vmem:[#allocation6 + $0xa88] sm:$0xff] }
 0x352   : > { %v10488_v29 = vpack.c.bf16 %v2648_v35, %v2644_v24  ;;  %v2686_v24 = vld [vmem:[#allocation6 + $0xa68] sm:$0xff]  ;;  %v2684_v35 = vld [vmem:[#allocation6 + $0xa58] sm:$0xff] }
 0x353   : > { %10215 = vmatpush1.bf16.msra.mxu1 %v10214_v0  ;;  %v2652_v0 = vld [vmem:[#allocation6 + $0x958] sm:$0xff] }
 0x354   : > { %10343 = vmatpush1.bf16.msra.mxu0 %v10342_v4  ;;  %10345 = vmatprep.subr.bf16.mxu1 %v10344_v6  ;;  %v2656_v4 = vld [vmem:[#allocation6 + $0x978] sm:$0xff]  ;;  %v10362_v6 = vpack.c.bf16 %v2645_v1, %v2641_v32  ;;  %v10380_v32 = vpack.c.bf16 %v2686_v24, %v2682_v58  ;;  %v2681_v1 = vld [vmem:[#allocation6 + $0xa40] sm:$0xff]  ;;  %v2715_v58 = vld [vmem:[#allocation6 + $0xb50] sm:$0xff] }
 0x355   : > { %10473 = vmatprep.subr.bf16.mxu0 %v10472_v7  ;;  %v10490_v7 = vpack.c.bf16 %v2647_v9, %v2643_v62  ;;  %v10492_v14 = vpack.c.bf16 %v2656_v4, %v2652_v0  ;;  %v2685_v62 = vld [vmem:[#allocation6 + $0xa60] sm:$0xff]  ;;  %v2694_v0 = vld [vmem:[#allocation6 + $0xaa8] sm:$0xff]  ;;  %v2692_v4 = vld [vmem:[#allocation6 + $0xa98] sm:$0xff] }
 0x356   : > { %2128 = vmatmul.mubr.f32.vlgmr.msra.gmra.mrb[8].mxu1 %v12036_v23  ;;  %v2719_v24 = vld [vmem:[#allocation6 + $0xb70] sm:$0xff] }
 0x357   : > { %2282 = vmatmul.mubr.f32.vlgmr.msra.gmra.mrb[4].mxu0 %v12036_v23  ;;  %2133 = vmatprep.mubr.f32.mxu1 %v13155_v27  ;;  %v2661_v23 = vld [vmem:[#allocation6 + $0x9a0] sm:$0xff] }
 0x358   : > { %2287 = vmatprep.mubr.f32.mxu0 %v13155_v27  ;;  %10347 = vmatpush1.bf16.msra.mxu1 %v10346_v17  ;;  %v2640_v27 = vld [vmem:[#allocation6 + $0x8f8] sm:$0xff] }
 0x359   : > { %10475 = vmatpush1.bf16.msra.mxu0 %v10474_v20  ;;  %10349 = vmatprep.subr.bf16.mxu1 %v10348_v50  ;;  %v10484_v55 = vpack.c.bf16 %v2640_v27, %v2636_v47  ;;  %v2660_v17 = vld [vmem:[#allocation6 + $0x998] sm:$0xff]  ;;  %v10366_v50 = vpack.c.bf16 %v2653_v12, %v2649_v10  ;;  %v2678_v47 = vld [vmem:[#allocation6 + $0xa28] sm:$0xff]  ;;  %v10384_v10 = vpack.c.bf16 %v2694_v0, %v2690_v63  ;;  %v2689_v12 = vld [vmem:[#allocation6 + $0xa80] sm:$0xff] }
 0x35a   : > { %2134 = vmatmul.mubr.f32.gmra.mrb[10].mxu1 %v13163_v61  ;;  %10477 = vmatprep.subr.bf16.mxu0 %v10476_v25  ;;  %v2664_v20 = vld [vmem:[#allocation6 + $0x9b8] sm:$0xff]  ;;  %v2659_v25 = vld [vmem:[#allocation6 + $0x990] sm:$0xff]  ;;  %v10386_v16 = vpack.c.bf16 %v2693_v13, %v2689_v12 }
 0x35b   : > { %2288 = vmatmul.mubr.f32.gmra.mrb[6].mxu0 %v13163_v61  ;;  %v10358_v61 = vpack.c.bf16 %v2637_v52, %v2633_v51  ;;  %v10496_v26 = vpack.c.bf16 %v2664_v20, %v2660_v17  ;;  %v2676_v27 = vld [vmem:[#allocation6 + $0xa18] sm:$0xff]  ;;  %v10376_v51 = vpack.c.bf16 %v2678_v47, %v2674_v46  ;;  %v2673_v52 = vld [vmem:[#allocation6 + $0xa00] sm:$0xff]  ;;  %v10514_v17 = vpack.c.bf16 %v2695_v40, %v2691_v15  ;;  %v2698_v20 = vld [vmem:[#allocation6 + $0xac8] sm:$0xff] }
 0x35c   : > { %10351 = vmatpush1.bf16.msra.mxu1 %v10350_v36  ;;  %v2672_v36 = vld [vmem:[#allocation6 + $0x9f8] sm:$0xff]  ;;  %v2711_v46 = vld [vmem:[#allocation6 + $0xb30] sm:$0xff]  ;;  %v2733_v15 = vld [vmem:[#allocation6 + $0xbe0] sm:$0xff] }
 0x35d   : > { %10479 = vmatpush1.bf16.msra.mxu0 %v10478_v37  ;;  %10353 = vmatprep.subr.bf16.mxu1 %v10352_v38  ;;  %v10370_v37 = vpack.c.bf16 %v2661_v23, %v2657_v22  ;;  %v10498_v38 = vpack.c.bf16 %v2663_v28, %v2659_v25  ;;  %v10500_v44 = vpack.c.bf16 %v2672_v36, %v2668_v60  ;;  %v2704_v22 = vld [vmem:[#allocation6 + $0xaf8] sm:$0xff]  ;;  %v2697_v23 = vld [vmem:[#allocation6 + $0xac0] sm:$0xff]  ;;  %v2706_v36 = vld [vmem:[#allocation6 + $0xb08] sm:$0xff] }
 0x35e   : > { %10481 = vmatprep.subr.bf16.mxu0 %v10480_v43  ;;  %v2667_v43 = vld [vmem:[#allocation6 + $0x9d0] sm:$0xff]  ;;  %v2701_v25 = vld [vmem:[#allocation6 + $0xae0] sm:$0xff]  ;;  %v10518_v60 = vpack.c.bf16 %v2703_v34, %v2699_v33 }
 0x35f   : > { %v10390_v28 = vpack.c.bf16 %v2701_v25, %v2697_v23  ;;  %v2723_v63 = vld [vmem:[#allocation6 + $0xb90] sm:$0xff]  ;;  %v2744_v23 = vld [vmem:[#allocation6 + $0xc38] sm:$0xff] }
 0x360   : > { %10355 = vmatpush1.bf16.msra.mxu1 %v10354_v48  ;;  %v2680_v48 = vld [vmem:[#allocation6 + $0xa38] sm:$0xff]  ;;  %v2727_v0 = vld [vmem:[#allocation6 + $0xbb0] sm:$0xff] }
 0x361   : > { %10483 = vmatpush1.bf16.msra.mxu0 %v10482_v11  ;;  %10357 = vmatprep.subr.bf16.mxu1 %v10356_v49  ;;  %v10374_v11 = vpack.c.bf16 %v2669_v30, %v2665_v41  ;;  %v10502_v49 = vpack.c.bf16 %v2671_v45, %v2667_v43  ;;  %v10504_v56 = vpack.c.bf16 %v2680_v48, %v2676_v27  ;;  %v2712_v41 = vld [vmem:[#allocation6 + $0xb38] sm:$0xff]  ;;  %v2705_v30 = vld [vmem:[#allocation6 + $0xb00] sm:$0xff]  ;;  %v2707_v45 = vld [vmem:[#allocation6 + $0xb10] sm:$0xff] }
 0x362   : > { %10485 = vmatprep.subr.bf16.mxu0 %v10484_v55  ;;  %v2675_v55 = vld [vmem:[#allocation6 + $0xa10] sm:$0xff]  ;;  %v10522_v27 = vpack.c.bf16 %v2711_v46, %v2707_v45  ;;  %v2714_v48 = vld [vmem:[#allocation6 + $0xb48] sm:$0xff] }
 0x363   : > { %v2731_v40 = vld [vmem:[#allocation6 + $0xbd0] sm:$0xff] }
 0x364   : > { %10359 = vmatpush1.bf16.msra.mxu1 %v10358_v61  ;;  %v2688_v61 = vld [vmem:[#allocation6 + $0xa78] sm:$0xff] }
 0x365   : > { %10487 = vmatpush1.bf16.msra.mxu0 %v10486_v42  ;;  %10361 = vmatprep.subr.bf16.mxu1 %v10360_v19  ;;  %v10378_v42 = vpack.c.bf16 %v2677_v54, %v2673_v52  ;;  %v10506_v19 = vpack.c.bf16 %v2679_v18, %v2675_v55  ;;  %v10508_v9 = vpack.c.bf16 %v2688_v61, %v2684_v35  ;;  %v2720_v52 = vld [vmem:[#allocation6 + $0xb78] sm:$0xff]  ;;  %v2713_v54 = vld [vmem:[#allocation6 + $0xb40] sm:$0xff]  ;;  %v2722_v61 = vld [vmem:[#allocation6 + $0xb88] sm:$0xff] }
 0x366   : > { %10489 = vmatprep.subr.bf16.mxu0 %v10488_v29  ;;  %v2683_v29 = vld [vmem:[#allocation6 + $0xa50] sm:$0xff]  ;;  %v2717_v55 = vld [vmem:[#allocation6 + $0xb60] sm:$0xff]  ;;  %v10526_v35 = vpack.c.bf16 %v2719_v24, %v2715_v58 }
 0x367   : > { %v10398_v18 = vpack.c.bf16 %v2717_v55, %v2713_v54  ;;  %v2737_v58 = vld [vmem:[#allocation6 + $0xc00] sm:$0xff] }
 0x368   : > { %10363 = vmatpush1.bf16.msra.mxu1 %v10362_v6  ;;  %v2696_v6 = vld [vmem:[#allocation6 + $0xab8] sm:$0xff]  ;;  %v2741_v24 = vld [vmem:[#allocation6 + $0xc20] sm:$0xff] }
 0x369   : > { %10491 = vmatpush1.bf16.msra.mxu0 %v10490_v7  ;;  %10365 = vmatprep.subr.bf16.mxu1 %v10364_v8  ;;  %v10382_v7 = vpack.c.bf16 %v2685_v62, %v2681_v1  ;;  %v10510_v8 = vpack.c.bf16 %v2687_v2, %v2683_v29  ;;  %v2728_v1 = vld [vmem:[#allocation6 + $0xbb8] sm:$0xff]  ;;  %v2721_v62 = vld [vmem:[#allocation6 + $0xb80] sm:$0xff] }
 0x36a   : > { %10493 = vmatprep.subr.bf16.mxu0 %v10492_v14  ;;  %v10512_v14 = vpack.c.bf16 %v2696_v6, %v2692_v4  ;;  %v2725_v29 = vld [vmem:[#allocation6 + $0xba0] sm:$0xff]  ;;  %v2730_v4 = vld [vmem:[#allocation6 + $0xbc8] sm:$0xff]  ;;  %v10530_v6 = vpack.c.bf16 %v2727_v0, %v2723_v63 }
 0x36b   : > { %v10402_v2 = vpack.c.bf16 %v2725_v29, %v2721_v62  ;;  %v2746_v29 = vld [vmem:[#allocation6 + $0xc48] sm:$0xff] }
 0x36c   : > { %10367 = vmatpush1.bf16.msra.mxu1 %v10366_v50  ;;  %v2702_v50 = vld [vmem:[#allocation6 + $0xae8] sm:$0xff] }
 0x36d   : > { %10495 = vmatpush1.bf16.msra.mxu0 %v10494_v31  ;;  %10369 = vmatprep.subr.bf16.mxu1 %v10368_v21  ;;  %v2700_v31 = vld [vmem:[#allocation6 + $0xad8] sm:$0xff]  ;;  %v10388_v21 = vpack.c.bf16 %v2702_v50, %v2698_v20  ;;  %v2738_v50 = vld [vmem:[#allocation6 + $0xc08] sm:$0xff] }
 0x36e   : > { %10497 = vmatprep.subr.bf16.mxu0 %v10496_v26  ;;  %v10516_v26 = vpack.c.bf16 %v2704_v22, %v2700_v31  ;;  %v2742_v31 = vld [vmem:[#allocation6 + $0xc28] sm:$0xff] }
 0x36f   : > { %v10408_v22 = vpack.c.bf16 %v2742_v31, %v2738_v50  ;;  %v2750_v0 = vld [vmem:[#allocation6 + $0xc68] sm:$0xff] }
 0x370   : > { %10371 = vmatpush1.bf16.msra.mxu1 %v10370_v37  ;;  %v2710_v37 = vld [vmem:[#allocation6 + $0xb28] sm:$0xff] }
 0x371   : > { %10499 = vmatpush1.bf16.msra.mxu0 %v10498_v38  ;;  %10373 = vmatprep.subr.bf16.mxu1 %v10372_v39  ;;  %v10392_v38 = vpack.c.bf16 %v2710_v37, %v2706_v36  ;;  %v2708_v39 = vld [vmem:[#allocation6 + $0xb18] sm:$0xff] }
 0x372   : > { %10501 = vmatprep.subr.bf16.mxu0 %v10500_v44  ;;  %v10520_v43 = vpack.c.bf16 %v2712_v41, %v2708_v39  ;;  %v2709_v44 = vld [vmem:[#allocation6 + $0xb20] sm:$0xff] }
 0x373   : > { %v10394_v47 = vpack.c.bf16 %v2709_v44, %v2705_v30 }
 0x374   : > { %10375 = vmatpush1.bf16.msra.mxu1 %v10374_v11  ;;  %v2718_v11 = vld [vmem:[#allocation6 + $0xb68] sm:$0xff] }
 0x375   : > { %10503 = vmatpush1.bf16.msra.mxu0 %v10502_v49  ;;  %10377 = vmatprep.subr.bf16.mxu1 %v10376_v51  ;;  %v2716_v49 = vld [vmem:[#allocation6 + $0xb58] sm:$0xff]  ;;  %v10396_v51 = vpack.c.bf16 %v2718_v11, %v2714_v48 }
 0x376   : > { %10505 = vmatprep.subr.bf16.mxu0 %v10504_v56  ;;  %v10524_v56 = vpack.c.bf16 %v2720_v52, %v2716_v49 }
 0x378   : > { %10379 = vmatpush1.bf16.msra.mxu1 %v10378_v42  ;;  %v2726_v42 = vld [vmem:[#allocation6 + $0xba8] sm:$0xff] }
 0x379   : > { %10507 = vmatpush1.bf16.msra.mxu0 %v10506_v19  ;;  %10381 = vmatprep.subr.bf16.mxu1 %v10380_v32  ;;  %v2724_v19 = vld [vmem:[#allocation6 + $0xb98] sm:$0xff]  ;;  %v10400_v32 = vpack.c.bf16 %v2726_v42, %v2722_v61  ;;  %v2739_v42 = vld [vmem:[#allocation6 + $0xc10] sm:$0xff] }
 0x37a   : > { %10509 = vmatprep.subr.bf16.mxu0 %v10508_v9  ;;  %v10528_v9 = vpack.c.bf16 %v2728_v1, %v2724_v19  ;;  %v2743_v19 = vld [vmem:[#allocation6 + $0xc30] sm:$0xff] }
 0x37c   : > { %10383 = vmatpush1.bf16.msra.mxu1 %v10382_v7  ;;  %v2734_v7 = vld [vmem:[#allocation6 + $0xbe8] sm:$0xff] }
 0x37d   : > { %10511 = vmatpush1.bf16.msra.mxu0 %v10510_v8  ;;  %10385 = vmatprep.subr.bf16.mxu1 %v10384_v10  ;;  %v2732_v8 = vld [vmem:[#allocation6 + $0xbd8] sm:$0xff]  ;;  %v10404_v12 = vpack.c.bf16 %v2734_v7, %v2730_v4 }
 0x37e   : > { %10513 = vmatprep.subr.bf16.mxu0 %v10512_v14  ;;  %v2736_v10 = vld [vmem:[#allocation6 + $0xbf8] sm:$0xff]  ;;  %v2729_v14 = vld [vmem:[#allocation6 + $0xbc0] sm:$0xff] }
 0x37f   : > { %v10532_v13 = vpack.c.bf16 %v2736_v10, %v2732_v8  ;;  %v2748_v4 = vld [vmem:[#allocation6 + $0xc58] sm:$0xff]  ;;  %v10410_v8 = vpack.c.bf16 %v2741_v24, %v2737_v58  ;;  %v10538_v10 = vpack.c.bf16 %v2743_v19, %v2739_v42  ;;  %v2765_v58 = vld [vmem:[#allocation6 + $0xce0] sm:$0xff]  ;;  %v2767_v42 = vld [vmem:[#allocation6 + $0xcf0] sm:$0xff] }
 0x380   : > { %10387 = vmatpush1.bf16.msra.mxu1 %v10386_v16  ;;  %v10406_v16 = vpack.c.bf16 %v2733_v15, %v2729_v14  ;;  %v2749_v14 = vld [vmem:[#allocation6 + $0xc60] sm:$0xff]  ;;  %v2770_v19 = vld [vmem:[#allocation6 + $0xd08] sm:$0xff] }
 0x381   : > { %10515 = vmatpush1.bf16.msra.mxu0 %v10514_v17  ;;  %10389 = vmatprep.subr.bf16.mxu1 %v10388_v21  ;;  %v2735_v17 = vld [vmem:[#allocation6 + $0xbf0] sm:$0xff]  ;;  %v2740_v21 = vld [vmem:[#allocation6 + $0xc18] sm:$0xff] }
 0x382   : > { %10517 = vmatprep.subr.bf16.mxu0 %v10516_v26  ;;  %v10534_v20 = vpack.c.bf16 %v2735_v17, %v2731_v40  ;;  %v10536_v25 = vpack.c.bf16 %v2744_v23, %v2740_v21  ;;  %v2294_v26 = vld [vmem:[%s16547_s6] sm:$0xf]  ;;  %v2751_v17 = vld [vmem:[#allocation6 + $0xc70] sm:$0xff]  ;;  %v10412_v21 = vpack.c.bf16 %v2750_v0, %v2746_v29  ;;  %v2754_v23 = vld [vmem:[#allocation6 + $0xc88] sm:$0xff] }
 0x383   : > { %v2307_v33 = vrot.slane %v2294_v26, %v13138_v53  ;;  %v2303_v34 = vrot.slane %v2294_v26, %v12946_v5 }
 0x384   : > { %10391 = vmatpush1.bf16.msra.mxu1 %v10390_v28  ;;  %v2299_v28 = vrot.slane %v2294_v26, %v12940_v3 }
 0x385   : > { %10519 = vmatpush1.bf16.msra.mxu0 %v10518_v60  ;;  %10393 = vmatprep.subr.bf16.mxu1 %v10392_v38  ;;  %v2311_v60 = vrot.slane %v2294_v26, %v13141_v57  ;;  %v2756_v26 = vld [vmem:[#allocation6 + $0xc98] sm:$0xff] }
 0x386   : > { %10521 = vmatprep.subr.bf16.mxu0 %v10520_v43 }
 0x388   : > { %10395 = vmatpush1.bf16.msra.mxu1 %v10394_v47 }
 0x389   : > { %10523 = vmatpush1.bf16.msra.mxu0 %v10522_v27  ;;  %10397 = vmatprep.subr.bf16.mxu1 %v10396_v51 }
 0x38a   : > { %10525 = vmatprep.subr.bf16.mxu0 %v10524_v56 }
 0x38c   : > { %10399 = vmatpush1.bf16.msra.mxu1 %v10398_v18 }
 0x38d   : > { %10527 = vmatpush1.bf16.msra.mxu0 %v10526_v35  ;;  %10401 = vmatprep.subr.bf16.mxu1 %v10400_v32  ;;  %v2349_v35 = vld [vmem:[#allocation2 + $0x48] sm:$0x1] }
 0x38e   : > { %10529 = vmatprep.subr.bf16.mxu0 %v10528_v9  ;;  %v2348_v9 = vld [vmem:[#allocation2 + $0x40] sm:$0x1] }
 0x38f   : > { %v2889_v40 = vrot.slane %v2348_v9, 1 }
 0x390   : > { %10403 = vmatpush1.bf16.msra.mxu1 %v10402_v2 }
 0x391   : > { %10531 = vmatpush1.bf16.msra.mxu0 %v10530_v6  ;;  %10405 = vmatprep.subr.bf16.mxu1 %v10404_v12  ;;  %v2752_v6 = vld [vmem:[#allocation6 + $0xc78] sm:$0xff]  ;;  %v2891_v12 = vrot.slane %v2349_v35, 1 }
 0x392   : > { %10533 = vmatprep.subr.bf16.mxu0 %v10532_v13  ;;  %v2745_v13 = vld [vmem:[#allocation6 + $0xc40] sm:$0xff] }
 0x394   : > { %10407 = vmatpush1.bf16.msra.mxu1 %v10406_v16  ;;  %v2747_v16 = vld [vmem:[#allocation6 + $0xc50] sm:$0xff] }
 0x395   : > { %10535 = vmatpush1.bf16.msra.mxu0 %v10534_v20  ;;  %10409 = vmatprep.subr.bf16.mxu1 %v10408_v22  ;;  %v10540_v22 = vpack.c.bf16 %v2752_v6, %v2748_v4  ;;  %v2771_v6 = vld [vmem:[#allocation6 + $0xd10] sm:$0xff] }
 0x396   : > { %10537 = vmatprep.subr.bf16.mxu0 %v10536_v25  ;;  %v2758_v25 = vld [vmem:[#allocation6 + $0xca8] sm:$0xff] }
 0x429   : > { %v2129_v36 = vpop.f32.mrb[8].mxu1 }
 0x42a   : > { %v2316_v37 = vadd.f32 %v2299_v28, %v2129_v36  ;;  %v2283_v38 = vpop.f32.mrb[4].mxu0  ;;  %v2131_v39 = vpop.f32.mrb[9].mxu1 }
 0x42b   : > { %v2318_v41 = vadd.f32 %v2307_v33, %v2283_v38  ;;  %v2317_v30 = vadd.f32 %v2303_v34, %v2131_v39  ;;  %v2285_v43 = vpop.f32.mrb[5].mxu0  ;;  %v2757_v38 = vld [vmem:[#allocation6 + $0xca0] sm:$0xff]  ;;  %v2755_v39 = vld [vmem:[#allocation6 + $0xc90] sm:$0xff] }
 0x42c   : > { %v2324_v44 = vmax.f32 %v2316_v37, 0.0  ;;  %v2319_v45 = vadd.f32 %v2311_v60, %v2285_v43  ;;  %v2753_v37 = vld [vmem:[#allocation6 + $0xc80] sm:$0xff] }
 0x42d   : > { %v2326_v46 = vmax.f32 %v2318_v41, 0.0  ;;  %v13190_v47 = vmax.f32 %v2317_v30, 0.0  ;;  %v2135_v27 = vpop.f32.mrb[10].mxu1  ;;  %v2759_v41 = vld [vmem:[#allocation6 + $0xcb0] sm:$0xff]  ;;  %v2762_v30 = vld [vmem:[#allocation6 + $0xcc8] sm:$0xff] }
 0x42e   : > { %2332 = vst [vmem:[#allocation2] sm:$0xff] %v2324_v44  ;;  %v2327_v48 = vmax.f32 %v2319_v45, 0.0  ;;  %v2289_v11 = vpop.f32.mrb[6].mxu0  ;;  %v2137_v49 = vpop.f32.mrb[11].mxu1  ;;  %v2320_v55 = vadd.f32 %v2299_v28, %v2135_v27  ;;  %v2760_v28 = vld [vmem:[#allocation6 + $0xcb8] sm:$0xff]  ;;  %v10416_v45 = vpack.c.bf16 %v2758_v25, %v2754_v23  ;;  %v2766_v27 = vld [vmem:[#allocation6 + $0xce8] sm:$0xff] }
 0x42f   : > { %2334 = vst [vmem:[#allocation2 + $0x10] sm:$0xff] %v2326_v46  ;;  %2333 = vst [vmem:[#allocation2 + $0x8] sm:$0xff] %v13190_v47  ;;  %v13193_v51 = vadd.f32 %v2307_v33, %v2289_v11  ;;  %v2321_v52 = vadd.f32 %v2303_v34, %v2137_v49  ;;  %v2291_v54 = vpop.f32.mrb[7].mxu0  ;;  %v10414_v34 = vpack.c.bf16 %v2749_v14, %v2745_v13  ;;  %v2768_v11 = vld [vmem:[#allocation6 + $0xcf8] sm:$0xff]  ;;  %v2790_v23 = vld [vmem:[#allocation6 + $0xda8] sm:$0xff] }
 0x430   : > { %2335 = vst [vmem:[#allocation2 + $0x18] sm:$0xff] %v2327_v48  ;;  %v13197_v18 = vmax.f32 %v2320_v55, 0.0  ;;  %v2323_v32 = vadd.f32 %v2311_v60, %v2291_v54  ;;  %v10542_v60 = vpack.c.bf16 %v2751_v17, %v2747_v16  ;;  %v10544_v46 = vpack.c.bf16 %v2760_v28, %v2756_v26  ;;  %v2764_v48 = vld [vmem:[#allocation6 + $0xcd8] sm:$0xff]  ;;  %v2761_v55 = vld [vmem:[#allocation6 + $0xcc0] sm:$0xff] }
 0x431   : > { %v13195_v56 = vmax.f32 %v2321_v52, 0.0  ;;  %v10418_v52 = vpack.c.bf16 %v2757_v38, %v2753_v37  ;;  %v10546_v54 = vpack.c.bf16 %v2759_v41, %v2755_v39  ;;  %v10420_v24 = vpack.c.bf16 %v2766_v27, %v2762_v30  ;;  %v2784_v13 = vld [vmem:[#allocation6 + $0xd78] sm:$0xff]  ;;  %v2781_v16 = vld [vmem:[#allocation6 + $0xd60] sm:$0xff]  ;;  %v2787_v38 = vld [vmem:[#allocation6 + $0xd90] sm:$0xff] }
 0x432   : > { %v2878_v7 = vrot.slane %v13197_v18, 1  ;;  %v13202_v50 = vmax.f32 %v2323_v32, 0.0  ;;  %v10548_v35 = vpack.c.bf16 %v2768_v11, %v2764_v48  ;;  %v2774_v32 = vld [vmem:[#allocation6 + $0xd28] sm:$0xff]  ;;  %v10422_v29 = vpack.c.bf16 %v2765_v58, %v2761_v55  ;;  %v2788_v25 = vld [vmem:[#allocation6 + $0xd98] sm:$0xff]  ;;  %v2791_v39 = vld [vmem:[#allocation6 + $0xdb0] sm:$0xff] }
 0x433   : > { %v2881_v63 = vrot.slane %v13195_v56, 1  ;;  %v10424_v0 = vpack.c.bf16 %v2774_v32, %v2770_v19  ;;  %v2792_v26 = vld [vmem:[#allocation6 + $0xdb8] sm:$0xff]  ;;  %v2794_v41 = vld [vmem:[#allocation6 + $0xdc8] sm:$0xff]  ;;  %v10562_v27 = vpack.c.bf16 %v2791_v39, %v2787_v38  ;;  %v2793_v48 = vld [vmem:[#allocation6 + $0xdc0] sm:$0xff] }
 0x434   : > { %v2890_v43 = vsel %vm608_vm0, %v2878_v7, %v2889_v40  ;;  %v2887_v44 = vrot.slane %v13202_v50, 1  ;;  %v2777_v40 = vld [vmem:[#allocation6 + $0xd40] sm:$0xff]  ;;  %v10560_v37 = vpack.c.bf16 %v2792_v26, %v2788_v25  ;;  %v2798_v30 = vld [vmem:[#allocation6 + $0xde8] sm:$0xff]  ;;  %v2799_v55 = vld [vmem:[#allocation6 + $0xdf0] sm:$0xff] }
 0x435   : > { %v2340_v61 = vld [vmem:[#allocation2] sm:$0xfe]  ;;  %v2892_v33 = vsel %vm608_vm0, %v2881_v63, %v2891_v12  ;;  %v2780_v12 = vld [vmem:[#allocation6 + $0xd58] sm:$0xff]  ;;  %v10430_v28 = vpack.c.bf16 %v2781_v16, %v2777_v40  ;;  %v2802_v58 = vld [vmem:[#allocation6 + $0xe08] sm:$0xff] }
 0x436   : > { %v2341_v1 = vld [vmem:[#allocation2 + $0x8] sm:$0xfe]  ;;  %v2877_v62 = vrot.slane %v2340_v61, 1  ;;  %v2763_v61 = vld [vmem:[#allocation6 + $0xcd0] sm:$0xff]  ;;  %v2797_v11 = vld [vmem:[#allocation6 + $0xde0] sm:$0xff] }
 0x437   : > { %v2880_v2 = vrot.slane %v2341_v1, 1  ;;  %v2343_v20 = vld [vmem:[#allocation2 + $0x18] sm:$0xfe]  ;;  %v10550_v9 = vpack.c.bf16 %v2767_v42, %v2763_v61  ;;  %v10438_v42 = vpack.c.bf16 %v2797_v11, %v2793_v48  ;;  %v2801_v32 = vld [vmem:[#allocation6 + $0xe00] sm:$0xff]  ;;  %v2815_v40 = vld [vmem:[#allocation6 + $0xe70] sm:$0xff] }
 0x438   : > { %v2879_v31 = vsel %vm608_vm0, %v2877_v62, %v2878_v7  ;;  %v2886_v36 = vrot.slane %v2343_v20, 1  ;;  %v2772_v1 = vld [vmem:[#allocation6 + $0xd18] sm:$0xff]  ;;  %v2775_v7 = vld [vmem:[#allocation6 + $0xd30] sm:$0xff]  ;;  %v10556_v20 = vpack.c.bf16 %v2784_v13, %v2780_v12  ;;  %v2813_v12 = vld [vmem:[#allocation6 + $0xe60] sm:$0xff] }
 0x439   : > { %v2882_v15 = vsel %vm608_vm0, %v2880_v2, %v2881_v63  ;;  %v2776_v62 = vld [vmem:[#allocation6 + $0xd38] sm:$0xff]  ;;  %v2769_v2 = vld [vmem:[#allocation6 + $0xd00] sm:$0xff]  ;;  %v2818_v16 = vld [vmem:[#allocation6 + $0xe88] sm:$0xff] }
 0x43a   : > { %2969 = vmatprep.mubr.f32.mxu1 %v2882_v15  ;;  %3123 = vmatprep.mubr.f32.mxu0 %v2882_v15  ;;  %v2888_v49 = vsel %vm608_vm0, %v2886_v36, %v2887_v44  ;;  %v2773_v63 = vld [vmem:[#allocation6 + $0xd20] sm:$0xff]  ;;  %v10552_v4 = vpack.c.bf16 %v2776_v62, %v2772_v1  ;;  %v10554_v15 = vpack.c.bf16 %v2775_v7, %v2771_v6  ;;  %v2808_v61 = vld [vmem:[#allocation6 + $0xe38] sm:$0xff]  ;;  %v2831_v48 = vld [vmem:[#allocation6 + $0xef0] sm:$0xff] }
 0x43b   : > { %2970 = vmatmul.mubr.f32.vlgmr.msra.gmra.mrb[12].mxu1 %v2879_v31  ;;  %3124 = vmatmul.mubr.f32.vlgmr.msra.gmra.mrb[8].mxu0 %v2879_v31  ;;  %v10426_v14 = vpack.c.bf16 %v2773_v63, %v2769_v2  ;;  %v2779_v31 = vld [vmem:[#allocation6 + $0xd50] sm:$0xff]  ;;  %v2805_v1 = vld [vmem:[#allocation6 + $0xe20] sm:$0xff]  ;;  %v2810_v63 = vld [vmem:[#allocation6 + $0xe48] sm:$0xff] }
 0x43c   : > { %10411 = vmatpush1.bf16.msra.mxu1 %v10410_v8  ;;  %10539 = vmatpush1.bf16.msra.mxu0 %v10538_v10  ;;  %v2778_v8 = vld [vmem:[#allocation6 + $0xd48] sm:$0xff]  ;;  %v2807_v2 = vld [vmem:[#allocation6 + $0xe30] sm:$0xff]  ;;  %v2816_v6 = vld [vmem:[#allocation6 + $0xe78] sm:$0xff]  ;;  %v10442_v7 = vpack.c.bf16 %v2805_v1, %v2801_v32 }
 0x43d   : > { %2975 = vmatprep.mubr.f32.mxu1 %v2892_v33  ;;  %3129 = vmatprep.mubr.f32.mxu0 %v2892_v33  ;;  %v2782_v10 = vld [vmem:[#allocation6 + $0xd68] sm:$0xff]  ;;  %v2821_v25 = vld [vmem:[#allocation6 + $0xea0] sm:$0xff]  ;;  %v2832_v38 = vld [vmem:[#allocation6 + $0xef8] sm:$0xff] }
 0x43e   : > { %10413 = vmatprep.subr.bf16.mxu1 %v10412_v21  ;;  %10541 = vmatprep.subr.bf16.mxu0 %v10540_v22  ;;  %v10428_v17 = vpack.c.bf16 %v2782_v10, %v2778_v8  ;;  %v2783_v21 = vld [vmem:[#allocation6 + $0xd70] sm:$0xff]  ;;  %v2786_v22 = vld [vmem:[#allocation6 + $0xd88] sm:$0xff]  ;;  %v2809_v10 = vld [vmem:[#allocation6 + $0xe40] sm:$0xff] }
 0x43f   : > { %2976 = vmatmul.mubr.f32.gmra.mrb[14].mxu1 %v2890_v43  ;;  %3130 = vmatmul.mubr.f32.gmra.mrb[10].mxu0 %v2890_v43  ;;  %v10558_v33 = vpack.c.bf16 %v2783_v21, %v2779_v31  ;;  %v10432_v36 = vpack.c.bf16 %v2790_v23, %v2786_v22  ;;  %v2796_v43 = vld [vmem:[#allocation6 + $0xdd8] sm:$0xff]  ;;  %v10446_v21 = vpack.c.bf16 %v2813_v12, %v2809_v10  ;;  %v2817_v23 = vld [vmem:[#allocation6 + $0xe80] sm:$0xff]  ;;  %v2834_v11 = vld [vmem:[#allocation6 + $0xf08] sm:$0xff] }
 0x440   : > { %10415 = vmatpush1.bf16.msra.mxu1 %v10414_v34  ;;  %10543 = vmatpush1.bf16.msra.mxu0 %v10542_v60  ;;  %v2785_v34 = vld [vmem:[#allocation6 + $0xd80] sm:$0xff]  ;;  %v2824_v31 = vld [vmem:[#allocation6 + $0xeb8] sm:$0xff]  ;;  %v10450_v39 = vpack.c.bf16 %v2821_v25, %v2817_v23  ;;  %v2839_v32 = vld [vmem:[#allocation6 + $0xf30] sm:$0xff] }
 0x441   : > { %3046 = vmatprep.mubr.f32.mxu1 %v2888_v49  ;;  %3200 = vmatprep.mubr.f32.mxu0 %v2888_v49  ;;  %v2789_v60 = vld [vmem:[#allocation6 + $0xda0] sm:$0xff]  ;;  %v10436_v49 = vpack.c.bf16 %v2798_v30, %v2794_v41  ;;  %v2842_v1 = vld [vmem:[#allocation6 + $0xf48] sm:$0xff]  ;;  %v2847_v10 = vld [vmem:[#allocation6 + $0xf70] sm:$0xff] }
 0x442   : > { %10417 = vmatprep.subr.bf16.mxu1 %v10416_v45  ;;  %10545 = vmatprep.subr.bf16.mxu0 %v10544_v46  ;;  %v2800_v45 = vld [vmem:[#allocation6 + $0xdf8] sm:$0xff]  ;;  %v10434_v46 = vpack.c.bf16 %v2789_v60, %v2785_v34  ;;  %v2823_v34 = vld [vmem:[#allocation6 + $0xeb0] sm:$0xff]  ;;  %v2826_v60 = vld [vmem:[#allocation6 + $0xec8] sm:$0xff] }
 0x443   : > { %v2825_v30 = vld [vmem:[#allocation6 + $0xec0] sm:$0xff]  ;;  %v2850_v12 = vld [vmem:[#allocation6 + $0xf88] sm:$0xff]  ;;  %v2855_v23 = vld [vmem:[#allocation6 + $0xfb0] sm:$0xff] }
 0x444   : > { %10419 = vmatpush1.bf16.msra.mxu1 %v10418_v52  ;;  %10547 = vmatpush1.bf16.msra.mxu0 %v10546_v54  ;;  %v10564_v52 = vpack.c.bf16 %v2800_v45, %v2796_v43  ;;  %v2795_v54 = vld [vmem:[#allocation6 + $0xdd0] sm:$0xff]  ;;  %v2829_v43 = vld [vmem:[#allocation6 + $0xee0] sm:$0xff]  ;;  %v2858_v25 = vld [vmem:[#allocation6 + $0xfc8] sm:$0xff] }
 0x445   : > { %10421 = vmatprep.subr.bf16.mxu1 %v10420_v24  ;;  %10549 = vmatprep.subr.bf16.mxu0 %v10548_v35  ;;  %v2806_v24 = vld [vmem:[#allocation6 + $0xe28] sm:$0xff]  ;;  %v2804_v35 = vld [vmem:[#allocation6 + $0xe18] sm:$0xff]  ;;  %v10566_v19 = vpack.c.bf16 %v2799_v55, %v2795_v54  ;;  %v10454_v55 = vpack.c.bf16 %v2829_v43, %v2825_v30  ;;  %v2863_v30 = vld [vmem:[#allocation6 + $0xff0] sm:$0xff] }
 0x446   : > { %v10440_v62 = vpack.c.bf16 %v2806_v24, %v2802_v58  ;;  %v2840_v54 = vld [vmem:[#allocation6 + $0xf38] sm:$0xff]  ;;  %v2833_v24 = vld [vmem:[#allocation6 + $0xf00] sm:$0xff]  ;;  %v2353_v43 = vld [vmem:[#allocation6 + $0x8] sm:$0xff] }
 0x448   : > { %10423 = vmatpush1.bf16.msra.mxu1 %v10422_v29  ;;  %10551 = vmatpush1.bf16.msra.mxu0 %v10550_v9  ;;  %v10568_v29 = vpack.c.bf16 %v2808_v61, %v2804_v35  ;;  %v2803_v9 = vld [vmem:[#allocation6 + $0xe10] sm:$0xff]  ;;  %v2837_v35 = vld [vmem:[#allocation6 + $0xf20] sm:$0xff] }
 0x449   : > { %10425 = vmatprep.subr.bf16.mxu1 %v10424_v0  ;;  %10553 = vmatprep.subr.bf16.mxu0 %v10552_v4  ;;  %v2814_v0 = vld [vmem:[#allocation6 + $0xe68] sm:$0xff]  ;;  %v2812_v4 = vld [vmem:[#allocation6 + $0xe58] sm:$0xff]  ;;  %v10570_v8 = vpack.c.bf16 %v2807_v2, %v2803_v9  ;;  %v10458_v2 = vpack.c.bf16 %v2837_v35, %v2833_v24  ;;  %v2352_v24 = vld [vmem:[#allocation6] sm:$0xff] }
 0x44a   : > { %v10444_v13 = vpack.c.bf16 %v2814_v0, %v2810_v63  ;;  %v2848_v9 = vld [vmem:[#allocation6 + $0xf78] sm:$0xff]  ;;  %v2841_v0 = vld [vmem:[#allocation6 + $0xf40] sm:$0xff] }
 0x44b   : > { %v2356_v35 = vld [vmem:[#allocation6 + $0x20] sm:$0xff] }
 0x44c   : > { %10427 = vmatpush1.bf16.msra.mxu1 %v10426_v14  ;;  %10555 = vmatpush1.bf16.msra.mxu0 %v10554_v15  ;;  %v10572_v14 = vpack.c.bf16 %v2816_v6, %v2812_v4  ;;  %v2811_v15 = vld [vmem:[#allocation6 + $0xe50] sm:$0xff]  ;;  %v2845_v4 = vld [vmem:[#allocation6 + $0xf60] sm:$0xff] }
 0x44d   : > { %10429 = vmatprep.subr.bf16.mxu1 %v10428_v17  ;;  %10557 = vmatprep.subr.bf16.mxu0 %v10556_v20  ;;  %v2822_v17 = vld [vmem:[#allocation6 + $0xea8] sm:$0xff]  ;;  %v2820_v20 = vld [vmem:[#allocation6 + $0xe98] sm:$0xff]  ;;  %v10574_v22 = vpack.c.bf16 %v2815_v40, %v2811_v15  ;;  %v10462_v40 = vpack.c.bf16 %v2845_v4, %v2841_v0  ;;  %v2360_v4 = vld [vmem:[#allocation6 + $0x40] sm:$0xff] }
 0x44e   : > { %v10448_v26 = vpack.c.bf16 %v2822_v17, %v2818_v16  ;;  %v2856_v15 = vld [vmem:[#allocation6 + $0xfb8] sm:$0xff]  ;;  %v2849_v17 = vld [vmem:[#allocation6 + $0xf80] sm:$0xff] }
 0x450   : > { %10431 = vmatpush1.bf16.msra.mxu1 %v10430_v28  ;;  %10559 = vmatpush1.bf16.msra.mxu0 %v10558_v33  ;;  %v10576_v28 = vpack.c.bf16 %v2824_v31, %v2820_v20  ;;  %v2819_v33 = vld [vmem:[#allocation6 + $0xe90] sm:$0xff]  ;;  %v2853_v20 = vld [vmem:[#allocation6 + $0xfa0] sm:$0xff] }
 0x451   : > { %10433 = vmatprep.subr.bf16.mxu1 %v10432_v36  ;;  %10561 = vmatprep.subr.bf16.mxu0 %v10560_v37  ;;  %v2830_v36 = vld [vmem:[#allocation6 + $0xee8] sm:$0xff]  ;;  %v2828_v37 = vld [vmem:[#allocation6 + $0xed8] sm:$0xff]  ;;  %v10578_v41 = vpack.c.bf16 %v2823_v34, %v2819_v33  ;;  %v10466_v34 = vpack.c.bf16 %v2853_v20, %v2849_v17 }
 0x452   : > { %v10452_v45 = vpack.c.bf16 %v2830_v36, %v2826_v60  ;;  %v2864_v33 = vld [vmem:[#allocation6 + $0xff8] sm:$0xff]  ;;  %v2857_v36 = vld [vmem:[#allocation6 + $0xfc0] sm:$0xff] }
 0x453   : > { %v2371_v17 = vld [vmem:[#allocation6 + $0x98] sm:$0xff] }
 0x454   : > { %10435 = vmatpush1.bf16.msra.mxu1 %v10434_v46  ;;  %10563 = vmatpush1.bf16.msra.mxu0 %v10562_v27  ;;  %v10580_v46 = vpack.c.bf16 %v2832_v38, %v2828_v37  ;;  %v2827_v27 = vld [vmem:[#allocation6 + $0xed0] sm:$0xff]  ;;  %v2861_v37 = vld [vmem:[#allocation6 + $0xfe0] sm:$0xff]  ;;  %v2375_v20 = vld [vmem:[#allocation6 + $0xb8] sm:$0xff] }
 0x455   : > { %10437 = vmatprep.subr.bf16.mxu1 %v10436_v49  ;;  %10565 = vmatprep.subr.bf16.mxu0 %v10564_v52  ;;  %v2838_v49 = vld [vmem:[#allocation6 + $0xf28] sm:$0xff]  ;;  %v2836_v52 = vld [vmem:[#allocation6 + $0xf18] sm:$0xff]  ;;  %v10582_v58 = vpack.c.bf16 %v2831_v48, %v2827_v27  ;;  %v2342_v48 = vld [vmem:[#allocation2 + $0x10] sm:$0xfe] }
 0x456   : > { %v10456_v61 = vpack.c.bf16 %v2838_v49, %v2834_v11  ;;  %v2359_v27 = vld [vmem:[#allocation6 + $0x38] sm:$0xff]  ;;  %v13212_v11 = vmax.f32 %v13193_v51, 0.0  ;;  %v10470_v49 = vpack.c.bf16 %v2861_v37, %v2857_v36 }
 0x457   : > { %v2363_v51 = vld [vmem:[#allocation6 + $0x58] sm:$0xff] }
 0x458   : > { %10439 = vmatpush1.bf16.msra.mxu1 %v10438_v42  ;;  %10567 = vmatpush1.bf16.msra.mxu0 %v10566_v19  ;;  %v10584_v42 = vpack.c.bf16 %v2840_v54, %v2836_v52  ;;  %v2835_v19 = vld [vmem:[#allocation6 + $0xf10] sm:$0xff]  ;;  %v2351_v54 = vld [vmem:[#allocation2 + $0x58] sm:$0x1] }
 0x459   : > { %10441 = vmatprep.subr.bf16.mxu1 %v10440_v62  ;;  %10569 = vmatprep.subr.bf16.mxu0 %v10568_v29  ;;  %v2846_v62 = vld [vmem:[#allocation6 + $0xf68] sm:$0xff]  ;;  %v2844_v29 = vld [vmem:[#allocation6 + $0xf58] sm:$0xff]  ;;  %v10586_v63 = vpack.c.bf16 %v2839_v32, %v2835_v19  ;;  %v2354_v19 = vld [vmem:[#allocation6 + $0x10] sm:$0xff] }
 0x45a   : > { %v10460_v6 = vpack.c.bf16 %v2846_v62, %v2842_v1  ;;  %v2358_v32 = vld [vmem:[#allocation6 + $0x30] sm:$0xff]  ;;  %v2361_v1 = vld [vmem:[#allocation6 + $0x48] sm:$0xff]  ;;  %v2895_v62 = vrot.slane %v2351_v54, 1  ;;  %v2379_v36 = vld [vmem:[#allocation6 + $0xd8] sm:$0xff] }
 0x45b   : > { %v10730_v0 = vpack.c.bf16 %v2358_v32, %v2354_v19  ;;  %v2383_v37 = vld [vmem:[#allocation6 + $0xf8] sm:$0xff]  ;;  %v2390_v19 = vld [vmem:[#allocation6 + $0x130] sm:$0xff]  ;;  %v2393_v32 = vld [vmem:[#allocation6 + $0x148] sm:$0xff] }
 0x45c   : > { %10443 = vmatpush1.bf16.msra.mxu1 %v10442_v7  ;;  %10571 = vmatpush1.bf16.msra.mxu0 %v10570_v8  ;;  %v10588_v7 = vpack.c.bf16 %v2848_v9, %v2844_v29  ;;  %v2843_v8 = vld [vmem:[#allocation6 + $0xf50] sm:$0xff]  ;;  %v2365_v29 = vld [vmem:[#allocation6 + $0x68] sm:$0xff]  ;;  %v2367_v9 = vld [vmem:[#allocation6 + $0x78] sm:$0xff] }
 0x45d   : > { %10445 = vmatprep.subr.bf16.mxu1 %v10444_v13  ;;  %10573 = vmatprep.subr.bf16.mxu0 %v10572_v14  ;;  %v2854_v13 = vld [vmem:[#allocation6 + $0xfa8] sm:$0xff]  ;;  %v2852_v14 = vld [vmem:[#allocation6 + $0xf98] sm:$0xff]  ;;  %v10590_v16 = vpack.c.bf16 %v2847_v10, %v2843_v8  ;;  %v10604_v10 = vpack.c.bf16 %v2365_v29, %v2361_v1 }
 0x45e   : > { %v10464_v31 = vpack.c.bf16 %v2854_v13, %v2850_v12  ;;  %v10732_v12 = vpack.c.bf16 %v2367_v9, %v2363_v51  ;;  %v2362_v13 = vld [vmem:[#allocation6 + $0x50] sm:$0xff]  ;;  %v2391_v54 = vld [vmem:[#allocation6 + $0x138] sm:$0xff]  ;;  %v2397_v1 = vld [vmem:[#allocation6 + $0x168] sm:$0xff] }
 0x45f   : > { %v2399_v29 = vld [vmem:[#allocation6 + $0x178] sm:$0xff] }
 0x460   : > { %10447 = vmatpush1.bf16.msra.mxu1 %v10446_v21  ;;  %10575 = vmatpush1.bf16.msra.mxu0 %v10574_v22  ;;  %v10592_v21 = vpack.c.bf16 %v2856_v15, %v2852_v14  ;;  %v2851_v22 = vld [vmem:[#allocation6 + $0xf90] sm:$0xff]  ;;  %v2369_v15 = vld [vmem:[#allocation6 + $0x88] sm:$0xff] }
 0x461   : > { %10449 = vmatprep.subr.bf16.mxu1 %v10448_v26  ;;  %10577 = vmatprep.subr.bf16.mxu0 %v10576_v28  ;;  %v2862_v26 = vld [vmem:[#allocation6 + $0xfe8] sm:$0xff]  ;;  %v2860_v28 = vld [vmem:[#allocation6 + $0xfd8] sm:$0xff]  ;;  %v10594_v60 = vpack.c.bf16 %v2855_v23, %v2851_v22  ;;  %v2366_v14 = vld [vmem:[#allocation6 + $0x70] sm:$0xff] }
 0x462   : > { %v10468_v38 = vpack.c.bf16 %v2862_v26, %v2858_v25  ;;  %v2368_v22 = vld [vmem:[#allocation6 + $0x80] sm:$0xff] }
 0x463   : > { %v2372_v23 = vld [vmem:[#allocation6 + $0xa0] sm:$0xff] }
 0x464   : > { %10451 = vmatpush1.bf16.msra.mxu1 %v10450_v39  ;;  %10579 = vmatpush1.bf16.msra.mxu0 %v10578_v41  ;;  %v10596_v39 = vpack.c.bf16 %v2864_v33, %v2860_v28  ;;  %v2859_v41 = vld [vmem:[#allocation6 + $0xfd0] sm:$0xff]  ;;  %v10736_v28 = vpack.c.bf16 %v2375_v20, %v2371_v17 }
 0x465   : > { %10453 = vmatprep.subr.bf16.mxu1 %v10452_v45  ;;  %10581 = vmatprep.subr.bf16.mxu0 %v10580_v46  ;;  %v2357_v45 = vld [vmem:[#allocation6 + $0x28] sm:$0xff]  ;;  %v2355_v46 = vld [vmem:[#allocation6 + $0x18] sm:$0xff]  ;;  %v10598_v52 = vpack.c.bf16 %v2863_v30, %v2859_v41  ;;  %v2370_v33 = vld [vmem:[#allocation6 + $0x90] sm:$0xff] }
 0x466   : > { %v2376_v41 = vld [vmem:[#allocation6 + $0xc0] sm:$0xff] }
 0x467   : > { %v2380_v30 = vld [vmem:[#allocation6 + $0xe0] sm:$0xff] }
 0x468   : > { %10455 = vmatpush1.bf16.msra.mxu1 %v10454_v55  ;;  %10583 = vmatpush1.bf16.msra.mxu0 %v10582_v58  ;;  %v10600_v55 = vpack.c.bf16 %v2357_v45, %v2353_v43  ;;  %v10728_v58 = vpack.c.bf16 %v2359_v27, %v2355_v46  ;;  %v10740_v45 = vpack.c.bf16 %v2383_v37, %v2379_v36  ;;  %v2378_v46 = vld [vmem:[#allocation6 + $0xd0] sm:$0xff] }
 0x469   : > { %10457 = vmatprep.subr.bf16.mxu1 %v10456_v61  ;;  %10585 = vmatprep.subr.bf16.mxu0 %v10584_v42  ;;  %v2350_v61 = vld [vmem:[#allocation2 + $0x50] sm:$0x1]  ;;  %v2883_v42 = vrot.slane %v2342_v48, 1  ;;  %v2385_v48 = vld [vmem:[#allocation6 + $0x108] sm:$0xff] }
 0x46a   : > { %v2893_v8 = vrot.slane %v2350_v61, 1  ;;  %v2382_v27 = vld [vmem:[#allocation6 + $0xf0] sm:$0xff] }
 0x46b   : > { %v2410_v37 = vld [vmem:[#allocation6 + $0x1d0] sm:$0xff] }
 0x46c   : > { %10459 = vmatpush1.bf16.msra.mxu1 %v10458_v2  ;;  %10587 = vmatpush1.bf16.msra.mxu0 %v10586_v63  ;;  %v2884_v2 = vrot.slane %v13212_v11, 1  ;;  %v10602_v63 = vpack.c.bf16 %v2356_v35, %v2352_v24  ;;  %v2388_v24 = vld [vmem:[#allocation6 + $0x120] sm:$0xff] }
 0x46d   : > { %10461 = vmatprep.subr.bf16.mxu1 %v10460_v6  ;;  %10589 = vmatprep.subr.bf16.mxu0 %v10588_v7  ;;  %v2364_v6 = vld [vmem:[#allocation6 + $0x60] sm:$0xff] }
 0x46e   : > { %v2885_v7 = vsel %vm608_vm0, %v2883_v42, %v2884_v2  ;;  %v2894_v25 = vsel %vm608_vm0, %v2884_v2, %v2893_v8  ;;  %v2386_v42 = vld [vmem:[#allocation6 + $0x110] sm:$0xff]  ;;  %v2392_v2 = vld [vmem:[#allocation6 + $0x140] sm:$0xff]  ;;  %v2401_v8 = vld [vmem:[#allocation6 + $0x188] sm:$0xff] }
 0x46f   : > { %v10746_v9 = vpack.c.bf16 %v2390_v19, %v2386_v42  ;;  %v2424_v19 = vld [vmem:[#allocation6 + $0x240] sm:$0xff] }
 0x470   : > { %10463 = vmatpush1.bf16.msra.mxu1 %v10462_v40  ;;  %10591 = vmatpush1.bf16.msra.mxu0 %v10590_v16  ;;  %v2896_v40 = vsel %vm608_vm0, %v2887_v44, %v2895_v62  ;;  %v2373_v16 = vld [vmem:[#allocation6 + $0xa8] sm:$0xff]  ;;  %v2395_v62 = vld [vmem:[#allocation6 + $0x158] sm:$0xff] }
 0x471   : > { %10465 = vmatprep.subr.bf16.mxu1 %v10464_v31  ;;  %10593 = vmatprep.subr.bf16.mxu0 %v10592_v21  ;;  %v10606_v31 = vpack.c.bf16 %v2364_v6, %v2360_v4  ;;  %v10734_v21 = vpack.c.bf16 %v2366_v14, %v2362_v13  ;;  %v10608_v26 = vpack.c.bf16 %v2373_v16, %v2369_v15  ;;  %v2377_v44 = vld [vmem:[#allocation6 + $0xc8] sm:$0xff]  ;;  %v2394_v6 = vld [vmem:[#allocation6 + $0x150] sm:$0xff]  ;;  %v2407_v13 = vld [vmem:[#allocation6 + $0x1b8] sm:$0xff] }
 0x472   : > { %v10748_v4 = vpack.c.bf16 %v2399_v29, %v2395_v62  ;;  %v2404_v16 = vld [vmem:[#allocation6 + $0x1a0] sm:$0xff]  ;;  %v2426_v29 = vld [vmem:[#allocation6 + $0x250] sm:$0xff] }
 0x474   : > { %10467 = vmatpush1.bf16.msra.mxu1 %v10466_v34  ;;  %10595 = vmatpush1.bf16.msra.mxu0 %v10594_v60  ;;  %v2374_v34 = vld [vmem:[#allocation6 + $0xb0] sm:$0xff]  ;;  %v2381_v60 = vld [vmem:[#allocation6 + $0xe8] sm:$0xff] }
 0x475   : > { %10469 = vmatprep.subr.bf16.mxu1 %v10468_v38  ;;  %10597 = vmatprep.subr.bf16.mxu0 %v10596_v39  ;;  %v10610_v38 = vpack.c.bf16 %v2372_v23, %v2368_v22  ;;  %v10738_v39 = vpack.c.bf16 %v2374_v34, %v2370_v33  ;;  %v10612_v43 = vpack.c.bf16 %v2381_v60, %v2377_v44  ;;  %v2409_v22 = vld [vmem:[#allocation6 + $0x1c8] sm:$0xff]  ;;  %v2408_v34 = vld [vmem:[#allocation6 + $0x1c0] sm:$0xff] }
 0x476   : > { %v2413_v23 = vld [vmem:[#allocation6 + $0x1e8] sm:$0xff]  ;;  %v2412_v44 = vld [vmem:[#allocation6 + $0x1e0] sm:$0xff] }
 0x477   : > { %v10628_v60 = vpack.c.bf16 %v2413_v23, %v2409_v22  ;;  %v2444_v22 = vld [vmem:[#allocation6 + $0x2e0] sm:$0xff] }
 0x478   : > { %10471 = vmatpush1.bf16.msra.mxu1 %v10470_v49  ;;  %10599 = vmatpush1.bf16.msra.mxu0 %v10598_v52  ;;  %v2389_v49 = vld [vmem:[#allocation6 + $0x128] sm:$0xff]  ;;  %v2387_v52 = vld [vmem:[#allocation6 + $0x118] sm:$0xff] }
 0x479   : > { %10601 = vmatprep.subr.bf16.mxu1 %v10600_v55  ;;  %10729 = vmatprep.subr.bf16.mxu0 %v10728_v58  ;;  %v10614_v55 = vpack.c.bf16 %v2380_v30, %v2376_v41  ;;  %v2384_v58 = vld [vmem:[#allocation6 + $0x100] sm:$0xff]  ;;  %v10616_v35 = vpack.c.bf16 %v2389_v49, %v2385_v48  ;;  %v10744_v61 = vpack.c.bf16 %v2391_v54, %v2387_v52  ;;  %v2421_v41 = vld [vmem:[#allocation6 + $0x228] sm:$0xff]  ;;  %v2419_v30 = vld [vmem:[#allocation6 + $0x218] sm:$0xff] }
 0x47a   : > { %v10618_v51 = vpack.c.bf16 %v2388_v24, %v2384_v58  ;;  %v2420_v48 = vld [vmem:[#allocation6 + $0x220] sm:$0xff]  ;;  %v2418_v54 = vld [vmem:[#allocation6 + $0x210] sm:$0xff]  ;;  %v2429_v58 = vld [vmem:[#allocation6 + $0x268] sm:$0xff] }
 0x47b   : > { %3047 = vmatmul.mubr.f32.vlgmr.msra.gmra.mrb[12].mxu1 %v2885_v7  ;;  %3201 = vmatmul.mubr.f32.vlgmr.msra.gmra.mrb[8].mxu0 %v2885_v7  ;;  %v2398_v7 = vld [vmem:[#allocation6 + $0x170] sm:$0xff]  ;;  %v2427_v24 = vld [vmem:[#allocation6 + $0x258] sm:$0xff] }
 0x47c   : > { %3052 = vmatprep.mubr.f32.mxu1 %v2896_v40  ;;  %3206 = vmatprep.mubr.f32.mxu0 %v2896_v40  ;;  %v10750_v15 = vpack.c.bf16 %v2398_v7, %v2394_v6  ;;  %v2400_v40 = vld [vmem:[#allocation6 + $0x180] sm:$0xff] }
 0x47d   : > { %10603 = vmatpush1.bf16.msra.mxu1 %v10602_v63  ;;  %10731 = vmatpush1.bf16.msra.mxu0 %v10730_v0  ;;  %v2396_v63 = vld [vmem:[#allocation6 + $0x160] sm:$0xff]  ;;  %v10620_v0 = vpack.c.bf16 %v2397_v1, %v2393_v32 }
 0x47e   : > { %10605 = vmatprep.subr.bf16.mxu1 %v10604_v10  ;;  %10733 = vmatprep.subr.bf16.mxu0 %v10732_v12  ;;  %v2405_v10 = vld [vmem:[#allocation6 + $0x1a8] sm:$0xff]  ;;  %v2403_v12 = vld [vmem:[#allocation6 + $0x198] sm:$0xff]  ;;  %v10622_v14 = vpack.c.bf16 %v2396_v63, %v2392_v2  ;;  %v2428_v32 = vld [vmem:[#allocation6 + $0x260] sm:$0xff] }
 0x47f   : > { %3053 = vmatmul.mubr.f32.gmra.mrb[14].mxu1 %v2894_v25  ;;  %3207 = vmatmul.mubr.f32.gmra.mrb[10].mxu0 %v2894_v25  ;;  %v10624_v17 = vpack.c.bf16 %v2405_v10, %v2401_v8  ;;  %v10752_v20 = vpack.c.bf16 %v2407_v13, %v2403_v12  ;;  %v2411_v25 = vld [vmem:[#allocation6 + $0x1d8] sm:$0xff]  ;;  %v2437_v2 = vld [vmem:[#allocation6 + $0x2a8] sm:$0xff]  ;;  %v2432_v7 = vld [vmem:[#allocation6 + $0x280] sm:$0xff] }
 0x480   : > { %3277 = vmatprep.mubr.f32.mxu1 %v13190_v47  ;;  %3431 = vmatprep.mubr.f32.mxu0 %v13190_v47  ;;  %v10742_v47 = vpack.c.bf16 %v2382_v27, %v2378_v46  ;;  %v2416_v27 = vld [vmem:[#allocation6 + $0x200] sm:$0xff]  ;;  %v2435_v63 = vld [vmem:[#allocation6 + $0x298] sm:$0xff]  ;;  %v2434_v13 = vld [vmem:[#allocation6 + $0x290] sm:$0xff] }
 0x481   : > { %10607 = vmatpush1.bf16.msra.mxu1 %v10606_v31  ;;  %10735 = vmatpush1.bf16.msra.mxu0 %v10734_v21  ;;  %v2402_v31 = vld [vmem:[#allocation6 + $0x190] sm:$0xff]  ;;  %v2436_v8 = vld [vmem:[#allocation6 + $0x2a0] sm:$0xff] }
 0x482   : > { %10609 = vmatprep.subr.bf16.mxu1 %v10608_v26  ;;  %10737 = vmatprep.subr.bf16.mxu0 %v10736_v28  ;;  %v2406_v21 = vld [vmem:[#allocation6 + $0x1b0] sm:$0xff]  ;;  %v2415_v26 = vld [vmem:[#allocation6 + $0x1f8] sm:$0xff]  ;;  %v10626_v28 = vpack.c.bf16 %v2404_v16, %v2400_v40  ;;  %v2445_v40 = vld [vmem:[#allocation6 + $0x2e8] sm:$0xff] }
 0x483   : > { %v10754_v33 = vpack.c.bf16 %v2406_v21, %v2402_v31  ;;  %v10756_v36 = vpack.c.bf16 %v2415_v26, %v2411_v25  ;;  %v2443_v16 = vld [vmem:[#allocation6 + $0x2d8] sm:$0xff]  ;;  %v2440_v21 = vld [vmem:[#allocation6 + $0x2c0] sm:$0xff]  ;;  %v2442_v26 = vld [vmem:[#allocation6 + $0x2d0] sm:$0xff] }
 0x485   : > { %10611 = vmatpush1.bf16.msra.mxu1 %v10610_v38  ;;  %10739 = vmatpush1.bf16.msra.mxu0 %v10738_v39  ;;  %v2414_v38 = vld [vmem:[#allocation6 + $0x1f0] sm:$0xff]  ;;  %v2417_v39 = vld [vmem:[#allocation6 + $0x208] sm:$0xff] }
 0x486   : > { %10613 = vmatprep.subr.bf16.mxu1 %v10612_v43  ;;  %10741 = vmatprep.subr.bf16.mxu0 %v10740_v45  ;;  %v2423_v43 = vld [vmem:[#allocation6 + $0x238] sm:$0xff]  ;;  %v10630_v45 = vpack.c.bf16 %v2412_v44, %v2408_v34  ;;  %v10758_v46 = vpack.c.bf16 %v2414_v38, %v2410_v37  ;;  %v10632_v49 = vpack.c.bf16 %v2421_v41, %v2417_v39  ;;  %v2453_v34 = vld [vmem:[#allocation6 + $0x328] sm:$0xff]  ;;  %v2448_v38 = vld [vmem:[#allocation6 + $0x300] sm:$0xff] }
 0x487   : > { %v10760_v52 = vpack.c.bf16 %v2423_v43, %v2419_v30  ;;  %v2451_v44 = vld [vmem:[#allocation6 + $0x318] sm:$0xff]  ;;  %v2452_v39 = vld [vmem:[#allocation6 + $0x320] sm:$0xff]  ;;  %v2450_v43 = vld [vmem:[#allocation6 + $0x310] sm:$0xff] }
 0x489   : > { %10615 = vmatpush1.bf16.msra.mxu1 %v10614_v55  ;;  %10743 = vmatpush1.bf16.msra.mxu0 %v10742_v47  ;;  %v2422_v55 = vld [vmem:[#allocation6 + $0x230] sm:$0xff]  ;;  %v2425_v47 = vld [vmem:[#allocation6 + $0x248] sm:$0xff] }
 0x48a   : > { %10617 = vmatprep.subr.bf16.mxu1 %v10616_v35  ;;  %10745 = vmatprep.subr.bf16.mxu0 %v10744_v61  ;;  %v2431_v35 = vld [vmem:[#allocation6 + $0x278] sm:$0xff]  ;;  %v10634_v61 = vpack.c.bf16 %v2420_v48, %v2416_v27  ;;  %v10762_v42 = vpack.c.bf16 %v2422_v55, %v2418_v54  ;;  %v10636_v1 = vpack.c.bf16 %v2429_v58, %v2425_v47  ;;  %v2461_v27 = vld [vmem:[#allocation6 + $0x368] sm:$0xff]  ;;  %v2456_v55 = vld [vmem:[#allocation6 + $0x340] sm:$0xff] }
 0x48b   : > { %v10764_v62 = vpack.c.bf16 %v2431_v35, %v2427_v24  ;;  %v2459_v48 = vld [vmem:[#allocation6 + $0x358] sm:$0xff]  ;;  %v2460_v47 = vld [vmem:[#allocation6 + $0x360] sm:$0xff]  ;;  %v2458_v35 = vld [vmem:[#allocation6 + $0x350] sm:$0xff] }
 0x48d   : > { %10619 = vmatpush1.bf16.msra.mxu1 %v10618_v51  ;;  %10747 = vmatpush1.bf16.msra.mxu0 %v10746_v9  ;;  %v2430_v51 = vld [vmem:[#allocation6 + $0x270] sm:$0xff]  ;;  %v2433_v9 = vld [vmem:[#allocation6 + $0x288] sm:$0xff] }
 0x48e   : > { %10621 = vmatprep.subr.bf16.mxu1 %v10620_v0  ;;  %10749 = vmatprep.subr.bf16.mxu0 %v10748_v4  ;;  %v2439_v0 = vld [vmem:[#allocation6 + $0x2b8] sm:$0xff]  ;;  %v10638_v4 = vpack.c.bf16 %v2428_v32, %v2424_v19  ;;  %v10766_v6 = vpack.c.bf16 %v2430_v51, %v2426_v29  ;;  %v10640_v10 = vpack.c.bf16 %v2437_v2, %v2433_v9  ;;  %v2469_v19 = vld [vmem:[#allocation6 + $0x3a8] sm:$0xff]  ;;  %v2464_v51 = vld [vmem:[#allocation6 + $0x380] sm:$0xff] }
 0x48f   : > { %v10768_v12 = vpack.c.bf16 %v2439_v0, %v2435_v63  ;;  %v2467_v32 = vld [vmem:[#allocation6 + $0x398] sm:$0xff]  ;;  %v2468_v9 = vld [vmem:[#allocation6 + $0x3a0] sm:$0xff]  ;;  %v2466_v0 = vld [vmem:[#allocation6 + $0x390] sm:$0xff] }
 0x491   : > { %10623 = vmatpush1.bf16.msra.mxu1 %v10622_v14  ;;  %10751 = vmatpush1.bf16.msra.mxu0 %v10750_v15  ;;  %v2438_v14 = vld [vmem:[#allocation6 + $0x2b0] sm:$0xff]  ;;  %v2441_v15 = vld [vmem:[#allocation6 + $0x2c8] sm:$0xff] }
 0x492   : > { %10625 = vmatprep.subr.bf16.mxu1 %v10624_v17  ;;  %10753 = vmatprep.subr.bf16.mxu0 %v10752_v20  ;;  %v2447_v17 = vld [vmem:[#allocation6 + $0x2f8] sm:$0xff]  ;;  %v10642_v20 = vpack.c.bf16 %v2436_v8, %v2432_v7  ;;  %v10770_v31 = vpack.c.bf16 %v2438_v14, %v2434_v13  ;;  %v10644_v23 = vpack.c.bf16 %v2445_v40, %v2441_v15  ;;  %v2477_v7 = vld [vmem:[#allocation6 + $0x3e8] sm:$0xff]  ;;  %v2472_v14 = vld [vmem:[#allocation6 + $0x3c0] sm:$0xff] }
 0x493   : > { %v10772_v25 = vpack.c.bf16 %v2447_v17, %v2443_v16  ;;  %v2475_v8 = vld [vmem:[#allocation6 + $0x3d8] sm:$0xff]  ;;  %v2476_v15 = vld [vmem:[#allocation6 + $0x3e0] sm:$0xff]  ;;  %v2474_v17 = vld [vmem:[#allocation6 + $0x3d0] sm:$0xff] }
 0x495   : > { %10627 = vmatpush1.bf16.msra.mxu1 %v10626_v28  ;;  %10755 = vmatpush1.bf16.msra.mxu0 %v10754_v33  ;;  %v2446_v28 = vld [vmem:[#allocation6 + $0x2f0] sm:$0xff]  ;;  %v2449_v33 = vld [vmem:[#allocation6 + $0x308] sm:$0xff] }
 0x496   : > { %10629 = vmatprep.subr.bf16.mxu1 %v10628_v60  ;;  %10757 = vmatprep.subr.bf16.mxu0 %v10756_v36  ;;  %v2455_v60 = vld [vmem:[#allocation6 + $0x338] sm:$0xff]  ;;  %v10646_v36 = vpack.c.bf16 %v2444_v22, %v2440_v21  ;;  %v10774_v37 = vpack.c.bf16 %v2446_v28, %v2442_v26  ;;  %v10648_v41 = vpack.c.bf16 %v2453_v34, %v2449_v33  ;;  %v2485_v21 = vld [vmem:[#allocation6 + $0x428] sm:$0xff]  ;;  %v2480_v34 = vld [vmem:[#allocation6 + $0x400] sm:$0xff] }
 0x497   : > { %v10776_v30 = vpack.c.bf16 %v2455_v60, %v2451_v44  ;;  %v2483_v22 = vld [vmem:[#allocation6 + $0x418] sm:$0xff]  ;;  %v2484_v44 = vld [vmem:[#allocation6 + $0x420] sm:$0xff]  ;;  %v2482_v60 = vld [vmem:[#allocation6 + $0x410] sm:$0xff] }
 0x499   : > { %10631 = vmatpush1.bf16.msra.mxu1 %v10630_v45  ;;  %10759 = vmatpush1.bf16.msra.mxu0 %v10758_v46  ;;  %v2454_v45 = vld [vmem:[#allocation6 + $0x330] sm:$0xff]  ;;  %v2457_v46 = vld [vmem:[#allocation6 + $0x348] sm:$0xff] }
 0x49a   : > { %10633 = vmatprep.subr.bf16.mxu1 %v10632_v49  ;;  %10761 = vmatprep.subr.bf16.mxu0 %v10760_v52  ;;  %v2463_v49 = vld [vmem:[#allocation6 + $0x378] sm:$0xff]  ;;  %v10650_v52 = vpack.c.bf16 %v2452_v39, %v2448_v38  ;;  %v10778_v54 = vpack.c.bf16 %v2454_v45, %v2450_v43  ;;  %v10652_v58 = vpack.c.bf16 %v2461_v27, %v2457_v46  ;;  %v2493_v38 = vld [vmem:[#allocation6 + $0x468] sm:$0xff]  ;;  %v2488_v45 = vld [vmem:[#allocation6 + $0x440] sm:$0xff] }
 0x49b   : > { %v10780_v24 = vpack.c.bf16 %v2463_v49, %v2459_v48  ;;  %v2491_v39 = vld [vmem:[#allocation6 + $0x458] sm:$0xff]  ;;  %v2492_v46 = vld [vmem:[#allocation6 + $0x460] sm:$0xff]  ;;  %v2490_v49 = vld [vmem:[#allocation6 + $0x450] sm:$0xff] }
 0x49d   : > { %10635 = vmatpush1.bf16.msra.mxu1 %v10634_v61  ;;  %10763 = vmatpush1.bf16.msra.mxu0 %v10762_v42  ;;  %v2462_v61 = vld [vmem:[#allocation6 + $0x370] sm:$0xff]  ;;  %v2465_v42 = vld [vmem:[#allocation6 + $0x388] sm:$0xff] }
 0x49e   : > { %10637 = vmatprep.subr.bf16.mxu1 %v10636_v1  ;;  %10765 = vmatprep.subr.bf16.mxu0 %v10764_v62  ;;  %v2471_v1 = vld [vmem:[#allocation6 + $0x3b8] sm:$0xff]  ;;  %v10654_v62 = vpack.c.bf16 %v2460_v47, %v2456_v55  ;;  %v10782_v29 = vpack.c.bf16 %v2462_v61, %v2458_v35  ;;  %v10656_v2 = vpack.c.bf16 %v2469_v19, %v2465_v42  ;;  %v12037_v55 = vld [vmem:[#allocation2] sm:$0xff]  ;;  %v2501_v47 = vld [vmem:[#allocation6 + $0x4a8] sm:$0xff] }
 0x49f   : > { %v10784_v63 = vpack.c.bf16 %v2471_v1, %v2467_v32  ;;  %v10670_v35 = vpack.c.bf16 %v2492_v46, %v2488_v45  ;;  %v2496_v42 = vld [vmem:[#allocation6 + $0x480] sm:$0xff]  ;;  %v2498_v32 = vld [vmem:[#allocation6 + $0x490] sm:$0xff]  ;;  %v2533_v45 = vld [vmem:[#allocation6 + $0x5a8] sm:$0xff] }
 0x4a0   : > { %v2500_v19 = vld [vmem:[#allocation6 + $0x4a0] sm:$0xff]  ;;  %v2531_v46 = vld [vmem:[#allocation6 + $0x598] sm:$0xff] }
 0x4a1   : > { %10639 = vmatpush1.bf16.msra.mxu1 %v10638_v4  ;;  %10767 = vmatpush1.bf16.msra.mxu0 %v10766_v6  ;;  %v2470_v4 = vld [vmem:[#allocation6 + $0x3b0] sm:$0xff]  ;;  %v2473_v6 = vld [vmem:[#allocation6 + $0x3c8] sm:$0xff] }
 0x4a2   : > { %10641 = vmatprep.subr.bf16.mxu1 %v10640_v10  ;;  %10769 = vmatprep.subr.bf16.mxu0 %v10768_v12  ;;  %v2479_v10 = vld [vmem:[#allocation6 + $0x3f8] sm:$0xff]  ;;  %v10658_v12 = vpack.c.bf16 %v2468_v9, %v2464_v51  ;;  %v10786_v13 = vpack.c.bf16 %v2470_v4, %v2466_v0  ;;  %v10660_v40 = vpack.c.bf16 %v2477_v7, %v2473_v6  ;;  %v2505_v51 = vld [vmem:[#allocation6 + $0x4c8] sm:$0xff]  ;;  %v2504_v7 = vld [vmem:[#allocation6 + $0x4c0] sm:$0xff] }
 0x4a3   : > { %v10788_v16 = vpack.c.bf16 %v2479_v10, %v2475_v8  ;;  %v2509_v9 = vld [vmem:[#allocation6 + $0x4e8] sm:$0xff]  ;;  %v10674_v0 = vpack.c.bf16 %v2500_v19, %v2496_v42  ;;  %v2508_v8 = vld [vmem:[#allocation6 + $0x4e0] sm:$0xff]  ;;  %v2506_v10 = vld [vmem:[#allocation6 + $0x4d0] sm:$0xff] }
 0x4a4   : > { %v10676_v6 = vpack.c.bf16 %v2509_v9, %v2505_v51  ;;  %v2539_v42 = vld [vmem:[#allocation6 + $0x5d8] sm:$0xff]  ;;  %v2540_v51 = vld [vmem:[#allocation6 + $0x5e0] sm:$0xff]  ;;  %v2538_v9 = vld [vmem:[#allocation6 + $0x5d0] sm:$0xff] }
 0x4a5   : > { %10643 = vmatpush1.bf16.msra.mxu1 %v10642_v20  ;;  %10771 = vmatpush1.bf16.msra.mxu0 %v10770_v31  ;;  %v2478_v20 = vld [vmem:[#allocation6 + $0x3f0] sm:$0xff]  ;;  %v2481_v31 = vld [vmem:[#allocation6 + $0x408] sm:$0xff]  ;;  %v2543_v19 = vld [vmem:[#allocation6 + $0x5f8] sm:$0xff] }
 0x4a6   : > { %10645 = vmatprep.subr.bf16.mxu1 %v10644_v23  ;;  %10773 = vmatprep.subr.bf16.mxu0 %v10772_v25  ;;  %v2487_v23 = vld [vmem:[#allocation6 + $0x438] sm:$0xff]  ;;  %v10662_v25 = vpack.c.bf16 %v2476_v15, %v2472_v14  ;;  %v10790_v26 = vpack.c.bf16 %v2478_v20, %v2474_v17  ;;  %v10664_v28 = vpack.c.bf16 %v2485_v21, %v2481_v31  ;;  %v2513_v14 = vld [vmem:[#allocation6 + $0x508] sm:$0xff]  ;;  %v2512_v31 = vld [vmem:[#allocation6 + $0x500] sm:$0xff] }
 0x4a7   : > { %v10792_v33 = vpack.c.bf16 %v2487_v23, %v2483_v22  ;;  %v2517_v15 = vld [vmem:[#allocation6 + $0x528] sm:$0xff]  ;;  %v2516_v21 = vld [vmem:[#allocation6 + $0x520] sm:$0xff]  ;;  %v2514_v22 = vld [vmem:[#allocation6 + $0x510] sm:$0xff] }
 0x4a8   : > { %v10680_v20 = vpack.c.bf16 %v2517_v15, %v2513_v14  ;;  %v2546_v14 = vld [vmem:[#allocation6 + $0x610] sm:$0xff] }
 0x4a9   : > { %10647 = vmatpush1.bf16.msra.mxu1 %v10646_v36  ;;  %10775 = vmatpush1.bf16.msra.mxu0 %v10774_v37  ;;  %v2486_v36 = vld [vmem:[#allocation6 + $0x430] sm:$0xff]  ;;  %v2489_v37 = vld [vmem:[#allocation6 + $0x448] sm:$0xff] }
 0x4aa   : > { %10649 = vmatprep.subr.bf16.mxu1 %v10648_v41  ;;  %10777 = vmatprep.subr.bf16.mxu0 %v10776_v30  ;;  %v2495_v41 = vld [vmem:[#allocation6 + $0x478] sm:$0xff]  ;;  %v10666_v30 = vpack.c.bf16 %v2484_v44, %v2480_v34  ;;  %v10794_v43 = vpack.c.bf16 %v2486_v36, %v2482_v60  ;;  %v10668_v27 = vpack.c.bf16 %v2493_v38, %v2489_v37  ;;  %v2520_v37 = vld [vmem:[#allocation6 + $0x540] sm:$0xff] }
 0x4ab   : > { %v10796_v48 = vpack.c.bf16 %v2495_v41, %v2491_v39  ;;  %v2527_v34 = vld [vmem:[#allocation6 + $0x578] sm:$0xff]  ;;  %v10682_v44 = vpack.c.bf16 %v2516_v21, %v2512_v31  ;;  %v2524_v38 = vld [vmem:[#allocation6 + $0x560] sm:$0xff]  ;;  %v2522_v39 = vld [vmem:[#allocation6 + $0x550] sm:$0xff] }
 0x4ad   : > { %10651 = vmatpush1.bf16.msra.mxu1 %v10650_v52  ;;  %10779 = vmatpush1.bf16.msra.mxu0 %v10778_v54  ;;  %v2494_v52 = vld [vmem:[#allocation6 + $0x470] sm:$0xff]  ;;  %v2497_v54 = vld [vmem:[#allocation6 + $0x488] sm:$0xff] }
 0x4ae   : > { %10653 = vmatprep.subr.bf16.mxu1 %v10652_v58  ;;  %10781 = vmatprep.subr.bf16.mxu0 %v10780_v24  ;;  %v2499_v58 = vld [vmem:[#allocation6 + $0x498] sm:$0xff]  ;;  %v10798_v61 = vpack.c.bf16 %v2494_v52, %v2490_v49  ;;  %v10672_v1 = vpack.c.bf16 %v2501_v47, %v2497_v54  ;;  %v2528_v54 = vld [vmem:[#allocation6 + $0x580] sm:$0xff]  ;;  %v2530_v47 = vld [vmem:[#allocation6 + $0x590] sm:$0xff] }
 0x4af   : > { %v2503_v24 = vld [vmem:[#allocation6 + $0x4b8] sm:$0xff] }
 0x4b1   : > { %10655 = vmatpush1.bf16.msra.mxu1 %v10654_v62  ;;  %10783 = vmatpush1.bf16.msra.mxu0 %v10782_v29  ;;  %v10800_v62 = vpack.c.bf16 %v2503_v24, %v2499_v58  ;;  %v2502_v29 = vld [vmem:[#allocation6 + $0x4b0] sm:$0xff] }
 0x4b2   : > { %10657 = vmatprep.subr.bf16.mxu1 %v10656_v2  ;;  %10785 = vmatprep.subr.bf16.mxu0 %v10784_v63  ;;  %v2507_v2 = vld [vmem:[#allocation6 + $0x4d8] sm:$0xff]  ;;  %v10802_v4 = vpack.c.bf16 %v2502_v29, %v2498_v32  ;;  %v2534_v24 = vld [vmem:[#allocation6 + $0x5b0] sm:$0xff]  ;;  %v2536_v29 = vld [vmem:[#allocation6 + $0x5c0] sm:$0xff] }
 0x4b3   : > { %v2511_v63 = vld [vmem:[#allocation6 + $0x4f8] sm:$0xff] }
 0x4b5   : > { %10659 = vmatpush1.bf16.msra.mxu1 %v10658_v12  ;;  %10787 = vmatpush1.bf16.msra.mxu0 %v10786_v13  ;;  %v10804_v12 = vpack.c.bf16 %v2511_v63, %v2507_v2  ;;  %v2510_v13 = vld [vmem:[#allocation6 + $0x4f0] sm:$0xff]  ;;  %v10820_v2 = vpack.c.bf16 %v2543_v19, %v2539_v42  ;;  %v2577_v19 = vld [vmem:[#allocation6 + $0x708] sm:$0xff] }
 0x4b6   : > { %10661 = vmatprep.subr.bf16.mxu1 %v10660_v40  ;;  %10789 = vmatprep.subr.bf16.mxu0 %v10788_v16  ;;  %v2519_v40 = vld [vmem:[#allocation6 + $0x538] sm:$0xff]  ;;  %v10678_v16 = vpack.c.bf16 %v2508_v8, %v2504_v7  ;;  %v10806_v17 = vpack.c.bf16 %v2510_v13, %v2506_v10  ;;  %v2542_v63 = vld [vmem:[#allocation6 + $0x5f0] sm:$0xff]  ;;  %v10694_v7 = vpack.c.bf16 %v2540_v51, %v2536_v29  ;;  %v2548_v13 = vld [vmem:[#allocation6 + $0x620] sm:$0xff] }
 0x4b7   : > { %v10822_v8 = vpack.c.bf16 %v2542_v63, %v2538_v9  ;;  %v2574_v42 = vld [vmem:[#allocation6 + $0x6f0] sm:$0xff]  ;;  %v2580_v63 = vld [vmem:[#allocation6 + $0x720] sm:$0xff] }
 0x4b9   : > { %10663 = vmatpush1.bf16.msra.mxu1 %v10662_v25  ;;  %10791 = vmatpush1.bf16.msra.mxu0 %v10790_v26  ;;  %v2518_v25 = vld [vmem:[#allocation6 + $0x530] sm:$0xff]  ;;  %v2521_v26 = vld [vmem:[#allocation6 + $0x548] sm:$0xff] }
 0x4ba   : > { %10665 = vmatprep.subr.bf16.mxu1 %v10664_v28  ;;  %10793 = vmatprep.subr.bf16.mxu0 %v10792_v33  ;;  %v2525_v28 = vld [vmem:[#allocation6 + $0x568] sm:$0xff]  ;;  %v2523_v33 = vld [vmem:[#allocation6 + $0x558] sm:$0xff]  ;;  %v10810_v60 = vpack.c.bf16 %v2518_v25, %v2514_v22  ;;  %v2556_v25 = vld [vmem:[#allocation6 + $0x660] sm:$0xff] }
 0x4bb   : > { %v10684_v36 = vpack.c.bf16 %v2525_v28, %v2521_v26  ;;  %v10812_v41 = vpack.c.bf16 %v2527_v34, %v2523_v33  ;;  %v2554_v26 = vld [vmem:[#allocation6 + $0x650] sm:$0xff]  ;;  %v2561_v34 = vld [vmem:[#allocation6 + $0x688] sm:$0xff] }
 0x4bc   : > { %3278 = vmatmul.mubr.f32.vlgmr.msra.gmra.mrb[12].mxu1 %v12037_v55  ;;  %3432 = vmatmul.mubr.f32.vlgmr.msra.gmra.mrb[8].mxu0 %v12037_v55  ;;  %v2532_v55 = vld [vmem:[#allocation6 + $0x5a0] sm:$0xff]  ;;  %v2558_v33 = vld [vmem:[#allocation6 + $0x670] sm:$0xff] }
 0x4bd   : > { %3283 = vmatprep.mubr.f32.mxu1 %v13195_v56  ;;  %10667 = vmatpush1.bf16.msra.mxu1 %v10666_v30  ;;  %v2526_v30 = vld [vmem:[#allocation6 + $0x570] sm:$0xff]  ;;  %v10690_v32 = vpack.c.bf16 %v2532_v55, %v2528_v54 }
 0x4be   : > { %3437 = vmatprep.mubr.f32.mxu0 %v13195_v56  ;;  %10795 = vmatpush1.bf16.msra.mxu0 %v10794_v43  ;;  %v12038_v56 = vld [vmem:[#allocation2 + $0x18] sm:$0xff]  ;;  %v2529_v43 = vld [vmem:[#allocation6 + $0x588] sm:$0xff]  ;;  %v10814_v49 = vpack.c.bf16 %v2526_v30, %v2522_v39  ;;  %v2564_v30 = vld [vmem:[#allocation6 + $0x6a0] sm:$0xff] }
 0x4bf   : > { %10669 = vmatprep.subr.bf16.mxu1 %v10668_v27  ;;  %10797 = vmatprep.subr.bf16.mxu0 %v10796_v48  ;;  %v2535_v27 = vld [vmem:[#allocation6 + $0x5b8] sm:$0xff]  ;;  %v10686_v48 = vpack.c.bf16 %v2524_v38, %v2520_v37  ;;  %v10688_v52 = vpack.c.bf16 %v2533_v45, %v2529_v43  ;;  %v10830_v38 = vpack.c.bf16 %v2558_v33, %v2554_v26  ;;  %v2562_v43 = vld [vmem:[#allocation6 + $0x690] sm:$0xff]  ;;  %v2596_v33 = vld [vmem:[#allocation6 + $0x7a0] sm:$0xff] }
 0x4c0   : > { %3284 = vmatmul.mubr.f32.gmra.mrb[14].mxu1 %v13197_v18  ;;  %3438 = vmatmul.mubr.f32.gmra.mrb[10].mxu0 %v13197_v18  ;;  %v2515_v18 = vld [vmem:[#allocation6 + $0x518] sm:$0xff]  ;;  %v10816_v58 = vpack.c.bf16 %v2535_v27, %v2531_v46  ;;  %v2566_v46 = vld [vmem:[#allocation6 + $0x6b0] sm:$0xff]  ;;  %v2569_v27 = vld [vmem:[#allocation6 + $0x6c8] sm:$0xff] }
 0x4c1   : > { %10671 = vmatpush1.bf16.msra.mxu1 %v10670_v35  ;;  %3354 = vmatprep.mubr.f32.mxu1 %v12038_v56  ;;  %v10808_v23 = vpack.c.bf16 %v2519_v40, %v2515_v18  ;;  %v2537_v35 = vld [vmem:[#allocation6 + $0x5c8] sm:$0xff]  ;;  %v2550_v18 = vld [vmem:[#allocation6 + $0x630] sm:$0xff]  ;;  %v10834_v55 = vpack.c.bf16 %v2566_v46, %v2562_v43  ;;  %v2604_v46 = vld [vmem:[#allocation6 + $0x7e0] sm:$0xff] }
 0x4c2   : > { %10799 = vmatpush1.bf16.msra.mxu0 %v10798_v61  ;;  %3508 = vmatprep.mubr.f32.mxu0 %v12038_v56  ;;  %v2541_v61 = vld [vmem:[#allocation6 + $0x5e8] sm:$0xff]  ;;  %v10826_v21 = vpack.c.bf16 %v2550_v18, %v2546_v14  ;;  %v2588_v18 = vld [vmem:[#allocation6 + $0x760] sm:$0xff] }
 0x4c3   : > { %10673 = vmatprep.subr.bf16.mxu1 %v10672_v1  ;;  %10801 = vmatprep.subr.bf16.mxu0 %v10800_v62  ;;  %v10818_v1 = vpack.c.bf16 %v2534_v24, %v2530_v47  ;;  %v10692_v62 = vpack.c.bf16 %v2541_v61, %v2537_v35  ;;  %v2545_v56 = vld [vmem:[#allocation6 + $0x608] sm:$0xff]  ;;  %v2572_v24 = vld [vmem:[#allocation6 + $0x6e0] sm:$0xff]  ;;  %v2570_v35 = vld [vmem:[#allocation6 + $0x6d0] sm:$0xff] }
 0x4c4   : > { %v2553_v40 = vld [vmem:[#allocation6 + $0x648] sm:$0xff]  ;;  %v10838_v51 = vpack.c.bf16 %v2574_v42, %v2570_v35  ;;  %v7493_v42 = vld [vmem:[%s16550_s9 + $0x200] sm:$0xff] }
 0x4c5   : > { %10675 = vmatpush1.bf16.msra.mxu1 %v10674_v0  ;;  %v2549_v0 = vld [vmem:[#allocation6 + $0x628] sm:$0xff] }
 0x4c6   : > { %10803 = vmatpush1.bf16.msra.mxu0 %v10802_v4  ;;  %10677 = vmatprep.subr.bf16.mxu1 %v10676_v6  ;;  %v2547_v4 = vld [vmem:[#allocation6 + $0x618] sm:$0xff]  ;;  %v10696_v10 = vpack.c.bf16 %v2549_v0, %v2545_v56  ;;  %v2578_v56 = vld [vmem:[#allocation6 + $0x710] sm:$0xff] }
 0x4c7   : > { %10805 = vmatprep.subr.bf16.mxu0 %v10804_v12  ;;  %v2551_v6 = vld [vmem:[#allocation6 + $0x638] sm:$0xff]  ;;  %v2544_v12 = vld [vmem:[#allocation6 + $0x600] sm:$0xff] }
 0x4c8   : > { %v10824_v15 = vpack.c.bf16 %v2551_v6, %v2547_v4  ;;  %v10698_v31 = vpack.c.bf16 %v2548_v13, %v2544_v12  ;;  %v2582_v4 = vld [vmem:[#allocation6 + $0x730] sm:$0xff]  ;;  %v2585_v6 = vld [vmem:[#allocation6 + $0x748] sm:$0xff] }
 0x4c9   : > { %10679 = vmatpush1.bf16.msra.mxu1 %v10678_v16  ;;  %v2557_v16 = vld [vmem:[#allocation6 + $0x668] sm:$0xff]  ;;  %v10842_v13 = vpack.c.bf16 %v2582_v4, %v2578_v56  ;;  %v7496_v4 = vld [vmem:[%s16550_s9 + $0x218] sm:$0xff] }
 0x4ca   : > { %10807 = vmatpush1.bf16.msra.mxu0 %v10806_v17  ;;  %10681 = vmatprep.subr.bf16.mxu1 %v10680_v20  ;;  %v2555_v17 = vld [vmem:[#allocation6 + $0x658] sm:$0xff]  ;;  %v10700_v22 = vpack.c.bf16 %v2557_v16, %v2553_v40  ;;  %v2586_v40 = vld [vmem:[#allocation6 + $0x750] sm:$0xff] }
 0x4cb   : > { %10809 = vmatprep.subr.bf16.mxu0 %v10808_v23  ;;  %v2559_v20 = vld [vmem:[#allocation6 + $0x678] sm:$0xff]  ;;  %v2552_v23 = vld [vmem:[#allocation6 + $0x640] sm:$0xff] }
 0x4cc   : > { %v10828_v28 = vpack.c.bf16 %v2559_v20, %v2555_v17  ;;  %v10702_v37 = vpack.c.bf16 %v2556_v25, %v2552_v23  ;;  %v2590_v17 = vld [vmem:[#allocation6 + $0x770] sm:$0xff]  ;;  %v2593_v20 = vld [vmem:[#allocation6 + $0x788] sm:$0xff] }
 0x4cd   : > { %10683 = vmatpush1.bf16.msra.mxu1 %v10682_v44  ;;  %v2565_v44 = vld [vmem:[#allocation6 + $0x6a8] sm:$0xff]  ;;  %v10846_v25 = vpack.c.bf16 %v2590_v17, %v2586_v40  ;;  %v7497_v17 = vld [vmem:[%s16550_s9 + $0x220] sm:$0xff] }
 0x4ce   : > { %10811 = vmatpush1.bf16.msra.mxu0 %v10810_v60  ;;  %10685 = vmatprep.subr.bf16.mxu1 %v10684_v36  ;;  %v2563_v60 = vld [vmem:[#allocation6 + $0x698] sm:$0xff]  ;;  %v10704_v39 = vpack.c.bf16 %v2565_v44, %v2561_v34  ;;  %v2594_v34 = vld [vmem:[#allocation6 + $0x790] sm:$0xff] }
 0x4cf   : > { %10813 = vmatprep.subr.bf16.mxu0 %v10812_v41  ;;  %v2567_v36 = vld [vmem:[#allocation6 + $0x6b8] sm:$0xff]  ;;  %v2560_v41 = vld [vmem:[#allocation6 + $0x680] sm:$0xff] }
 0x4d0   : > { %v10832_v45 = vpack.c.bf16 %v2567_v36, %v2563_v60  ;;  %v10706_v54 = vpack.c.bf16 %v2564_v30, %v2560_v41  ;;  %v2598_v60 = vld [vmem:[#allocation6 + $0x7b0] sm:$0xff]  ;;  %v2601_v36 = vld [vmem:[#allocation6 + $0x7c8] sm:$0xff] }
 0x4d1   : > { %10687 = vmatpush1.bf16.msra.mxu1 %v10686_v48  ;;  %v2573_v48 = vld [vmem:[#allocation6 + $0x6e8] sm:$0xff]  ;;  %v10850_v30 = vpack.c.bf16 %v2598_v60, %v2594_v34 }
 0x4d2   : > { %10815 = vmatpush1.bf16.msra.mxu0 %v10814_v49  ;;  %10689 = vmatprep.subr.bf16.mxu1 %v10688_v52  ;;  %v2571_v49 = vld [vmem:[#allocation6 + $0x6d8] sm:$0xff]  ;;  %v10708_v47 = vpack.c.bf16 %v2573_v48, %v2569_v27  ;;  %v2602_v27 = vld [vmem:[#allocation6 + $0x7d0] sm:$0xff] }
 0x4d3   : > { %10817 = vmatprep.subr.bf16.mxu0 %v10816_v58  ;;  %v2575_v52 = vld [vmem:[#allocation6 + $0x6f8] sm:$0xff]  ;;  %v2568_v58 = vld [vmem:[#allocation6 + $0x6c0] sm:$0xff] }
 0x4d4   : > { %v10836_v61 = vpack.c.bf16 %v2575_v52, %v2571_v49  ;;  %v10710_v29 = vpack.c.bf16 %v2572_v24, %v2568_v58  ;;  %v2606_v49 = vld [vmem:[#allocation6 + $0x7f0] sm:$0xff]  ;;  %v7509_v52 = vld [vmem:[%s16550_s9 + $0x280] sm:$0xff] }
 0x4d5   : > { %10691 = vmatpush1.bf16.msra.mxu1 %v10690_v32  ;;  %v2581_v32 = vld [vmem:[#allocation6 + $0x728] sm:$0xff]  ;;  %v10854_v24 = vpack.c.bf16 %v2606_v49, %v2602_v27  ;;  %v7501_v27 = vld [vmem:[%s16550_s9 + $0x240] sm:$0xff] }
 0x4d6   : > { %10819 = vmatpush1.bf16.msra.mxu0 %v10818_v1  ;;  %10693 = vmatprep.subr.bf16.mxu1 %v10692_v62  ;;  %v2579_v1 = vld [vmem:[#allocation6 + $0x718] sm:$0xff]  ;;  %v10712_v9 = vpack.c.bf16 %v2581_v32, %v2577_v19  ;;  %v7494_v19 = vld [vmem:[%s16550_s9 + $0x208] sm:$0xff]  ;;  %v7525_v32 = vld [vmem:[%s16550_s9 + $0x300] sm:$0xff] }
 0x4d7   : > { %10821 = vmatprep.subr.bf16.mxu0 %v10820_v2  ;;  %v2583_v62 = vld [vmem:[#allocation6 + $0x738] sm:$0xff]  ;;  %v2576_v2 = vld [vmem:[#allocation6 + $0x700] sm:$0xff]  ;;  %v7502_v49 = vld [vmem:[%s16550_s9 + $0x248] sm:$0xff] }
 0x4d8   : > { %v10840_v0 = vpack.c.bf16 %v2583_v62, %v2579_v1  ;;  %v10714_v12 = vpack.c.bf16 %v2580_v63, %v2576_v2  ;;  %v7526_v1 = vld [vmem:[%s16550_s9 + $0x308] sm:$0xff]  ;;  %v7511_v62 = vld [vmem:[%s16550_s9 + $0x290] sm:$0xff]  ;;  %v10858_v2 = vpack.c.bf16 %v7494_v19, %v7493_v42  ;;  %v7552_v42 = vld [vmem:[%s16550_s9 + $0x3d8] sm:$0xff] }
 0x4d9   : > { %10695 = vmatpush1.bf16.msra.mxu1 %v10694_v7  ;;  %v2589_v7 = vld [vmem:[#allocation6 + $0x768] sm:$0xff]  ;;  %v10890_v63 = vpack.c.bf16 %v7526_v1, %v7525_v32  ;;  %v7503_v19 = vld [vmem:[%s16550_s9 + $0x250] sm:$0xff]  ;;  %v7504_v32 = vld [vmem:[%s16550_s9 + $0x258] sm:$0xff] }
 0x4da   : > { %10823 = vmatpush1.bf16.msra.mxu0 %v10822_v8  ;;  %10697 = vmatprep.subr.bf16.mxu1 %v10696_v10  ;;  %v2587_v8 = vld [vmem:[#allocation6 + $0x758] sm:$0xff]  ;;  %v10716_v14 = vpack.c.bf16 %v2589_v7, %v2585_v6  ;;  %v7527_v6 = vld [vmem:[%s16550_s9 + $0x310] sm:$0xff] }
 0x4db   : > { %10825 = vmatprep.subr.bf16.mxu0 %v10824_v15  ;;  %v2591_v10 = vld [vmem:[#allocation6 + $0x778] sm:$0xff]  ;;  %v2584_v15 = vld [vmem:[#allocation6 + $0x740] sm:$0xff]  ;;  %v12039_v7 = vld [vmem:[#allocation2 + $0x10] sm:$0xff] }
 0x4dc   : > { %v10844_v16 = vpack.c.bf16 %v2591_v10, %v2587_v8  ;;  %v10718_v23 = vpack.c.bf16 %v2588_v18, %v2584_v15  ;;  %v7528_v10 = vld [vmem:[%s16550_s9 + $0x318] sm:$0xff]  ;;  %v7546_v15 = vld [vmem:[%s16550_s9 + $0x3a8] sm:$0xff] }
 0x4dd   : > { %10699 = vmatpush1.bf16.msra.mxu1 %v10698_v31  ;;  %v2597_v31 = vld [vmem:[#allocation6 + $0x7a8] sm:$0xff]  ;;  %v10894_v40 = vpack.c.bf16 %v7528_v10, %v7527_v6  ;;  %v7505_v6 = vld [vmem:[%s16550_s9 + $0x260] sm:$0xff] }
 0x4de   : > { %10827 = vmatpush1.bf16.msra.mxu0 %v10826_v21  ;;  %10701 = vmatprep.subr.bf16.mxu1 %v10700_v22  ;;  %v2595_v21 = vld [vmem:[#allocation6 + $0x798] sm:$0xff]  ;;  %v10720_v26 = vpack.c.bf16 %v2597_v31, %v2593_v20  ;;  %v7498_v20 = vld [vmem:[%s16550_s9 + $0x228] sm:$0xff]  ;;  %v7529_v31 = vld [vmem:[%s16550_s9 + $0x320] sm:$0xff] }
 0x4df   : > { %10829 = vmatprep.subr.bf16.mxu0 %v10828_v28  ;;  %v2599_v22 = vld [vmem:[#allocation6 + $0x7b8] sm:$0xff]  ;;  %v2592_v28 = vld [vmem:[#allocation6 + $0x780] sm:$0xff] }
 0x4e0   : > { %v10848_v44 = vpack.c.bf16 %v2599_v22, %v2595_v21  ;;  %v10722_v41 = vpack.c.bf16 %v2596_v33, %v2592_v28  ;;  %v7530_v21 = vld [vmem:[%s16550_s9 + $0x328] sm:$0xff]  ;;  %v7515_v22 = vld [vmem:[%s16550_s9 + $0x2b0] sm:$0xff]  ;;  %v10866_v28 = vpack.c.bf16 %v7498_v20, %v7497_v17  ;;  %v7556_v17 = vld [vmem:[%s16550_s9 + $0x3f8] sm:$0xff] }
 0x4e1   : > { %10703 = vmatpush1.bf16.msra.mxu1 %v10702_v37  ;;  %v2605_v37 = vld [vmem:[#allocation6 + $0x7e8] sm:$0xff]  ;;  %v10898_v33 = vpack.c.bf16 %v7530_v21, %v7529_v31  ;;  %v7507_v20 = vld [vmem:[%s16550_s9 + $0x270] sm:$0xff]  ;;  %v7508_v31 = vld [vmem:[%s16550_s9 + $0x278] sm:$0xff] }
 0x4e2   : > { %10831 = vmatpush1.bf16.msra.mxu0 %v10830_v38  ;;  %10705 = vmatprep.subr.bf16.mxu1 %v10704_v39  ;;  %v2603_v38 = vld [vmem:[#allocation6 + $0x7d8] sm:$0xff]  ;;  %v10724_v43 = vpack.c.bf16 %v2605_v37, %v2601_v36  ;;  %v7531_v36 = vld [vmem:[%s16550_s9 + $0x330] sm:$0xff]  ;;  %v10886_v21 = vpack.c.bf16 %v7508_v31, %v7507_v20 }
 0x4e3   : > { %10833 = vmatprep.subr.bf16.mxu0 %v10832_v45  ;;  %v2607_v39 = vld [vmem:[#allocation6 + $0x7f8] sm:$0xff]  ;;  %v2600_v45 = vld [vmem:[#allocation6 + $0x7c0] sm:$0xff]  ;;  %v3602_v31 = vld [vmem:[%s16550_s9 + $0x110] sm:$0xff] }
 0x4e4   : > { %v10852_v48 = vpack.c.bf16 %v2607_v39, %v2603_v38  ;;  %v10726_v58 = vpack.c.bf16 %v2604_v46, %v2600_v45  ;;  %v7532_v37 = vld [vmem:[%s16550_s9 + $0x338] sm:$0xff]  ;;  %v7550_v46 = vld [vmem:[%s16550_s9 + $0x3c8] sm:$0xff] }
 0x4e5   : > { %10707 = vmatpush1.bf16.msra.mxu1 %v10706_v54  ;;  %v7510_v54 = vld [vmem:[%s16550_s9 + $0x288] sm:$0xff]  ;;  %v10902_v39 = vpack.c.bf16 %v7532_v37, %v7531_v36  ;;  %v3571_v20 = vld [vmem:[%s16550_s9 + $0x18] sm:$0xff] }
 0x4e6   : > { %10835 = vmatpush1.bf16.msra.mxu0 %v10834_v55  ;;  %10709 = vmatprep.subr.bf16.mxu1 %v10708_v47  ;;  %v7541_v55 = vld [vmem:[%s16550_s9 + $0x380] sm:$0xff]  ;;  %v7542_v47 = vld [vmem:[%s16550_s9 + $0x388] sm:$0xff]  ;;  %v10856_v35 = vpack.c.bf16 %v7510_v54, %v7509_v52 }
 0x4e7   : > { %10837 = vmatprep.subr.bf16.mxu0 %v10836_v61  ;;  %v10888_v61 = vpack.c.bf16 %v7542_v47, %v7541_v55  ;;  %v7533_v52 = vld [vmem:[%s16550_s9 + $0x340] sm:$0xff]  ;;  %v7534_v54 = vld [vmem:[%s16550_s9 + $0x348] sm:$0xff]  ;;  %v10874_v55 = vpack.c.bf16 %v7502_v49, %v7501_v27 }
 0x4e8   : > { %v10906_v47 = vpack.c.bf16 %v7534_v54, %v7533_v52 }
 0x4e9   : > { %10711 = vmatpush1.bf16.msra.mxu1 %v10710_v29  ;;  %v7512_v29 = vld [vmem:[%s16550_s9 + $0x298] sm:$0xff] }
 0x4ea   : > { %10839 = vmatpush1.bf16.msra.mxu0 %v10838_v51  ;;  %10713 = vmatprep.subr.bf16.mxu1 %v10712_v9  ;;  %v7543_v51 = vld [vmem:[%s16550_s9 + $0x390] sm:$0xff]  ;;  %v7544_v9 = vld [vmem:[%s16550_s9 + $0x398] sm:$0xff]  ;;  %v10860_v56 = vpack.c.bf16 %v7512_v29, %v7511_v62  ;;  %v10878_v62 = vpack.c.bf16 %v7504_v32, %v7503_v19 }
 0x4eb   : > { %10841 = vmatprep.subr.bf16.mxu0 %v10840_v0  ;;  %v7495_v0 = vld [vmem:[%s16550_s9 + $0x210] sm:$0xff]  ;;  %v10892_v8 = vpack.c.bf16 %v7544_v9, %v7543_v51  ;;  %v7536_v51 = vld [vmem:[%s16550_s9 + $0x358] sm:$0xff] }
 0x4ec   : > { %v10862_v18 = vpack.c.bf16 %v7496_v4, %v7495_v0  ;;  %v7535_v29 = vld [vmem:[%s16550_s9 + $0x350] sm:$0xff]  ;;  %v7554_v4 = vld [vmem:[%s16550_s9 + $0x3e8] sm:$0xff] }
 0x4ed   : > { %10715 = vmatpush1.bf16.msra.mxu1 %v10714_v12  ;;  %v7513_v12 = vld [vmem:[%s16550_s9 + $0x2a0] sm:$0xff]  ;;  %v10910_v9 = vpack.c.bf16 %v7536_v51, %v7535_v29 }
 0x4ee   : > { %10843 = vmatpush1.bf16.msra.mxu0 %v10842_v13  ;;  %10717 = vmatprep.subr.bf16.mxu1 %v10716_v14  ;;  %v7514_v13 = vld [vmem:[%s16550_s9 + $0x2a8] sm:$0xff]  ;;  %v7545_v14 = vld [vmem:[%s16550_s9 + $0x3a0] sm:$0xff] }
 0x4ef   : > { %10845 = vmatprep.subr.bf16.mxu0 %v10844_v16  ;;  %v10864_v16 = vpack.c.bf16 %v7514_v13, %v7513_v12  ;;  %v7537_v12 = vld [vmem:[%s16550_s9 + $0x360] sm:$0xff]  ;;  %v7538_v13 = vld [vmem:[%s16550_s9 + $0x368] sm:$0xff] }
 0x4f1   : > { %10719 = vmatpush1.bf16.msra.mxu1 %v10718_v23  ;;  %v7516_v23 = vld [vmem:[%s16550_s9 + $0x2b8] sm:$0xff] }
 0x4f2   : > { %10847 = vmatpush1.bf16.msra.mxu0 %v10846_v25  ;;  %10721 = vmatprep.subr.bf16.mxu1 %v10720_v26  ;;  %v7547_v25 = vld [vmem:[%s16550_s9 + $0x3b0] sm:$0xff]  ;;  %v7548_v26 = vld [vmem:[%s16550_s9 + $0x3b8] sm:$0xff]  ;;  %v10868_v34 = vpack.c.bf16 %v7516_v23, %v7515_v22 }
 0x4f3   : > { %10849 = vmatprep.subr.bf16.mxu0 %v10848_v44  ;;  %v7499_v44 = vld [vmem:[%s16550_s9 + $0x230] sm:$0xff]  ;;  %v10900_v60 = vpack.c.bf16 %v7548_v26, %v7547_v25  ;;  %v7540_v23 = vld [vmem:[%s16550_s9 + $0x378] sm:$0xff]  ;;  %v3584_v26 = vld [vmem:[%s16550_s9 + $0x80] sm:$0xff] }
 0x4f4   : > { %v7539_v22 = vld [vmem:[%s16550_s9 + $0x370] sm:$0xff] }
 0x4f5   : > { %10723 = vmatpush1.bf16.msra.mxu1 %v10722_v41  ;;  %v7517_v41 = vld [vmem:[%s16550_s9 + $0x2c0] sm:$0xff]  ;;  %v10918_v25 = vpack.c.bf16 %v7540_v23, %v7539_v22 }
 0x4f6   : > { %10851 = vmatpush1.bf16.msra.mxu0 %v10850_v30  ;;  %10725 = vmatprep.subr.bf16.mxu1 %v10724_v43  ;;  %v7518_v30 = vld [vmem:[%s16550_s9 + $0x2c8] sm:$0xff]  ;;  %v7549_v43 = vld [vmem:[%s16550_s9 + $0x3c0] sm:$0xff] }
 0x4f7   : > { %10853 = vmatprep.subr.bf16.mxu0 %v10852_v48  ;;  %v10872_v45 = vpack.c.bf16 %v7518_v30, %v7517_v41  ;;  %v10904_v48 = vpack.c.bf16 %v7550_v46, %v7549_v43 }
 0x4f9   : > { %10727 = vmatpush1.bf16.msra.mxu1 %v10726_v58  ;;  %v7519_v58 = vld [vmem:[%s16550_s9 + $0x2d0] sm:$0xff] }
 0x4fa   : > { %10855 = vmatpush1.bf16.msra.mxu0 %v10854_v24  ;;  %10857 = vmatprep.subr.bf16.mxu1 %v10856_v35  ;;  %v7520_v24 = vld [vmem:[%s16550_s9 + $0x2d8] sm:$0xff]  ;;  %v7551_v35 = vld [vmem:[%s16550_s9 + $0x3d0] sm:$0xff] }
 0x4fb   : > { %10889 = vmatprep.subr.bf16.mxu0 %v10888_v61  ;;  %v10876_v61 = vpack.c.bf16 %v7520_v24, %v7519_v58  ;;  %v10908_v1 = vpack.c.bf16 %v7552_v42, %v7551_v35 }
 0x4fc   : > { %3355 = vmatmul.mubr.f32.vlgmr.msra.gmra.mrb[12].mxu1 %v12039_v7 }
 0x4fd   : > { %3509 = vmatmul.mubr.f32.vlgmr.msra.gmra.mrb[8].mxu0 %v12039_v7  ;;  %3360 = vmatprep.mubr.f32.mxu1 %v13202_v50  ;;  %v7506_v7 = vld [vmem:[%s16550_s9 + $0x268] sm:$0xff] }
 0x4fe   : > { %3514 = vmatprep.mubr.f32.mxu0 %v13202_v50  ;;  %10859 = vmatpush3.bf16.msra.mxu1 %v10858_v2  ;;  %v10896_v50 = vpack.c.bf16 %v7546_v15, %v7545_v14  ;;  %v7521_v2 = vld [vmem:[%s16550_s9 + $0x2e0] sm:$0xff]  ;;  %v10882_v10 = vpack.c.bf16 %v7506_v7, %v7505_v6  ;;  %v10914_v14 = vpack.c.bf16 %v7538_v13, %v7537_v12  ;;  %v7523_v15 = vld [vmem:[%s16550_s9 + $0x2f0] sm:$0xff]  ;;  %v3587_v6 = vld [vmem:[%s16550_s9 + $0x98] sm:$0xff] }
 0x4ff   : > { %10891 = vmatpush3.bf16.msra.mxu0 %v10890_v63  ;;  %10861 = vmatprep.subr.bf16.mxu1 %v10860_v56  ;;  %v7522_v63 = vld [vmem:[%s16550_s9 + $0x2e8] sm:$0xff]  ;;  %v7553_v56 = vld [vmem:[%s16550_s9 + $0x3e0] sm:$0xff]  ;;  %v3618_v12 = vld [vmem:[%s16550_s9 + $0x190] sm:$0xff] }
 0x500   : > { %3361 = vmatmul.mubr.f32.gmra.mrb[14].mxu1 %v13212_v11  ;;  %10893 = vmatprep.subr.bf16.mxu0 %v10892_v8  ;;  %v10880_v0 = vpack.c.bf16 %v7522_v63, %v7521_v2  ;;  %v10912_v8 = vpack.c.bf16 %v7554_v4, %v7553_v56  ;;  %v3568_v2 = vld [vmem:[%s16550_s9] sm:$0xff]  ;;  %v3569_v63 = vld [vmem:[%s16550_s9 + $0x8] sm:$0xff]  ;;  %v3586_v4 = vld [vmem:[%s16550_s9 + $0x90] sm:$0xff] }
 0x501   : > { %3515 = vmatmul.mubr.f32.gmra.mrb[10].mxu0 %v13212_v11  ;;  %v7500_v11 = vld [vmem:[%s16550_s9 + $0x238] sm:$0xff]  ;;  %v3600_v56 = vld [vmem:[%s16550_s9 + $0x100] sm:$0xff]  ;;  %v10924_v22 = vpack.c.bf16 %v3587_v6, %v3586_v4 }
 0x502   : > { %10863 = vmatpush3.bf16.msra.mxu1 %v10862_v18  ;;  %v10870_v38 = vpack.c.bf16 %v7500_v11, %v7499_v44  ;;  %v7524_v18 = vld [vmem:[%s16550_s9 + $0x2f8] sm:$0xff]  ;;  %v3617_v44 = vld [vmem:[%s16550_s9 + $0x188] sm:$0xff] }
 0x503   : > { %10895 = vmatpush3.bf16.msra.mxu0 %v10894_v40  ;;  %10865 = vmatprep.subr.bf16.mxu1 %v10864_v16  ;;  %v7555_v40 = vld [vmem:[%s16550_s9 + $0x3f0] sm:$0xff]  ;;  %v10884_v16 = vpack.c.bf16 %v7524_v18, %v7523_v15  ;;  %v3619_v13 = vld [vmem:[%s16550_s9 + $0x198] sm:$0xff] }
 0x504   : > { %10897 = vmatprep.subr.bf16.mxu0 %v10896_v50  ;;  %v10916_v50 = vpack.c.bf16 %v7556_v17, %v7555_v40  ;;  %v3570_v17 = vld [vmem:[%s16550_s9 + $0x10] sm:$0xff]  ;;  %v10956_v23 = vpack.c.bf16 %v3619_v13, %v3618_v12  ;;  %v3627_v4 = vld [vmem:[%s16550_s9 + $0x1d8] sm:$0xff] }
 0x506   : > { %10867 = vmatpush3.bf16.msra.mxu1 %v10866_v28  ;;  %v3585_v28 = vld [vmem:[%s16550_s9 + $0x88] sm:$0xff] }
 0x507   : > { %10899 = vmatpush3.bf16.msra.mxu0 %v10898_v33  ;;  %10869 = vmatprep.subr.bf16.mxu1 %v10868_v34  ;;  %v3616_v33 = vld [vmem:[%s16550_s9 + $0x180] sm:$0xff]  ;;  %v10920_v34 = vpack.c.bf16 %v3585_v28, %v3584_v26  ;;  %v3621_v28 = vld [vmem:[%s16550_s9 + $0x1a8] sm:$0xff] }
 0x508   : > { %10901 = vmatprep.subr.bf16.mxu0 %v10900_v60  ;;  %v10952_v11 = vpack.c.bf16 %v3617_v44, %v3616_v33  ;;  %v3521_v60 = vld [vmem:[%s16549_s8] sm:$0xf]  ;;  %v10926_v44 = vpack.c.bf16 %v3571_v20, %v3570_v17  ;;  %v3629_v20 = vld [vmem:[%s16550_s9 + $0x1e8] sm:$0xff] }
 0x509   : > { %v3526_v36 = vrot.slane %v3521_v60, %v12940_v3  ;;  %v3534_v37 = vrot.slane %v3521_v60, %v13138_v53  ;;  %v3620_v26 = vld [vmem:[%s16550_s9 + $0x1a0] sm:$0xff] }
 0x50a   : > { %10871 = vmatpush3.bf16.msra.mxu1 %v10870_v38  ;;  %v3530_v38 = vrot.slane %v3521_v60, %v12946_v5  ;;  %v3628_v17 = vld [vmem:[%s16550_s9 + $0x1e0] sm:$0xff] }
 0x50b   : > { %10903 = vmatpush3.bf16.msra.mxu0 %v10902_v39  ;;  %10873 = vmatprep.subr.bf16.mxu1 %v10872_v45  ;;  %v3538_v39 = vrot.slane %v3521_v60, %v13141_v57  ;;  %v3572_v60 = vld [vmem:[%s16550_s9 + $0x20] sm:$0xff] }
 0x50c   : > { %10905 = vmatprep.subr.bf16.mxu0 %v10904_v48 }
 0x50e   : > { %10875 = vmatpush3.bf16.msra.mxu1 %v10874_v55 }
 0x50f   : > { %10907 = vmatpush3.bf16.msra.mxu0 %v10906_v47  ;;  %10877 = vmatprep.subr.bf16.mxu1 %v10876_v61 }
 0x510   : > { %10909 = vmatprep.subr.bf16.mxu0 %v10908_v1 }
 0x512   : > { %10879 = vmatpush3.bf16.msra.mxu1 %v10878_v62 }
 0x513   : > { %10911 = vmatpush3.bf16.msra.mxu0 %v10910_v9  ;;  %10881 = vmatprep.subr.bf16.mxu1 %v10880_v0  ;;  %v3601_v0 = vld [vmem:[%s16550_s9 + $0x108] sm:$0xff] }
 0x514   : > { %10913 = vmatprep.subr.bf16.mxu0 %v10912_v8  ;;  %v10922_v8 = vpack.c.bf16 %v3569_v63, %v3568_v2  ;;  %v3609_v2 = vld [vmem:[%s16550_s9 + $0x148] sm:$0xff]  ;;  %v3594_v63 = vld [vmem:[%s16550_s9 + $0xd0] sm:$0xff] }
 0x516   : > { %10883 = vmatpush3.bf16.msra.mxu1 %v10882_v10  ;;  %v10954_v10 = vpack.c.bf16 %v3601_v0, %v3600_v56  ;;  %v3595_v56 = vld [vmem:[%s16550_s9 + $0xd8] sm:$0xff]  ;;  %v3626_v0 = vld [vmem:[%s16550_s9 + $0x1d0] sm:$0xff] }
 0x517   : > { %10915 = vmatpush3.bf16.msra.mxu0 %v10914_v14  ;;  %10885 = vmatprep.subr.bf16.mxu1 %v10884_v16  ;;  %v10940_v12 = vpack.c.bf16 %v3595_v56, %v3594_v63  ;;  %v10972_v13 = vpack.c.bf16 %v3627_v4, %v3626_v0  ;;  %v7560_v63 = vld [vmem:[%s16550_s9 + $0x418] sm:$0xff]  ;;  %v7591_v56 = vld [vmem:[%s16550_s9 + $0x510] sm:$0xff] }
 0x518   : > { %10917 = vmatprep.subr.bf16.mxu0 %v10916_v50  ;;  %v3603_v50 = vld [vmem:[%s16550_s9 + $0x118] sm:$0xff] }
 0x51a   : > { %10887 = vmatpush3.bf16.msra.mxu1 %v10886_v21  ;;  %v3588_v21 = vld [vmem:[%s16550_s9 + $0xa0] sm:$0xff] }
 0x51b   : > { %10919 = vmatpush3.bf16.msra.mxu0 %v10918_v25  ;;  %10921 = vmatprep.subr.bf16.mxu1 %v10920_v34  ;;  %v3589_v25 = vld [vmem:[%s16550_s9 + $0xa8] sm:$0xff] }
 0x51c   : > { %10953 = vmatprep.subr.bf16.mxu0 %v10952_v11  ;;  %v10958_v11 = vpack.c.bf16 %v3603_v50, %v3602_v31 }
 0x5cf   : > { %v3356_v41 = vpop.f32.mrb[12].mxu1 }
 0x5d0   : > { %v3543_v30 = vadd.f32 %v3526_v36, %v3356_v41  ;;  %v3510_v43 = vpop.f32.mrb[8].mxu0  ;;  %v3358_v45 = vpop.f32.mrb[13].mxu1  ;;  %v3605_v41 = vld [vmem:[%s16550_s9 + $0x128] sm:$0xff] }
 0x5d1   : > { %v3545_v46 = vadd.f32 %v3534_v37, %v3510_v43  ;;  %v3544_v27 = vadd.f32 %v3530_v38, %v3358_v45  ;;  %v3512_v48 = vpop.f32.mrb[9].mxu0  ;;  %v3591_v43 = vld [vmem:[%s16550_s9 + $0xb8] sm:$0xff]  ;;  %v3622_v45 = vld [vmem:[%s16550_s9 + $0x1b0] sm:$0xff] }
 0x5d2   : > { %v3551_v49 = vmax.f32 %v3543_v30, 0.0  ;;  %v3546_v52 = vadd.f32 %v3538_v39, %v3512_v48  ;;  %v3590_v30 = vld [vmem:[%s16550_s9 + $0xb0] sm:$0xff] }
 0x5d3   : > { %v3553_v54 = vmax.f32 %v3545_v46, 0.0  ;;  %v3552_v55 = vmax.f32 %v3544_v27, 0.0  ;;  %v3362_v47 = vpop.f32.mrb[14].mxu1  ;;  %v3623_v46 = vld [vmem:[%s16550_s9 + $0x1b8] sm:$0xff] }
 0x5d4   : > { %3559 = vst [vmem:[#allocation2] sm:$0xff] %v3551_v49  ;;  %v3554_v58 = vmax.f32 %v3546_v52, 0.0  ;;  %v3547_v24 = vadd.f32 %v3526_v36, %v3362_v47  ;;  %v3516_v35 = vpop.f32.mrb[10].mxu0  ;;  %v3364_v61 = vpop.f32.mrb[15].mxu1  ;;  %v3573_v36 = vld [vmem:[%s16550_s9 + $0x28] sm:$0xff]  ;;  %v3574_v49 = vld [vmem:[%s16550_s9 + $0x30] sm:$0xff] }
 0x5d5   : > { %3561 = vst [vmem:[#allocation2 + $0x10] sm:$0xff] %v3553_v54  ;;  %3560 = vst [vmem:[#allocation2 + $0x8] sm:$0xff] %v3552_v55  ;;  %v3549_v42 = vadd.f32 %v3534_v37, %v3516_v35  ;;  %v3548_v19 = vadd.f32 %v3530_v38, %v3364_v61  ;;  %v3518_v32 = vpop.f32.mrb[11].mxu0  ;;  %v10928_v37 = vpack.c.bf16 %v3589_v25, %v3588_v21  ;;  %v3575_v52 = vld [vmem:[%s16550_s9 + $0x38] sm:$0xff]  ;;  %v3606_v47 = vld [vmem:[%s16550_s9 + $0x130] sm:$0xff] }
 0x5d6   : > { %3562 = vst [vmem:[#allocation2 + $0x18] sm:$0xff] %v3554_v58  ;;  %v3555_v1 = vmax.f32 %v3547_v24, 0.0  ;;  %v3550_v62 = vadd.f32 %v3538_v39, %v3518_v32  ;;  %v10960_v38 = vpack.c.bf16 %v3621_v28, %v3620_v26  ;;  %v3604_v39 = vld [vmem:[%s16550_s9 + $0x120] sm:$0xff]  ;;  %v10930_v27 = vpack.c.bf16 %v3573_v36, %v3572_v60  ;;  %v3607_v58 = vld [vmem:[%s16550_s9 + $0x138] sm:$0xff]  ;;  %v3593_v35 = vld [vmem:[%s16550_s9 + $0xc8] sm:$0xff] }
 0x5d7   : > { %v3557_v29 = vmax.f32 %v3549_v42, 0.0  ;;  %v3556_v51 = vmax.f32 %v3548_v19, 0.0  ;;  %v10962_v48 = vpack.c.bf16 %v3605_v41, %v3604_v39  ;;  %v10932_v54 = vpack.c.bf16 %v3591_v43, %v3590_v30  ;;  %v3592_v24 = vld [vmem:[%s16550_s9 + $0xc0] sm:$0xff]  ;;  %v3625_v42 = vld [vmem:[%s16550_s9 + $0x1c8] sm:$0xff]  ;;  %v3614_v30 = vld [vmem:[%s16550_s9 + $0x170] sm:$0xff] }
 0x5d8   : > { %3563 = vst [vmem:[#allocation2 + $0x20] sm:$0xff] %v3555_v1  ;;  %v3558_v9 = vmax.f32 %v3550_v62, 0.0  ;;  %v10964_v55 = vpack.c.bf16 %v3623_v46, %v3622_v45  ;;  %v3624_v61 = vld [vmem:[%s16550_s9 + $0x1c0] sm:$0xff]  ;;  %v10934_v19 = vpack.c.bf16 %v3575_v52, %v3574_v49  ;;  %v10966_v32 = vpack.c.bf16 %v3607_v58, %v3606_v47  ;;  %v3577_v62 = vld [vmem:[%s16550_s9 + $0x48] sm:$0xff]  ;;  %v3615_v43 = vld [vmem:[%s16550_s9 + $0x178] sm:$0xff] }
 0x5d9   : > { %3565 = vst [vmem:[#allocation2 + $0x30] sm:$0xff] %v3557_v29  ;;  %3564 = vst [vmem:[#allocation2 + $0x28] sm:$0xff] %v3556_v51  ;;  %v3576_v1 = vld [vmem:[%s16550_s9 + $0x40] sm:$0xff]  ;;  %v10936_v29 = vpack.c.bf16 %v3593_v35, %v3592_v24  ;;  %v10968_v51 = vpack.c.bf16 %v3625_v42, %v3624_v61  ;;  %v10976_v25 = vpack.c.bf16 %v3629_v20, %v3628_v17  ;;  %v3613_v28 = vld [vmem:[%s16550_s9 + $0x168] sm:$0xff] }
 0x5da   : > { %3566 = vst [vmem:[#allocation2 + $0x38] sm:$0xff] %v3558_v9  ;;  %v3608_v9 = vld [vmem:[%s16550_s9 + $0x140] sm:$0xff]  ;;  %v10938_v6 = vpack.c.bf16 %v3577_v62, %v3576_v1  ;;  %v7574_v46 = vld [vmem:[%s16550_s9 + $0x488] sm:$0xff]  ;;  %v10982_v52 = vpack.c.bf16 %v3615_v43, %v3614_v30  ;;  %v7575_v61 = vld [vmem:[%s16550_s9 + $0x490] sm:$0xff] }
 0x5db   : > { %v3580_v21 = vld [vmem:[%s16550_s9 + $0x60] sm:$0xff]  ;;  %v7558_v58 = vld [vmem:[%s16550_s9 + $0x408] sm:$0xff]  ;;  %v7576_v42 = vld [vmem:[%s16550_s9 + $0x498] sm:$0xff] }
 0x5dc   : > { %v3612_v26 = vld [vmem:[%s16550_s9 + $0x160] sm:$0xff]  ;;  %v7590_v35 = vld [vmem:[%s16550_s9 + $0x508] sm:$0xff]  ;;  %v7608_v1 = vld [vmem:[%s16550_s9 + $0x598] sm:$0xff]  ;;  %v10988_v4 = vpack.c.bf16 %v7576_v42, %v7575_v61 }
 0x5dd   : > { %v3633_v7 = vld [vmem:[#allocation2 + $0x1] ss:$8 sm:$0xf]  ;;  %v13469_v16 = vld [vmem:[#allocation2] ss:$8 sm:$0xf]  ;;  %v10978_v36 = vpack.c.bf16 %v3613_v28, %v3612_v26 }
 0x5de   : > { %v3707_v14 = vrot.slane %v3633_v7, %v12946_v5  ;;  %v3715_v15 = vrot.slane %v3633_v7, %v13141_v57  ;;  %v3703_v18 = vrot.slane %v3633_v7, %v12940_v3  ;;  %v3711_v40 = vrot.slane %v3633_v7, %v13138_v53  ;;  %v7573_v45 = vld [vmem:[%s16550_s9 + $0x480] sm:$0xff]  ;;  %v7562_v17 = vld [vmem:[%s16550_s9 + $0x428] sm:$0xff]  ;;  %v7567_v42 = vld [vmem:[%s16550_s9 + $0x450] sm:$0xff] }
 0x5df   : > { %v3868_v33 = vrot.slane %v13469_v16, %v12946_v5  ;;  %v3876_v34 = vrot.slane %v13469_v16, %v13141_v57  ;;  %v10970_v7 = vpack.c.bf16 %v3609_v2, %v3608_v9  ;;  %v7557_v47 = vld [vmem:[%s16550_s9 + $0x400] sm:$0xff]  ;;  %v7559_v2 = vld [vmem:[%s16550_s9 + $0x410] sm:$0xff] }
 0x5e0   : > { %3784 = vmatprep.mubr.f32.mxu1 %v3707_v14  ;;  %3854 = vmatprep.mubr.f32.mxu0 %v3715_v15  ;;  %v3610_v14 = vld [vmem:[%s16550_s9 + $0x150] sm:$0xff]  ;;  %v3611_v15 = vld [vmem:[%s16550_s9 + $0x158] sm:$0xff]  ;;  %v7589_v24 = vld [vmem:[%s16550_s9 + $0x500] sm:$0xff]  ;;  %v10986_v62 = vpack.c.bf16 %v7558_v58, %v7557_v47 }
 0x5e1   : > { %3785 = vmatmul.mubr.f32.vlgmr.msra.gmra.mrb[16].mxu1 %v3703_v18  ;;  %3855 = vmatmul.mubr.f32.vlgmr.msra.gmra.mrb[12].mxu0 %v3711_v40  ;;  %v3596_v18 = vld [vmem:[%s16550_s9 + $0xe0] sm:$0xff]  ;;  %v3597_v40 = vld [vmem:[%s16550_s9 + $0xe8] sm:$0xff]  ;;  %v10974_v50 = vpack.c.bf16 %v3611_v15, %v3610_v14  ;;  %v11018_v9 = vpack.c.bf16 %v7590_v35, %v7589_v24  ;;  %v10990_v14 = vpack.c.bf16 %v7560_v63, %v7559_v2  ;;  %v7615_v47 = vld [vmem:[%s16550_s9 + $0x5d0] sm:$0xff] }
 0x5e2   : > { %10923 = vmatpush3.bf16.msra.mxu1 %v10922_v8  ;;  %10955 = vmatpush3.bf16.msra.mxu0 %v10954_v10  ;;  %v3578_v8 = vld [vmem:[%s16550_s9 + $0x50] sm:$0xff]  ;;  %v3579_v10 = vld [vmem:[%s16550_s9 + $0x58] sm:$0xff]  ;;  %v7593_v20 = vld [vmem:[%s16550_s9 + $0x520] sm:$0xff] }
 0x5e3   : > { %3945 = vmatprep.mubr.f32.mxu1 %v3868_v33  ;;  %4015 = vmatprep.mubr.f32.mxu0 %v3876_v34  ;;  %v10942_v31 = vpack.c.bf16 %v3579_v10, %v3578_v8  ;;  %v3598_v33 = vld [vmem:[%s16550_s9 + $0xf0] sm:$0xff]  ;;  %v3599_v34 = vld [vmem:[%s16550_s9 + $0xf8] sm:$0xff]  ;;  %v7578_v8 = vld [vmem:[%s16550_s9 + $0x4a8] sm:$0xff] }
 0x5e4   : > { %10925 = vmatprep.subr.bf16.mxu1 %v10924_v22  ;;  %10957 = vmatprep.subr.bf16.mxu0 %v10956_v23  ;;  %v3581_v22 = vld [vmem:[%s16550_s9 + $0x68] sm:$0xff]  ;;  %v10944_v23 = vpack.c.bf16 %v3597_v40, %v3596_v18  ;;  %v10948_v39 = vpack.c.bf16 %v3599_v34, %v3598_v33  ;;  %v7561_v40 = vld [vmem:[%s16550_s9 + $0x420] sm:$0xff]  ;;  %v7563_v34 = vld [vmem:[%s16550_s9 + $0x430] sm:$0xff] }
 0x5e5   : > { %v10946_v60 = vpack.c.bf16 %v3581_v22, %v3580_v21  ;;  %v7579_v21 = vld [vmem:[%s16550_s9 + $0x4b0] sm:$0xff]  ;;  %v7580_v22 = vld [vmem:[%s16550_s9 + $0x4b8] sm:$0xff]  ;;  %v10994_v26 = vpack.c.bf16 %v7562_v17, %v7561_v40  ;;  %v7617_v2 = vld [vmem:[%s16550_s9 + $0x5e0] sm:$0xff] }
 0x5e6   : > { %10927 = vmatpush3.bf16.msra.mxu1 %v10926_v44  ;;  %10959 = vmatpush3.bf16.msra.mxu0 %v10958_v11  ;;  %v3630_v44 = vld [vmem:[%s16550_s9 + $0x1f0] sm:$0xff]  ;;  %v3631_v11 = vld [vmem:[%s16550_s9 + $0x1f8] sm:$0xff]  ;;  %v10996_v33 = vpack.c.bf16 %v7580_v22, %v7579_v21  ;;  %v7618_v63 = vld [vmem:[%s16550_s9 + $0x5e8] sm:$0xff] }
 0x5e7   : > { %10929 = vmatprep.subr.bf16.mxu1 %v10928_v37  ;;  %10961 = vmatprep.subr.bf16.mxu0 %v10960_v38  ;;  %v3582_v37 = vld [vmem:[%s16550_s9 + $0x70] sm:$0xff]  ;;  %v3583_v38 = vld [vmem:[%s16550_s9 + $0x78] sm:$0xff]  ;;  %v10980_v41 = vpack.c.bf16 %v3631_v11, %v3630_v44 }
 0x5e8   : > { %v10950_v49 = vpack.c.bf16 %v3583_v38, %v3582_v37  ;;  %v7564_v44 = vld [vmem:[%s16550_s9 + $0x438] sm:$0xff]  ;;  %v7595_v11 = vld [vmem:[%s16550_s9 + $0x530] sm:$0xff]  ;;  %v7581_v37 = vld [vmem:[%s16550_s9 + $0x4c0] sm:$0xff] }
 0x5e9   : > { %v7582_v38 = vld [vmem:[%s16550_s9 + $0x4c8] sm:$0xff]  ;;  %v10998_v30 = vpack.c.bf16 %v7564_v44, %v7563_v34  ;;  %v7616_v58 = vld [vmem:[%s16550_s9 + $0x5d8] sm:$0xff] }
 0x5ea   : > { %10931 = vmatpush3.bf16.msra.mxu1 %v10930_v27  ;;  %10963 = vmatpush3.bf16.msra.mxu0 %v10962_v48  ;;  %v7605_v27 = vld [vmem:[%s16550_s9 + $0x580] sm:$0xff]  ;;  %v7606_v48 = vld [vmem:[%s16550_s9 + $0x588] sm:$0xff]  ;;  %v7604_v22 = vld [vmem:[%s16550_s9 + $0x578] sm:$0xff] }
 0x5eb   : > { %10933 = vmatprep.subr.bf16.mxu1 %v10932_v54  ;;  %10965 = vmatprep.subr.bf16.mxu0 %v10964_v55  ;;  %v10984_v54 = vpack.c.bf16 %v7574_v46, %v7573_v45  ;;  %v11016_v55 = vpack.c.bf16 %v7606_v48, %v7605_v27  ;;  %v11000_v45 = vpack.c.bf16 %v7582_v38, %v7581_v37  ;;  %v7565_v46 = vld [vmem:[%s16550_s9 + $0x440] sm:$0xff]  ;;  %v7566_v27 = vld [vmem:[%s16550_s9 + $0x448] sm:$0xff] }
 0x5ec   : > { %v7597_v48 = vld [vmem:[%s16550_s9 + $0x540] sm:$0xff]  ;;  %v11002_v24 = vpack.c.bf16 %v7566_v27, %v7565_v46  ;;  %v7654_v38 = vld [vmem:[%s16550_s9 + $0x708] sm:$0xff]  ;;  %v7672_v46 = vld [vmem:[%s16550_s9 + $0x798] sm:$0xff] }
 0x5ed   : > { %v7653_v37 = vld [vmem:[%s16550_s9 + $0x700] sm:$0xff] }
 0x5ee   : > { %10935 = vmatpush3.bf16.msra.mxu1 %v10934_v19  ;;  %10967 = vmatpush3.bf16.msra.mxu0 %v10966_v32  ;;  %v13661_v19 = vld [vmem:[#allocation2 + $0x2] ss:$8 sm:$0xf] }
 0x5ef   : > { %10937 = vmatprep.subr.bf16.mxu1 %v10936_v29  ;;  %10969 = vmatprep.subr.bf16.mxu0 %v10968_v51  ;;  %v7607_v32 = vld [vmem:[%s16550_s9 + $0x590] sm:$0xff]  ;;  %v3864_v29 = vrot.slane %v13469_v16, %v12940_v3  ;;  %v3872_v51 = vrot.slane %v13469_v16, %v13138_v53  ;;  %v4096_v0 = vrot.slane %v13661_v19, %v12946_v5 }
 0x5f0   : > { %v11020_v16 = vpack.c.bf16 %v7608_v1, %v7607_v32  ;;  %v4104_v10 = vrot.slane %v13661_v19, %v13141_v57  ;;  %v7568_v32 = vld [vmem:[%s16550_s9 + $0x458] sm:$0xff]  ;;  %v7599_v1 = vld [vmem:[%s16550_s9 + $0x550] sm:$0xff]  ;;  %v4092_v27 = vrot.slane %v13661_v19, %v12940_v3 }
 0x5f2   : > { %10939 = vmatpush3.bf16.msra.mxu1 %v10938_v6  ;;  %10971 = vmatpush3.bf16.msra.mxu0 %v10970_v7  ;;  %v7592_v6 = vld [vmem:[%s16550_s9 + $0x518] sm:$0xff]  ;;  %v7577_v7 = vld [vmem:[%s16550_s9 + $0x4a0] sm:$0xff] }
 0x5f3   : > { %10941 = vmatprep.subr.bf16.mxu1 %v10940_v12  ;;  %10973 = vmatprep.subr.bf16.mxu0 %v10972_v13  ;;  %v7609_v12 = vld [vmem:[%s16550_s9 + $0x5a0] sm:$0xff]  ;;  %v7610_v13 = vld [vmem:[%s16550_s9 + $0x5a8] sm:$0xff]  ;;  %v11022_v15 = vpack.c.bf16 %v7592_v6, %v7591_v56  ;;  %v10992_v18 = vpack.c.bf16 %v7578_v8, %v7577_v7  ;;  %v11006_v56 = vpack.c.bf16 %v7568_v32, %v7567_v42 }
 0x5f4   : > { %v7570_v6 = vld [vmem:[%s16550_s9 + $0x468] sm:$0xff]  ;;  %v7601_v7 = vld [vmem:[%s16550_s9 + $0x560] sm:$0xff]  ;;  %v11040_v8 = vpack.c.bf16 %v7618_v63, %v7617_v2 }
 0x5f5   : > { %v7674_v32 = vld [vmem:[%s16550_s9 + $0x7a8] sm:$0xff]  ;;  %v7657_v63 = vld [vmem:[%s16550_s9 + $0x720] sm:$0xff] }
 0x5f6   : > { %10943 = vmatpush3.bf16.msra.mxu1 %v10942_v31  ;;  %10975 = vmatpush3.bf16.msra.mxu0 %v10974_v50  ;;  %v11024_v31 = vpack.c.bf16 %v7610_v13, %v7609_v12  ;;  %v7594_v50 = vld [vmem:[%s16550_s9 + $0x528] sm:$0xff]  ;;  %v7587_v12 = vld [vmem:[%s16550_s9 + $0x4f0] sm:$0xff]  ;;  %v7588_v13 = vld [vmem:[%s16550_s9 + $0x4f8] sm:$0xff] }
 0x5f7   : > { %10945 = vmatprep.subr.bf16.mxu1 %v10944_v23  ;;  %10977 = vmatprep.subr.bf16.mxu0 %v10976_v25  ;;  %v7611_v23 = vld [vmem:[%s16550_s9 + $0x5b0] sm:$0xff]  ;;  %v7612_v25 = vld [vmem:[%s16550_s9 + $0x5b8] sm:$0xff]  ;;  %v11026_v28 = vpack.c.bf16 %v7594_v50, %v7593_v20  ;;  %v11012_v17 = vpack.c.bf16 %v7588_v13, %v7587_v12  ;;  %v7626_v2 = vld [vmem:[%s16550_s9 + $0x628] sm:$0xff] }
 0x5f8   : > { %v7571_v20 = vld [vmem:[%s16550_s9 + $0x470] sm:$0xff] }
 0x5f9   : > { %v7603_v50 = vld [vmem:[%s16550_s9 + $0x570] sm:$0xff] }
 0x5fa   : > { %10947 = vmatpush3.bf16.msra.mxu1 %v10946_v60  ;;  %10979 = vmatpush3.bf16.msra.mxu0 %v10978_v36  ;;  %v11028_v60 = vpack.c.bf16 %v7612_v25, %v7611_v23  ;;  %v7596_v36 = vld [vmem:[%s16550_s9 + $0x538] sm:$0xff]  ;;  %v7637_v23 = vld [vmem:[%s16550_s9 + $0x680] sm:$0xff]  ;;  %v7638_v25 = vld [vmem:[%s16550_s9 + $0x688] sm:$0xff]  ;;  %v11046_v34 = vpack.c.bf16 %v7604_v22, %v7603_v50 }
 0x5fb   : > { %10949 = vmatprep.subr.bf16.mxu1 %v10948_v39  ;;  %10981 = vmatprep.subr.bf16.mxu0 %v10980_v41  ;;  %v7613_v39 = vld [vmem:[%s16550_s9 + $0x5c0] sm:$0xff]  ;;  %v7614_v41 = vld [vmem:[%s16550_s9 + $0x5c8] sm:$0xff]  ;;  %v11030_v43 = vpack.c.bf16 %v7596_v36, %v7595_v11  ;;  %v11048_v44 = vpack.c.bf16 %v7638_v25, %v7637_v23  ;;  %v7627_v13 = vld [vmem:[%s16550_s9 + $0x630] sm:$0xff] }
 0x5fc   : > { %v7621_v11 = vld [vmem:[%s16550_s9 + $0x600] sm:$0xff]  ;;  %v7678_v50 = vld [vmem:[%s16550_s9 + $0x7c8] sm:$0xff] }
 0x5fd   : > { %v7629_v25 = vld [vmem:[%s16550_s9 + $0x640] sm:$0xff] }
 0x5fe   : > { %10951 = vmatpush3.bf16.msra.mxu1 %v10950_v49  ;;  %10983 = vmatpush3.bf16.msra.mxu0 %v10982_v52  ;;  %v11032_v49 = vpack.c.bf16 %v7614_v41, %v7613_v39  ;;  %v7598_v52 = vld [vmem:[%s16550_s9 + $0x548] sm:$0xff]  ;;  %v7639_v39 = vld [vmem:[%s16550_s9 + $0x690] sm:$0xff]  ;;  %v7640_v41 = vld [vmem:[%s16550_s9 + $0x698] sm:$0xff] }
 0x5ff   : > { %10985 = vmatprep.subr.bf16.mxu1 %v10984_v54  ;;  %11017 = vmatprep.subr.bf16.mxu0 %v11016_v55  ;;  %v7583_v54 = vld [vmem:[%s16550_s9 + $0x4d0] sm:$0xff]  ;;  %v7584_v55 = vld [vmem:[%s16550_s9 + $0x4d8] sm:$0xff]  ;;  %v11034_v35 = vpack.c.bf16 %v7598_v52, %v7597_v48  ;;  %v11082_v48 = vpack.c.bf16 %v7654_v38, %v7653_v37 }
 0x600   : > { %v11004_v61 = vpack.c.bf16 %v7584_v55, %v7583_v54  ;;  %v7624_v52 = vld [vmem:[%s16550_s9 + $0x618] sm:$0xff]  ;;  %v7655_v54 = vld [vmem:[%s16550_s9 + $0x710] sm:$0xff]  ;;  %v4100_v55 = vrot.slane %v13661_v19, %v13138_v53  ;;  %v7673_v19 = vld [vmem:[%s16550_s9 + $0x7a0] sm:$0xff] }
 0x601   : > { %3946 = vmatmul.mubr.f32.vlgmr.msra.gmra.mrb[18].mxu1 %v3864_v29  ;;  %4016 = vmatmul.mubr.f32.vlgmr.msra.gmra.mrb[14].mxu0 %v3872_v51  ;;  %v7600_v29 = vld [vmem:[%s16550_s9 + $0x558] sm:$0xff]  ;;  %v7585_v51 = vld [vmem:[%s16550_s9 + $0x4e0] sm:$0xff] }
 0x602   : > { %10987 = vmatpush3.bf16.msra.mxu1 %v10986_v62  ;;  %4173 = vmatprep.mubr.f32.mxu1 %v4096_v0  ;;  %v11036_v62 = vpack.c.bf16 %v7616_v58, %v7615_v47  ;;  %v11038_v0 = vpack.c.bf16 %v7600_v29, %v7599_v1  ;;  %v11052_v47 = vpack.c.bf16 %v7640_v41, %v7639_v39  ;;  %v7656_v58 = vld [vmem:[%s16550_s9 + $0x718] sm:$0xff]  ;;  %v7631_v41 = vld [vmem:[%s16550_s9 + $0x650] sm:$0xff] }
 0x603   : > { %11019 = vmatpush3.bf16.msra.mxu0 %v11018_v9  ;;  %4243 = vmatprep.mubr.f32.mxu0 %v4104_v10  ;;  %v7586_v9 = vld [vmem:[%s16550_s9 + $0x4e8] sm:$0xff]  ;;  %v11086_v29 = vpack.c.bf16 %v7656_v58, %v7655_v54 }
 0x604   : > { %10989 = vmatprep.subr.bf16.mxu1 %v10988_v4  ;;  %11021 = vmatprep.subr.bf16.mxu0 %v11020_v16  ;;  %v11008_v4 = vpack.c.bf16 %v7586_v9, %v7585_v51  ;;  %v7569_v16 = vld [vmem:[%s16550_s9 + $0x460] sm:$0xff]  ;;  %v7602_v10 = vld [vmem:[%s16550_s9 + $0x568] sm:$0xff] }
 0x605   : > { %v11042_v40 = vpack.c.bf16 %v7602_v10, %v7601_v7  ;;  %v7625_v9 = vld [vmem:[%s16550_s9 + $0x620] sm:$0xff]  ;;  %v7676_v7 = vld [vmem:[%s16550_s9 + $0x7b8] sm:$0xff]  ;;  %v7682_v54 = vld [vmem:[%s16550_s9 + $0x7e8] sm:$0xff] }
 0x606   : > { %10991 = vmatpush3.bf16.msra.mxu1 %v10990_v14  ;;  %v7619_v14 = vld [vmem:[%s16550_s9 + $0x5f0] sm:$0xff] }
 0x607   : > { %11023 = vmatpush3.bf16.msra.mxu0 %v11022_v15  ;;  %10993 = vmatprep.subr.bf16.mxu1 %v10992_v18  ;;  %v7620_v15 = vld [vmem:[%s16550_s9 + $0x5f8] sm:$0xff]  ;;  %v11010_v18 = vpack.c.bf16 %v7570_v6, %v7569_v16  ;;  %v7675_v6 = vld [vmem:[%s16550_s9 + $0x7b0] sm:$0xff] }
 0x608   : > { %11025 = vmatprep.subr.bf16.mxu0 %v11024_v31  ;;  %v7572_v31 = vld [vmem:[%s16550_s9 + $0x478] sm:$0xff]  ;;  %v11044_v21 = vpack.c.bf16 %v7620_v15, %v7619_v14  ;;  %v7659_v15 = vld [vmem:[%s16550_s9 + $0x730] sm:$0xff] }
 0x609   : > { %v7644_v16 = vld [vmem:[%s16550_s9 + $0x6b8] sm:$0xff] }
 0x60a   : > { %10995 = vmatpush3.bf16.msra.mxu1 %v10994_v26  ;;  %v7669_v26 = vld [vmem:[%s16550_s9 + $0x780] sm:$0xff]  ;;  %v7628_v14 = vld [vmem:[%s16550_s9 + $0x638] sm:$0xff] }
 0x60b   : > { %11027 = vmatpush3.bf16.msra.mxu0 %v11026_v28  ;;  %10997 = vmatprep.subr.bf16.mxu1 %v10996_v33  ;;  %v7670_v28 = vld [vmem:[%s16550_s9 + $0x788] sm:$0xff]  ;;  %v11014_v33 = vpack.c.bf16 %v7572_v31, %v7571_v20  ;;  %v7677_v31 = vld [vmem:[%s16550_s9 + $0x7c0] sm:$0xff] }
 0x60c   : > { %11029 = vmatprep.subr.bf16.mxu0 %v11028_v60  ;;  %v7622_v60 = vld [vmem:[%s16550_s9 + $0x608] sm:$0xff]  ;;  %v11080_v36 = vpack.c.bf16 %v7670_v28, %v7669_v26  ;;  %v7661_v28 = vld [vmem:[%s16550_s9 + $0x740] sm:$0xff] }
 0x60d   : > { %v7646_v20 = vld [vmem:[%s16550_s9 + $0x6c8] sm:$0xff] }
 0x60e   : > { %10999 = vmatpush3.bf16.msra.mxu1 %v10998_v30  ;;  %v11050_v30 = vpack.c.bf16 %v7622_v60, %v7621_v11  ;;  %v7630_v26 = vld [vmem:[%s16550_s9 + $0x648] sm:$0xff]  ;;  %v7648_v11 = vld [vmem:[%s16550_s9 + $0x6d8] sm:$0xff]  ;;  %v7679_v60 = vld [vmem:[%s16550_s9 + $0x7d0] sm:$0xff] }
 0x60f   : > { %11031 = vmatpush3.bf16.msra.mxu0 %v11030_v43  ;;  %11001 = vmatprep.subr.bf16.mxu1 %v11000_v45  ;;  %v13863_v43 = vld [vmem:[#allocation2 + $0x3] ss:$8 sm:$0xf]  ;;  %v11066_v37 = vpack.c.bf16 %v7630_v26, %v7629_v25 }
 0x610   : > { %11033 = vmatprep.subr.bf16.mxu0 %v11032_v49  ;;  %v7671_v45 = vld [vmem:[%s16550_s9 + $0x790] sm:$0xff]  ;;  %v4333_v1 = vrot.slane %v13863_v43, %v13141_v57  ;;  %v7736_v25 = vld [vmem:[%s16550_s9 + $0x998] sm:$0xff]  ;;  %v4321_v26 = vrot.slane %v13863_v43, %v12940_v3 }
 0x611   : > { %v7623_v49 = vld [vmem:[%s16550_s9 + $0x610] sm:$0xff]  ;;  %v11084_v42 = vpack.c.bf16 %v7672_v46, %v7671_v45 }
 0x612   : > { %11003 = vmatpush3.bf16.msra.mxu1 %v11002_v24  ;;  %v7641_v24 = vld [vmem:[%s16550_s9 + $0x6a0] sm:$0xff]  ;;  %v7663_v45 = vld [vmem:[%s16550_s9 + $0x750] sm:$0xff] }
 0x613   : > { %11035 = vmatpush3.bf16.msra.mxu0 %v11034_v35  ;;  %11005 = vmatprep.subr.bf16.mxu1 %v11004_v61  ;;  %v7642_v35 = vld [vmem:[%s16550_s9 + $0x6a8] sm:$0xff]  ;;  %v4325_v61 = vrot.slane %v13863_v43, %v12946_v5 }
 0x614   : > { %11037 = vmatprep.subr.bf16.mxu0 %v11036_v62  ;;  %v11054_v62 = vpack.c.bf16 %v7624_v52, %v7623_v49  ;;  %v11056_v51 = vpack.c.bf16 %v7642_v35, %v7641_v24  ;;  %v7650_v49 = vld [vmem:[%s16550_s9 + $0x6e8] sm:$0xff]  ;;  %v7681_v52 = vld [vmem:[%s16550_s9 + $0x7e0] sm:$0xff] }
 0x615   : > { %v7633_v24 = vld [vmem:[%s16550_s9 + $0x660] sm:$0xff]  ;;  %v7634_v35 = vld [vmem:[%s16550_s9 + $0x668] sm:$0xff] }
 0x616   : > { %11007 = vmatpush3.bf16.msra.mxu1 %v11006_v56  ;;  %v11088_v56 = vpack.c.bf16 %v7674_v32, %v7673_v19  ;;  %v7666_v19 = vld [vmem:[%s16550_s9 + $0x768] sm:$0xff]  ;;  %v7651_v32 = vld [vmem:[%s16550_s9 + $0x6f0] sm:$0xff] }
 0x617   : > { %11039 = vmatpush3.bf16.msra.mxu0 %v11038_v0  ;;  %11009 = vmatprep.subr.bf16.mxu1 %v11008_v4  ;;  %v7658_v0 = vld [vmem:[%s16550_s9 + $0x728] sm:$0xff]  ;;  %v7643_v4 = vld [vmem:[%s16550_s9 + $0x6b0] sm:$0xff] }
 0x618   : > { %11041 = vmatprep.subr.bf16.mxu0 %v11040_v8  ;;  %v11058_v8 = vpack.c.bf16 %v7626_v2, %v7625_v9  ;;  %v11090_v10 = vpack.c.bf16 %v7658_v0, %v7657_v63  ;;  %v11060_v12 = vpack.c.bf16 %v7644_v16, %v7643_v4  ;;  %v7635_v63 = vld [vmem:[%s16550_s9 + $0x670] sm:$0xff]  ;;  %v7668_v16 = vld [vmem:[%s16550_s9 + $0x778] sm:$0xff] }
 0x619   : > { %v7667_v0 = vld [vmem:[%s16550_s9 + $0x770] sm:$0xff] }
 0x61a   : > { %11011 = vmatpush3.bf16.msra.mxu1 %v11010_v18  ;;  %v11092_v18 = vpack.c.bf16 %v7676_v7, %v7675_v6  ;;  %v7701_v6 = vld [vmem:[%s16550_s9 + $0x880] sm:$0xff]  ;;  %v7702_v7 = vld [vmem:[%s16550_s9 + $0x888] sm:$0xff] }
 0x61b   : > { %11043 = vmatpush3.bf16.msra.mxu0 %v11042_v40  ;;  %11013 = vmatprep.subr.bf16.mxu1 %v11012_v17  ;;  %v7660_v40 = vld [vmem:[%s16550_s9 + $0x738] sm:$0xff]  ;;  %v7645_v17 = vld [vmem:[%s16550_s9 + $0x6c0] sm:$0xff] }
 0x61c   : > { %11045 = vmatprep.subr.bf16.mxu0 %v11044_v21  ;;  %v11062_v21 = vpack.c.bf16 %v7628_v14, %v7627_v13  ;;  %v11094_v22 = vpack.c.bf16 %v7660_v40, %v7659_v15  ;;  %v11064_v23 = vpack.c.bf16 %v7646_v20, %v7645_v17  ;;  %v11110_v13 = vpack.c.bf16 %v7668_v16, %v7667_v0  ;;  %v7685_v15 = vld [vmem:[%s16550_s9 + $0x800] sm:$0xff]  ;;  %v7718_v20 = vld [vmem:[%s16550_s9 + $0x908] sm:$0xff] }
 0x61d   : > { %v11112_v14 = vpack.c.bf16 %v7702_v7, %v7701_v6  ;;  %v7717_v17 = vld [vmem:[%s16550_s9 + $0x900] sm:$0xff]  ;;  %v7742_v0 = vld [vmem:[%s16550_s9 + $0x9c8] sm:$0xff] }
 0x61e   : > { %11015 = vmatpush3.bf16.msra.mxu1 %v11014_v33  ;;  %v11096_v33 = vpack.c.bf16 %v7678_v50, %v7677_v31  ;;  %v7703_v31 = vld [vmem:[%s16550_s9 + $0x890] sm:$0xff]  ;;  %v7704_v50 = vld [vmem:[%s16550_s9 + $0x898] sm:$0xff]  ;;  %v7693_v7 = vld [vmem:[%s16550_s9 + $0x840] sm:$0xff] }
 0x61f   : > { %11047 = vmatpush3.bf16.msra.mxu0 %v11046_v34  ;;  %11049 = vmatprep.subr.bf16.mxu1 %v11048_v44  ;;  %v7662_v34 = vld [vmem:[%s16550_s9 + $0x748] sm:$0xff]  ;;  %v7647_v44 = vld [vmem:[%s16550_s9 + $0x6d0] sm:$0xff] }
 0x620   : > { %11081 = vmatprep.subr.bf16.mxu0 %v11080_v36  ;;  %v7680_v36 = vld [vmem:[%s16550_s9 + $0x7d8] sm:$0xff]  ;;  %v11098_v38 = vpack.c.bf16 %v7662_v34, %v7661_v28  ;;  %v11068_v39 = vpack.c.bf16 %v7648_v11, %v7647_v44  ;;  %v11146_v28 = vpack.c.bf16 %v7718_v20, %v7717_v17  ;;  %v7719_v44 = vld [vmem:[%s16550_s9 + $0x910] sm:$0xff]  ;;  %v4329_v11 = vrot.slane %v13863_v43, %v13138_v53  ;;  %v7737_v43 = vld [vmem:[%s16550_s9 + $0x9a0] sm:$0xff] }
 0x621   : > { %4174 = vmatmul.mubr.f32.vlgmr.msra.gmra.mrb[20].mxu1 %v4092_v27  ;;  %v11100_v46 = vpack.c.bf16 %v7680_v36, %v7679_v60  ;;  %v7664_v27 = vld [vmem:[%s16550_s9 + $0x758] sm:$0xff]  ;;  %v11116_v60 = vpack.c.bf16 %v7704_v50, %v7703_v31  ;;  %v7695_v50 = vld [vmem:[%s16550_s9 + $0x850] sm:$0xff] }
 0x622   : > { %4244 = vmatmul.mubr.f32.vlgmr.msra.gmra.mrb[16].mxu0 %v4100_v55  ;;  %11051 = vmatpush3.bf16.msra.mxu1 %v11050_v30  ;;  %v7632_v30 = vld [vmem:[%s16550_s9 + $0x658] sm:$0xff] }
 0x623   : > { %4402 = vmatprep.mubr.f32.mxu1 %v4325_v61  ;;  %11083 = vmatpush3.bf16.msra.mxu0 %v11082_v48  ;;  %v7649_v48 = vld [vmem:[%s16550_s9 + $0x6e0] sm:$0xff]  ;;  %v11070_v55 = vpack.c.bf16 %v7632_v30, %v7631_v41  ;;  %v7688_v34 = vld [vmem:[%s16550_s9 + $0x818] sm:$0xff]  ;;  %v7738_v30 = vld [vmem:[%s16550_s9 + $0x9a8] sm:$0xff] }
 0x624   : > { %4472 = vmatprep.mubr.f32.mxu0 %v4333_v1  ;;  %11053 = vmatprep.subr.bf16.mxu1 %v11052_v47  ;;  %v11102_v47 = vpack.c.bf16 %v7664_v27, %v7663_v45  ;;  %v11072_v58 = vpack.c.bf16 %v7650_v49, %v7649_v48  ;;  %v7665_v61 = vld [vmem:[%s16550_s9 + $0x760] sm:$0xff]  ;;  %v7652_v1 = vld [vmem:[%s16550_s9 + $0x6f8] sm:$0xff] }
 0x625   : > { %11085 = vmatprep.subr.bf16.mxu0 %v11084_v42  ;;  %v11104_v42 = vpack.c.bf16 %v7682_v54, %v7681_v52  ;;  %v11106_v9 = vpack.c.bf16 %v7666_v19, %v7665_v61  ;;  %v11076_v2 = vpack.c.bf16 %v7652_v1, %v7651_v32  ;;  %v7720_v36 = vld [vmem:[%s16550_s9 + $0x918] sm:$0xff]  ;;  %v7689_v49 = vld [vmem:[%s16550_s9 + $0x820] sm:$0xff]  ;;  %v7690_v52 = vld [vmem:[%s16550_s9 + $0x828] sm:$0xff] }
 0x626   : > { %11055 = vmatpush3.bf16.msra.mxu1 %v11054_v62  ;;  %v7683_v62 = vld [vmem:[%s16550_s9 + $0x7f0] sm:$0xff]  ;;  %v11150_v27 = vpack.c.bf16 %v7720_v36, %v7719_v44  ;;  %v7721_v54 = vld [vmem:[%s16550_s9 + $0x920] sm:$0xff]  ;;  %v7740_v61 = vld [vmem:[%s16550_s9 + $0x9b8] sm:$0xff] }
 0x627   : > { %11087 = vmatpush3.bf16.msra.mxu0 %v11086_v29  ;;  %11057 = vmatprep.subr.bf16.mxu1 %v11056_v51  ;;  %v7684_v29 = vld [vmem:[%s16550_s9 + $0x7f8] sm:$0xff]  ;;  %v11074_v51 = vpack.c.bf16 %v7634_v35, %v7633_v24  ;;  %v7739_v35 = vld [vmem:[%s16550_s9 + $0x9b0] sm:$0xff]  ;;  %v7746_v44 = vld [vmem:[%s16550_s9 + $0x9e8] sm:$0xff] }
 0x628   : > { %11089 = vmatprep.subr.bf16.mxu0 %v11088_v56  ;;  %v7636_v56 = vld [vmem:[%s16550_s9 + $0x678] sm:$0xff]  ;;  %v11108_v4 = vpack.c.bf16 %v7684_v29, %v7683_v62  ;;  %v7691_v1 = vld [vmem:[%s16550_s9 + $0x830] sm:$0xff] }
 0x629   : > { %v7708_v24 = vld [vmem:[%s16550_s9 + $0x8b8] sm:$0xff]  ;;  %v7723_v29 = vld [vmem:[%s16550_s9 + $0x930] sm:$0xff] }
 0x62a   : > { %11059 = vmatpush3.bf16.msra.mxu1 %v11058_v8  ;;  %v7733_v8 = vld [vmem:[%s16550_s9 + $0x980] sm:$0xff]  ;;  %v7692_v62 = vld [vmem:[%s16550_s9 + $0x838] sm:$0xff] }
 0x62b   : > { %11091 = vmatpush3.bf16.msra.mxu0 %v11090_v10  ;;  %11061 = vmatprep.subr.bf16.mxu1 %v11060_v12  ;;  %v7734_v10 = vld [vmem:[%s16550_s9 + $0x988] sm:$0xff]  ;;  %v11078_v12 = vpack.c.bf16 %v7636_v56, %v7635_v63  ;;  %v7741_v56 = vld [vmem:[%s16550_s9 + $0x9c0] sm:$0xff] }
 0x62c   : > { %11093 = vmatprep.subr.bf16.mxu0 %v11092_v18  ;;  %v7686_v18 = vld [vmem:[%s16550_s9 + $0x808] sm:$0xff]  ;;  %v11144_v40 = vpack.c.bf16 %v7734_v10, %v7733_v8  ;;  %v7725_v10 = vld [vmem:[%s16550_s9 + $0x940] sm:$0xff] }
 0x62d   : > { %v7710_v63 = vld [vmem:[%s16550_s9 + $0x8c8] sm:$0xff] }
 0x62e   : > { %11063 = vmatpush3.bf16.msra.mxu1 %v11062_v21  ;;  %v11114_v21 = vpack.c.bf16 %v7686_v18, %v7685_v15  ;;  %v7694_v8 = vld [vmem:[%s16550_s9 + $0x848] sm:$0xff]  ;;  %v7712_v15 = vld [vmem:[%s16550_s9 + $0x8d8] sm:$0xff]  ;;  %v7743_v18 = vld [vmem:[%s16550_s9 + $0x9d0] sm:$0xff] }
 0x62f   : > { %11095 = vmatpush3.bf16.msra.mxu0 %v11094_v22  ;;  %11065 = vmatprep.subr.bf16.mxu1 %v11064_v23  ;;  %v14065_v22 = vld [vmem:[#allocation2 + $0x4] ss:$8 sm:$0xf]  ;;  %v11130_v17 = vpack.c.bf16 %v7694_v8, %v7693_v7 }
 0x630   : > { %11097 = vmatprep.subr.bf16.mxu0 %v11096_v33  ;;  %v7735_v23 = vld [vmem:[%s16550_s9 + $0x990] sm:$0xff]  ;;  %v4562_v45 = vrot.slane %v14065_v22, %v13141_v57  ;;  %v7800_v7 = vld [vmem:[%s16550_s9 + $0xb98] sm:$0xff]  ;;  %v4550_v8 = vrot.slane %v14065_v22, %v12940_v3 }
 0x631   : > { %v7687_v33 = vld [vmem:[%s16550_s9 + $0x810] sm:$0xff]  ;;  %v11148_v41 = vpack.c.bf16 %v7736_v25, %v7735_v23 }
 0x632   : > { %11067 = vmatpush3.bf16.msra.mxu1 %v11066_v37  ;;  %v7705_v37 = vld [vmem:[%s16550_s9 + $0x8a0] sm:$0xff]  ;;  %v7727_v23 = vld [vmem:[%s16550_s9 + $0x950] sm:$0xff] }
 0x633   : > { %11099 = vmatpush3.bf16.msra.mxu0 %v11098_v38  ;;  %11069 = vmatprep.subr.bf16.mxu1 %v11068_v39  ;;  %v7706_v38 = vld [vmem:[%s16550_s9 + $0x8a8] sm:$0xff]  ;;  %v4554_v39 = vrot.slane %v14065_v22, %v12946_v5 }
 0x634   : > { %11101 = vmatprep.subr.bf16.mxu0 %v11100_v46  ;;  %v11118_v46 = vpack.c.bf16 %v7688_v34, %v7687_v33  ;;  %v11120_v48 = vpack.c.bf16 %v7706_v38, %v7705_v37  ;;  %v7714_v33 = vld [vmem:[%s16550_s9 + $0x8e8] sm:$0xff]  ;;  %v7745_v34 = vld [vmem:[%s16550_s9 + $0x9e0] sm:$0xff] }
 0x635   : > { %v7697_v37 = vld [vmem:[%s16550_s9 + $0x860] sm:$0xff]  ;;  %v7698_v38 = vld [vmem:[%s16550_s9 + $0x868] sm:$0xff] }
 0x636   : > { %11071 = vmatpush3.bf16.msra.mxu1 %v11070_v55  ;;  %v11152_v55 = vpack.c.bf16 %v7738_v30, %v7737_v43  ;;  %v7730_v43 = vld [vmem:[%s16550_s9 + $0x968] sm:$0xff]  ;;  %v7715_v30 = vld [vmem:[%s16550_s9 + $0x8f0] sm:$0xff] }
 0x637   : > { %11103 = vmatpush3.bf16.msra.mxu0 %v11102_v47  ;;  %11073 = vmatprep.subr.bf16.mxu1 %v11072_v58  ;;  %v7722_v47 = vld [vmem:[%s16550_s9 + $0x928] sm:$0xff]  ;;  %v7707_v58 = vld [vmem:[%s16550_s9 + $0x8b0] sm:$0xff] }
 0x638   : > { %11105 = vmatprep.subr.bf16.mxu0 %v11104_v42  ;;  %v11122_v42 = vpack.c.bf16 %v7690_v52, %v7689_v49  ;;  %v11154_v19 = vpack.c.bf16 %v7722_v47, %v7721_v54  ;;  %v11124_v32 = vpack.c.bf16 %v7708_v24, %v7707_v58  ;;  %v7699_v54 = vld [vmem:[%s16550_s9 + $0x870] sm:$0xff]  ;;  %v7732_v24 = vld [vmem:[%s16550_s9 + $0x978] sm:$0xff] }
 0x639   : > { %v7731_v47 = vld [vmem:[%s16550_s9 + $0x970] sm:$0xff] }
 0x63a   : > { %11075 = vmatpush3.bf16.msra.mxu1 %v11074_v51  ;;  %v11156_v51 = vpack.c.bf16 %v7740_v61, %v7739_v35  ;;  %v7765_v35 = vld [vmem:[%s16550_s9 + $0xa80] sm:$0xff]  ;;  %v7766_v61 = vld [vmem:[%s16550_s9 + $0xa88] sm:$0xff] }
 0x63b   : > { %11107 = vmatpush3.bf16.msra.mxu0 %v11106_v9  ;;  %11077 = vmatprep.subr.bf16.mxu1 %v11076_v2  ;;  %v7724_v9 = vld [vmem:[%s16550_s9 + $0x938] sm:$0xff]  ;;  %v7709_v2 = vld [vmem:[%s16550_s9 + $0x8c0] sm:$0xff] }
 0x63c   : > { %11109 = vmatprep.subr.bf16.mxu0 %v11108_v4  ;;  %v11126_v4 = vpack.c.bf16 %v7692_v62, %v7691_v1  ;;  %v11158_v16 = vpack.c.bf16 %v7724_v9, %v7723_v29  ;;  %v11128_v6 = vpack.c.bf16 %v7710_v63, %v7709_v2  ;;  %v11174_v1 = vpack.c.bf16 %v7732_v24, %v7731_v47  ;;  %v7749_v29 = vld [vmem:[%s16550_s9 + $0xa00] sm:$0xff]  ;;  %v7782_v63 = vld [vmem:[%s16550_s9 + $0xb08] sm:$0xff] }
 0x63d   : > { %v11176_v62 = vpack.c.bf16 %v7766_v61, %v7765_v35  ;;  %v7781_v2 = vld [vmem:[%s16550_s9 + $0xb00] sm:$0xff]  ;;  %v7806_v47 = vld [vmem:[%s16550_s9 + $0xbc8] sm:$0xff] }
 0x63e   : > { %11079 = vmatpush3.bf16.msra.mxu1 %v11078_v12  ;;  %v11160_v12 = vpack.c.bf16 %v7742_v0, %v7741_v56  ;;  %v7767_v56 = vld [vmem:[%s16550_s9 + $0xa90] sm:$0xff]  ;;  %v7768_v0 = vld [vmem:[%s16550_s9 + $0xa98] sm:$0xff]  ;;  %v7757_v61 = vld [vmem:[%s16550_s9 + $0xa40] sm:$0xff] }
 0x63f   : > { %11111 = vmatpush3.bf16.msra.mxu0 %v11110_v13  ;;  %11113 = vmatprep.subr.bf16.mxu1 %v11112_v14  ;;  %v7726_v13 = vld [vmem:[%s16550_s9 + $0x948] sm:$0xff]  ;;  %v7711_v14 = vld [vmem:[%s16550_s9 + $0x8d0] sm:$0xff] }
 0x640   : > { %11145 = vmatprep.subr.bf16.mxu0 %v11144_v40  ;;  %v7744_v40 = vld [vmem:[%s16550_s9 + $0x9d8] sm:$0xff]  ;;  %v11162_v20 = vpack.c.bf16 %v7726_v13, %v7725_v10  ;;  %v11132_v31 = vpack.c.bf16 %v7712_v15, %v7711_v14  ;;  %v11210_v10 = vpack.c.bf16 %v7782_v63, %v7781_v2  ;;  %v7783_v14 = vld [vmem:[%s16550_s9 + $0xb10] sm:$0xff]  ;;  %v4558_v15 = vrot.slane %v14065_v22, %v13138_v53  ;;  %v7801_v22 = vld [vmem:[%s16550_s9 + $0xba0] sm:$0xff] }
 0x641   : > { %4403 = vmatmul.mubr.f32.vlgmr.msra.gmra.mrb[22].mxu1 %v4321_v26  ;;  %v11164_v25 = vpack.c.bf16 %v7744_v40, %v7743_v18  ;;  %v7728_v26 = vld [vmem:[%s16550_s9 + $0x958] sm:$0xff]  ;;  %v11180_v18 = vpack.c.bf16 %v7768_v0, %v7767_v56  ;;  %v7759_v0 = vld [vmem:[%s16550_s9 + $0xa50] sm:$0xff] }
 0x642   : > { %4473 = vmatmul.mubr.f32.vlgmr.msra.gmra.mrb[18].mxu0 %v4329_v11  ;;  %11115 = vmatpush3.bf16.msra.mxu1 %v11114_v21  ;;  %v7696_v21 = vld [vmem:[%s16550_s9 + $0x858] sm:$0xff] }
 0x643   : > { %4631 = vmatprep.mubr.f32.mxu1 %v4554_v39  ;;  %11147 = vmatpush3.bf16.msra.mxu0 %v11146_v28  ;;  %v7713_v28 = vld [vmem:[%s16550_s9 + $0x8e0] sm:$0xff]  ;;  %v11134_v11 = vpack.c.bf16 %v7696_v21, %v7695_v50  ;;  %v7752_v13 = vld [vmem:[%s16550_s9 + $0xa18] sm:$0xff]  ;;  %v7802_v21 = vld [vmem:[%s16550_s9 + $0xba8] sm:$0xff] }
 0x644   : > { %4701 = vmatprep.mubr.f32.mxu0 %v4562_v45  ;;  %11117 = vmatprep.subr.bf16.mxu1 %v11116_v60  ;;  %v11166_v60 = vpack.c.bf16 %v7728_v26, %v7727_v23  ;;  %v11136_v36 = vpack.c.bf16 %v7714_v33, %v7713_v28  ;;  %v7729_v39 = vld [vmem:[%s16550_s9 + $0x960] sm:$0xff]  ;;  %v7716_v45 = vld [vmem:[%s16550_s9 + $0x8f8] sm:$0xff] }
 0x645   : > { %11149 = vmatprep.subr.bf16.mxu0 %v11148_v41  ;;  %v11168_v41 = vpack.c.bf16 %v7746_v44, %v7745_v34  ;;  %v11170_v49 = vpack.c.bf16 %v7730_v43, %v7729_v39  ;;  %v11140_v52 = vpack.c.bf16 %v7716_v45, %v7715_v30  ;;  %v7784_v40 = vld [vmem:[%s16550_s9 + $0xb18] sm:$0xff]  ;;  %v7753_v33 = vld [vmem:[%s16550_s9 + $0xa20] sm:$0xff]  ;;  %v7754_v34 = vld [vmem:[%s16550_s9 + $0xa28] sm:$0xff] }
 0x646   : > { %11119 = vmatpush3.bf16.msra.mxu1 %v11118_v46  ;;  %v7747_v46 = vld [vmem:[%s16550_s9 + $0x9f0] sm:$0xff]  ;;  %v11214_v26 = vpack.c.bf16 %v7784_v40, %v7783_v14  ;;  %v7785_v44 = vld [vmem:[%s16550_s9 + $0xb20] sm:$0xff]  ;;  %v7804_v39 = vld [vmem:[%s16550_s9 + $0xbb8] sm:$0xff] }
 0x647   : > { %11151 = vmatpush3.bf16.msra.mxu0 %v11150_v27  ;;  %11121 = vmatprep.subr.bf16.mxu1 %v11120_v48  ;;  %v7748_v27 = vld [vmem:[%s16550_s9 + $0x9f8] sm:$0xff]  ;;  %v11138_v48 = vpack.c.bf16 %v7698_v38, %v7697_v37  ;;  %v7803_v38 = vld [vmem:[%s16550_s9 + $0xbb0] sm:$0xff]  ;;  %v7810_v14 = vld [vmem:[%s16550_s9 + $0xbe8] sm:$0xff] }
 0x648   : > { %11153 = vmatprep.subr.bf16.mxu0 %v11152_v55  ;;  %v7700_v55 = vld [vmem:[%s16550_s9 + $0x878] sm:$0xff]  ;;  %v11172_v58 = vpack.c.bf16 %v7748_v27, %v7747_v46  ;;  %v7755_v45 = vld [vmem:[%s16550_s9 + $0xa30] sm:$0xff] }
 0x649   : > { %v7772_v37 = vld [vmem:[%s16550_s9 + $0xab8] sm:$0xff]  ;;  %v7787_v27 = vld [vmem:[%s16550_s9 + $0xb30] sm:$0xff] }
 0x64a   : > { %11123 = vmatpush3.bf16.msra.mxu1 %v11122_v42  ;;  %v7797_v42 = vld [vmem:[%s16550_s9 + $0xb80] sm:$0xff]  ;;  %v7756_v46 = vld [vmem:[%s16550_s9 + $0xa38] sm:$0xff] }
 0x64b   : > { %11155 = vmatpush3.bf16.msra.mxu0 %v11154_v19  ;;  %11125 = vmatprep.subr.bf16.mxu1 %v11124_v32  ;;  %v7798_v19 = vld [vmem:[%s16550_s9 + $0xb88] sm:$0xff]  ;;  %v11142_v32 = vpack.c.bf16 %v7700_v55, %v7699_v54  ;;  %v7805_v55 = vld [vmem:[%s16550_s9 + $0xbc0] sm:$0xff] }
 0x64c   : > { %11157 = vmatprep.subr.bf16.mxu0 %v11156_v51  ;;  %v7750_v51 = vld [vmem:[%s16550_s9 + $0xa08] sm:$0xff]  ;;  %v11208_v9 = vpack.c.bf16 %v7798_v19, %v7797_v42  ;;  %v7789_v19 = vld [vmem:[%s16550_s9 + $0xb40] sm:$0xff] }
 0x64d   : > { %v7774_v54 = vld [vmem:[%s16550_s9 + $0xac8] sm:$0xff] }
 0x64e   : > { %11127 = vmatpush3.bf16.msra.mxu1 %v11126_v4  ;;  %v11178_v4 = vpack.c.bf16 %v7750_v51, %v7749_v29  ;;  %v7758_v42 = vld [vmem:[%s16550_s9 + $0xa48] sm:$0xff]  ;;  %v7776_v29 = vld [vmem:[%s16550_s9 + $0xad8] sm:$0xff]  ;;  %v7807_v51 = vld [vmem:[%s16550_s9 + $0xbd0] sm:$0xff] }
 0x64f   : > { %11159 = vmatpush3.bf16.msra.mxu0 %v11158_v16  ;;  %11129 = vmatprep.subr.bf16.mxu1 %v11128_v6  ;;  %v14267_v16 = vld [vmem:[#allocation2 + $0x5] ss:$8 sm:$0xf]  ;;  %v11194_v2 = vpack.c.bf16 %v7758_v42, %v7757_v61 }
 0x650   : > { %11161 = vmatprep.subr.bf16.mxu0 %v11160_v12  ;;  %v7799_v6 = vld [vmem:[%s16550_s9 + $0xb90] sm:$0xff]  ;;  %v4791_v23 = vrot.slane %v14267_v16, %v13141_v57  ;;  %v7864_v61 = vld [vmem:[%s16550_s9 + $0xd98] sm:$0xff]  ;;  %v4779_v42 = vrot.slane %v14267_v16, %v12940_v3 }
 0x651   : > { %v7751_v12 = vld [vmem:[%s16550_s9 + $0xa10] sm:$0xff]  ;;  %v11212_v50 = vpack.c.bf16 %v7800_v7, %v7799_v6 }
 0x652   : > { %11131 = vmatpush3.bf16.msra.mxu1 %v11130_v17  ;;  %v7769_v17 = vld [vmem:[%s16550_s9 + $0xaa0] sm:$0xff]  ;;  %v7791_v6 = vld [vmem:[%s16550_s9 + $0xb50] sm:$0xff] }
 0x653   : > { %11163 = vmatpush3.bf16.msra.mxu0 %v11162_v20  ;;  %11133 = vmatprep.subr.bf16.mxu1 %v11132_v31  ;;  %v7770_v20 = vld [vmem:[%s16550_s9 + $0xaa8] sm:$0xff]  ;;  %v4783_v31 = vrot.slane %v14267_v16, %v12946_v5 }
 0x654   : > { %11165 = vmatprep.subr.bf16.mxu0 %v11164_v25  ;;  %v11182_v25 = vpack.c.bf16 %v7752_v13, %v7751_v12  ;;  %v11184_v28 = vpack.c.bf16 %v7770_v20, %v7769_v17  ;;  %v7778_v12 = vld [vmem:[%s16550_s9 + $0xae8] sm:$0xff]  ;;  %v7809_v13 = vld [vmem:[%s16550_s9 + $0xbe0] sm:$0xff] }
 0x655   : > { %v7761_v17 = vld [vmem:[%s16550_s9 + $0xa60] sm:$0xff]  ;;  %v7762_v20 = vld [vmem:[%s16550_s9 + $0xa68] sm:$0xff] }
 0x656   : > { %11135 = vmatpush3.bf16.msra.mxu1 %v11134_v11  ;;  %v11216_v11 = vpack.c.bf16 %v7802_v21, %v7801_v22  ;;  %v7794_v22 = vld [vmem:[%s16550_s9 + $0xb68] sm:$0xff]  ;;  %v7779_v21 = vld [vmem:[%s16550_s9 + $0xaf0] sm:$0xff] }
 0x657   : > { %11167 = vmatpush3.bf16.msra.mxu0 %v11166_v60  ;;  %11137 = vmatprep.subr.bf16.mxu1 %v11136_v36  ;;  %v7786_v60 = vld [vmem:[%s16550_s9 + $0xb28] sm:$0xff]  ;;  %v7771_v36 = vld [vmem:[%s16550_s9 + $0xab0] sm:$0xff] }
 0x658   : > { %11169 = vmatprep.subr.bf16.mxu0 %v11168_v41  ;;  %v11186_v41 = vpack.c.bf16 %v7754_v34, %v7753_v33  ;;  %v11218_v43 = vpack.c.bf16 %v7786_v60, %v7785_v44  ;;  %v11188_v30 = vpack.c.bf16 %v7772_v37, %v7771_v36  ;;  %v7763_v44 = vld [vmem:[%s16550_s9 + $0xa70] sm:$0xff]  ;;  %v7796_v37 = vld [vmem:[%s16550_s9 + $0xb78] sm:$0xff] }
 0x659   : > { %v7795_v60 = vld [vmem:[%s16550_s9 + $0xb70] sm:$0xff] }
 0x65a   : > { %11139 = vmatpush3.bf16.msra.mxu1 %v11138_v48  ;;  %v11220_v48 = vpack.c.bf16 %v7804_v39, %v7803_v38  ;;  %v7829_v38 = vld [vmem:[%s16550_s9 + $0xc80] sm:$0xff]  ;;  %v7830_v39 = vld [vmem:[%s16550_s9 + $0xc88] sm:$0xff] }
 0x65b   : > { %11171 = vmatpush3.bf16.msra.mxu0 %v11170_v49  ;;  %11141 = vmatprep.subr.bf16.mxu1 %v11140_v52  ;;  %v7788_v49 = vld [vmem:[%s16550_s9 + $0xb38] sm:$0xff]  ;;  %v7773_v52 = vld [vmem:[%s16550_s9 + $0xac0] sm:$0xff] }
 0x65c   : > { %11173 = vmatprep.subr.bf16.mxu0 %v11172_v58  ;;  %v11190_v58 = vpack.c.bf16 %v7756_v46, %v7755_v45  ;;  %v11222_v24 = vpack.c.bf16 %v7788_v49, %v7787_v27  ;;  %v11192_v35 = vpack.c.bf16 %v7774_v54, %v7773_v52  ;;  %v11238_v45 = vpack.c.bf16 %v7796_v37, %v7795_v60  ;;  %v7813_v27 = vld [vmem:[%s16550_s9 + $0xc00] sm:$0xff]  ;;  %v7846_v54 = vld [vmem:[%s16550_s9 + $0xd08] sm:$0xff] }
 0x65d   : > { %v11240_v46 = vpack.c.bf16 %v7830_v39, %v7829_v38  ;;  %v7845_v52 = vld [vmem:[%s16550_s9 + $0xd00] sm:$0xff]  ;;  %v7870_v60 = vld [vmem:[%s16550_s9 + $0xdc8] sm:$0xff] }
 0x65e   : > { %11143 = vmatpush3.bf16.msra.mxu1 %v11142_v32  ;;  %v11224_v32 = vpack.c.bf16 %v7806_v47, %v7805_v55  ;;  %v7831_v55 = vld [vmem:[%s16550_s9 + $0xc90] sm:$0xff]  ;;  %v7832_v47 = vld [vmem:[%s16550_s9 + $0xc98] sm:$0xff]  ;;  %v7821_v39 = vld [vmem:[%s16550_s9 + $0xc40] sm:$0xff] }
 0x65f   : > { %11175 = vmatpush3.bf16.msra.mxu0 %v11174_v1  ;;  %11177 = vmatprep.subr.bf16.mxu1 %v11176_v62  ;;  %v7790_v1 = vld [vmem:[%s16550_s9 + $0xb48] sm:$0xff]  ;;  %v7775_v62 = vld [vmem:[%s16550_s9 + $0xad0] sm:$0xff] }
 0x660   : > { %11209 = vmatprep.subr.bf16.mxu0 %v11208_v9  ;;  %v7808_v9 = vld [vmem:[%s16550_s9 + $0xbd8] sm:$0xff]  ;;  %v11226_v63 = vpack.c.bf16 %v7790_v1, %v7789_v19  ;;  %v11196_v56 = vpack.c.bf16 %v7776_v29, %v7775_v62  ;;  %v11274_v19 = vpack.c.bf16 %v7846_v54, %v7845_v52  ;;  %v7847_v62 = vld [vmem:[%s16550_s9 + $0xd10] sm:$0xff]  ;;  %v4787_v29 = vrot.slane %v14267_v16, %v13138_v53  ;;  %v7865_v16 = vld [vmem:[%s16550_s9 + $0xda0] sm:$0xff] }
 0x661   : > { %4632 = vmatmul.mubr.f32.vlgmr.msra.gmra.mrb[24].mxu1 %v4550_v8  ;;  %v11228_v7 = vpack.c.bf16 %v7808_v9, %v7807_v51  ;;  %v7792_v8 = vld [vmem:[%s16550_s9 + $0xb58] sm:$0xff]  ;;  %v11244_v51 = vpack.c.bf16 %v7832_v47, %v7831_v55  ;;  %v7823_v47 = vld [vmem:[%s16550_s9 + $0xc50] sm:$0xff] }
 0x662   : > { %4702 = vmatmul.mubr.f32.vlgmr.msra.gmra.mrb[20].mxu0 %v4558_v15  ;;  %11179 = vmatpush3.bf16.msra.mxu1 %v11178_v4  ;;  %v7760_v4 = vld [vmem:[%s16550_s9 + $0xa58] sm:$0xff] }
 0x663   : > { %4860 = vmatprep.mubr.f32.mxu1 %v4783_v31  ;;  %11211 = vmatpush3.bf16.msra.mxu0 %v11210_v10  ;;  %v7777_v10 = vld [vmem:[%s16550_s9 + $0xae0] sm:$0xff]  ;;  %v11198_v15 = vpack.c.bf16 %v7760_v4, %v7759_v0  ;;  %v7816_v1 = vld [vmem:[%s16550_s9 + $0xc18] sm:$0xff]  ;;  %v7866_v4 = vld [vmem:[%s16550_s9 + $0xda8] sm:$0xff] }
 0x664   : > { %4930 = vmatprep.mubr.f32.mxu0 %v4791_v23  ;;  %11181 = vmatprep.subr.bf16.mxu1 %v11180_v18  ;;  %v11230_v18 = vpack.c.bf16 %v7792_v8, %v7791_v6  ;;  %v11200_v40 = vpack.c.bf16 %v7778_v12, %v7777_v10  ;;  %v7793_v31 = vld [vmem:[%s16550_s9 + $0xb60] sm:$0xff]  ;;  %v7780_v23 = vld [vmem:[%s16550_s9 + $0xaf8] sm:$0xff] }
 0x665   : > { %11213 = vmatprep.subr.bf16.mxu0 %v11212_v50  ;;  %v11232_v50 = vpack.c.bf16 %v7810_v14, %v7809_v13  ;;  %v11234_v33 = vpack.c.bf16 %v7794_v22, %v7793_v31  ;;  %v11204_v34 = vpack.c.bf16 %v7780_v23, %v7779_v21  ;;  %v7848_v9 = vld [vmem:[%s16550_s9 + $0xd18] sm:$0xff]  ;;  %v7817_v12 = vld [vmem:[%s16550_s9 + $0xc20] sm:$0xff]  ;;  %v7818_v13 = vld [vmem:[%s16550_s9 + $0xc28] sm:$0xff] }
 0x666   : > { %11183 = vmatpush3.bf16.msra.mxu1 %v11182_v25  ;;  %v7811_v25 = vld [vmem:[%s16550_s9 + $0xbf0] sm:$0xff]  ;;  %v11278_v8 = vpack.c.bf16 %v7848_v9, %v7847_v62  ;;  %v7849_v14 = vld [vmem:[%s16550_s9 + $0xd20] sm:$0xff]  ;;  %v7868_v31 = vld [vmem:[%s16550_s9 + $0xdb8] sm:$0xff] }
 0x667   : > { %11215 = vmatpush3.bf16.msra.mxu0 %v11214_v26  ;;  %11185 = vmatprep.subr.bf16.mxu1 %v11184_v28  ;;  %v7812_v26 = vld [vmem:[%s16550_s9 + $0xbf8] sm:$0xff]  ;;  %v11202_v28 = vpack.c.bf16 %v7762_v20, %v7761_v17  ;;  %v7867_v20 = vld [vmem:[%s16550_s9 + $0xdb0] sm:$0xff]  ;;  %v7874_v62 = vld [vmem:[%s16550_s9 + $0xde8] sm:$0xff] }
 0x668   : > { %11217 = vmatprep.subr.bf16.mxu0 %v11216_v11  ;;  %v7764_v11 = vld [vmem:[%s16550_s9 + $0xa78] sm:$0xff]  ;;  %v11236_v36 = vpack.c.bf16 %v7812_v26, %v7811_v25  ;;  %v7819_v23 = vld [vmem:[%s16550_s9 + $0xc30] sm:$0xff] }
 0x669   : > { %v7836_v17 = vld [vmem:[%s16550_s9 + $0xcb8] sm:$0xff]  ;;  %v7851_v26 = vld [vmem:[%s16550_s9 + $0xd30] sm:$0xff] }
 0x66a   : > { %11187 = vmatpush3.bf16.msra.mxu1 %v11186_v41  ;;  %v7861_v41 = vld [vmem:[%s16550_s9 + $0xd80] sm:$0xff]  ;;  %v7820_v25 = vld [vmem:[%s16550_s9 + $0xc38] sm:$0xff] }
 0x66b   : > { %11219 = vmatpush3.bf16.msra.mxu0 %v11218_v43  ;;  %11189 = vmatprep.subr.bf16.mxu1 %v11188_v30  ;;  %v7862_v43 = vld [vmem:[%s16550_s9 + $0xd88] sm:$0xff]  ;;  %v11206_v30 = vpack.c.bf16 %v7764_v11, %v7763_v44  ;;  %v7869_v11 = vld [vmem:[%s16550_s9 + $0xdc0] sm:$0xff] }
 0x66c   : > { %11221 = vmatprep.subr.bf16.mxu0 %v11220_v48  ;;  %v7814_v48 = vld [vmem:[%s16550_s9 + $0xc08] sm:$0xff]  ;;  %v11272_v49 = vpack.c.bf16 %v7862_v43, %v7861_v41  ;;  %v7853_v43 = vld [vmem:[%s16550_s9 + $0xd40] sm:$0xff] }
 0x66d   : > { %v7838_v44 = vld [vmem:[%s16550_s9 + $0xcc8] sm:$0xff] }
 0x66e   : > { %11191 = vmatpush3.bf16.msra.mxu1 %v11190_v58  ;;  %v11242_v58 = vpack.c.bf16 %v7814_v48, %v7813_v27  ;;  %v7822_v41 = vld [vmem:[%s16550_s9 + $0xc48] sm:$0xff]  ;;  %v7840_v27 = vld [vmem:[%s16550_s9 + $0xcd8] sm:$0xff]  ;;  %v7871_v48 = vld [vmem:[%s16550_s9 + $0xdd0] sm:$0xff] }
 0x66f   : > { %11223 = vmatpush3.bf16.msra.mxu0 %v11222_v24  ;;  %11193 = vmatprep.subr.bf16.mxu1 %v11192_v35  ;;  %v14469_v24 = vld [vmem:[#allocation2 + $0x6] ss:$8 sm:$0xf]  ;;  %v11258_v52 = vpack.c.bf16 %v7822_v41, %v7821_v39 }
 0x670   : > { %11225 = vmatprep.subr.bf16.mxu0 %v11224_v32  ;;  %v7863_v35 = vld [vmem:[%s16550_s9 + $0xd90] sm:$0xff]  ;;  %v5020_v6 = vrot.slane %v14469_v24, %v13141_v57  ;;  %v7928_v39 = vld [vmem:[%s16550_s9 + $0xf98] sm:$0xff]  ;;  %v5008_v41 = vrot.slane %v14469_v24, %v12940_v3 }
 0x671   : > { %v7815_v32 = vld [vmem:[%s16550_s9 + $0xc10] sm:$0xff]  ;;  %v11276_v0 = vpack.c.bf16 %v7864_v61, %v7863_v35 }
 0x672   : > { %11195 = vmatpush3.bf16.msra.mxu1 %v11194_v2  ;;  %v7833_v2 = vld [vmem:[%s16550_s9 + $0xca0] sm:$0xff]  ;;  %v7855_v35 = vld [vmem:[%s16550_s9 + $0xd50] sm:$0xff] }
 0x673   : > { %11227 = vmatpush3.bf16.msra.mxu0 %v11226_v63  ;;  %11197 = vmatprep.subr.bf16.mxu1 %v11196_v56  ;;  %v7834_v63 = vld [vmem:[%s16550_s9 + $0xca8] sm:$0xff]  ;;  %v5012_v56 = vrot.slane %v14469_v24, %v12946_v5 }
 0x674   : > { %11229 = vmatprep.subr.bf16.mxu0 %v11228_v7  ;;  %v11246_v7 = vpack.c.bf16 %v7816_v1, %v7815_v32  ;;  %v11248_v10 = vpack.c.bf16 %v7834_v63, %v7833_v2  ;;  %v7842_v32 = vld [vmem:[%s16550_s9 + $0xce8] sm:$0xff]  ;;  %v7873_v1 = vld [vmem:[%s16550_s9 + $0xde0] sm:$0xff] }
 0x675   : > { %v7825_v2 = vld [vmem:[%s16550_s9 + $0xc60] sm:$0xff]  ;;  %v7826_v63 = vld [vmem:[%s16550_s9 + $0xc68] sm:$0xff] }
 0x676   : > { %11199 = vmatpush3.bf16.msra.mxu1 %v11198_v15  ;;  %v11280_v15 = vpack.c.bf16 %v7866_v4, %v7865_v16  ;;  %v7858_v16 = vld [vmem:[%s16550_s9 + $0xd68] sm:$0xff]  ;;  %v7843_v4 = vld [vmem:[%s16550_s9 + $0xcf0] sm:$0xff] }
 0x677   : > { %11231 = vmatpush3.bf16.msra.mxu0 %v11230_v18  ;;  %11201 = vmatprep.subr.bf16.mxu1 %v11200_v40  ;;  %v7850_v18 = vld [vmem:[%s16550_s9 + $0xd28] sm:$0xff]  ;;  %v7835_v40 = vld [vmem:[%s16550_s9 + $0xcb0] sm:$0xff] }
 0x678   : > { %11233 = vmatprep.subr.bf16.mxu0 %v11232_v50  ;;  %v11250_v50 = vpack.c.bf16 %v7818_v13, %v7817_v12  ;;  %v11282_v22 = vpack.c.bf16 %v7850_v18, %v7849_v14  ;;  %v11252_v21 = vpack.c.bf16 %v7836_v17, %v7835_v40  ;;  %v7827_v14 = vld [vmem:[%s16550_s9 + $0xc70] sm:$0xff]  ;;  %v7860_v17 = vld [vmem:[%s16550_s9 + $0xd78] sm:$0xff] }
 0x679   : > { %v7859_v18 = vld [vmem:[%s16550_s9 + $0xd70] sm:$0xff] }
 0x67a   : > { %11203 = vmatpush3.bf16.msra.mxu1 %v11202_v28  ;;  %v11284_v28 = vpack.c.bf16 %v7868_v31, %v7867_v20  ;;  %v7893_v20 = vld [vmem:[%s16550_s9 + $0xe80] sm:$0xff]  ;;  %v7894_v31 = vld [vmem:[%s16550_s9 + $0xe88] sm:$0xff] }
 0x67b   : > { %11235 = vmatpush3.bf16.msra.mxu0 %v11234_v33  ;;  %11205 = vmatprep.subr.bf16.mxu1 %v11204_v34  ;;  %v7852_v33 = vld [vmem:[%s16550_s9 + $0xd38] sm:$0xff]  ;;  %v7837_v34 = vld [vmem:[%s16550_s9 + $0xcc0] sm:$0xff] }
 0x67c   : > { %11237 = vmatprep.subr.bf16.mxu0 %v11236_v36  ;;  %v11254_v36 = vpack.c.bf16 %v7820_v25, %v7819_v23  ;;  %v11286_v37 = vpack.c.bf16 %v7852_v33, %v7851_v26  ;;  %v11256_v38 = vpack.c.bf16 %v7838_v44, %v7837_v34  ;;  %v11302_v23 = vpack.c.bf16 %v7860_v17, %v7859_v18  ;;  %v7877_v26 = vld [vmem:[%s16550_s9 + $0xe00] sm:$0xff]  ;;  %v7910_v44 = vld [vmem:[%s16550_s9 + $0xf08] sm:$0xff] }
 0x67d   : > { %v11304_v25 = vpack.c.bf16 %v7894_v31, %v7893_v20  ;;  %v7909_v34 = vld [vmem:[%s16550_s9 + $0xf00] sm:$0xff]  ;;  %v7934_v18 = vld [vmem:[%s16550_s9 + $0xfc8] sm:$0xff] }
 0x67e   : > { %11207 = vmatpush3.bf16.msra.mxu1 %v11206_v30  ;;  %v11288_v30 = vpack.c.bf16 %v7870_v60, %v7869_v11  ;;  %v7895_v11 = vld [vmem:[%s16550_s9 + $0xe90] sm:$0xff]  ;;  %v7896_v60 = vld [vmem:[%s16550_s9 + $0xe98] sm:$0xff]  ;;  %v7885_v31 = vld [vmem:[%s16550_s9 + $0xe40] sm:$0xff] }
 0x67f   : > { %11239 = vmatpush3.bf16.msra.mxu0 %v11238_v45  ;;  %11241 = vmatprep.subr.bf16.mxu1 %v11240_v46  ;;  %v7854_v45 = vld [vmem:[%s16550_s9 + $0xd48] sm:$0xff]  ;;  %v7839_v46 = vld [vmem:[%s16550_s9 + $0xcd0] sm:$0xff] }
 0x680   : > { %11273 = vmatprep.subr.bf16.mxu0 %v11272_v49  ;;  %v7872_v49 = vld [vmem:[%s16550_s9 + $0xdd8] sm:$0xff]  ;;  %v11290_v54 = vpack.c.bf16 %v7854_v45, %v7853_v43  ;;  %v11260_v55 = vpack.c.bf16 %v7840_v27, %v7839_v46  ;;  %v11338_v43 = vpack.c.bf16 %v7910_v44, %v7909_v34  ;;  %v7911_v46 = vld [vmem:[%s16550_s9 + $0xf10] sm:$0xff]  ;;  %v5016_v27 = vrot.slane %v14469_v24, %v13138_v53  ;;  %v7929_v24 = vld [vmem:[%s16550_s9 + $0xfa0] sm:$0xff] }
 0x681   : > { %4861 = vmatmul.mubr.f32.vlgmr.msra.gmra.mrb[26].mxu1 %v4779_v42  ;;  %v11292_v61 = vpack.c.bf16 %v7872_v49, %v7871_v48  ;;  %v7856_v42 = vld [vmem:[%s16550_s9 + $0xd58] sm:$0xff]  ;;  %v11308_v48 = vpack.c.bf16 %v7896_v60, %v7895_v11  ;;  %v7887_v60 = vld [vmem:[%s16550_s9 + $0xe50] sm:$0xff] }
 0x682   : > { %4931 = vmatmul.mubr.f32.vlgmr.msra.gmra.mrb[22].mxu0 %v4787_v29  ;;  %11243 = vmatpush3.bf16.msra.mxu1 %v11242_v58  ;;  %v7824_v58 = vld [vmem:[%s16550_s9 + $0xc58] sm:$0xff] }
 0x683   : > { %5089 = vmatprep.mubr.f32.mxu1 %v5012_v56  ;;  %11275 = vmatpush3.bf16.msra.mxu0 %v11274_v19  ;;  %v7841_v19 = vld [vmem:[%s16550_s9 + $0xce0] sm:$0xff]  ;;  %v11262_v29 = vpack.c.bf16 %v7824_v58, %v7823_v47  ;;  %v7880_v45 = vld [vmem:[%s16550_s9 + $0xe18] sm:$0xff]  ;;  %v7930_v58 = vld [vmem:[%s16550_s9 + $0xfa8] sm:$0xff] }
 0x684   : > { %5159 = vmatprep.mubr.f32.mxu0 %v5020_v6  ;;  %11245 = vmatprep.subr.bf16.mxu1 %v11244_v51  ;;  %v11294_v51 = vpack.c.bf16 %v7856_v42, %v7855_v35  ;;  %v11264_v9 = vpack.c.bf16 %v7842_v32, %v7841_v19  ;;  %v7857_v56 = vld [vmem:[%s16550_s9 + $0xd60] sm:$0xff]  ;;  %v7844_v6 = vld [vmem:[%s16550_s9 + $0xcf8] sm:$0xff] }
 0x685   : > { %11277 = vmatprep.subr.bf16.mxu0 %v11276_v0  ;;  %v11296_v0 = vpack.c.bf16 %v7874_v62, %v7873_v1  ;;  %v11298_v12 = vpack.c.bf16 %v7858_v16, %v7857_v56  ;;  %v11268_v13 = vpack.c.bf16 %v7844_v6, %v7843_v4  ;;  %v7912_v49 = vld [vmem:[%s16550_s9 + $0xf18] sm:$0xff]  ;;  %v7881_v32 = vld [vmem:[%s16550_s9 + $0xe20] sm:$0xff]  ;;  %v7882_v1 = vld [vmem:[%s16550_s9 + $0xe28] sm:$0xff] }
 0x686   : > { %11247 = vmatpush3.bf16.msra.mxu1 %v11246_v7  ;;  %v7875_v7 = vld [vmem:[%s16550_s9 + $0xdf0] sm:$0xff]  ;;  %v11342_v42 = vpack.c.bf16 %v7912_v49, %v7911_v46  ;;  %v7913_v62 = vld [vmem:[%s16550_s9 + $0xf20] sm:$0xff]  ;;  %v7932_v56 = vld [vmem:[%s16550_s9 + $0xfb8] sm:$0xff] }
 0x687   : > { %11279 = vmatpush3.bf16.msra.mxu0 %v11278_v8  ;;  %11249 = vmatprep.subr.bf16.mxu1 %v11248_v10  ;;  %v7876_v8 = vld [vmem:[%s16550_s9 + $0xdf8] sm:$0xff]  ;;  %v11266_v10 = vpack.c.bf16 %v7826_v63, %v7825_v2  ;;  %v7931_v63 = vld [vmem:[%s16550_s9 + $0xfb0] sm:$0xff]  ;;  %v7938_v46 = vld [vmem:[%s16550_s9 + $0xfe8] sm:$0xff] }
 0x688   : > { %11281 = vmatprep.subr.bf16.mxu0 %v11280_v15  ;;  %v7828_v15 = vld [vmem:[%s16550_s9 + $0xc78] sm:$0xff]  ;;  %v11300_v40 = vpack.c.bf16 %v7876_v8, %v7875_v7  ;;  %v7883_v6 = vld [vmem:[%s16550_s9 + $0xe30] sm:$0xff] }
 0x689   : > { %v7900_v2 = vld [vmem:[%s16550_s9 + $0xeb8] sm:$0xff]  ;;  %v7915_v8 = vld [vmem:[%s16550_s9 + $0xf30] sm:$0xff] }
 0x68a   : > { %11251 = vmatpush3.bf16.msra.mxu1 %v11250_v50  ;;  %v7925_v50 = vld [vmem:[%s16550_s9 + $0xf80] sm:$0xff]  ;;  %v7884_v7 = vld [vmem:[%s16550_s9 + $0xe38] sm:$0xff] }
 0x68b   : > { %11283 = vmatpush3.bf16.msra.mxu0 %v11282_v22  ;;  %11253 = vmatprep.subr.bf16.mxu1 %v11252_v21  ;;  %v7926_v22 = vld [vmem:[%s16550_s9 + $0xf88] sm:$0xff]  ;;  %v11270_v21 = vpack.c.bf16 %v7828_v15, %v7827_v14  ;;  %v7933_v15 = vld [vmem:[%s16550_s9 + $0xfc0] sm:$0xff] }
 0x68c   : > { %11285 = vmatprep.subr.bf16.mxu0 %v11284_v28  ;;  %v7878_v28 = vld [vmem:[%s16550_s9 + $0xe08] sm:$0xff]  ;;  %v11336_v33 = vpack.c.bf16 %v7926_v22, %v7925_v50  ;;  %v7917_v22 = vld [vmem:[%s16550_s9 + $0xf40] sm:$0xff] }
 0x68d   : > { %v7902_v14 = vld [vmem:[%s16550_s9 + $0xec8] sm:$0xff] }
 0x68e   : > { %11255 = vmatpush3.bf16.msra.mxu1 %v11254_v36  ;;  %v11306_v36 = vpack.c.bf16 %v7878_v28, %v7877_v26  ;;  %v7886_v50 = vld [vmem:[%s16550_s9 + $0xe48] sm:$0xff]  ;;  %v7904_v26 = vld [vmem:[%s16550_s9 + $0xed8] sm:$0xff]  ;;  %v7935_v28 = vld [vmem:[%s16550_s9 + $0xfd0] sm:$0xff] }
 0x68f   : > { %11287 = vmatpush3.bf16.msra.mxu0 %v11286_v37  ;;  %11257 = vmatprep.subr.bf16.mxu1 %v11256_v38  ;;  %v14671_v37 = vld [vmem:[#allocation2 + $0x7] ss:$8 sm:$0xf]  ;;  %v11322_v34 = vpack.c.bf16 %v7886_v50, %v7885_v31 }
 0x690   : > { %11289 = vmatprep.subr.bf16.mxu0 %v11288_v30  ;;  %v7927_v38 = vld [vmem:[%s16550_s9 + $0xf90] sm:$0xff]  ;;  %v5249_v35 = vrot.slane %v14671_v37, %v13141_v57  ;;  %v7973_v31 = vld [vmem:[%s16550_s9 + $0x1100] sm:$0xff]  ;;  %v7974_v50 = vld [vmem:[%s16550_s9 + $0x1108] sm:$0xff] }
 0x691   : > { %v7879_v30 = vld [vmem:[%s16550_s9 + $0xe10] sm:$0xff]  ;;  %v11340_v47 = vpack.c.bf16 %v7928_v39, %v7927_v38 }
 0x692   : > { %11259 = vmatpush3.bf16.msra.mxu1 %v11258_v52  ;;  %v7897_v52 = vld [vmem:[%s16550_s9 + $0xea0] sm:$0xff]  ;;  %v7919_v38 = vld [vmem:[%s16550_s9 + $0xf50] sm:$0xff] }
 0x693   : > { %11291 = vmatpush3.bf16.msra.mxu0 %v11290_v54  ;;  %11261 = vmatprep.subr.bf16.mxu1 %v11260_v55  ;;  %v7898_v54 = vld [vmem:[%s16550_s9 + $0xea8] sm:$0xff]  ;;  %v5241_v55 = vrot.slane %v14671_v37, %v12946_v5 }
 0x694   : > { %11293 = vmatprep.subr.bf16.mxu0 %v11292_v61  ;;  %v11310_v61 = vpack.c.bf16 %v7880_v45, %v7879_v30  ;;  %v11312_v19 = vpack.c.bf16 %v7898_v54, %v7897_v52  ;;  %v7906_v30 = vld [vmem:[%s16550_s9 + $0xee8] sm:$0xff]  ;;  %v7937_v45 = vld [vmem:[%s16550_s9 + $0xfe0] sm:$0xff] }
 0x695   : > { %v7889_v52 = vld [vmem:[%s16550_s9 + $0xe60] sm:$0xff]  ;;  %v7890_v54 = vld [vmem:[%s16550_s9 + $0xe68] sm:$0xff] }
 0x696   : > { %11263 = vmatpush3.bf16.msra.mxu1 %v11262_v29  ;;  %v11344_v29 = vpack.c.bf16 %v7930_v58, %v7929_v24  ;;  %v11360_v58 = vpack.c.bf16 %v7938_v46, %v7937_v45  ;;  %v7994_v46 = vld [vmem:[%s16550_s9 + $0x11a8] sm:$0xff] }
 0x697   : > { %11295 = vmatpush3.bf16.msra.mxu0 %v11294_v51  ;;  %11265 = vmatprep.subr.bf16.mxu1 %v11264_v9  ;;  %v7914_v51 = vld [vmem:[%s16550_s9 + $0xf28] sm:$0xff]  ;;  %v7899_v9 = vld [vmem:[%s16550_s9 + $0xeb0] sm:$0xff] }
 0x698   : > { %11297 = vmatprep.subr.bf16.mxu0 %v11296_v0  ;;  %v11314_v0 = vpack.c.bf16 %v7882_v1, %v7881_v32  ;;  %v11346_v16 = vpack.c.bf16 %v7914_v51, %v7913_v62  ;;  %v11316_v4 = vpack.c.bf16 %v7900_v2, %v7899_v9  ;;  %v7939_v1 = vld [vmem:[%s16550_s9 + $0xff0] sm:$0xff]  ;;  %v7940_v62 = vld [vmem:[%s16550_s9 + $0xff8] sm:$0xff]  ;;  %v11330_v9 = vpack.c.bf16 %v7890_v54, %v7889_v52  ;;  %v7945_v54 = vld [vmem:[%s16550_s9 + $0x1020] sm:$0xff] }
 0x69a   : > { %11267 = vmatpush3.bf16.msra.mxu1 %v11266_v10  ;;  %v11348_v10 = vpack.c.bf16 %v7932_v56, %v7931_v63  ;;  %v7891_v56 = vld [vmem:[%s16550_s9 + $0xe70] sm:$0xff] }
 0x69b   : > { %11299 = vmatpush3.bf16.msra.mxu0 %v11298_v12  ;;  %11269 = vmatprep.subr.bf16.mxu1 %v11268_v13  ;;  %v7916_v12 = vld [vmem:[%s16550_s9 + $0xf38] sm:$0xff]  ;;  %v7901_v13 = vld [vmem:[%s16550_s9 + $0xec0] sm:$0xff] }
 0x69c   : > { %11301 = vmatprep.subr.bf16.mxu0 %v11300_v40  ;;  %v11318_v40 = vpack.c.bf16 %v7884_v7, %v7883_v6  ;;  %v11350_v17 = vpack.c.bf16 %v7916_v12, %v7915_v8  ;;  %v11320_v20 = vpack.c.bf16 %v7902_v14, %v7901_v13  ;;  %v11364_v6 = vpack.c.bf16 %v7940_v62, %v7939_v1  ;;  %v7924_v7 = vld [vmem:[%s16550_s9 + $0xf78] sm:$0xff]  ;;  %v7957_v8 = vld [vmem:[%s16550_s9 + $0x1080] sm:$0xff]  ;;  %v7990_v13 = vld [vmem:[%s16550_s9 + $0x1188] sm:$0xff] }
 0x69d   : > { %v7989_v12 = vld [vmem:[%s16550_s9 + $0x1180] sm:$0xff] }
 0x69e   : > { %11271 = vmatpush3.bf16.msra.mxu1 %v11270_v21  ;;  %v11352_v21 = vpack.c.bf16 %v7934_v18, %v7933_v15 }
 0x69f   : > { %11303 = vmatpush3.bf16.msra.mxu0 %v11302_v23  ;;  %11305 = vmatprep.subr.bf16.mxu1 %v11304_v25  ;;  %v7918_v23 = vld [vmem:[%s16550_s9 + $0xf48] sm:$0xff]  ;;  %v7903_v25 = vld [vmem:[%s16550_s9 + $0xed0] sm:$0xff] }
 0x6a0   : > { %11337 = vmatprep.subr.bf16.mxu0 %v11336_v33  ;;  %v7936_v33 = vld [vmem:[%s16550_s9 + $0xfd8] sm:$0xff]  ;;  %v11354_v44 = vpack.c.bf16 %v7918_v23, %v7917_v22  ;;  %v11324_v11 = vpack.c.bf16 %v7904_v26, %v7903_v25  ;;  %v7959_v22 = vld [vmem:[%s16550_s9 + $0x1090] sm:$0xff] }
 0x6a1   : > { %5090 = vmatmul.mubr.f32.vlgmr.msra.gmra.mrb[28].mxu1 %v5008_v41  ;;  %v11356_v39 = vpack.c.bf16 %v7936_v33, %v7935_v28  ;;  %v7920_v41 = vld [vmem:[%s16550_s9 + $0xf58] sm:$0xff]  ;;  %v7991_v26 = vld [vmem:[%s16550_s9 + $0x1190] sm:$0xff]  ;;  %v5237_v33 = vrot.slane %v14671_v37, %v12940_v3 }
 0x6a2   : > { %5160 = vmatmul.mubr.f32.vlgmr.msra.gmra.mrb[24].mxu0 %v5016_v27  ;;  %11307 = vmatpush3.bf16.msra.mxu1 %v11306_v36  ;;  %v7888_v36 = vld [vmem:[%s16550_s9 + $0xe58] sm:$0xff] }
 0x6a3   : > { %5318 = vmatprep.mubr.f32.mxu1 %v5241_v55  ;;  %11339 = vmatpush3.bf16.msra.mxu0 %v11338_v43  ;;  %v7905_v43 = vld [vmem:[%s16550_s9 + $0xee0] sm:$0xff]  ;;  %v11326_v27 = vpack.c.bf16 %v7888_v36, %v7887_v60  ;;  %v7992_v28 = vld [vmem:[%s16550_s9 + $0x1198] sm:$0xff]  ;;  %v7975_v60 = vld [vmem:[%s16550_s9 + $0x1110] sm:$0xff]  ;;  %v5245_v36 = vrot.slane %v14671_v37, %v13138_v53 }
 0x6a4   : > { %5388 = vmatprep.mubr.f32.mxu0 %v5249_v35  ;;  %11309 = vmatprep.subr.bf16.mxu1 %v11308_v48  ;;  %v11358_v48 = vpack.c.bf16 %v7920_v41, %v7919_v38  ;;  %v11328_v49 = vpack.c.bf16 %v7906_v30, %v7905_v43  ;;  %v7921_v55 = vld [vmem:[%s16550_s9 + $0xf60] sm:$0xff]  ;;  %v7922_v35 = vld [vmem:[%s16550_s9 + $0xf68] sm:$0xff]  ;;  %v11404_v45 = vpack.c.bf16 %v7992_v28, %v7991_v26  ;;  %v7952_v26 = vld [vmem:[%s16550_s9 + $0x1058] sm:$0xff] }
 0x6a5   : > { %11341 = vmatprep.subr.bf16.mxu0 %v11340_v47  ;;  %v11362_v2 = vpack.c.bf16 %v7922_v35, %v7921_v55  ;;  %v14875_v25 = vld [vmem:[#allocation2 + $0x20] ss:$8 sm:$0xf] }
 0x6a6   : > { %11311 = vmatpush3.bf16.msra.mxu1 %v11310_v61  ;;  %v7907_v61 = vld [vmem:[%s16550_s9 + $0xef0] sm:$0xff]  ;;  %v7961_v41 = vld [vmem:[%s16550_s9 + $0x10a0] sm:$0xff]  ;;  %v7962_v43 = vld [vmem:[%s16550_s9 + $0x10a8] sm:$0xff]  ;;  %v5470_v30 = vrot.slane %v14875_v25, %v12946_v5 }
 0x6a7   : > { %11343 = vmatpush3.bf16.msra.mxu0 %v11342_v42  ;;  %11313 = vmatprep.subr.bf16.mxu1 %v11312_v19  ;;  %v7908_v42 = vld [vmem:[%s16550_s9 + $0xef8] sm:$0xff]  ;;  %v7993_v37 = vld [vmem:[%s16550_s9 + $0x11a0] sm:$0xff]  ;;  %v11376_v52 = vpack.c.bf16 %v7962_v43, %v7961_v41  ;;  %v7946_v55 = vld [vmem:[%s16550_s9 + $0x1028] sm:$0xff] }
 0x6a8   : > { %11345 = vmatprep.subr.bf16.mxu0 %v11344_v29  ;;  %v11332_v63 = vpack.c.bf16 %v7908_v42, %v7907_v61  ;;  %v7963_v35 = vld [vmem:[%s16550_s9 + $0x10b0] sm:$0xff]  ;;  %v7964_v61 = vld [vmem:[%s16550_s9 + $0x10b8] sm:$0xff]  ;;  %v7953_v43 = vld [vmem:[%s16550_s9 + $0x1060] sm:$0xff] }
 0x6a9   : > { %v7995_v42 = vld [vmem:[%s16550_s9 + $0x11b0] sm:$0xff]  ;;  %v11380_v62 = vpack.c.bf16 %v7964_v61, %v7963_v35 }
 0x6aa   : > { %11315 = vmatpush3.bf16.msra.mxu1 %v11314_v0  ;;  %v7892_v0 = vld [vmem:[%s16550_s9 + $0xe78] sm:$0xff]  ;;  %v7983_v28 = vld [vmem:[%s16550_s9 + $0x1150] sm:$0xff] }
 0x6ab   : > { %11347 = vmatpush3.bf16.msra.mxu0 %v11346_v16  ;;  %11317 = vmatprep.subr.bf16.mxu1 %v11316_v4  ;;  %v7923_v16 = vld [vmem:[%s16550_s9 + $0xf70] sm:$0xff]  ;;  %v11334_v14 = vpack.c.bf16 %v7892_v0, %v7891_v56  ;;  %v7965_v56 = vld [vmem:[%s16550_s9 + $0x10c0] sm:$0xff]  ;;  %v7966_v0 = vld [vmem:[%s16550_s9 + $0x10c8] sm:$0xff] }
 0x6ac   : > { %11349 = vmatprep.subr.bf16.mxu0 %v11348_v10  ;;  %v7958_v10 = vld [vmem:[%s16550_s9 + $0x1088] sm:$0xff]  ;;  %v11366_v15 = vpack.c.bf16 %v7924_v7, %v7923_v16  ;;  %v7997_v16 = vld [vmem:[%s16550_s9 + $0x11c0] sm:$0xff] }
 0x6ad   : > { %v11368_v18 = vpack.c.bf16 %v7958_v10, %v7957_v8  ;;  %v11384_v10 = vpack.c.bf16 %v7966_v0, %v7965_v56  ;;  %v8053_v56 = vld [vmem:[%s16550_s9 + $0x1380] sm:$0xff] }
 0x6ae   : > { %11319 = vmatpush3.bf16.msra.mxu1 %v11318_v40  ;;  %v7941_v40 = vld [vmem:[%s16550_s9 + $0x1000] sm:$0xff] }
 0x6af   : > { %11351 = vmatpush3.bf16.msra.mxu0 %v11350_v17  ;;  %11321 = vmatprep.subr.bf16.mxu1 %v11320_v20  ;;  %v7942_v17 = vld [vmem:[%s16550_s9 + $0x1008] sm:$0xff]  ;;  %v11400_v20 = vpack.c.bf16 %v7990_v13, %v7989_v12  ;;  %v7949_v12 = vld [vmem:[%s16550_s9 + $0x1040] sm:$0xff] }
 0x6b0   : > { %11353 = vmatprep.subr.bf16.mxu0 %v11352_v21  ;;  %v7960_v21 = vld [vmem:[%s16550_s9 + $0x1098] sm:$0xff]  ;;  %v11370_v23 = vpack.c.bf16 %v7942_v17, %v7941_v40  ;;  %v7950_v13 = vld [vmem:[%s16550_s9 + $0x1048] sm:$0xff]  ;;  %v7967_v40 = vld [vmem:[%s16550_s9 + $0x10d0] sm:$0xff] }
 0x6b1   : > { %v11372_v38 = vpack.c.bf16 %v7960_v21, %v7959_v22  ;;  %v7968_v17 = vld [vmem:[%s16550_s9 + $0x10d8] sm:$0xff] }
 0x6b2   : > { %11323 = vmatpush3.bf16.msra.mxu1 %v11322_v34  ;;  %v11402_v34 = vpack.c.bf16 %v7974_v50, %v7973_v31  ;;  %v8000_v31 = vld [vmem:[%s16550_s9 + $0x11d8] sm:$0xff]  ;;  %v11386_v50 = vpack.c.bf16 %v7950_v13, %v7949_v12  ;;  %v11388_v21 = vpack.c.bf16 %v7968_v17, %v7967_v40  ;;  %v8037_v13 = vld [vmem:[%s16550_s9 + $0x1300] sm:$0xff] }
 0x6b3   : > { %11355 = vmatpush3.bf16.msra.mxu0 %v11354_v44  ;;  %11325 = vmatprep.subr.bf16.mxu1 %v11324_v11  ;;  %v7943_v44 = vld [vmem:[%s16550_s9 + $0x1010] sm:$0xff]  ;;  %v7944_v11 = vld [vmem:[%s16550_s9 + $0x1018] sm:$0xff] }
 0x6b4   : > { %v8488_v47 = vpop.f32.mrb[16].mxu1  ;;  %v8523_v24 = vpop.f32.mrb[12].mxu0  ;;  %11357 = vmatprep.subr.bf16.mxu0 %v11356_v39  ;;  %v7976_v39 = vld [vmem:[%s16550_s9 + $0x1118] sm:$0xff] }
 0x6b5   : > { %v8489_v19 = vpop.f32.mrb[17].mxu1  ;;  %v8524_v32 = vpop.f32.mrb[13].mxu0  ;;  %v15080_v17 = vld [vmem:[#allocation2 + $0x21] ss:$8 sm:$0xf] }
 0x6b6   : > { %v8490_v29 = vadd.f32 %v8489_v19, %v8488_v47  ;;  %v8525_v51 = vadd.f32 %v8524_v32, %v8523_v24  ;;  %11327 = vmatpush3.bf16.msra.mxu1 %v11326_v27  ;;  %v5478_v27 = vrot.slane %v14875_v25, %v13141_v57  ;;  %v7977_v47 = vld [vmem:[%s16550_s9 + $0x1120] sm:$0xff]  ;;  %v11408_v24 = vpack.c.bf16 %v7994_v46, %v7993_v37  ;;  %v7996_v19 = vld [vmem:[%s16550_s9 + $0x11b8] sm:$0xff] }
 0x6b7   : > { %11359 = vmatpush3.bf16.msra.mxu0 %v11358_v48  ;;  %11329 = vmatprep.subr.bf16.mxu1 %v11328_v49  ;;  %v11374_v48 = vpack.c.bf16 %v7944_v11, %v7943_v44  ;;  %v11406_v49 = vpack.c.bf16 %v7976_v39, %v7975_v60  ;;  %v11378_v32 = vpack.c.bf16 %v7946_v55, %v7945_v54  ;;  %v7969_v44 = vld [vmem:[%s16550_s9 + $0x10e0] sm:$0xff]  ;;  %v7970_v11 = vld [vmem:[%s16550_s9 + $0x10e8] sm:$0xff] }
 0x6b8   : > { %v14840_v4 = vadd.f32 %v8525_v51, %v8490_v29  ;;  %11361 = vmatprep.subr.bf16.mxu0 %v11360_v58  ;;  %v7978_v58 = vld [vmem:[%s16550_s9 + $0x1128] sm:$0xff]  ;;  %v7947_v29 = vld [vmem:[%s16550_s9 + $0x1030] sm:$0xff]  ;;  %v7948_v51 = vld [vmem:[%s16550_s9 + $0x1038] sm:$0xff]  ;;  %v11392_v41 = vpack.c.bf16 %v7970_v11, %v7969_v44 }
 0x6b9   : > { %v11410_v1 = vpack.c.bf16 %v7978_v58, %v7977_v47  ;;  %v11382_v7 = vpack.c.bf16 %v7948_v51, %v7947_v29  ;;  %v8001_v60 = vld [vmem:[%s16550_s9 + $0x11e0] sm:$0xff]  ;;  %v8003_v47 = vld [vmem:[%s16550_s9 + $0x11f0] sm:$0xff]  ;;  %v8026_v11 = vld [vmem:[%s16550_s9 + $0x12a8] sm:$0xff] }
 0x6ba   : > { %11331 = vmatpush3.bf16.msra.mxu1 %v11330_v9  ;;  %v7979_v9 = vld [vmem:[%s16550_s9 + $0x1130] sm:$0xff]  ;;  %v8025_v44 = vld [vmem:[%s16550_s9 + $0x12a0] sm:$0xff] }
 0x6bb   : > { %11363 = vmatpush3.bf16.msra.mxu0 %v11362_v2  ;;  %11333 = vmatprep.subr.bf16.mxu1 %v11332_v63  ;;  %v11412_v2 = vpack.c.bf16 %v7996_v19, %v7995_v42  ;;  %v7980_v63 = vld [vmem:[%s16550_s9 + $0x1138] sm:$0xff] }
 0x6bc   : > { %11365 = vmatprep.subr.bf16.mxu0 %v11364_v6  ;;  %v7998_v6 = vld [vmem:[%s16550_s9 + $0x11c8] sm:$0xff]  ;;  %v11414_v8 = vpack.c.bf16 %v7980_v63, %v7979_v9  ;;  %v7988_v9 = vld [vmem:[%s16550_s9 + $0x1178] sm:$0xff] }
 0x6bd   : > { %v8022_v63 = vld [vmem:[%s16550_s9 + $0x1288] sm:$0xff] }
 0x6be   : > { %11335 = vmatpush3.bf16.msra.mxu1 %v11334_v14  ;;  %v7981_v14 = vld [vmem:[%s16550_s9 + $0x1140] sm:$0xff] }
 0x6bf   : > { %11367 = vmatpush3.bf16.msra.mxu0 %v11366_v15  ;;  %11369 = vmatprep.subr.bf16.mxu1 %v11368_v18  ;;  %v11416_v15 = vpack.c.bf16 %v7998_v6, %v7997_v16  ;;  %v7982_v18 = vld [vmem:[%s16550_s9 + $0x1148] sm:$0xff] }
 0x6c0   : > { %11401 = vmatprep.subr.bf16.mxu0 %v11400_v20  ;;  %v7999_v20 = vld [vmem:[%s16550_s9 + $0x11d0] sm:$0xff]  ;;  %v11418_v22 = vpack.c.bf16 %v7982_v18, %v7981_v14  ;;  %v8038_v14 = vld [vmem:[%s16550_s9 + $0x1308] sm:$0xff]  ;;  %v8024_v18 = vld [vmem:[%s16550_s9 + $0x1298] sm:$0xff] }
 0x6c1   : > { %5319 = vmatmul.mubr.f32.vlgmr.msra.gmra.mrb[30].mxu1 %v5237_v33  ;;  %v11420_v33 = vpack.c.bf16 %v8000_v31, %v7999_v20  ;;  %v8055_v20 = vld [vmem:[%s16550_s9 + $0x1390] sm:$0xff]  ;;  %v8056_v31 = vld [vmem:[%s16550_s9 + $0x1398] sm:$0xff] }
 0x6c2   : > { %5389 = vmatmul.mubr.f32.vlgmr.msra.gmra.mrb[26].mxu0 %v5245_v36  ;;  %11371 = vmatpush3.bf16.msra.mxu1 %v11370_v23  ;;  %v7951_v23 = vld [vmem:[%s16550_s9 + $0x1050] sm:$0xff]  ;;  %v8002_v36 = vld [vmem:[%s16550_s9 + $0x11e8] sm:$0xff] }
 0x6c3   : > { %5547 = vmatprep.mubr.f32.mxu1 %v5470_v30  ;;  %11403 = vmatpush3.bf16.msra.mxu0 %v11402_v34  ;;  %v7984_v34 = vld [vmem:[%s16550_s9 + $0x1158] sm:$0xff]  ;;  %v7954_v30 = vld [vmem:[%s16550_s9 + $0x1068] sm:$0xff] }
 0x6c4   : > { %5617 = vmatprep.mubr.f32.mxu0 %v5478_v27  ;;  %11373 = vmatprep.subr.bf16.mxu1 %v11372_v38  ;;  %v11390_v38 = vpack.c.bf16 %v7952_v26, %v7951_v23  ;;  %v11422_v39 = vpack.c.bf16 %v7984_v34, %v7983_v28  ;;  %v11424_v27 = vpack.c.bf16 %v8002_v36, %v8001_v60  ;;  %v8008_v23 = vld [vmem:[%s16550_s9 + $0x1218] sm:$0xff]  ;;  %v8039_v26 = vld [vmem:[%s16550_s9 + $0x1310] sm:$0xff] }
 0x6c5   : > { %11405 = vmatprep.subr.bf16.mxu0 %v11404_v45  ;;  %v7985_v45 = vld [vmem:[%s16550_s9 + $0x1160] sm:$0xff]  ;;  %v11394_v61 = vpack.c.bf16 %v7954_v30, %v7953_v43  ;;  %v5474_v28 = vrot.slane %v14875_v25, %v13138_v53  ;;  %v8040_v34 = vld [vmem:[%s16550_s9 + $0x1318] sm:$0xff]  ;;  %v5699_v60 = vrot.slane %v15080_v17, %v12946_v5  ;;  %v11468_v36 = vpack.c.bf16 %v8056_v31, %v8055_v20  ;;  %v8047_v31 = vld [vmem:[%s16550_s9 + $0x1350] sm:$0xff] }
 0x6c6   : > { %11375 = vmatpush3.bf16.msra.mxu1 %v11374_v48  ;;  %v7986_v48 = vld [vmem:[%s16550_s9 + $0x1168] sm:$0xff]  ;;  %v11470_v43 = vpack.c.bf16 %v8040_v34, %v8039_v26  ;;  %v11440_v30 = vpack.c.bf16 %v8026_v11, %v8025_v44  ;;  %v8016_v20 = vld [vmem:[%s16550_s9 + $0x1258] sm:$0xff]  ;;  %v8065_v26 = vld [vmem:[%s16550_s9 + $0x13e0] sm:$0xff] }
 0x6c7   : > { %11407 = vmatpush3.bf16.msra.mxu0 %v11406_v49  ;;  %11377 = vmatprep.subr.bf16.mxu1 %v11376_v52  ;;  %v7971_v49 = vld [vmem:[%s16550_s9 + $0x10f0] sm:$0xff]  ;;  %v7972_v52 = vld [vmem:[%s16550_s9 + $0x10f8] sm:$0xff]  ;;  %v11426_v42 = vpack.c.bf16 %v7986_v48, %v7985_v45  ;;  %v8009_v45 = vld [vmem:[%s16550_s9 + $0x1220] sm:$0xff] }
 0x6c8   : > { %11409 = vmatprep.subr.bf16.mxu0 %v11408_v24  ;;  %v8004_v24 = vld [vmem:[%s16550_s9 + $0x11f8] sm:$0xff]  ;;  %v11396_v19 = vpack.c.bf16 %v7972_v52, %v7971_v49  ;;  %v8042_v48 = vld [vmem:[%s16550_s9 + $0x1328] sm:$0xff]  ;;  %v8027_v49 = vld [vmem:[%s16550_s9 + $0x12b0] sm:$0xff] }
 0x6c9   : > { %v11428_v51 = vpack.c.bf16 %v8004_v24, %v8003_v47  ;;  %v8028_v52 = vld [vmem:[%s16550_s9 + $0x12b8] sm:$0xff]  ;;  %v8017_v11 = vld [vmem:[%s16550_s9 + $0x1260] sm:$0xff] }
 0x6ca   : > { %11379 = vmatpush3.bf16.msra.mxu1 %v11378_v32  ;;  %v7955_v32 = vld [vmem:[%s16550_s9 + $0x1070] sm:$0xff] }
 0x6cb   : > { %11411 = vmatpush3.bf16.msra.mxu0 %v11410_v1  ;;  %11381 = vmatprep.subr.bf16.mxu1 %v11380_v62  ;;  %v7956_v1 = vld [vmem:[%s16550_s9 + $0x1078] sm:$0xff]  ;;  %v7987_v62 = vld [vmem:[%s16550_s9 + $0x1170] sm:$0xff] }
 0x6cc   : > { %11413 = vmatprep.subr.bf16.mxu0 %v11412_v2  ;;  %v8021_v2 = vld [vmem:[%s16550_s9 + $0x1280] sm:$0xff]  ;;  %v11398_v16 = vpack.c.bf16 %v7956_v1, %v7955_v32  ;;  %v11430_v6 = vpack.c.bf16 %v7988_v9, %v7987_v62  ;;  %v8044_v32 = vld [vmem:[%s16550_s9 + $0x1338] sm:$0xff]  ;;  %v8030_v62 = vld [vmem:[%s16550_s9 + $0x12c8] sm:$0xff] }
 0x6cd   : > { %v8029_v1 = vld [vmem:[%s16550_s9 + $0x12c0] sm:$0xff] }
 0x6ce   : > { %11383 = vmatpush3.bf16.msra.mxu1 %v11382_v7  ;;  %v11432_v7 = vpack.c.bf16 %v8022_v63, %v8021_v2  ;;  %v11448_v63 = vpack.c.bf16 %v8030_v62, %v8029_v1  ;;  %v8117_v1 = vld [vmem:[%s16550_s9 + $0x1580] sm:$0xff]  ;;  %v8118_v62 = vld [vmem:[%s16550_s9 + $0x1588] sm:$0xff] }
 0x6cf   : > { %11415 = vmatpush3.bf16.msra.mxu0 %v11414_v8  ;;  %11385 = vmatprep.subr.bf16.mxu1 %v11384_v10  ;;  %v8005_v8 = vld [vmem:[%s16550_s9 + $0x1200] sm:$0xff]  ;;  %v8006_v10 = vld [vmem:[%s16550_s9 + $0x1208] sm:$0xff] }
 0x6d0   : > { %11417 = vmatprep.subr.bf16.mxu0 %v11416_v15  ;;  %v8023_v15 = vld [vmem:[%s16550_s9 + $0x1290] sm:$0xff]  ;;  %v11434_v40 = vpack.c.bf16 %v8006_v10, %v8005_v8  ;;  %v8032_v10 = vld [vmem:[%s16550_s9 + $0x12d8] sm:$0xff] }
 0x6d1   : > { %v8031_v8 = vld [vmem:[%s16550_s9 + $0x12d0] sm:$0xff] }
 0x6d2   : > { %11387 = vmatpush3.bf16.msra.mxu1 %v11386_v50  ;;  %v5466_v50 = vrot.slane %v14875_v25, %v12940_v3  ;;  %v8057_v25 = vld [vmem:[%s16550_s9 + $0x13a0] sm:$0xff] }
 0x6d3   : > { %11419 = vmatpush3.bf16.msra.mxu0 %v11418_v22  ;;  %11389 = vmatprep.subr.bf16.mxu1 %v11388_v21  ;;  %v11466_v22 = vpack.c.bf16 %v8038_v14, %v8037_v13  ;;  %v8007_v21 = vld [vmem:[%s16550_s9 + $0x1210] sm:$0xff]  ;;  %v8064_v13 = vld [vmem:[%s16550_s9 + $0x13d8] sm:$0xff] }
 0x6d4   : > { %v8558_v37 = vpop.f32.mrb[18].mxu1  ;;  %v8593_v46 = vpop.f32.mrb[14].mxu0  ;;  %11421 = vmatprep.subr.bf16.mxu0 %v11420_v33  ;;  %v11436_v33 = vpack.c.bf16 %v8024_v18, %v8023_v15  ;;  %v11452_v18 = vpack.c.bf16 %v8032_v10, %v8031_v8  ;;  %v15285_v10 = vld [vmem:[#allocation2 + $0x22] ss:$8 sm:$0xf] }
 0x6d5   : > { %v8559_v54 = vpop.f32.mrb[19].mxu1  ;;  %v8594_v55 = vpop.f32.mrb[15].mxu0 }
 0x6d6   : > { %v8560_v58 = vadd.f32 %v8559_v54, %v8558_v37  ;;  %v8595_v35 = vadd.f32 %v8594_v55, %v8593_v46  ;;  %11391 = vmatpush3.bf16.msra.mxu1 %v11390_v38  ;;  %v8058_v38 = vld [vmem:[%s16550_s9 + $0x13a8] sm:$0xff]  ;;  %v8041_v46 = vld [vmem:[%s16550_s9 + $0x1320] sm:$0xff]  ;;  %v8059_v54 = vld [vmem:[%s16550_s9 + $0x13b0] sm:$0xff] }
 0x6d7   : > { %11423 = vmatpush3.bf16.msra.mxu0 %v11422_v39  ;;  %11393 = vmatprep.subr.bf16.mxu1 %v11392_v41  ;;  %v5707_v39 = vrot.slane %v15080_v17, %v13141_v57  ;;  %v11438_v41 = vpack.c.bf16 %v8008_v23, %v8007_v21  ;;  %v8010_v37 = vld [vmem:[%s16550_s9 + $0x1228] sm:$0xff]  ;;  %v8060_v55 = vld [vmem:[%s16550_s9 + $0x13b8] sm:$0xff]  ;;  %v11474_v24 = vpack.c.bf16 %v8042_v48, %v8041_v46  ;;  %v8033_v21 = vld [vmem:[%s16550_s9 + $0x12e0] sm:$0xff] }
 0x6d8   : > { %v3948_v29 = vadd.f32 %v8560_v58, %v14840_v4  ;;  %11425 = vmatprep.subr.bf16.mxu0 %v11424_v27  ;;  %v8054_v4 = vld [vmem:[%s16550_s9 + $0x1388] sm:$0xff]  ;;  %v11472_v27 = vpack.c.bf16 %v8058_v38, %v8057_v25  ;;  %v11442_v47 = vpack.c.bf16 %v8010_v37, %v8009_v45  ;;  %v11444_v58 = vpack.c.bf16 %v8028_v52, %v8027_v49  ;;  %v8067_v37 = vld [vmem:[%s16550_s9 + $0x13f0] sm:$0xff]  ;;  %v8068_v46 = vld [vmem:[%s16550_s9 + $0x13f8] sm:$0xff] }
 0x6d9   : > { %v11464_v12 = vpack.c.bf16 %v8054_v4, %v8053_v56  ;;  %v8013_v56 = vld [vmem:[%s16550_s9 + $0x1240] sm:$0xff]  ;;  %v8014_v4 = vld [vmem:[%s16550_s9 + $0x1248] sm:$0xff] }
 0x6da   : > { %v15060_v0 = vadd.f32 %v8595_v35, %v3948_v29  ;;  %11395 = vmatpush3.bf16.msra.mxu1 %v11394_v61  ;;  %v8011_v35 = vld [vmem:[%s16550_s9 + $0x1230] sm:$0xff]  ;;  %v8012_v61 = vld [vmem:[%s16550_s9 + $0x1238] sm:$0xff]  ;;  %v8061_v29 = vld [vmem:[%s16550_s9 + $0x13c0] sm:$0xff]  ;;  %v11450_v14 = vpack.c.bf16 %v8014_v4, %v8013_v56  ;;  %v11528_v4 = vpack.c.bf16 %v8118_v62, %v8117_v1 }
 0x6db   : > { %11427 = vmatpush3.bf16.msra.mxu0 %v11426_v42  ;;  %11397 = vmatprep.subr.bf16.mxu1 %v11396_v19  ;;  %v8043_v42 = vld [vmem:[%s16550_s9 + $0x1330] sm:$0xff]  ;;  %v11476_v19 = vpack.c.bf16 %v8060_v55, %v8059_v54  ;;  %v11446_v9 = vpack.c.bf16 %v8012_v61, %v8011_v35  ;;  %v8034_v23 = vld [vmem:[%s16550_s9 + $0x12e8] sm:$0xff]  ;;  %v11492_v35 = vpack.c.bf16 %v8068_v46, %v8067_v37  ;;  %v8052_v61 = vld [vmem:[%s16550_s9 + $0x1378] sm:$0xff] }
 0x6dc   : > { %11429 = vmatprep.subr.bf16.mxu0 %v11428_v51  ;;  %v8062_v51 = vld [vmem:[%s16550_s9 + $0x13c8] sm:$0xff]  ;;  %v11478_v2 = vpack.c.bf16 %v8044_v32, %v8043_v42  ;;  %v11456_v44 = vpack.c.bf16 %v8034_v23, %v8033_v21  ;;  %v8085_v42 = vld [vmem:[%s16550_s9 + $0x1480] sm:$0xff]  ;;  %v8124_v37 = vld [vmem:[%s16550_s9 + $0x15b8] sm:$0xff] }
 0x6dd   : > { %v8070_v56 = vld [vmem:[%s16550_s9 + $0x1408] sm:$0xff]  ;;  %v8089_v21 = vld [vmem:[%s16550_s9 + $0x14a0] sm:$0xff] }
 0x6de   : > { %11399 = vmatpush3.bf16.msra.mxu1 %v11398_v16  ;;  %v8045_v16 = vld [vmem:[%s16550_s9 + $0x1340] sm:$0xff]  ;;  %v8090_v23 = vld [vmem:[%s16550_s9 + $0x14a8] sm:$0xff] }
 0x6df   : > { %11431 = vmatpush3.bf16.msra.mxu0 %v11430_v6  ;;  %11433 = vmatprep.subr.bf16.mxu1 %v11432_v7  ;;  %v11480_v6 = vpack.c.bf16 %v8062_v51, %v8061_v29  ;;  %v8046_v7 = vld [vmem:[%s16550_s9 + $0x1348] sm:$0xff]  ;;  %v8077_v1 = vld [vmem:[%s16550_s9 + $0x1440] sm:$0xff] }
 0x6e0   : > { %11465 = vmatprep.subr.bf16.mxu0 %v11464_v12  ;;  %v8063_v12 = vld [vmem:[%s16550_s9 + $0x13d0] sm:$0xff]  ;;  %v11482_v15 = vpack.c.bf16 %v8046_v7, %v8045_v16  ;;  %v8101_v16 = vld [vmem:[%s16550_s9 + $0x1500] sm:$0xff]  ;;  %v8088_v7 = vld [vmem:[%s16550_s9 + $0x1498] sm:$0xff] }
 0x6e1   : > { %5548 = vmatmul.mubr.f32.vlgmr.msra.gmra.mrb[32].mxu1 %v5466_v50  ;;  %v11484_v50 = vpack.c.bf16 %v8064_v13, %v8063_v12  ;;  %v8119_v12 = vld [vmem:[%s16550_s9 + $0x1590] sm:$0xff]  ;;  %v8120_v13 = vld [vmem:[%s16550_s9 + $0x1598] sm:$0xff]  ;;  %v8078_v62 = vld [vmem:[%s16550_s9 + $0x1448] sm:$0xff] }
 0x6e2   : > { %5618 = vmatmul.mubr.f32.vlgmr.msra.gmra.mrb[28].mxu0 %v5474_v28  ;;  %11435 = vmatpush3.bf16.msra.mxu1 %v11434_v40  ;;  %v8015_v40 = vld [vmem:[%s16550_s9 + $0x1250] sm:$0xff]  ;;  %v8066_v28 = vld [vmem:[%s16550_s9 + $0x13e8] sm:$0xff] }
 0x6e3   : > { %5776 = vmatprep.mubr.f32.mxu1 %v5699_v60  ;;  %11467 = vmatpush3.bf16.msra.mxu0 %v11466_v22  ;;  %v8048_v22 = vld [vmem:[%s16550_s9 + $0x1358] sm:$0xff]  ;;  %v8018_v60 = vld [vmem:[%s16550_s9 + $0x1268] sm:$0xff]  ;;  %v11488_v38 = vpack.c.bf16 %v8066_v28, %v8065_v26  ;;  %v5928_v26 = vrot.slane %v15285_v10, %v12946_v5  ;;  %v11532_v28 = vpack.c.bf16 %v8120_v13, %v8119_v12  ;;  %v8111_v13 = vld [vmem:[%s16550_s9 + $0x1550] sm:$0xff] }
 0x6e4   : > { %5846 = vmatprep.mubr.f32.mxu0 %v5707_v39  ;;  %11437 = vmatprep.subr.bf16.mxu1 %v11436_v33  ;;  %v11454_v33 = vpack.c.bf16 %v8016_v20, %v8015_v40  ;;  %v11486_v34 = vpack.c.bf16 %v8048_v22, %v8047_v31  ;;  %v8050_v39 = vld [vmem:[%s16550_s9 + $0x1368] sm:$0xff]  ;;  %v11458_v49 = vpack.c.bf16 %v8018_v60, %v8017_v11  ;;  %v8072_v40 = vld [vmem:[%s16550_s9 + $0x1418] sm:$0xff]  ;;  %v8103_v20 = vld [vmem:[%s16550_s9 + $0x1510] sm:$0xff] }
 0x6e5   : > { %11469 = vmatprep.subr.bf16.mxu0 %v11468_v36  ;;  %v8049_v36 = vld [vmem:[%s16550_s9 + $0x1360] sm:$0xff]  ;;  %v5703_v31 = vrot.slane %v15080_v17, %v13138_v53  ;;  %v8104_v22 = vld [vmem:[%s16550_s9 + $0x1518] sm:$0xff]  ;;  %v11504_v60 = vpack.c.bf16 %v8090_v23, %v8089_v21 }
 0x6e6   : > { %11439 = vmatpush3.bf16.msra.mxu1 %v11438_v41  ;;  %v8035_v41 = vld [vmem:[%s16550_s9 + $0x12f0] sm:$0xff]  ;;  %v11490_v54 = vpack.c.bf16 %v8050_v39, %v8049_v36  ;;  %v11534_v11 = vpack.c.bf16 %v8104_v22, %v8103_v20  ;;  %v8073_v36 = vld [vmem:[%s16550_s9 + $0x1420] sm:$0xff]  ;;  %v8080_v12 = vld [vmem:[%s16550_s9 + $0x1458] sm:$0xff] }
 0x6e7   : > { %11471 = vmatpush3.bf16.msra.mxu0 %v11470_v43  ;;  %11441 = vmatprep.subr.bf16.mxu1 %v11440_v30  ;;  %v8036_v43 = vld [vmem:[%s16550_s9 + $0x12f8] sm:$0xff]  ;;  %v8129_v20 = vld [vmem:[%s16550_s9 + $0x15e0] sm:$0xff] }
 0x6e8   : > { %11473 = vmatprep.subr.bf16.mxu0 %v11472_v27  ;;  %v11460_v55 = vpack.c.bf16 %v8036_v43, %v8035_v41  ;;  %v8106_v41 = vld [vmem:[%s16550_s9 + $0x1528] sm:$0xff]  ;;  %v8091_v43 = vld [vmem:[%s16550_s9 + $0x14b0] sm:$0xff]  ;;  %v8081_v23 = vld [vmem:[%s16550_s9 + $0x1460] sm:$0xff] }
 0x6ea   : > { %11443 = vmatpush3.bf16.msra.mxu1 %v11442_v47  ;;  %v8019_v47 = vld [vmem:[%s16550_s9 + $0x1270] sm:$0xff] }
 0x6eb   : > { %11475 = vmatpush3.bf16.msra.mxu0 %v11474_v24  ;;  %11445 = vmatprep.subr.bf16.mxu1 %v11444_v58  ;;  %v8020_v24 = vld [vmem:[%s16550_s9 + $0x1278] sm:$0xff]  ;;  %v8051_v58 = vld [vmem:[%s16550_s9 + $0x1370] sm:$0xff] }
 0x6ec   : > { %11477 = vmatprep.subr.bf16.mxu0 %v11476_v19  ;;  %v8086_v19 = vld [vmem:[%s16550_s9 + $0x1488] sm:$0xff]  ;;  %v11462_v29 = vpack.c.bf16 %v8020_v24, %v8019_v47  ;;  %v8108_v47 = vld [vmem:[%s16550_s9 + $0x1538] sm:$0xff]  ;;  %v8093_v24 = vld [vmem:[%s16550_s9 + $0x14c0] sm:$0xff] }
 0x6ee   : > { %11447 = vmatpush3.bf16.msra.mxu1 %v11446_v9  ;;  %v11494_v9 = vpack.c.bf16 %v8052_v61, %v8051_v58  ;;  %v8094_v58 = vld [vmem:[%s16550_s9 + $0x14c8] sm:$0xff] }
 0x6ef   : > { %11479 = vmatpush3.bf16.msra.mxu0 %v11478_v2  ;;  %11449 = vmatprep.subr.bf16.mxu1 %v11448_v63  ;;  %v11496_v2 = vpack.c.bf16 %v8086_v19, %v8085_v42  ;;  %v8069_v63 = vld [vmem:[%s16550_s9 + $0x1400] sm:$0xff]  ;;  %v8126_v61 = vld [vmem:[%s16550_s9 + $0x15c8] sm:$0xff] }
 0x6f0   : > { %11481 = vmatprep.subr.bf16.mxu0 %v11480_v6  ;;  %v8087_v6 = vld [vmem:[%s16550_s9 + $0x1490] sm:$0xff]  ;;  %v11498_v8 = vpack.c.bf16 %v8070_v56, %v8069_v63  ;;  %v8096_v56 = vld [vmem:[%s16550_s9 + $0x14d8] sm:$0xff] }
 0x6f1   : > { %v8095_v63 = vld [vmem:[%s16550_s9 + $0x14d0] sm:$0xff] }
 0x6f2   : > { %11451 = vmatpush3.bf16.msra.mxu1 %v11450_v14  ;;  %v5695_v14 = vrot.slane %v15080_v17, %v12940_v3  ;;  %v8121_v17 = vld [vmem:[%s16550_s9 + $0x15a0] sm:$0xff] }
 0x6f3   : > { %11483 = vmatpush3.bf16.msra.mxu0 %v11482_v15  ;;  %11453 = vmatprep.subr.bf16.mxu1 %v11452_v18  ;;  %v8071_v18 = vld [vmem:[%s16550_s9 + $0x1410] sm:$0xff] }
 0x6f4   : > { %v8628_v25 = vpop.f32.mrb[20].mxu1  ;;  %11485 = vmatprep.subr.bf16.mxu0 %v11484_v50  ;;  %v11500_v50 = vpack.c.bf16 %v8088_v7, %v8087_v6  ;;  %v11516_v7 = vpack.c.bf16 %v8096_v56, %v8095_v63  ;;  %v15490_v56 = vld [vmem:[#allocation2 + $0x23] ss:$8 sm:$0xf] }
 0x6f5   : > { %v8663_v30 = vpop.f32.mrb[16].mxu0  ;;  %v8629_v45 = vpop.f32.mrb[21].mxu1 }
 0x6f6   : > { %v8630_v27 = vadd.f32 %v8629_v45, %v8628_v25  ;;  %v8664_v48 = vpop.f32.mrb[17].mxu0  ;;  %11455 = vmatpush3.bf16.msra.mxu1 %v11454_v33  ;;  %v8122_v33 = vld [vmem:[%s16550_s9 + $0x15a8] sm:$0xff]  ;;  %v8123_v45 = vld [vmem:[%s16550_s9 + $0x15b0] sm:$0xff] }
 0x6f7   : > { %v8665_v52 = vadd.f32 %v8664_v48, %v8663_v30  ;;  %11487 = vmatpush3.bf16.msra.mxu0 %v11486_v34  ;;  %11457 = vmatprep.subr.bf16.mxu1 %v11456_v44  ;;  %v5936_v34 = vrot.slane %v15285_v10, %v13141_v57  ;;  %v11502_v44 = vpack.c.bf16 %v8072_v40, %v8071_v18  ;;  %v8074_v25 = vld [vmem:[%s16550_s9 + $0x1428] sm:$0xff]  ;;  %v8092_v30 = vld [vmem:[%s16550_s9 + $0x14b8] sm:$0xff]  ;;  %v8097_v18 = vld [vmem:[%s16550_s9 + $0x14e0] sm:$0xff] }
 0x6f8   : > { %11489 = vmatprep.subr.bf16.mxu0 %v11488_v38  ;;  %v8105_v38 = vld [vmem:[%s16550_s9 + $0x1520] sm:$0xff]  ;;  %v11536_v39 = vpack.c.bf16 %v8122_v33, %v8121_v17  ;;  %v11506_v46 = vpack.c.bf16 %v8074_v25, %v8073_v36  ;;  %v11508_v48 = vpack.c.bf16 %v8092_v30, %v8091_v43  ;;  %v8098_v40 = vld [vmem:[%s16550_s9 + $0x14e8] sm:$0xff]  ;;  %v8131_v25 = vld [vmem:[%s16550_s9 + $0x15f0] sm:$0xff] }
 0x6f9   : > { %v4246_v32 = vadd.f32 %v8665_v52, %v8630_v27  ;;  %v11538_v27 = vpack.c.bf16 %v8106_v41, %v8105_v38  ;;  %v8076_v52 = vld [vmem:[%s16550_s9 + $0x1438] sm:$0xff]  ;;  %v11520_v21 = vpack.c.bf16 %v8098_v40, %v8097_v18  ;;  %v8153_v18 = vld [vmem:[%s16550_s9 + $0x16a0] sm:$0xff]  ;;  %v8154_v40 = vld [vmem:[%s16550_s9 + $0x16a8] sm:$0xff] }
 0x6fa   : > { %11459 = vmatpush3.bf16.msra.mxu1 %v11458_v49  ;;  %v8075_v49 = vld [vmem:[%s16550_s9 + $0x1430] sm:$0xff]  ;;  %v8132_v38 = vld [vmem:[%s16550_s9 + $0x15f8] sm:$0xff] }
 0x6fb   : > { %v15265_v51 = vadd.f32 %v4246_v32, %v15060_v0  ;;  %11491 = vmatpush3.bf16.msra.mxu0 %v11490_v54  ;;  %11461 = vmatprep.subr.bf16.mxu1 %v11460_v55  ;;  %v8102_v0 = vld [vmem:[%s16550_s9 + $0x1508] sm:$0xff]  ;;  %v8107_v54 = vld [vmem:[%s16550_s9 + $0x1530] sm:$0xff]  ;;  %v11540_v55 = vpack.c.bf16 %v8124_v37, %v8123_v45  ;;  %v11510_v42 = vpack.c.bf16 %v8076_v52, %v8075_v49  ;;  %v8116_v52 = vld [vmem:[%s16550_s9 + $0x1578] sm:$0xff] }
 0x6fc   : > { %11493 = vmatprep.subr.bf16.mxu0 %v11492_v35  ;;  %v11530_v15 = vpack.c.bf16 %v8102_v0, %v8101_v16  ;;  %v8125_v35 = vld [vmem:[%s16550_s9 + $0x15c0] sm:$0xff]  ;;  %v11542_v19 = vpack.c.bf16 %v8108_v47, %v8107_v54  ;;  %v11512_v32 = vpack.c.bf16 %v8094_v58, %v8093_v24  ;;  %v8128_v16 = vld [vmem:[%s16550_s9 + $0x15d8] sm:$0xff]  ;;  %v11514_v0 = vpack.c.bf16 %v8078_v62, %v8077_v1  ;;  %v8182_v58 = vld [vmem:[%s16550_s9 + $0x1788] sm:$0xff] }
 0x6fd   : > { %v11556_v49 = vpack.c.bf16 %v8132_v38, %v8131_v25  ;;  %v8149_v54 = vld [vmem:[%s16550_s9 + $0x1680] sm:$0xff]  ;;  %v8134_v1 = vld [vmem:[%s16550_s9 + $0x1608] sm:$0xff]  ;;  %v8188_v25 = vld [vmem:[%s16550_s9 + $0x17b8] sm:$0xff] }
 0x6fe   : > { %11463 = vmatpush3.bf16.msra.mxu1 %v11462_v29  ;;  %v8109_v29 = vld [vmem:[%s16550_s9 + $0x1540] sm:$0xff] }
 0x6ff   : > { %11495 = vmatpush3.bf16.msra.mxu0 %v11494_v9  ;;  %11497 = vmatprep.subr.bf16.mxu1 %v11496_v2  ;;  %v11544_v9 = vpack.c.bf16 %v8126_v61, %v8125_v35  ;;  %v8110_v2 = vld [vmem:[%s16550_s9 + $0x1548] sm:$0xff]  ;;  %v8181_v24 = vld [vmem:[%s16550_s9 + $0x1780] sm:$0xff] }
 0x700   : > { %11529 = vmatprep.subr.bf16.mxu0 %v11528_v4  ;;  %v8127_v4 = vld [vmem:[%s16550_s9 + $0x15d0] sm:$0xff]  ;;  %v11546_v6 = vpack.c.bf16 %v8110_v2, %v8109_v29  ;;  %v11592_v62 = vpack.c.bf16 %v8182_v58, %v8181_v24  ;;  %v8165_v29 = vld [vmem:[%s16550_s9 + $0x1700] sm:$0xff]  ;;  %v8152_v2 = vld [vmem:[%s16550_s9 + $0x1698] sm:$0xff] }
 0x701   : > { %5777 = vmatmul.mubr.f32.vlgmr.msra.gmra.mrb[34].mxu1 %v5695_v14  ;;  %v11548_v14 = vpack.c.bf16 %v8128_v16, %v8127_v4  ;;  %v8183_v4 = vld [vmem:[%s16550_s9 + $0x1790] sm:$0xff]  ;;  %v8184_v16 = vld [vmem:[%s16550_s9 + $0x1798] sm:$0xff]  ;;  %v8141_v24 = vld [vmem:[%s16550_s9 + $0x1640] sm:$0xff] }
 0x702   : > { %5847 = vmatmul.mubr.f32.vlgmr.msra.gmra.mrb[30].mxu0 %v5703_v31  ;;  %11499 = vmatpush3.bf16.msra.mxu1 %v11498_v8  ;;  %v8079_v8 = vld [vmem:[%s16550_s9 + $0x1450] sm:$0xff]  ;;  %v8130_v31 = vld [vmem:[%s16550_s9 + $0x15e8] sm:$0xff] }
 0x703   : > { %6005 = vmatprep.mubr.f32.mxu1 %v5928_v26  ;;  %11531 = vmatpush3.bf16.msra.mxu0 %v11530_v15  ;;  %v8112_v15 = vld [vmem:[%s16550_s9 + $0x1558] sm:$0xff]  ;;  %v8082_v26 = vld [vmem:[%s16550_s9 + $0x1468] sm:$0xff]  ;;  %v11552_v33 = vpack.c.bf16 %v8130_v31, %v8129_v20  ;;  %v6157_v20 = vrot.slane %v15490_v56, %v12946_v5  ;;  %v11596_v31 = vpack.c.bf16 %v8184_v16, %v8183_v4  ;;  %v8175_v16 = vld [vmem:[%s16550_s9 + $0x1750] sm:$0xff] }
 0x704   : > { %6075 = vmatprep.mubr.f32.mxu0 %v5936_v34  ;;  %11501 = vmatprep.subr.bf16.mxu1 %v11500_v50  ;;  %v11518_v50 = vpack.c.bf16 %v8080_v12, %v8079_v8  ;;  %v11550_v22 = vpack.c.bf16 %v8112_v15, %v8111_v13  ;;  %v8114_v34 = vld [vmem:[%s16550_s9 + $0x1568] sm:$0xff]  ;;  %v11522_v43 = vpack.c.bf16 %v8082_v26, %v8081_v23  ;;  %v8136_v8 = vld [vmem:[%s16550_s9 + $0x1618] sm:$0xff]  ;;  %v8167_v12 = vld [vmem:[%s16550_s9 + $0x1710] sm:$0xff] }
 0x705   : > { %11533 = vmatprep.subr.bf16.mxu0 %v11532_v28  ;;  %v8113_v28 = vld [vmem:[%s16550_s9 + $0x1560] sm:$0xff]  ;;  %v5932_v13 = vrot.slane %v15285_v10, %v13138_v53  ;;  %v8168_v15 = vld [vmem:[%s16550_s9 + $0x1718] sm:$0xff]  ;;  %v11568_v26 = vpack.c.bf16 %v8154_v40, %v8153_v18  ;;  %v8142_v58 = vld [vmem:[%s16550_s9 + $0x1648] sm:$0xff] }
 0x706   : > { %11503 = vmatpush3.bf16.msra.mxu1 %v11502_v44  ;;  %v8099_v44 = vld [vmem:[%s16550_s9 + $0x14f0] sm:$0xff]  ;;  %v11554_v45 = vpack.c.bf16 %v8114_v34, %v8113_v28  ;;  %v11598_v23 = vpack.c.bf16 %v8168_v15, %v8167_v12  ;;  %v8137_v28 = vld [vmem:[%s16550_s9 + $0x1620] sm:$0xff]  ;;  %v8144_v4 = vld [vmem:[%s16550_s9 + $0x1658] sm:$0xff] }
 0x707   : > { %11535 = vmatpush3.bf16.msra.mxu0 %v11534_v11  ;;  %11505 = vmatprep.subr.bf16.mxu1 %v11504_v60  ;;  %v8100_v11 = vld [vmem:[%s16550_s9 + $0x14f8] sm:$0xff]  ;;  %v8193_v12 = vld [vmem:[%s16550_s9 + $0x17e0] sm:$0xff] }
 0x708   : > { %11537 = vmatprep.subr.bf16.mxu0 %v11536_v39  ;;  %v11524_v37 = vpack.c.bf16 %v8100_v11, %v8099_v44  ;;  %v8170_v44 = vld [vmem:[%s16550_s9 + $0x1728] sm:$0xff]  ;;  %v8155_v11 = vld [vmem:[%s16550_s9 + $0x16b0] sm:$0xff]  ;;  %v8145_v40 = vld [vmem:[%s16550_s9 + $0x1660] sm:$0xff] }
 0x70a   : > { %11507 = vmatpush3.bf16.msra.mxu1 %v11506_v46  ;;  %v8083_v46 = vld [vmem:[%s16550_s9 + $0x1470] sm:$0xff] }
 0x70b   : > { %11539 = vmatpush3.bf16.msra.mxu0 %v11538_v27  ;;  %11509 = vmatprep.subr.bf16.mxu1 %v11508_v48  ;;  %v8084_v27 = vld [vmem:[%s16550_s9 + $0x1478] sm:$0xff]  ;;  %v8115_v48 = vld [vmem:[%s16550_s9 + $0x1570] sm:$0xff] }
 0x70c   : > { %11541 = vmatprep.subr.bf16.mxu0 %v11540_v55  ;;  %v8150_v55 = vld [vmem:[%s16550_s9 + $0x1688] sm:$0xff]  ;;  %v11526_v35 = vpack.c.bf16 %v8084_v27, %v8083_v46  ;;  %v8172_v46 = vld [vmem:[%s16550_s9 + $0x1738] sm:$0xff]  ;;  %v8157_v27 = vld [vmem:[%s16550_s9 + $0x16c0] sm:$0xff] }
 0x70e   : > { %11511 = vmatpush3.bf16.msra.mxu1 %v11510_v42  ;;  %v11558_v42 = vpack.c.bf16 %v8116_v52, %v8115_v48  ;;  %v8158_v48 = vld [vmem:[%s16550_s9 + $0x16c8] sm:$0xff] }
 0x70f   : > { %11543 = vmatpush3.bf16.msra.mxu0 %v11542_v19  ;;  %11513 = vmatprep.subr.bf16.mxu1 %v11512_v32  ;;  %v11560_v19 = vpack.c.bf16 %v8150_v55, %v8149_v54  ;;  %v8133_v32 = vld [vmem:[%s16550_s9 + $0x1600] sm:$0xff]  ;;  %v8190_v52 = vld [vmem:[%s16550_s9 + $0x17c8] sm:$0xff] }
 0x710   : > { %11545 = vmatprep.subr.bf16.mxu0 %v11544_v9  ;;  %v8151_v9 = vld [vmem:[%s16550_s9 + $0x1690] sm:$0xff]  ;;  %v11562_v63 = vpack.c.bf16 %v8134_v1, %v8133_v32  ;;  %v8160_v1 = vld [vmem:[%s16550_s9 + $0x16d8] sm:$0xff] }
 0x711   : > { %v8159_v32 = vld [vmem:[%s16550_s9 + $0x16d0] sm:$0xff] }
 0x712   : > { %11515 = vmatpush3.bf16.msra.mxu1 %v11514_v0  ;;  %v5924_v0 = vrot.slane %v15285_v10, %v12940_v3  ;;  %v8185_v10 = vld [vmem:[%s16550_s9 + $0x17a0] sm:$0xff] }
 0x713   : > { %11547 = vmatpush3.bf16.msra.mxu0 %v11546_v6  ;;  %11517 = vmatprep.subr.bf16.mxu1 %v11516_v7  ;;  %v8135_v7 = vld [vmem:[%s16550_s9 + $0x1610] sm:$0xff] }
 0x714   : > { %v8698_v17 = vpop.f32.mrb[22].mxu1  ;;  %11549 = vmatprep.subr.bf16.mxu0 %v11548_v14  ;;  %v11564_v14 = vpack.c.bf16 %v8152_v2, %v8151_v9  ;;  %v11580_v2 = vpack.c.bf16 %v8160_v1, %v8159_v32  ;;  %v15695_v1 = vld [vmem:[#allocation2 + $0x24] ss:$8 sm:$0xf] }
 0x715   : > { %v8733_v60 = vpop.f32.mrb[18].mxu0  ;;  %v8699_v36 = vpop.f32.mrb[23].mxu1 }
 0x716   : > { %v8700_v39 = vadd.f32 %v8699_v36, %v8698_v17  ;;  %v8734_v41 = vpop.f32.mrb[19].mxu0  ;;  %11519 = vmatpush3.bf16.msra.mxu1 %v11518_v50  ;;  %v8186_v50 = vld [vmem:[%s16550_s9 + $0x17a8] sm:$0xff]  ;;  %v8187_v36 = vld [vmem:[%s16550_s9 + $0x17b0] sm:$0xff] }
 0x717   : > { %v8735_v30 = vadd.f32 %v8734_v41, %v8733_v60  ;;  %11551 = vmatpush3.bf16.msra.mxu0 %v11550_v22  ;;  %11521 = vmatprep.subr.bf16.mxu1 %v11520_v21  ;;  %v6165_v22 = vrot.slane %v15490_v56, %v13141_v57  ;;  %v11566_v21 = vpack.c.bf16 %v8136_v8, %v8135_v7  ;;  %v8138_v17 = vld [vmem:[%s16550_s9 + $0x1628] sm:$0xff]  ;;  %v8156_v60 = vld [vmem:[%s16550_s9 + $0x16b8] sm:$0xff]  ;;  %v8161_v7 = vld [vmem:[%s16550_s9 + $0x16e0] sm:$0xff] }
 0x718   : > { %11553 = vmatprep.subr.bf16.mxu0 %v11552_v33  ;;  %v8169_v33 = vld [vmem:[%s16550_s9 + $0x1720] sm:$0xff]  ;;  %v11600_v34 = vpack.c.bf16 %v8186_v50, %v8185_v10  ;;  %v11570_v38 = vpack.c.bf16 %v8138_v17, %v8137_v28  ;;  %v11572_v41 = vpack.c.bf16 %v8156_v60, %v8155_v11  ;;  %v8162_v8 = vld [vmem:[%s16550_s9 + $0x16e8] sm:$0xff]  ;;  %v8195_v17 = vld [vmem:[%s16550_s9 + $0x17f0] sm:$0xff] }
 0x719   : > { %v4475_v47 = vadd.f32 %v8735_v30, %v8700_v39  ;;  %v11602_v39 = vpack.c.bf16 %v8170_v44, %v8169_v33  ;;  %v8140_v30 = vld [vmem:[%s16550_s9 + $0x1638] sm:$0xff]  ;;  %v11584_v18 = vpack.c.bf16 %v8162_v8, %v8161_v7  ;;  %v8217_v7 = vld [vmem:[%s16550_s9 + $0x18a0] sm:$0xff]  ;;  %v8218_v8 = vld [vmem:[%s16550_s9 + $0x18a8] sm:$0xff] }
 0x71a   : > { %11523 = vmatpush3.bf16.msra.mxu1 %v11522_v43  ;;  %v8139_v43 = vld [vmem:[%s16550_s9 + $0x1630] sm:$0xff]  ;;  %v8196_v33 = vld [vmem:[%s16550_s9 + $0x17f8] sm:$0xff] }
 0x71b   : > { %v15470_v61 = vadd.f32 %v4475_v47, %v15265_v51  ;;  %11555 = vmatpush3.bf16.msra.mxu0 %v11554_v45  ;;  %11525 = vmatprep.subr.bf16.mxu1 %v11524_v37  ;;  %v8166_v51 = vld [vmem:[%s16550_s9 + $0x1708] sm:$0xff]  ;;  %v8171_v45 = vld [vmem:[%s16550_s9 + $0x1730] sm:$0xff]  ;;  %v11604_v37 = vpack.c.bf16 %v8188_v25, %v8187_v36  ;;  %v11574_v54 = vpack.c.bf16 %v8140_v30, %v8139_v43  ;;  %v8180_v30 = vld [vmem:[%s16550_s9 + $0x1778] sm:$0xff] }
 0x71c   : > { %11557 = vmatprep.subr.bf16.mxu0 %v11556_v49  ;;  %v11594_v6 = vpack.c.bf16 %v8166_v51, %v8165_v29  ;;  %v8189_v49 = vld [vmem:[%s16550_s9 + $0x17c0] sm:$0xff]  ;;  %v11606_v55 = vpack.c.bf16 %v8172_v46, %v8171_v45  ;;  %v11576_v47 = vpack.c.bf16 %v8158_v48, %v8157_v27  ;;  %v8192_v29 = vld [vmem:[%s16550_s9 + $0x17d8] sm:$0xff]  ;;  %v11578_v51 = vpack.c.bf16 %v8142_v58, %v8141_v24  ;;  %v8246_v48 = vld [vmem:[%s16550_s9 + $0x1988] sm:$0xff] }
 0x71d   : > { %v11620_v43 = vpack.c.bf16 %v8196_v33, %v8195_v17  ;;  %v8213_v45 = vld [vmem:[%s16550_s9 + $0x1880] sm:$0xff]  ;;  %v8198_v24 = vld [vmem:[%s16550_s9 + $0x1808] sm:$0xff]  ;;  %v8252_v17 = vld [vmem:[%s16550_s9 + $0x19b8] sm:$0xff] }
 0x71e   : > { %11527 = vmatpush3.bf16.msra.mxu1 %v11526_v35  ;;  %v8173_v35 = vld [vmem:[%s16550_s9 + $0x1740] sm:$0xff] }
 0x71f   : > { %11559 = vmatpush3.bf16.msra.mxu0 %v11558_v42  ;;  %11561 = vmatprep.subr.bf16.mxu1 %v11560_v19  ;;  %v11608_v42 = vpack.c.bf16 %v8190_v52, %v8189_v49  ;;  %v8174_v19 = vld [vmem:[%s16550_s9 + $0x1748] sm:$0xff]  ;;  %v8245_v27 = vld [vmem:[%s16550_s9 + $0x1980] sm:$0xff] }
 0x720   : > { %11593 = vmatprep.subr.bf16.mxu0 %v11592_v62  ;;  %v8191_v62 = vld [vmem:[%s16550_s9 + $0x17d0] sm:$0xff]  ;;  %v11610_v9 = vpack.c.bf16 %v8174_v19, %v8173_v35  ;;  %v11656_v58 = vpack.c.bf16 %v8246_v48, %v8245_v27  ;;  %v8229_v35 = vld [vmem:[%s16550_s9 + $0x1900] sm:$0xff]  ;;  %v8216_v19 = vld [vmem:[%s16550_s9 + $0x1898] sm:$0xff] }
 0x721   : > { %6006 = vmatmul.mubr.f32.vlgmr.msra.gmra.mrb[36].mxu1 %v5924_v0  ;;  %v11612_v0 = vpack.c.bf16 %v8192_v29, %v8191_v62  ;;  %v8247_v62 = vld [vmem:[%s16550_s9 + $0x1990] sm:$0xff]  ;;  %v8248_v29 = vld [vmem:[%s16550_s9 + $0x1998] sm:$0xff]  ;;  %v8205_v27 = vld [vmem:[%s16550_s9 + $0x1840] sm:$0xff] }
 0x722   : > { %6076 = vmatmul.mubr.f32.vlgmr.msra.gmra.mrb[32].mxu0 %v5932_v13  ;;  %11563 = vmatpush3.bf16.msra.mxu1 %v11562_v63  ;;  %v8143_v63 = vld [vmem:[%s16550_s9 + $0x1650] sm:$0xff]  ;;  %v8194_v13 = vld [vmem:[%s16550_s9 + $0x17e8] sm:$0xff] }
 0x723   : > { %6234 = vmatprep.mubr.f32.mxu1 %v6157_v20  ;;  %11595 = vmatpush3.bf16.msra.mxu0 %v11594_v6  ;;  %v8176_v6 = vld [vmem:[%s16550_s9 + $0x1758] sm:$0xff]  ;;  %v8146_v20 = vld [vmem:[%s16550_s9 + $0x1668] sm:$0xff]  ;;  %v11616_v50 = vpack.c.bf16 %v8194_v13, %v8193_v12  ;;  %v6386_v12 = vrot.slane %v15695_v1, %v12946_v5  ;;  %v11660_v13 = vpack.c.bf16 %v8248_v29, %v8247_v62  ;;  %v8239_v29 = vld [vmem:[%s16550_s9 + $0x1950] sm:$0xff] }
 0x724   : > { %6304 = vmatprep.mubr.f32.mxu0 %v6165_v22  ;;  %11565 = vmatprep.subr.bf16.mxu1 %v11564_v14  ;;  %v11582_v14 = vpack.c.bf16 %v8144_v4, %v8143_v63  ;;  %v11614_v15 = vpack.c.bf16 %v8176_v6, %v8175_v16  ;;  %v8178_v22 = vld [vmem:[%s16550_s9 + $0x1768] sm:$0xff]  ;;  %v11586_v11 = vpack.c.bf16 %v8146_v20, %v8145_v40  ;;  %v8200_v63 = vld [vmem:[%s16550_s9 + $0x1818] sm:$0xff]  ;;  %v8231_v4 = vld [vmem:[%s16550_s9 + $0x1910] sm:$0xff] }
 0x725   : > { %11597 = vmatprep.subr.bf16.mxu0 %v11596_v31  ;;  %v8177_v31 = vld [vmem:[%s16550_s9 + $0x1760] sm:$0xff]  ;;  %v6161_v16 = vrot.slane %v15490_v56, %v13138_v53  ;;  %v8232_v6 = vld [vmem:[%s16550_s9 + $0x1918] sm:$0xff]  ;;  %v11632_v20 = vpack.c.bf16 %v8218_v8, %v8217_v7  ;;  %v8206_v48 = vld [vmem:[%s16550_s9 + $0x1848] sm:$0xff] }
 0x726   : > { %11567 = vmatpush3.bf16.msra.mxu1 %v11566_v21  ;;  %v8163_v21 = vld [vmem:[%s16550_s9 + $0x16f0] sm:$0xff]  ;;  %v11618_v36 = vpack.c.bf16 %v8178_v22, %v8177_v31  ;;  %v11662_v40 = vpack.c.bf16 %v8232_v6, %v8231_v4  ;;  %v8201_v31 = vld [vmem:[%s16550_s9 + $0x1820] sm:$0xff]  ;;  %v8208_v62 = vld [vmem:[%s16550_s9 + $0x1858] sm:$0xff] }
 0x727   : > { %11599 = vmatpush3.bf16.msra.mxu0 %v11598_v23  ;;  %11569 = vmatprep.subr.bf16.mxu1 %v11568_v26  ;;  %v8164_v23 = vld [vmem:[%s16550_s9 + $0x16f8] sm:$0xff]  ;;  %v8257_v4 = vld [vmem:[%s16550_s9 + $0x19e0] sm:$0xff] }
 0x728   : > { %11601 = vmatprep.subr.bf16.mxu0 %v11600_v34  ;;  %v11588_v25 = vpack.c.bf16 %v8164_v23, %v8163_v21  ;;  %v8234_v21 = vld [vmem:[%s16550_s9 + $0x1928] sm:$0xff]  ;;  %v8219_v23 = vld [vmem:[%s16550_s9 + $0x18b0] sm:$0xff]  ;;  %v8209_v8 = vld [vmem:[%s16550_s9 + $0x1860] sm:$0xff] }
 0x72a   : > { %11571 = vmatpush3.bf16.msra.mxu1 %v11570_v38  ;;  %v8147_v38 = vld [vmem:[%s16550_s9 + $0x1670] sm:$0xff] }
 0x72b   : > { %11603 = vmatpush3.bf16.msra.mxu0 %v11602_v39  ;;  %11573 = vmatprep.subr.bf16.mxu1 %v11572_v41  ;;  %v8148_v39 = vld [vmem:[%s16550_s9 + $0x1678] sm:$0xff]  ;;  %v8179_v41 = vld [vmem:[%s16550_s9 + $0x1770] sm:$0xff] }
 0x72c   : > { %11605 = vmatprep.subr.bf16.mxu0 %v11604_v37  ;;  %v8214_v37 = vld [vmem:[%s16550_s9 + $0x1888] sm:$0xff]  ;;  %v11590_v49 = vpack.c.bf16 %v8148_v39, %v8147_v38  ;;  %v8236_v38 = vld [vmem:[%s16550_s9 + $0x1938] sm:$0xff]  ;;  %v8221_v39 = vld [vmem:[%s16550_s9 + $0x18c0] sm:$0xff] }
 0x72e   : > { %11575 = vmatpush3.bf16.msra.mxu1 %v11574_v54  ;;  %v11622_v54 = vpack.c.bf16 %v8180_v30, %v8179_v41  ;;  %v8222_v41 = vld [vmem:[%s16550_s9 + $0x18c8] sm:$0xff] }
 0x72f   : > { %11607 = vmatpush3.bf16.msra.mxu0 %v11606_v55  ;;  %11577 = vmatprep.subr.bf16.mxu1 %v11576_v47  ;;  %v11624_v55 = vpack.c.bf16 %v8214_v37, %v8213_v45  ;;  %v8197_v47 = vld [vmem:[%s16550_s9 + $0x1800] sm:$0xff]  ;;  %v8254_v30 = vld [vmem:[%s16550_s9 + $0x19c8] sm:$0xff] }
 0x730   : > { %11609 = vmatprep.subr.bf16.mxu0 %v11608_v42  ;;  %v8215_v42 = vld [vmem:[%s16550_s9 + $0x1890] sm:$0xff]  ;;  %v11626_v32 = vpack.c.bf16 %v8198_v24, %v8197_v47  ;;  %v8224_v24 = vld [vmem:[%s16550_s9 + $0x18d8] sm:$0xff] }
 0x731   : > { %v8223_v47 = vld [vmem:[%s16550_s9 + $0x18d0] sm:$0xff] }
 0x732   : > { %11579 = vmatpush3.bf16.msra.mxu1 %v11578_v51  ;;  %v6153_v51 = vrot.slane %v15490_v56, %v12940_v3  ;;  %v8249_v56 = vld [vmem:[%s16550_s9 + $0x19a0] sm:$0xff] }
 0x733   : > { %11611 = vmatpush3.bf16.msra.mxu0 %v11610_v9  ;;  %11581 = vmatprep.subr.bf16.mxu1 %v11580_v2  ;;  %v8199_v2 = vld [vmem:[%s16550_s9 + $0x1810] sm:$0xff] }
 0x734   : > { %v8768_v10 = vpop.f32.mrb[24].mxu1  ;;  %11613 = vmatprep.subr.bf16.mxu0 %v11612_v0  ;;  %v11628_v0 = vpack.c.bf16 %v8216_v19, %v8215_v42  ;;  %v11644_v19 = vpack.c.bf16 %v8224_v24, %v8223_v47  ;;  %v15900_v24 = vld [vmem:[#allocation2 + $0x25] ss:$8 sm:$0xf] }
 0x735   : > { %v8803_v26 = vpop.f32.mrb[20].mxu0  ;;  %v8769_v28 = vpop.f32.mrb[25].mxu1 }
 0x736   : > { %v8770_v34 = vadd.f32 %v8769_v28, %v8768_v10  ;;  %v8804_v44 = vpop.f32.mrb[21].mxu0  ;;  %11583 = vmatpush3.bf16.msra.mxu1 %v11582_v14  ;;  %v8250_v14 = vld [vmem:[%s16550_s9 + $0x19a8] sm:$0xff]  ;;  %v8251_v28 = vld [vmem:[%s16550_s9 + $0x19b0] sm:$0xff] }
 0x737   : > { %v8805_v60 = vadd.f32 %v8804_v44, %v8803_v26  ;;  %11615 = vmatpush3.bf16.msra.mxu0 %v11614_v15  ;;  %11585 = vmatprep.subr.bf16.mxu1 %v11584_v18  ;;  %v6394_v15 = vrot.slane %v15695_v1, %v13141_v57  ;;  %v11630_v18 = vpack.c.bf16 %v8200_v63, %v8199_v2  ;;  %v8202_v10 = vld [vmem:[%s16550_s9 + $0x1828] sm:$0xff]  ;;  %v8220_v26 = vld [vmem:[%s16550_s9 + $0x18b8] sm:$0xff]  ;;  %v8225_v2 = vld [vmem:[%s16550_s9 + $0x18e0] sm:$0xff] }
 0x738   : > { %11617 = vmatprep.subr.bf16.mxu0 %v11616_v50  ;;  %v8233_v50 = vld [vmem:[%s16550_s9 + $0x1920] sm:$0xff]  ;;  %v11664_v22 = vpack.c.bf16 %v8250_v14, %v8249_v56  ;;  %v11634_v33 = vpack.c.bf16 %v8202_v10, %v8201_v31  ;;  %v11636_v44 = vpack.c.bf16 %v8220_v26, %v8219_v23  ;;  %v8226_v63 = vld [vmem:[%s16550_s9 + $0x18e8] sm:$0xff]  ;;  %v8259_v10 = vld [vmem:[%s16550_s9 + $0x19f0] sm:$0xff] }
 0x739   : > { %v4704_v46 = vadd.f32 %v8805_v60, %v8770_v34  ;;  %v11666_v34 = vpack.c.bf16 %v8234_v21, %v8233_v50  ;;  %v8204_v60 = vld [vmem:[%s16550_s9 + $0x1838] sm:$0xff]  ;;  %v11648_v7 = vpack.c.bf16 %v8226_v63, %v8225_v2  ;;  %v8281_v2 = vld [vmem:[%s16550_s9 + $0x1aa0] sm:$0xff]  ;;  %v8282_v63 = vld [vmem:[%s16550_s9 + $0x1aa8] sm:$0xff] }
 0x73a   : > { %11587 = vmatpush3.bf16.msra.mxu1 %v11586_v11  ;;  %v8203_v11 = vld [vmem:[%s16550_s9 + $0x1830] sm:$0xff]  ;;  %v8260_v50 = vld [vmem:[%s16550_s9 + $0x19f8] sm:$0xff] }
 0x73b   : > { %v15675_v52 = vadd.f32 %v4704_v46, %v15470_v61  ;;  %11619 = vmatpush3.bf16.msra.mxu0 %v11618_v36  ;;  %11589 = vmatprep.subr.bf16.mxu1 %v11588_v25  ;;  %v8230_v61 = vld [vmem:[%s16550_s9 + $0x1908] sm:$0xff]  ;;  %v8235_v36 = vld [vmem:[%s16550_s9 + $0x1930] sm:$0xff]  ;;  %v11668_v25 = vpack.c.bf16 %v8252_v17, %v8251_v28  ;;  %v11638_v45 = vpack.c.bf16 %v8204_v60, %v8203_v11  ;;  %v8244_v60 = vld [vmem:[%s16550_s9 + $0x1978] sm:$0xff] }
 0x73c   : > { %11621 = vmatprep.subr.bf16.mxu0 %v11620_v43  ;;  %v11658_v9 = vpack.c.bf16 %v8230_v61, %v8229_v35  ;;  %v8253_v43 = vld [vmem:[%s16550_s9 + $0x19c0] sm:$0xff]  ;;  %v11670_v37 = vpack.c.bf16 %v8236_v38, %v8235_v36  ;;  %v11640_v46 = vpack.c.bf16 %v8222_v41, %v8221_v39  ;;  %v8256_v35 = vld [vmem:[%s16550_s9 + $0x19d8] sm:$0xff]  ;;  %v11642_v61 = vpack.c.bf16 %v8206_v48, %v8205_v27  ;;  %v8310_v41 = vld [vmem:[%s16550_s9 + $0x1b88] sm:$0xff] }
 0x73d   : > { %v11684_v11 = vpack.c.bf16 %v8260_v50, %v8259_v10  ;;  %v8277_v36 = vld [vmem:[%s16550_s9 + $0x1a80] sm:$0xff]  ;;  %v8262_v27 = vld [vmem:[%s16550_s9 + $0x1a08] sm:$0xff]  ;;  %v8316_v10 = vld [vmem:[%s16550_s9 + $0x1bb8] sm:$0xff] }
 0x73e   : > { %11591 = vmatpush3.bf16.msra.mxu1 %v11590_v49  ;;  %v8237_v49 = vld [vmem:[%s16550_s9 + $0x1940] sm:$0xff] }
 0x73f   : > { %11623 = vmatpush3.bf16.msra.mxu0 %v11622_v54  ;;  %11625 = vmatprep.subr.bf16.mxu1 %v11624_v55  ;;  %v11672_v54 = vpack.c.bf16 %v8254_v30, %v8253_v43  ;;  %v8238_v55 = vld [vmem:[%s16550_s9 + $0x1948] sm:$0xff]  ;;  %v8309_v39 = vld [vmem:[%s16550_s9 + $0x1b80] sm:$0xff] }
 0x740   : > { %11657 = vmatprep.subr.bf16.mxu0 %v11656_v58  ;;  %v8255_v58 = vld [vmem:[%s16550_s9 + $0x19d0] sm:$0xff]  ;;  %v11674_v42 = vpack.c.bf16 %v8238_v55, %v8237_v49  ;;  %v11720_v48 = vpack.c.bf16 %v8310_v41, %v8309_v39  ;;  %v8293_v49 = vld [vmem:[%s16550_s9 + $0x1b00] sm:$0xff]  ;;  %v8280_v55 = vld [vmem:[%s16550_s9 + $0x1a98] sm:$0xff] }
 0x741   : > { %6235 = vmatmul.mubr.f32.vlgmr.msra.gmra.mrb[38].mxu1 %v6153_v51  ;;  %v11676_v51 = vpack.c.bf16 %v8256_v35, %v8255_v58  ;;  %v8311_v58 = vld [vmem:[%s16550_s9 + $0x1b90] sm:$0xff]  ;;  %v8312_v35 = vld [vmem:[%s16550_s9 + $0x1b98] sm:$0xff]  ;;  %v8269_v39 = vld [vmem:[%s16550_s9 + $0x1a40] sm:$0xff] }
 0x742   : > { %6305 = vmatmul.mubr.f32.vlgmr.msra.gmra.mrb[34].mxu0 %v6161_v16  ;;  %11627 = vmatpush3.bf16.msra.mxu1 %v11626_v32  ;;  %v8207_v32 = vld [vmem:[%s16550_s9 + $0x1850] sm:$0xff]  ;;  %v8258_v16 = vld [vmem:[%s16550_s9 + $0x19e8] sm:$0xff] }
 0x743   : > { %6463 = vmatprep.mubr.f32.mxu1 %v6386_v12  ;;  %11659 = vmatpush3.bf16.msra.mxu0 %v11658_v9  ;;  %v8240_v9 = vld [vmem:[%s16550_s9 + $0x1958] sm:$0xff]  ;;  %v8210_v12 = vld [vmem:[%s16550_s9 + $0x1868] sm:$0xff]  ;;  %v11680_v14 = vpack.c.bf16 %v8258_v16, %v8257_v4  ;;  %v6615_v4 = vrot.slane %v15900_v24, %v12946_v5  ;;  %v11724_v16 = vpack.c.bf16 %v8312_v35, %v8311_v58  ;;  %v8303_v35 = vld [vmem:[%s16550_s9 + $0x1b50] sm:$0xff] }
 0x744   : > { %6533 = vmatprep.mubr.f32.mxu0 %v6394_v15  ;;  %11629 = vmatprep.subr.bf16.mxu1 %v11628_v0  ;;  %v11646_v0 = vpack.c.bf16 %v8208_v62, %v8207_v32  ;;  %v11678_v6 = vpack.c.bf16 %v8240_v9, %v8239_v29  ;;  %v8242_v15 = vld [vmem:[%s16550_s9 + $0x1968] sm:$0xff]  ;;  %v11650_v23 = vpack.c.bf16 %v8210_v12, %v8209_v8  ;;  %v8264_v32 = vld [vmem:[%s16550_s9 + $0x1a18] sm:$0xff]  ;;  %v8295_v62 = vld [vmem:[%s16550_s9 + $0x1b10] sm:$0xff] }
 0x745   : > { %11661 = vmatprep.subr.bf16.mxu0 %v11660_v13  ;;  %v8241_v13 = vld [vmem:[%s16550_s9 + $0x1960] sm:$0xff]  ;;  %v6390_v29 = vrot.slane %v15695_v1, %v13138_v53  ;;  %v8296_v9 = vld [vmem:[%s16550_s9 + $0x1b18] sm:$0xff]  ;;  %v11696_v12 = vpack.c.bf16 %v8282_v63, %v8281_v2  ;;  %v8270_v41 = vld [vmem:[%s16550_s9 + $0x1a48] sm:$0xff] }
 0x746   : > { %11631 = vmatpush3.bf16.msra.mxu1 %v11630_v18  ;;  %v8227_v18 = vld [vmem:[%s16550_s9 + $0x18f0] sm:$0xff]  ;;  %v11682_v28 = vpack.c.bf16 %v8242_v15, %v8241_v13  ;;  %v11726_v8 = vpack.c.bf16 %v8296_v9, %v8295_v62  ;;  %v8265_v13 = vld [vmem:[%s16550_s9 + $0x1a20] sm:$0xff]  ;;  %v8272_v58 = vld [vmem:[%s16550_s9 + $0x1a58] sm:$0xff] }
 0x747   : > { %11663 = vmatpush3.bf16.msra.mxu0 %v11662_v40  ;;  %11633 = vmatprep.subr.bf16.mxu1 %v11632_v20  ;;  %v8228_v40 = vld [vmem:[%s16550_s9 + $0x18f8] sm:$0xff]  ;;  %v8321_v62 = vld [vmem:[%s16550_s9 + $0x1be0] sm:$0xff] }
 0x748   : > { %11665 = vmatprep.subr.bf16.mxu0 %v11664_v22  ;;  %v11652_v17 = vpack.c.bf16 %v8228_v40, %v8227_v18  ;;  %v8298_v18 = vld [vmem:[%s16550_s9 + $0x1b28] sm:$0xff]  ;;  %v8283_v40 = vld [vmem:[%s16550_s9 + $0x1ab0] sm:$0xff]  ;;  %v8273_v63 = vld [vmem:[%s16550_s9 + $0x1a60] sm:$0xff] }
 0x74a   : > { %11635 = vmatpush3.bf16.msra.mxu1 %v11634_v33  ;;  %v8211_v33 = vld [vmem:[%s16550_s9 + $0x1870] sm:$0xff] }
 0x74b   : > { %11667 = vmatpush3.bf16.msra.mxu0 %v11666_v34  ;;  %11637 = vmatprep.subr.bf16.mxu1 %v11636_v44  ;;  %v8212_v34 = vld [vmem:[%s16550_s9 + $0x1878] sm:$0xff]  ;;  %v8243_v44 = vld [vmem:[%s16550_s9 + $0x1970] sm:$0xff] }
 0x74c   : > { %11669 = vmatprep.subr.bf16.mxu0 %v11668_v25  ;;  %v8278_v25 = vld [vmem:[%s16550_s9 + $0x1a88] sm:$0xff]  ;;  %v11654_v43 = vpack.c.bf16 %v8212_v34, %v8211_v33  ;;  %v8300_v33 = vld [vmem:[%s16550_s9 + $0x1b38] sm:$0xff]  ;;  %v8285_v34 = vld [vmem:[%s16550_s9 + $0x1ac0] sm:$0xff] }
 0x74e   : > { %11639 = vmatpush3.bf16.msra.mxu1 %v11638_v45  ;;  %v11686_v45 = vpack.c.bf16 %v8244_v60, %v8243_v44  ;;  %v8286_v44 = vld [vmem:[%s16550_s9 + $0x1ac8] sm:$0xff] }
 0x74f   : > { %11671 = vmatpush3.bf16.msra.mxu0 %v11670_v37  ;;  %11641 = vmatprep.subr.bf16.mxu1 %v11640_v46  ;;  %v11688_v37 = vpack.c.bf16 %v8278_v25, %v8277_v36  ;;  %v8261_v46 = vld [vmem:[%s16550_s9 + $0x1a00] sm:$0xff]  ;;  %v8318_v60 = vld [vmem:[%s16550_s9 + $0x1bc8] sm:$0xff] }
 0x750   : > { %11673 = vmatprep.subr.bf16.mxu0 %v11672_v54  ;;  %v8279_v54 = vld [vmem:[%s16550_s9 + $0x1a90] sm:$0xff]  ;;  %v11690_v47 = vpack.c.bf16 %v8262_v27, %v8261_v46  ;;  %v8288_v27 = vld [vmem:[%s16550_s9 + $0x1ad8] sm:$0xff] }
 0x751   : > { %v8287_v46 = vld [vmem:[%s16550_s9 + $0x1ad0] sm:$0xff] }
 0x752   : > { %11643 = vmatpush3.bf16.msra.mxu1 %v11642_v61  ;;  %v6382_v61 = vrot.slane %v15695_v1, %v12940_v3  ;;  %v8313_v1 = vld [vmem:[%s16550_s9 + $0x1ba0] sm:$0xff] }
 0x753   : > { %11675 = vmatpush3.bf16.msra.mxu0 %v11674_v42  ;;  %11645 = vmatprep.subr.bf16.mxu1 %v11644_v19  ;;  %v8263_v19 = vld [vmem:[%s16550_s9 + $0x1a10] sm:$0xff] }
 0x754   : > { %v8838_v56 = vpop.f32.mrb[26].mxu1  ;;  %11677 = vmatprep.subr.bf16.mxu0 %v11676_v51  ;;  %v11692_v51 = vpack.c.bf16 %v8280_v55, %v8279_v54  ;;  %v11708_v55 = vpack.c.bf16 %v8288_v27, %v8287_v46  ;;  %v16105_v27 = vld [vmem:[#allocation2 + $0x26] ss:$8 sm:$0xf] }
 0x755   : > { %v8873_v20 = vpop.f32.mrb[22].mxu0  ;;  %v8839_v31 = vpop.f32.mrb[27].mxu1 }
 0x756   : > { %v8840_v22 = vadd.f32 %v8839_v31, %v8838_v56  ;;  %v8874_v21 = vpop.f32.mrb[23].mxu0  ;;  %11647 = vmatpush3.bf16.msra.mxu1 %v11646_v0  ;;  %v8314_v0 = vld [vmem:[%s16550_s9 + $0x1ba8] sm:$0xff]  ;;  %v8315_v31 = vld [vmem:[%s16550_s9 + $0x1bb0] sm:$0xff] }
 0x757   : > { %v8875_v26 = vadd.f32 %v8874_v21, %v8873_v20  ;;  %11679 = vmatpush3.bf16.msra.mxu0 %v11678_v6  ;;  %11649 = vmatprep.subr.bf16.mxu1 %v11648_v7  ;;  %v6623_v6 = vrot.slane %v15900_v24, %v13141_v57  ;;  %v11694_v7 = vpack.c.bf16 %v8264_v32, %v8263_v19  ;;  %v8266_v56 = vld [vmem:[%s16550_s9 + $0x1a28] sm:$0xff]  ;;  %v8284_v20 = vld [vmem:[%s16550_s9 + $0x1ab8] sm:$0xff]  ;;  %v8289_v19 = vld [vmem:[%s16550_s9 + $0x1ae0] sm:$0xff] }
 0x758   : > { %11681 = vmatprep.subr.bf16.mxu0 %v11680_v14  ;;  %v8297_v14 = vld [vmem:[%s16550_s9 + $0x1b20] sm:$0xff]  ;;  %v11728_v15 = vpack.c.bf16 %v8314_v0, %v8313_v1  ;;  %v11698_v50 = vpack.c.bf16 %v8266_v56, %v8265_v13  ;;  %v11700_v21 = vpack.c.bf16 %v8284_v20, %v8283_v40  ;;  %v8290_v32 = vld [vmem:[%s16550_s9 + $0x1ae8] sm:$0xff]  ;;  %v8323_v56 = vld [vmem:[%s16550_s9 + $0x1bf0] sm:$0xff] }
 0x759   : > { %v4933_v38 = vadd.f32 %v8875_v26, %v8840_v22  ;;  %v11730_v22 = vpack.c.bf16 %v8298_v18, %v8297_v14  ;;  %v8268_v26 = vld [vmem:[%s16550_s9 + $0x1a38] sm:$0xff]  ;;  %v11712_v2 = vpack.c.bf16 %v8290_v32, %v8289_v19  ;;  %v8345_v19 = vld [vmem:[%s16550_s9 + $0x1ca0] sm:$0xff]  ;;  %v8346_v32 = vld [vmem:[%s16550_s9 + $0x1ca8] sm:$0xff] }
 0x75a   : > { %11651 = vmatpush3.bf16.msra.mxu1 %v11650_v23  ;;  %v8267_v23 = vld [vmem:[%s16550_s9 + $0x1a30] sm:$0xff]  ;;  %v8324_v14 = vld [vmem:[%s16550_s9 + $0x1bf8] sm:$0xff] }
 0x75b   : > { %v15880_v30 = vadd.f32 %v4933_v38, %v15675_v52  ;;  %11683 = vmatpush3.bf16.msra.mxu0 %v11682_v28  ;;  %11653 = vmatprep.subr.bf16.mxu1 %v11652_v17  ;;  %v8294_v52 = vld [vmem:[%s16550_s9 + $0x1b08] sm:$0xff]  ;;  %v8299_v28 = vld [vmem:[%s16550_s9 + $0x1b30] sm:$0xff]  ;;  %v11732_v17 = vpack.c.bf16 %v8316_v10, %v8315_v31  ;;  %v11702_v36 = vpack.c.bf16 %v8268_v26, %v8267_v23  ;;  %v8308_v26 = vld [vmem:[%s16550_s9 + $0x1b78] sm:$0xff] }
 0x75c   : > { %11685 = vmatprep.subr.bf16.mxu0 %v11684_v11  ;;  %v11722_v42 = vpack.c.bf16 %v8294_v52, %v8293_v49  ;;  %v8317_v11 = vld [vmem:[%s16550_s9 + $0x1bc0] sm:$0xff]  ;;  %v11734_v25 = vpack.c.bf16 %v8300_v33, %v8299_v28  ;;  %v11704_v38 = vpack.c.bf16 %v8286_v44, %v8285_v34  ;;  %v8320_v49 = vld [vmem:[%s16550_s9 + $0x1bd8] sm:$0xff]  ;;  %v11706_v52 = vpack.c.bf16 %v8270_v41, %v8269_v39  ;;  %v8374_v44 = vld [vmem:[%s16550_s9 + $0x1d88] sm:$0xff] }
 0x75d   : > { %v11748_v23 = vpack.c.bf16 %v8324_v14, %v8323_v56  ;;  %v8341_v28 = vld [vmem:[%s16550_s9 + $0x1c80] sm:$0xff]  ;;  %v8326_v39 = vld [vmem:[%s16550_s9 + $0x1c08] sm:$0xff]  ;;  %v8380_v56 = vld [vmem:[%s16550_s9 + $0x1db8] sm:$0xff] }
 0x75e   : > { %11655 = vmatpush3.bf16.msra.mxu1 %v11654_v43  ;;  %v8301_v43 = vld [vmem:[%s16550_s9 + $0x1b40] sm:$0xff] }
 0x75f   : > { %11687 = vmatpush3.bf16.msra.mxu0 %v11686_v45  ;;  %11689 = vmatprep.subr.bf16.mxu1 %v11688_v37  ;;  %v11736_v45 = vpack.c.bf16 %v8318_v60, %v8317_v11  ;;  %v8302_v37 = vld [vmem:[%s16550_s9 + $0x1b48] sm:$0xff]  ;;  %v8373_v34 = vld [vmem:[%s16550_s9 + $0x1d80] sm:$0xff] }
 0x760   : > { %11721 = vmatprep.subr.bf16.mxu0 %v11720_v48  ;;  %v8319_v48 = vld [vmem:[%s16550_s9 + $0x1bd0] sm:$0xff]  ;;  %v11738_v54 = vpack.c.bf16 %v8302_v37, %v8301_v43  ;;  %v11784_v41 = vpack.c.bf16 %v8374_v44, %v8373_v34  ;;  %v8357_v43 = vld [vmem:[%s16550_s9 + $0x1d00] sm:$0xff]  ;;  %v8344_v37 = vld [vmem:[%s16550_s9 + $0x1c98] sm:$0xff] }
 0x761   : > { %6464 = vmatmul.mubr.f32.vlgmr.msra.gmra.mrb[40].mxu1 %v6382_v61  ;;  %v11740_v61 = vpack.c.bf16 %v8320_v49, %v8319_v48  ;;  %v8375_v48 = vld [vmem:[%s16550_s9 + $0x1d90] sm:$0xff]  ;;  %v8376_v49 = vld [vmem:[%s16550_s9 + $0x1d98] sm:$0xff]  ;;  %v8333_v34 = vld [vmem:[%s16550_s9 + $0x1c40] sm:$0xff] }
 0x762   : > { %6534 = vmatmul.mubr.f32.vlgmr.msra.gmra.mrb[36].mxu0 %v6390_v29  ;;  %11691 = vmatpush3.bf16.msra.mxu1 %v11690_v47  ;;  %v8271_v47 = vld [vmem:[%s16550_s9 + $0x1a50] sm:$0xff]  ;;  %v8322_v29 = vld [vmem:[%s16550_s9 + $0x1be8] sm:$0xff] }
 0x763   : > { %6692 = vmatprep.mubr.f32.mxu1 %v6615_v4  ;;  %11723 = vmatpush3.bf16.msra.mxu0 %v11722_v42  ;;  %v8304_v42 = vld [vmem:[%s16550_s9 + $0x1b58] sm:$0xff]  ;;  %v8274_v4 = vld [vmem:[%s16550_s9 + $0x1a68] sm:$0xff]  ;;  %v11744_v0 = vpack.c.bf16 %v8322_v29, %v8321_v62  ;;  %v6844_v62 = vrot.slane %v16105_v27, %v12946_v5  ;;  %v11788_v29 = vpack.c.bf16 %v8376_v49, %v8375_v48  ;;  %v8367_v49 = vld [vmem:[%s16550_s9 + $0x1d50] sm:$0xff] }
 0x764   : > { %6762 = vmatprep.mubr.f32.mxu0 %v6623_v6  ;;  %11693 = vmatprep.subr.bf16.mxu1 %v11692_v51  ;;  %v11710_v51 = vpack.c.bf16 %v8272_v58, %v8271_v47  ;;  %v11742_v9 = vpack.c.bf16 %v8304_v42, %v8303_v35  ;;  %v8306_v6 = vld [vmem:[%s16550_s9 + $0x1b68] sm:$0xff]  ;;  %v11714_v40 = vpack.c.bf16 %v8274_v4, %v8273_v63  ;;  %v8328_v47 = vld [vmem:[%s16550_s9 + $0x1c18] sm:$0xff]  ;;  %v8359_v58 = vld [vmem:[%s16550_s9 + $0x1d10] sm:$0xff] }
 0x765   : > { %11725 = vmatprep.subr.bf16.mxu0 %v11724_v16  ;;  %v8305_v16 = vld [vmem:[%s16550_s9 + $0x1b60] sm:$0xff]  ;;  %v6619_v35 = vrot.slane %v15900_v24, %v13138_v53  ;;  %v8360_v42 = vld [vmem:[%s16550_s9 + $0x1d18] sm:$0xff]  ;;  %v11760_v4 = vpack.c.bf16 %v8346_v32, %v8345_v19  ;;  %v8334_v44 = vld [vmem:[%s16550_s9 + $0x1c48] sm:$0xff] }
 0x766   : > { %11695 = vmatpush3.bf16.msra.mxu1 %v11694_v7  ;;  %v8291_v7 = vld [vmem:[%s16550_s9 + $0x1af0] sm:$0xff]  ;;  %v11746_v31 = vpack.c.bf16 %v8306_v6, %v8305_v16  ;;  %v11790_v63 = vpack.c.bf16 %v8360_v42, %v8359_v58  ;;  %v8329_v16 = vld [vmem:[%s16550_s9 + $0x1c20] sm:$0xff]  ;;  %v8336_v48 = vld [vmem:[%s16550_s9 + $0x1c58] sm:$0xff] }
 0x767   : > { %11727 = vmatpush3.bf16.msra.mxu0 %v11726_v8  ;;  %11697 = vmatprep.subr.bf16.mxu1 %v11696_v12  ;;  %v8292_v8 = vld [vmem:[%s16550_s9 + $0x1af8] sm:$0xff]  ;;  %v8385_v58 = vld [vmem:[%s16550_s9 + $0x1de0] sm:$0xff] }
 0x768   : > { %11729 = vmatprep.subr.bf16.mxu0 %v11728_v15  ;;  %v11716_v10 = vpack.c.bf16 %v8292_v8, %v8291_v7  ;;  %v8362_v7 = vld [vmem:[%s16550_s9 + $0x1d28] sm:$0xff]  ;;  %v8347_v8 = vld [vmem:[%s16550_s9 + $0x1cb0] sm:$0xff]  ;;  %v8337_v32 = vld [vmem:[%s16550_s9 + $0x1c60] sm:$0xff] }
 0x76a   : > { %11699 = vmatpush3.bf16.msra.mxu1 %v11698_v50  ;;  %v8275_v50 = vld [vmem:[%s16550_s9 + $0x1a70] sm:$0xff] }
 0x76b   : > { %11731 = vmatpush3.bf16.msra.mxu0 %v11730_v22  ;;  %11701 = vmatprep.subr.bf16.mxu1 %v11700_v21  ;;  %v8276_v22 = vld [vmem:[%s16550_s9 + $0x1a78] sm:$0xff]  ;;  %v8307_v21 = vld [vmem:[%s16550_s9 + $0x1b70] sm:$0xff] }
 0x76c   : > { %11733 = vmatprep.subr.bf16.mxu0 %v11732_v17  ;;  %v8342_v17 = vld [vmem:[%s16550_s9 + $0x1c88] sm:$0xff]  ;;  %v11718_v11 = vpack.c.bf16 %v8276_v22, %v8275_v50  ;;  %v8364_v50 = vld [vmem:[%s16550_s9 + $0x1d38] sm:$0xff]  ;;  %v8349_v22 = vld [vmem:[%s16550_s9 + $0x1cc0] sm:$0xff] }
 0x76e   : > { %11703 = vmatpush3.bf16.msra.mxu1 %v11702_v36  ;;  %v11750_v36 = vpack.c.bf16 %v8308_v26, %v8307_v21  ;;  %v8350_v21 = vld [vmem:[%s16550_s9 + $0x1cc8] sm:$0xff] }
 0x76f   : > { %11735 = vmatpush3.bf16.msra.mxu0 %v11734_v25  ;;  %11705 = vmatprep.subr.bf16.mxu1 %v11704_v38  ;;  %v11752_v25 = vpack.c.bf16 %v8342_v17, %v8341_v28  ;;  %v8325_v38 = vld [vmem:[%s16550_s9 + $0x1c00] sm:$0xff]  ;;  %v8382_v26 = vld [vmem:[%s16550_s9 + $0x1dc8] sm:$0xff] }
 0x770   : > { %11737 = vmatprep.subr.bf16.mxu0 %v11736_v45  ;;  %v8343_v45 = vld [vmem:[%s16550_s9 + $0x1c90] sm:$0xff]  ;;  %v11754_v46 = vpack.c.bf16 %v8326_v39, %v8325_v38  ;;  %v8352_v39 = vld [vmem:[%s16550_s9 + $0x1cd8] sm:$0xff] }
 0x771   : > { %v8351_v38 = vld [vmem:[%s16550_s9 + $0x1cd0] sm:$0xff] }
 0x772   : > { %11707 = vmatpush3.bf16.msra.mxu1 %v11706_v52  ;;  %v6611_v52 = vrot.slane %v15900_v24, %v12940_v3  ;;  %v8377_v24 = vld [vmem:[%s16550_s9 + $0x1da0] sm:$0xff] }
 0x773   : > { %11739 = vmatpush3.bf16.msra.mxu0 %v11738_v54  ;;  %11709 = vmatprep.subr.bf16.mxu1 %v11708_v55  ;;  %v8327_v55 = vld [vmem:[%s16550_s9 + $0x1c10] sm:$0xff] }
 0x774   : > { %v8908_v1 = vpop.f32.mrb[28].mxu1  ;;  %11741 = vmatprep.subr.bf16.mxu0 %v11740_v61  ;;  %v11756_v61 = vpack.c.bf16 %v8344_v37, %v8343_v45  ;;  %v11772_v37 = vpack.c.bf16 %v8352_v39, %v8351_v38  ;;  %v16310_v39 = vld [vmem:[#allocation2 + $0x27] ss:$8 sm:$0xf] }
 0x775   : > { %v8943_v12 = vpop.f32.mrb[24].mxu0  ;;  %v8909_v13 = vpop.f32.mrb[29].mxu1 }
 0x776   : > { %v8910_v15 = vadd.f32 %v8909_v13, %v8908_v1  ;;  %v8944_v18 = vpop.f32.mrb[25].mxu0  ;;  %11711 = vmatpush3.bf16.msra.mxu1 %v11710_v51  ;;  %v8378_v51 = vld [vmem:[%s16550_s9 + $0x1da8] sm:$0xff]  ;;  %v8379_v13 = vld [vmem:[%s16550_s9 + $0x1db0] sm:$0xff] }
 0x777   : > { %v8945_v20 = vadd.f32 %v8944_v18, %v8943_v12  ;;  %11743 = vmatpush3.bf16.msra.mxu0 %v11742_v9  ;;  %11713 = vmatprep.subr.bf16.mxu1 %v11712_v2  ;;  %v6852_v9 = vrot.slane %v16105_v27, %v13141_v57  ;;  %v11758_v2 = vpack.c.bf16 %v8328_v47, %v8327_v55  ;;  %v8330_v1 = vld [vmem:[%s16550_s9 + $0x1c28] sm:$0xff]  ;;  %v8348_v12 = vld [vmem:[%s16550_s9 + $0x1cb8] sm:$0xff]  ;;  %v8353_v55 = vld [vmem:[%s16550_s9 + $0x1ce0] sm:$0xff] }
 0x778   : > { %11745 = vmatprep.subr.bf16.mxu0 %v11744_v0  ;;  %v8361_v0 = vld [vmem:[%s16550_s9 + $0x1d20] sm:$0xff]  ;;  %v11792_v6 = vpack.c.bf16 %v8378_v51, %v8377_v24  ;;  %v11762_v14 = vpack.c.bf16 %v8330_v1, %v8329_v16  ;;  %v11764_v18 = vpack.c.bf16 %v8348_v12, %v8347_v8  ;;  %v8354_v47 = vld [vmem:[%s16550_s9 + $0x1ce8] sm:$0xff]  ;;  %v8387_v1 = vld [vmem:[%s16550_s9 + $0x1df0] sm:$0xff] }
 0x779   : > { %v5162_v33 = vadd.f32 %v8945_v20, %v8910_v15  ;;  %v11794_v15 = vpack.c.bf16 %v8362_v7, %v8361_v0  ;;  %v8332_v20 = vld [vmem:[%s16550_s9 + $0x1c38] sm:$0xff]  ;;  %v11776_v19 = vpack.c.bf16 %v8354_v47, %v8353_v55  ;;  %v8409_v55 = vld [vmem:[%s16550_s9 + $0x1ea0] sm:$0xff]  ;;  %v8410_v47 = vld [vmem:[%s16550_s9 + $0x1ea8] sm:$0xff] }
 0x77a   : > { %11715 = vmatpush3.bf16.msra.mxu1 %v11714_v40  ;;  %v8331_v40 = vld [vmem:[%s16550_s9 + $0x1c30] sm:$0xff]  ;;  %v8388_v0 = vld [vmem:[%s16550_s9 + $0x1df8] sm:$0xff] }
 0x77b   : > { %v16085_v60 = vadd.f32 %v5162_v33, %v15880_v30  ;;  %11747 = vmatpush3.bf16.msra.mxu0 %v11746_v31  ;;  %11717 = vmatprep.subr.bf16.mxu1 %v11716_v10  ;;  %v8358_v30 = vld [vmem:[%s16550_s9 + $0x1d08] sm:$0xff]  ;;  %v8363_v31 = vld [vmem:[%s16550_s9 + $0x1d30] sm:$0xff]  ;;  %v11796_v10 = vpack.c.bf16 %v8380_v56, %v8379_v13  ;;  %v11766_v28 = vpack.c.bf16 %v8332_v20, %v8331_v40  ;;  %v8372_v20 = vld [vmem:[%s16550_s9 + $0x1d78] sm:$0xff] }
 0x77c   : > { %11749 = vmatprep.subr.bf16.mxu0 %v11748_v23  ;;  %v11786_v54 = vpack.c.bf16 %v8358_v30, %v8357_v43  ;;  %v8381_v23 = vld [vmem:[%s16550_s9 + $0x1dc0] sm:$0xff]  ;;  %v11798_v17 = vpack.c.bf16 %v8364_v50, %v8363_v31  ;;  %v11768_v33 = vpack.c.bf16 %v8350_v21, %v8349_v22  ;;  %v8384_v43 = vld [vmem:[%s16550_s9 + $0x1dd8] sm:$0xff]  ;;  %v11770_v30 = vpack.c.bf16 %v8334_v44, %v8333_v34  ;;  %v8438_v21 = vld [vmem:[%s16550_s9 + $0x1f88] sm:$0xff] }
 0x77d   : > { %v11812_v40 = vpack.c.bf16 %v8388_v0, %v8387_v1  ;;  %v8405_v31 = vld [vmem:[%s16550_s9 + $0x1e80] sm:$0xff]  ;;  %v8390_v34 = vld [vmem:[%s16550_s9 + $0x1e08] sm:$0xff] }
 0x77e   : > { %11719 = vmatpush3.bf16.msra.mxu1 %v11718_v11  ;;  %v8365_v11 = vld [vmem:[%s16550_s9 + $0x1d40] sm:$0xff] }
 0x77f   : > { %11751 = vmatpush3.bf16.msra.mxu0 %v11750_v36  ;;  %11753 = vmatprep.subr.bf16.mxu1 %v11752_v25  ;;  %v11800_v36 = vpack.c.bf16 %v8382_v26, %v8381_v23  ;;  %v8366_v25 = vld [vmem:[%s16550_s9 + $0x1d48] sm:$0xff]  ;;  %v8437_v22 = vld [vmem:[%s16550_s9 + $0x1f80] sm:$0xff] }
 0x780   : > { %11785 = vmatprep.subr.bf16.mxu0 %v11784_v41  ;;  %v8383_v41 = vld [vmem:[%s16550_s9 + $0x1dd0] sm:$0xff]  ;;  %v11802_v45 = vpack.c.bf16 %v8366_v25, %v8365_v11  ;;  %v11848_v44 = vpack.c.bf16 %v8438_v21, %v8437_v22  ;;  %v8421_v11 = vld [vmem:[%s16550_s9 + $0x1f00] sm:$0xff]  ;;  %v8408_v25 = vld [vmem:[%s16550_s9 + $0x1e98] sm:$0xff] }
 0x781   : > { %6693 = vmatmul.mubr.f32.vlgmr.msra.gmra.mrb[42].mxu1 %v6611_v52  ;;  %v11804_v52 = vpack.c.bf16 %v8384_v43, %v8383_v41  ;;  %v8439_v41 = vld [vmem:[%s16550_s9 + $0x1f90] sm:$0xff]  ;;  %v8440_v43 = vld [vmem:[%s16550_s9 + $0x1f98] sm:$0xff]  ;;  %v8429_v22 = vld [vmem:[%s16550_s9 + $0x1f40] sm:$0xff] }
 0x782   : > { %6763 = vmatmul.mubr.f32.vlgmr.msra.gmra.mrb[38].mxu0 %v6619_v35  ;;  %11755 = vmatpush3.bf16.msra.mxu1 %v11754_v46  ;;  %v8335_v46 = vld [vmem:[%s16550_s9 + $0x1c50] sm:$0xff]  ;;  %v8386_v35 = vld [vmem:[%s16550_s9 + $0x1de8] sm:$0xff] }
 0x783   : > { %6921 = vmatprep.mubr.f32.mxu1 %v6844_v62  ;;  %11787 = vmatpush3.bf16.msra.mxu0 %v11786_v54  ;;  %v8368_v54 = vld [vmem:[%s16550_s9 + $0x1d58] sm:$0xff]  ;;  %v8338_v62 = vld [vmem:[%s16550_s9 + $0x1c68] sm:$0xff]  ;;  %v11808_v51 = vpack.c.bf16 %v8386_v35, %v8385_v58  ;;  %v7073_v58 = vrot.slane %v16310_v39, %v12946_v5  ;;  %v11852_v35 = vpack.c.bf16 %v8440_v43, %v8439_v41  ;;  %v8393_v5 = vld [vmem:[%s16550_s9 + $0x1e20] sm:$0xff] }
 0x784   : > { %6991 = vmatprep.mubr.f32.mxu0 %v6852_v9  ;;  %11757 = vmatprep.subr.bf16.mxu1 %v11756_v61  ;;  %v11774_v61 = vpack.c.bf16 %v8336_v48, %v8335_v46  ;;  %v11806_v42 = vpack.c.bf16 %v8368_v54, %v8367_v49  ;;  %v8370_v9 = vld [vmem:[%s16550_s9 + $0x1d68] sm:$0xff]  ;;  %v11778_v8 = vpack.c.bf16 %v8338_v62, %v8337_v32  ;;  %v8392_v46 = vld [vmem:[%s16550_s9 + $0x1e18] sm:$0xff]  ;;  %v8423_v48 = vld [vmem:[%s16550_s9 + $0x1f10] sm:$0xff] }
 0x785   : > { %11789 = vmatprep.subr.bf16.mxu0 %v11788_v29  ;;  %v8369_v29 = vld [vmem:[%s16550_s9 + $0x1d60] sm:$0xff]  ;;  %v6848_v49 = vrot.slane %v16105_v27, %v13138_v53  ;;  %v8424_v54 = vld [vmem:[%s16550_s9 + $0x1f18] sm:$0xff]  ;;  %v11824_v62 = vpack.c.bf16 %v8410_v47, %v8409_v55  ;;  %v8402_v55 = vld [vmem:[%s16550_s9 + $0x1e68] sm:$0xff] }
 0x786   : > { %11759 = vmatpush3.bf16.msra.mxu1 %v11758_v2  ;;  %v8355_v2 = vld [vmem:[%s16550_s9 + $0x1cf0] sm:$0xff]  ;;  %v11810_v13 = vpack.c.bf16 %v8370_v9, %v8369_v29  ;;  %v11854_v32 = vpack.c.bf16 %v8424_v54, %v8423_v48  ;;  %v8394_v29 = vld [vmem:[%s16550_s9 + $0x1e28] sm:$0xff]  ;;  %v8432_v43 = vld [vmem:[%s16550_s9 + $0x1f58] sm:$0xff] }
 0x787   : > { %11791 = vmatpush3.bf16.msra.mxu0 %v11790_v63  ;;  %11761 = vmatprep.subr.bf16.mxu1 %v11760_v4  ;;  %v8356_v63 = vld [vmem:[%s16550_s9 + $0x1cf8] sm:$0xff]  ;;  %v8411_v9 = vld [vmem:[%s16550_s9 + $0x1eb0] sm:$0xff]  ;;  %v8401_v54 = vld [vmem:[%s16550_s9 + $0x1e60] sm:$0xff] }
 0x788   : > { %11793 = vmatprep.subr.bf16.mxu0 %v11792_v6  ;;  %v11780_v56 = vpack.c.bf16 %v8356_v63, %v8355_v2  ;;  %v8412_v2 = vld [vmem:[%s16550_s9 + $0x1eb8] sm:$0xff]  ;;  %v8443_v63 = vld [vmem:[%s16550_s9 + $0x1fb0] sm:$0xff]  ;;  %v8433_v47 = vld [vmem:[%s16550_s9 + $0x1f60] sm:$0xff] }
 0x789   : > { %v11828_v0 = vpack.c.bf16 %v8412_v2, %v8411_v9 }
 0x78a   : > { %11763 = vmatpush3.bf16.msra.mxu1 %v11762_v14  ;;  %v8339_v14 = vld [vmem:[%s16550_s9 + $0x1c70] sm:$0xff] }
 0x78b   : > { %11795 = vmatpush3.bf16.msra.mxu0 %v11794_v15  ;;  %11765 = vmatprep.subr.bf16.mxu1 %v11764_v18  ;;  %v8340_v15 = vld [vmem:[%s16550_s9 + $0x1c78] sm:$0xff]  ;;  %v8371_v18 = vld [vmem:[%s16550_s9 + $0x1d70] sm:$0xff] }
 0x78c   : > { %11797 = vmatprep.subr.bf16.mxu0 %v11796_v10  ;;  %v8406_v10 = vld [vmem:[%s16550_s9 + $0x1e88] sm:$0xff]  ;;  %v11782_v23 = vpack.c.bf16 %v8340_v15, %v8339_v14  ;;  %v8445_v15 = vld [vmem:[%s16550_s9 + $0x1fc0] sm:$0xff] }
 0x78d   : > { %v8414_v14 = vld [vmem:[%s16550_s9 + $0x1ec8] sm:$0xff] }
 0x78e   : > { %11767 = vmatpush3.bf16.msra.mxu1 %v11766_v28  ;;  %v11814_v28 = vpack.c.bf16 %v8372_v20, %v8371_v18  ;;  %v8446_v18 = vld [vmem:[%s16550_s9 + $0x1fc8] sm:$0xff] }
 0x78f   : > { %11799 = vmatpush3.bf16.msra.mxu0 %v11798_v17  ;;  %11769 = vmatprep.subr.bf16.mxu1 %v11768_v33  ;;  %v11816_v17 = vpack.c.bf16 %v8406_v10, %v8405_v31  ;;  %v8389_v33 = vld [vmem:[%s16550_s9 + $0x1e00] sm:$0xff]  ;;  %v11864_v21 = vpack.c.bf16 %v8446_v18, %v8445_v15 }
 0x790   : > { %11801 = vmatprep.subr.bf16.mxu0 %v11800_v36  ;;  %v8407_v36 = vld [vmem:[%s16550_s9 + $0x1e90] sm:$0xff]  ;;  %v11818_v38 = vpack.c.bf16 %v8390_v34, %v8389_v33  ;;  %v8397_v10 = vld [vmem:[%s16550_s9 + $0x1e40] sm:$0xff]  ;;  %v8448_v34 = vld [vmem:[%s16550_s9 + $0x1fd8] sm:$0xff] }
 0x791   : > { %v8447_v33 = vld [vmem:[%s16550_s9 + $0x1fd0] sm:$0xff] }
 0x792   : > { %11771 = vmatpush3.bf16.msra.mxu1 %v11770_v30  ;;  %v6840_v30 = vrot.slane %v16105_v27, %v12940_v3  ;;  %v8441_v27 = vld [vmem:[%s16550_s9 + $0x1fa0] sm:$0xff]  ;;  %v11868_v41 = vpack.c.bf16 %v8448_v34, %v8447_v33 }
 0x793   : > { %11803 = vmatpush3.bf16.msra.mxu0 %v11802_v45  ;;  %11773 = vmatprep.subr.bf16.mxu1 %v11772_v37  ;;  %v8391_v37 = vld [vmem:[%s16550_s9 + $0x1e10] sm:$0xff]  ;;  %v7230_v34 = vld [vmem:[#allocation8] sm:$0xff] }
 0x794   : > { %v8978_v24 = vpop.f32.mrb[30].mxu1  ;;  %11805 = vmatprep.subr.bf16.mxu0 %v11804_v52  ;;  %v11820_v52 = vpack.c.bf16 %v8408_v25, %v8407_v36  ;;  %v8399_v36 = vld [vmem:[%s16550_s9 + $0x1e50] sm:$0xff]  ;;  %v8400_v25 = vld [vmem:[%s16550_s9 + $0x1e58] sm:$0xff] }
 0x795   : > { %v9013_v4 = vpop.f32.mrb[26].mxu0  ;;  %v8979_v16 = vpop.f32.mrb[31].mxu1  ;;  %v11838_v48 = vpack.c.bf16 %v8400_v25, %v8399_v36  ;;  %v7234_v25 = vld [vmem:[#allocation8 + $0x20] sm:$0xff] }
 0x796   : > { %v8980_v6 = vadd.f32 %v8979_v16, %v8978_v24  ;;  %v9014_v7 = vpop.f32.mrb[27].mxu0  ;;  %11775 = vmatpush3.bf16.msra.mxu1 %v11774_v61  ;;  %v8442_v61 = vld [vmem:[%s16550_s9 + $0x1fa8] sm:$0xff]  ;;  %v8425_v24 = vld [vmem:[%s16550_s9 + $0x1f20] sm:$0xff]  ;;  %v11826_v16 = vpack.c.bf16 %v8394_v29, %v8393_v5  ;;  %v8452_v5 = vld [vmem:[%s16550_s9 + $0x1ff8] sm:$0xff] }
 0x797   : > { %v9015_v12 = vadd.f32 %v9014_v7, %v9013_v4  ;;  %11807 = vmatpush3.bf16.msra.mxu0 %v11806_v42  ;;  %11777 = vmatprep.subr.bf16.mxu1 %v11776_v19  ;;  %v7081_v42 = vrot.slane %v16310_v39, %v13141_v57  ;;  %v11822_v19 = vpack.c.bf16 %v8392_v46, %v8391_v37  ;;  %v8444_v4 = vld [vmem:[%s16550_s9 + $0x1fb8] sm:$0xff]  ;;  %v8449_v37 = vld [vmem:[%s16550_s9 + $0x1fe0] sm:$0xff]  ;;  %v8450_v46 = vld [vmem:[%s16550_s9 + $0x1fe8] sm:$0xff] }
 0x798   : > { %11809 = vmatprep.subr.bf16.mxu0 %v11808_v51  ;;  %v11856_v57 = vpack.c.bf16 %v8442_v61, %v8441_v27  ;;  %v8426_v51 = vld [vmem:[%s16550_s9 + $0x1f28] sm:$0xff]  ;;  %v8396_v7 = vld [vmem:[%s16550_s9 + $0x1e38] sm:$0xff]  ;;  %v8419_v61 = vld [vmem:[%s16550_s9 + $0x1ef0] sm:$0xff] }
 0x799   : > { %v5391_v50 = vadd.f32 %v9015_v12, %v8980_v6  ;;  %v11858_v1 = vpack.c.bf16 %v8426_v51, %v8425_v24  ;;  %v8395_v6 = vld [vmem:[%s16550_s9 + $0x1e30] sm:$0xff]  ;;  %v11860_v12 = vpack.c.bf16 %v8444_v4, %v8443_v63  ;;  %v8434_v27 = vld [vmem:[%s16550_s9 + $0x1f68] sm:$0xff]  ;;  %v8404_v4 = vld [vmem:[%s16550_s9 + $0x1e78] sm:$0xff] }
 0x79a   : > { %11779 = vmatpush3.bf16.msra.mxu1 %v11778_v8  ;;  %v8427_v8 = vld [vmem:[%s16550_s9 + $0x1f30] sm:$0xff]  ;;  %v11874_v9 = vpack.c.bf16 %v8434_v27, %v8433_v47 }
 0x79b   : > { %v16290_v26 = vadd.f32 %v5391_v50, %v16085_v60  ;;  %11811 = vmatpush3.bf16.msra.mxu0 %v11810_v13  ;;  %11781 = vmatprep.subr.bf16.mxu1 %v11780_v56  ;;  %v8422_v60 = vld [vmem:[%s16550_s9 + $0x1f08] sm:$0xff]  ;;  %v8428_v13 = vld [vmem:[%s16550_s9 + $0x1f38] sm:$0xff]  ;;  %v8413_v56 = vld [vmem:[%s16550_s9 + $0x1ec0] sm:$0xff] }
 0x79c   : > { %11813 = vmatprep.subr.bf16.mxu0 %v11812_v40  ;;  %v11850_v45 = vpack.c.bf16 %v8422_v60, %v8421_v11  ;;  %v11830_v40 = vpack.c.bf16 %v8396_v7, %v8395_v6  ;;  %v11862_v20 = vpack.c.bf16 %v8428_v13, %v8427_v8  ;;  %v11832_v31 = vpack.c.bf16 %v8414_v14, %v8413_v56  ;;  %v8398_v50 = vld [vmem:[%s16550_s9 + $0x1e48] sm:$0xff]  ;;  %v8403_v63 = vld [vmem:[%s16550_s9 + $0x1e70] sm:$0xff] }
 0x79d   : > { %v11846_v7 = vpack.c.bf16 %v8404_v4, %v8403_v63  ;;  %v7069_v13 = vrot.slane %v16310_v39, %v12940_v3  ;;  %v7077_v56 = vrot.slane %v16310_v39, %v13138_v53  ;;  %v7231_v53 = vld [vmem:[#allocation8 + $0x8] sm:$0xff]  ;;  %v7232_v39 = vld [vmem:[#allocation8 + $0x10] sm:$0xff] }
 0x79e   : > { %11783 = vmatpush3.bf16.msra.mxu1 %v11782_v23  ;;  %v8430_v23 = vld [vmem:[%s16550_s9 + $0x1f48] sm:$0xff] }
 0x79f   : > { %11815 = vmatpush3.bf16.msra.mxu0 %v11814_v28  ;;  %11817 = vmatprep.subr.bf16.mxu1 %v11816_v17  ;;  %v8415_v28 = vld [vmem:[%s16550_s9 + $0x1ed0] sm:$0xff]  ;;  %v8416_v17 = vld [vmem:[%s16550_s9 + $0x1ed8] sm:$0xff]  ;;  %v11866_v11 = vpack.c.bf16 %v8430_v23, %v8429_v22 }
 0x7a0   : > { %11849 = vmatprep.subr.bf16.mxu0 %v11848_v44  ;;  %v11834_v44 = vpack.c.bf16 %v8398_v50, %v8397_v10  ;;  %v11836_v60 = vpack.c.bf16 %v8416_v17, %v8415_v28 }
 0x7a1   : > { %6922 = vmatmul.mubr.f32.vlgmr.msra.gmra.mrb[44].mxu1 %v6840_v30  ;;  %v8417_v30 = vld [vmem:[%s16550_s9 + $0x1ee0] sm:$0xff] }
 0x7a2   : > { %6992 = vmatmul.mubr.f32.vlgmr.msra.gmra.mrb[40].mxu0 %v6848_v49  ;;  %11819 = vmatpush3.bf16.msra.mxu1 %v11818_v38  ;;  %v8431_v38 = vld [vmem:[%s16550_s9 + $0x1f50] sm:$0xff] }
 0x7a3   : > { %7150 = vmatprep.mubr.f32.mxu1 %v7073_v58  ;;  %11851 = vmatpush3.bf16.msra.mxu0 %v11850_v45  ;;  %v8418_v45 = vld [vmem:[%s16550_s9 + $0x1ee8] sm:$0xff]  ;;  %v11870_v49 = vpack.c.bf16 %v8432_v43, %v8431_v38  ;;  %v7236_v43 = vld [vmem:[#allocation8 + $0x30] sm:$0xff] }
 0x7a4   : > { %7220 = vmatprep.mubr.f32.mxu0 %v7081_v42  ;;  %11821 = vmatprep.subr.bf16.mxu1 %v11820_v52  ;;  %v11840_v52 = vpack.c.bf16 %v8418_v45, %v8417_v30  ;;  %v8420_v42 = vld [vmem:[%s16550_s9 + $0x1ef8] sm:$0xff]  ;;  %v7235_v38 = vld [vmem:[#allocation8 + $0x28] sm:$0xff] }
 0x7a5   : > { %11853 = vmatprep.subr.bf16.mxu0 %v11852_v35  ;;  %v11872_v35 = vpack.c.bf16 %v8450_v46, %v8449_v37  ;;  %v11844_v2 = vpack.c.bf16 %v8420_v42, %v8419_v61  ;;  %v7237_v30 = vld [vmem:[#allocation8 + $0x38] sm:$0xff]  ;;  %v7238_v37 = vld [vmem:[#allocation8 + $0x40] sm:$0xff]  ;;  %v7239_v46 = vld [vmem:[#allocation8 + $0x48] sm:$0xff] }
 0x7a6   : > { %11823 = vmatpush3.bf16.msra.mxu1 %v11822_v19  ;;  %v11890_v45 = vpack.c.bf16 %v7237_v30, %v7236_v43  ;;  %v7240_v61 = vld [vmem:[#allocation8 + $0x50] sm:$0xff]  ;;  %v7241_v42 = vld [vmem:[#allocation8 + $0x58] sm:$0xff] }
 0x7a7   : > { %11855 = vmatpush3.bf16.msra.mxu0 %v11854_v32  ;;  %11825 = vmatprep.subr.bf16.mxu1 %v11824_v62  ;;  %v8451_v62 = vld [vmem:[%s16550_s9 + $0x1ff0] sm:$0xff] }
 0x7a8   : > { %11857 = vmatprep.subr.bf16.mxu0 %v11856_v57  ;;  %v11842_v57 = vpack.c.bf16 %v8402_v55, %v8401_v54 }
 0x7aa   : > { %11827 = vmatpush3.bf16.msra.mxu1 %v11826_v16  ;;  %v11876_v16 = vpack.c.bf16 %v8452_v5, %v8451_v62  ;;  %v7243_v62 = vld [vmem:[#allocation8 + $0x68] sm:$0xff] }
 0x7ab   : > { %11859 = vmatpush3.bf16.msra.mxu0 %v11858_v1  ;;  %11829 = vmatprep.subr.bf16.mxu1 %v11828_v0  ;;  %v8435_v1 = vld [vmem:[%s16550_s9 + $0x1f70] sm:$0xff]  ;;  %v8436_v0 = vld [vmem:[%s16550_s9 + $0x1f78] sm:$0xff] }
 0x7ac   : > { %11861 = vmatprep.subr.bf16.mxu0 %v11860_v12  ;;  %v11878_v12 = vpack.c.bf16 %v8436_v0, %v8435_v1 }
 0x7ae   : > { %11831 = vmatpush3.bf16.msra.mxu1 %v11830_v40 }
 0x7af   : > { %11863 = vmatpush3.bf16.msra.mxu0 %v11862_v20  ;;  %11833 = vmatprep.subr.bf16.mxu1 %v11832_v31 }
 0x7b0   : > { %11865 = vmatprep.subr.bf16.mxu0 %v11864_v21 }
 0x7b2   : > { %11835 = vmatpush3.bf16.msra.mxu1 %v11834_v44  ;;  %v12205_v44 = vmov 0.0|0.0  }
 0x7b3   : > { %11867 = vmatpush3.bf16.msra.mxu0 %v11866_v11  ;;  %11837 = vmatprep.subr.bf16.mxu1 %v11836_v60  ;;  %v11881_v11 = vpack.c.bf16 %v7231_v53, %v7230_v34  ;;  %v7233_v60 = vld [vmem:[#allocation8 + $0x18] sm:$0xff]  ;;  %v7227_v34 = vld [vmem:[%s16551_s10] sm:$0x1] }
 0x7b4   : > { %v9048_v58 = vpop.f32.mrb[32].mxu1  ;;  %11869 = vmatprep.subr.bf16.mxu0 %v11868_v41  ;;  %v11884_v36 = vpack.c.bf16 %v7233_v60, %v7232_v39  ;;  %v11887_v41 = vpack.c.bf16 %v7235_v38, %v7234_v25 }
 0x7b5   : > { %v9083_v19 = vpop.f32.mrb[28].mxu0  ;;  %v9049_v32 = vpop.f32.mrb[33].mxu1 }
 0x7b6   : > { %v9050_v29 = vadd.f32 %v9049_v32, %v9048_v58  ;;  %v9084_v24 = vpop.f32.mrb[29].mxu0  ;;  %11839 = vmatpush3.bf16.msra.mxu1 %v11838_v48  ;;  %v11893_v48 = vpack.c.bf16 %v7239_v46, %v7238_v37  ;;  %v11896_v32 = vpack.c.bf16 %v7241_v42, %v7240_v61 }
 0x7b7   : > { %v9085_v51 = vadd.f32 %v9084_v24, %v9083_v19  ;;  %11871 = vmatpush3.bf16.msra.mxu0 %v11870_v49  ;;  %11841 = vmatprep.subr.bf16.mxu1 %v11840_v52  ;;  %v7242_v19 = vld [vmem:[#allocation8 + $0x60] sm:$0xff]  ;;  %v7245_v24 = vld [vmem:[#allocation8 + $0x78] sm:$0xff] }
 0x7b8   : > { %11873 = vmatprep.subr.bf16.mxu0 %v11872_v35  ;;  %v11899_v5 = vpack.c.bf16 %v7243_v62, %v7242_v19 }
 0x7b9   : > { %v5620_v6 = vadd.f32 %v9085_v51, %v9050_v29  ;;  %v7244_v29 = vld [vmem:[#allocation8 + $0x70] sm:$0xff] }
 0x7ba   : > { %11843 = vmatpush3.bf16.msra.mxu1 %v11842_v57  ;;  %v11902_v57 = vpack.c.bf16 %v7245_v24, %v7244_v29 }
 0x7bb   : > { %v5623_v8 = vadd.f32 %v5620_v6, %v16290_v26  ;;  %11875 = vmatpush3.bf16.msra.mxu0 %v11874_v9  ;;  %11845 = vmatprep.subr.bf16.mxu1 %v11844_v2 }
 0x7bc   : > { %11877 = vmatprep.subr.bf16.mxu0 %v11876_v16 }
 0x7be   : > { %11847 = vmatpush3.bf16.msra.mxu1 %v11846_v7 }
 0x7bf   : > { %11879 = vmatpush3.bf16.msra.mxu0 %v11878_v12  ;;  %11880 = vmatprep.subr.bf16.mxu1 %v12205_v44 }
 0x7c1   : > { %7151 = vmatmul.mubr.f32.vlgmr.msra.gmra.mrb[46].mxu1 %v7069_v13 }
 0x7c2   : > { %7221 = vmatmul.mubr.f32.vlgmr.msra.gmra.mrb[42].mxu0 %v7077_v56  ;;  %11882 = vmatpush3.bf16.msra.mxu1 %v11881_v11  ;;  %v7246_v11 = vld [vmem:[%s16589_s25] sm:$0x1] }
 0x7c3   : > { %11883 = vmatprep.subr.bf16.mxu1 %v12205_v44  ;;  %9625 = vmatprep.mubr.msk.f32.mxu1 %vm12206_vm7, %v12204_v59 }
 0x7c6   : > { %11885 = vmatpush3.bf16.msra.mxu1 %v11884_v36 }
 0x7c7   : > { %11886 = vmatprep.subr.bf16.mxu1 %v12205_v44 }
 0x7ca   : > { %11888 = vmatpush3.bf16.msra.mxu1 %v11887_v41 }
 0x7cb   : > { %11889 = vmatprep.subr.bf16.mxu1 %v12205_v44 }
 0x7ce   : > { %11891 = vmatpush3.bf16.msra.mxu1 %v11890_v45 }
 0x7cf   : > { %11892 = vmatprep.subr.bf16.mxu1 %v12205_v44 }
 0x7d2   : > { %11894 = vmatpush3.bf16.msra.mxu1 %v11893_v48 }
 0x7d3   : > { %11895 = vmatprep.subr.bf16.mxu1 %v12205_v44 }
 0x7d4   : > { %v9118_v14 = vpop.f32.mrb[34].mxu1 }
 0x7d5   : > { %v9153_v15 = vpop.f32.mrb[30].mxu0  ;;  %v9119_v18 = vpop.f32.mrb[35].mxu1 }
 0x7d6   : > { %v9120_v40 = vadd.f32 %v9119_v18, %v9118_v14  ;;  %v9154_v20 = vpop.f32.mrb[31].mxu0  ;;  %11897 = vmatpush3.bf16.msra.mxu1 %v11896_v32 }
 0x7d7   : > { %v9155_v26 = vadd.f32 %v9154_v20, %v9153_v15  ;;  %11898 = vmatprep.subr.bf16.mxu1 %v12205_v44 }
 0x7d9   : > { %v5849_v31 = vadd.f32 %v9155_v26, %v9120_v40 }
 0x7da   : > { %11900 = vmatpush3.bf16.msra.mxu1 %v11899_v5 }
 0x7db   : > { %v5852_v10 = vadd.f32 %v5849_v31, %v5623_v8  ;;  %11901 = vmatprep.subr.bf16.mxu1 %v12205_v44 }
 0x7de   : > { %11903 = vmatpush3.bf16.msra.mxu1 %v11902_v57 }
 0x7f4   : > { %v9188_v50 = vpop.f32.mrb[36].mxu1 }
 0x7f5   : > { %v9223_v22 = vpop.f32.mrb[32].mxu0  ;;  %v9189_v21 = vpop.f32.mrb[37].mxu1 }
 0x7f6   : > { %v9190_v23 = vadd.f32 %v9189_v21, %v9188_v50  ;;  %v9224_v28 = vpop.f32.mrb[33].mxu0 }
 0x7f7   : > { %v9225_v17 = vadd.f32 %v9224_v28, %v9223_v22 }
 0x7f9   : > { %v6078_v3 = vadd.f32 %v9225_v17, %v9190_v23 }
 0x7fb   : > { %v6081_v33 = vadd.f32 %v6078_v3, %v5852_v10 }
 0x814   : > { %v9258_v49 = vpop.f32.mrb[38].mxu1 }
 0x815   : > { %v9293_v52 = vpop.f32.mrb[34].mxu0  ;;  %v9259_v54 = vpop.f32.mrb[39].mxu1 }
 0x816   : > { %v9260_v55 = vadd.f32 %v9259_v54, %v9258_v49  ;;  %v9294_v47 = vpop.f32.mrb[35].mxu0 }
 0x817   : > { %v9295_v58 = vadd.f32 %v9294_v47, %v9293_v52 }
 0x819   : > { %v6307_v35 = vadd.f32 %v9295_v58, %v9260_v55 }
 0x81b   : > { %v6310_v27 = vadd.f32 %v6307_v35, %v6081_v33 }
 0x834   : > { %v9328_v51 = vpop.f32.mrb[40].mxu1 }
 0x835   : > { %v9363_v9 = vpop.f32.mrb[36].mxu0  ;;  %v9329_v2 = vpop.f32.mrb[41].mxu1 }
 0x836   : > { %v9330_v63 = vadd.f32 %v9329_v2, %v9328_v51  ;;  %v9364_v4 = vpop.f32.mrb[37].mxu0 }
 0x837   : > { %v9365_v16 = vadd.f32 %v9364_v4, %v9363_v9 }
 0x839   : > { %v6536_v1 = vadd.f32 %v9365_v16, %v9330_v63 }
 0x83b   : > { %v6539_v0 = vadd.f32 %v6536_v1, %v6310_v27 }
 0x854   : > { %v9398_v6 = vpop.f32.mrb[42].mxu1 }
 0x855   : > { %v9433_v7 = vpop.f32.mrb[38].mxu0  ;;  %v9399_v59 = vpop.f32.mrb[43].mxu1 }
 0x856   : > { %v9400_v8 = vadd.f32 %v9399_v59, %v9398_v6  ;;  %v9434_v12 = vpop.f32.mrb[39].mxu0 }
 0x857   : > { %v9435_v13 = vadd.f32 %v9434_v12, %v9433_v7 }
 0x859   : > { %v6765_v56 = vadd.f32 %v9435_v13, %v9400_v8 }
 0x85b   : > { %v6768_v14 = vadd.f32 %v6765_v56, %v6539_v0 }
 0x874   : > { %v9468_v15 = vpop.f32.mrb[44].mxu1 }
 0x875   : > { %v9503_v18 = vpop.f32.mrb[40].mxu0  ;;  %v9469_v40 = vpop.f32.mrb[45].mxu1 }
 0x876   : > { %v9470_v20 = vadd.f32 %v9469_v40, %v9468_v15  ;;  %v9504_v26 = vpop.f32.mrb[41].mxu0 }
 0x877   : > { %v9505_v31 = vadd.f32 %v9504_v26, %v9503_v18 }
 0x879   : > { %v6994_v10 = vadd.f32 %v9505_v31, %v9470_v20 }
 0x87b   : > { %v6997_v50 = vadd.f32 %v6994_v10, %v6768_v14 }
 0x894   : > { %v9538_v22 = vpop.f32.mrb[46].mxu1 }
 0x895   : > { %v9573_v21 = vpop.f32.mrb[42].mxu0  ;;  %v9539_v23 = vpop.f32.mrb[47].mxu1 }
 0x896   : > { %v9540_v28 = vadd.f32 %v9539_v23, %v9538_v22  ;;  %v9574_v17 = vpop.f32.mrb[43].mxu0 }
 0x897   : > { %v9575_v3 = vadd.f32 %v9574_v17, %v9573_v21 }
 0x899   : > { %v7223_v33 = vadd.f32 %v9575_v3, %v9540_v28 }
 0x89b   : > { %v7226_v53 = vadd.f32 %v7223_v33, %v6997_v50 }
 0x89d   : > { %v7228_v39 = vadd.f32 %v7227_v34, %v7226_v53 }
 0x89f   : > { %v7229_v44 = vmax.f32 %v7228_v39, 0.0 }
 0x8a1   : > { %9626 = vmatmul.mubr.f32.vlgmr.msra.gmra.mrb[48].mxu1 %v7229_v44 }
 0x974   : > { %v7313_v60 = vpop.f32.mrb[48].mxu1 }
 0x975   : > { %v7314_v36 = vadd.f32 %v7313_v60, %v7246_v11  ;;  %v9627_v25 = vpop.f32.mrb[49].mxu1 }
 0x977   : > { %7318 = vst.msk [vmem:[%s476_s16] sm:$0x1] %vm7317_vm8, %v7314_v36 }
 0x978   : > { %12137 = shalt.err (!%p12134_p9)
}
 0x979   : > { %s12138_s27 = scalar_lea.hbm %s16499_s19, 16  ;;  %s12142_s17 = scalar_lea.hbm %s16590_s18, 32 }
 0x97a   : > { %p12139_p2 = scmp.ne.s32.totalorder %s16499_s19, %s12138_s27  ;;  %p12143_p5 = scmp.lt.u32.totalorder %s16499_s19, %s16590_s18 }
 0x97b   : > { %p12144_p10 = scmp.lt.u32.totalorder %s12142_s17, %s12138_s27  ;;  %p12146_p4 = scmp.lt.u32.totalorder %s12138_s27, %s16499_s19 }
 0x97c   : > { %p12140_p3 = pnand %p12139_p2, %p16591_p7 }
 0x97d   : > { %p12145_p12 = por %p12144_p10, %p12143_p5 }
 0x97e   : > { %p12141_p0 = pneg %p12140_p3 }
 0x97f   : > { %p12147_p8 = por %p12146_p4, %p12145_p12 }
 0x981   : > { %p12148_p11 = pnand %p12147_p8, %p12141_p0 }
 0x983   : > { %12151 = shalt.err (!%p12148_p11)
}
 0x984   : > { %11969 = dma.vmem_to_hbm [thread:$0]  (%p16591_p7), %s16501_s20, 16, %s16499_s19, %s7320_s21  }
 0x985 PF: > { %s16592_s16 = sld [smem:[#allocation15_spill]]  ;;  %s16593_s13 = sld [smem:[#allocation13_spill]] }
 0x986   : > { %s16594_s28 = sld [smem:[#allocation19_spill]] }
 0x98b   : > { %p11991_p13 = scmp.ge.s32.totalorder %s16592_s16, 2  ;;  %s7344_s24 = sand.u32 1, %s16593_s13  }
 0x98c   : > { %p16595_p1 = scmp.ne.s32.totalorder %s16594_s28, 0  ;;  %s7345_s29 = scalar_lea.sflag [#allocation5], %s7344_s24 }
 0x98e   : > { %p11982_p6 = pnand %p11991_p13, %p16595_p1 }
 0x990   : > { %12177 = dma.done.wait (!%p11982_p6), %s7345_s29, 16  }
 0x991   : > { %12179 = vsyncadd (!%p11982_p6), %s7345_s29, 4294967280  ;;  %s16596_s28 = sld [smem:[#allocation16_spill]]  ;;  %s16597_s15 = sld [smem:[#allocation14_spill]] }
 0x992   : > { %s16598_s27 = sld [smem:[#allocation17_spill]]  ;;  %s16599_s25 = smov %s12186_s26 }
 0x997   : > { %p25_p9 = scmp.ge.s32.totalorder %s16596_s28, 4   ;;  %s16600_s26 = smov %s16597_s15 }
 0x999   :  { %27 = sbr.rel (!%p25_p9) target bundleno = 8 (0x8), region = 154 }
 0x9a0   :  { %7349 = vsyncpa [#allocation4], 1 }
 0x9a1   :  { %7351 = vsyncpa [#allocation4 + $0x1], 1 }
 0x9a2   :  { %7352 = vsyncpa [#allocation7], 1 }
 0x9a3   :  { %7353 = vsyncpa [#allocation5], 1 }
 0x9a4   :  { %7355 = vsyncpa [#allocation5 + $0x1], 1 }

</bundles_post_ra>
